<compile_context>
chip_gen: v6e
topology: v6e:2x2x1
jax: 0.10.0
libtpu: 0.0.40
codegen_flags: <defaults>
</compile_context>

<pallas_src>
import jax
import jax.numpy as jnp
import numpy as np
from jax.experimental import pallas as pl
from jax.experimental.pallas import tpu as pltpu

# Make the pure-JAX reference matmuls full f32 so they match the Mosaic kernel tightly.
jax.config.update("jax_default_matmul_precision", "highest")

# ----------------------------- configuration --------------------------------
ATTN_TYPE = "galerkin"   # normalization applied to (k, v)
D_MODEL = 32
NHEAD = 4
B = 2
N = 64                   # sequence length
EPS = 1e-5               # LayerNorm eps (affine=False)
MIN_FREQ = 1.0 / 64.0    # RoPE min_freq (OFormer default)
ROPE_SCALE = 1.0         # PosEncodingConfig.scale

HD = NHEAD * D_MODEL     # 128 packed head-feature lanes
HALF = D_MODEL // 2      # rotate_half shift within each head
OUT_LANES = 128          # lane-dense output width (Wo zero-padded to this)
LOG_10000 = float(np.log(10000.0))

# ---------------- host-precomputed block-diagonal constants ------------------
# (built once with numpy; DMA'd into VMEM once via a constant index_map)
_r = np.arange(HD)[:, None]
_c = np.arange(HD)[None, :]
_same_head = (_r // D_MODEL) == (_c // D_MODEL)
HEAD_MASK_NP = _same_head.astype(np.float32)                  # 0/1 block-diagonal
AVG_MAT_NP = HEAD_MASK_NP * np.float32(1.0 / D_MODEL)         # per-head mean operator
# Signed permutation so that (y @ rot) == per-head rotate_half(y):
#   rot[r, c] = -1 if r%D == (c%D)+HALF (c in first half of its head)
#   rot[r, c] = +1 if r%D == (c%D)-HALF (c in second half), else 0.
_shift = (_r % D_MODEL) == ((_c + HALF) % D_MODEL)
_sign = np.where((_c % D_MODEL) < HALF, -1.0, 1.0)
ROT_NP = np.where(_same_head & _shift, _sign, 0.0).astype(np.float32)


# ------------------------------ small helpers (host reference) ---------------
def _layernorm(x, eps=EPS):
    mu = jnp.mean(x, axis=-1, keepdims=True)
    var = jnp.mean((x - mu) ** 2, axis=-1, keepdims=True)
    return (x - mu) * jax.lax.rsqrt(var + eps)


def _rotate_half(x):
    d = x.shape[-1] // 2
    return jnp.concatenate([-x[..., d:], x[..., :d]], axis=-1)


def _rope_cos_sin(pos, d):
    """pos: (B, N, 1) coordinates -> cos, sin of shape (B, N, d)."""
    m = jnp.arange(0, d // 2, dtype=jnp.float32)
    inv_freq = jnp.exp(m * (-(2.0 / d) * LOG_10000))      # == 1/10000^(2m/d)
    t = pos[..., 0] * (ROPE_SCALE / MIN_FREQ)             # (B, N)
    half = t[..., None] * inv_freq                        # (B, N, d//2)
    freqs = jnp.concatenate([half, half], axis=-1)        # (B, N, d)
    return jnp.cos(freqs), jnp.sin(freqs)


# ------------------------------- Pallas kernel -------------------------------
def _linear_mha_kernel(x_ref, wqkv_ref, wo_ref, pos_ref, avg_ref, mask_ref, rot_ref,
                       o_ref):
    """One grid step == one batch element.  All heads processed at once in a
    lane-dense (N, 128) packed layout; per-head structure is enforced with
    host-precomputed block-diagonal (128,128) operators on the MXU."""
    f32 = jnp.float32
    x = x_ref[0]                    # (N, D_MODEL)
    t = pos_ref[0]                  # (N, 1) 1-D coordinates
    n = x.shape[0]

    avg_mat = avg_ref[...]          # per-head mean operator (1/D block-diag)
    head_mask = mask_ref[...]       # 0/1 block-diag
    rot = rot_ref[...]              # signed rotate_half permutation

    # ---- RoPE cos/sin tables (N, 128) recomputed in-kernel on the EUP ----
    lane = jax.lax.broadcasted_iota(jnp.int32, (1, HD), 1)
    m = (lane % HALF).astype(f32)                                # freq index within head
    inv_freq = jnp.exp(m * (-(2.0 / D_MODEL) * LOG_10000))       # (1, HD)
    freqs = (t * (ROPE_SCALE / MIN_FREQ)) * inv_freq             # (N, HD)
    cosv = jnp.cos(freqs)
    sinv = jnp.sin(freqs)

    # ---- fused projection: one lane-dense matmul (N,32)@(32,512) ----
    #      columns: [ q | q@rot | k | v ]  (rotate_half(q) folded into the weights)
    qkv = jnp.dot(x, wqkv_ref[...], preferred_element_type=f32)  # (N, 4*HD)
    q = qkv[:, 0 * HD:1 * HD]
    q_rot = qkv[:, 1 * HD:2 * HD]
    k = qkv[:, 2 * HD:3 * HD]
    v = qkv[:, 3 * HD:4 * HD]

    # ---- galerkin normalization: merged per-head LayerNorm for k and v ----
    #      stack [k; v] along M so the two stat matmuls run at M=2N=128.
    kv = jnp.concatenate([k, v], axis=0)                         # (2N, HD)
    mean = jnp.dot(kv, avg_mat, preferred_element_type=f32)      # per-head mean, broadcast
    kvc = kv - mean
    var = jnp.dot(kvc * kvc, avg_mat, preferred_element_type=f32)
    kvn = kvc * jax.lax.rsqrt(var + EPS)
    k = kvn[:n]
    v = kvn[n:]

    # ---- RoPE on q, k (q_rot came from the projection; k needs the rot matmul) ----
    q = q * cosv + q_rot * sinv
    k = k * cosv + jnp.dot(k, rot, preferred_element_type=f32) * sinv

    # ---- linear attention for all heads at once ----
    dn_ktv = (((0,), (0,)), ((), ()))       # contract sequence dim -> K^T @ V
    attn = jax.lax.dot_general(k, v, dn_ktv, preferred_element_type=f32)   # (HD, HD)
    attn = attn * head_mask                 # zero cross-head terms (mandatory)
    z = jnp.dot(q, attn, preferred_element_type=f32)                       # (N, HD)

    # ---- output projection: Wo carries the 1/N scale and is zero-padded to 128
    #      lanes so the store / writeback DMA is lane-dense. ----
    o_ref[0] = jnp.dot(z, wo_ref[...], preferred_element_type=f32)         # (N, 128)


def linear_mha_forward(x, pos, wq, wk, wv, wo):
    """x: (B, N, D_MODEL) f32, pos: (B, N, 1) f32.
    wq/wk/wv: (NHEAD*D_MODEL, D_MODEL) torch-Linear weights; wo: (D_MODEL, NHEAD*D_MODEL)."""
    Bb, Nn, Dd = x.shape
    assert Dd == D_MODEL

    rot = jnp.asarray(ROT_NP)
    avg_mat = jnp.asarray(AVG_MAT_NP)
    head_mask = jnp.asarray(HEAD_MASK_NP)

    # Pre-transpose weights so the contraction dim leads on the RHS, stack q/q_rot/k/v
    # along the output lanes (each slab starts on a 128-lane vreg boundary), and fold
    # rotate_half into the q_rot slab.
    wq_t = wq.T                                                   # (D, HD)
    wqkv_t = jnp.concatenate(
        [wq_t,
         jnp.dot(wq_t, rot, preferred_element_type=jnp.float32),  # q @ rot slab
         wk.T,
         wv.T],
        axis=1)                                                   # (D, 4*HD)

    # Fold the 1/N attention scale into Wo and zero-pad its output lanes to 128.
    wo_t = wo.T * jnp.float32(1.0 / Nn)                           # (HD, D)
    wo_pad = jnp.pad(wo_t, ((0, 0), (0, OUT_LANES - Dd)))         # (HD, 128)

    grid_spec = pltpu.PrefetchScalarGridSpec(
        num_scalar_prefetch=0,
        grid=(Bb,),
        in_specs=[
            pl.BlockSpec((1, Nn, Dd), lambda b: (b, 0, 0)),       # x
            pl.BlockSpec((Dd, 4 * HD), lambda b: (0, 0)),         # stacked Wqkv (pre-T)
            pl.BlockSpec((HD, OUT_LANES), lambda b: (0, 0)),      # Wo (pre-T, /N, padded)
            pl.BlockSpec((1, Nn, 1), lambda b: (b, 0, 0)),        # pos coordinates
            pl.BlockSpec((HD, HD), lambda b: (0, 0)),             # avg_mat  (constant)
            pl.BlockSpec((HD, HD), lambda b: (0, 0)),             # head_mask (constant)
            pl.BlockSpec((HD, HD), lambda b: (0, 0)),             # rot       (constant)
        ],
        out_specs=pl.BlockSpec((1, Nn, OUT_LANES), lambda b: (b, 0, 0)),
    )
    out_padded = pl.pallas_call(
        _linear_mha_kernel,
        out_shape=jax.ShapeDtypeStruct((Bb, Nn, OUT_LANES), jnp.float32),
        grid_spec=grid_spec,
        compiler_params=pltpu.CompilerParams(dimension_semantics=("parallel",)),
    )(x, wqkv_t, wo_pad, pos, avg_mat, head_mask, rot)
    return out_padded[:, :, :Dd]


# ---------------------------- pure-JAX reference -----------------------------
def reference(x, pos, wq, wk, wv, wo):
    Bb, Nn, Dd = x.shape

    def proj(w):
        y = jnp.einsum("bnd,ed->bne", x, w)                        # (B, N, H*D)
        return y.reshape(Bb, Nn, NHEAD, Dd).transpose(0, 2, 1, 3)  # (B, H, N, D)

    q, k, v = proj(wq), proj(wk), proj(wv)
    k = _layernorm(k)
    v = _layernorm(v)
    cos, sin = _rope_cos_sin(pos, Dd)
    cos, sin = cos[:, None], sin[:, None]
    q = q * cos + _rotate_half(q) * sin
    k = k * cos + _rotate_half(k) * sin
    attn = jnp.einsum("bhnd,bhne->bhde", k, v)
    z = jnp.einsum("bhnd,bhde->bhne", q, attn) * (1.0 / Nn)
    z = z.transpose(0, 2, 1, 3).reshape(Bb, Nn, NHEAD * Dd)
    return jnp.einsum("bne,de->bnd", z, wo)


# ---------------------------------- main -------------------------------------
if __name__ == "__main__":
    key = jax.random.PRNGKey(0)
    kx, kq, kk, kv, ko = jax.random.split(key, 5)

    # qkv_projs: Linear(d_model, d_model*nhead, bias=False)
    # init: xavier_uniform(gain = 1/d_model) + (1/d_model) * I added to each head block
    fan_in, fan_out = D_MODEL, NHEAD * D_MODEL
    gain = 1.0 / D_MODEL
    bound = gain * (6.0 / (fan_in + fan_out)) ** 0.5

    def make_qkv_weight(k_):
        w = jax.random.uniform(k_, (NHEAD * D_MODEL, D_MODEL), jnp.float32, -bound, bound)
        diag_block = (1.0 / D_MODEL) * jnp.eye(D_MODEL, dtype=jnp.float32)
        return w + jnp.tile(diag_block, (NHEAD, 1))

    wq = make_qkv_weight(kq)
    wk = make_qkv_weight(kk)
    wv = make_qkv_weight(kv)

    # out_proj: Linear(d_model*nhead, d_model, bias=False), default PyTorch uniform init
    wo_bound = 1.0 / (NHEAD * D_MODEL) ** 0.5
    wo = jax.random.uniform(ko, (D_MODEL, NHEAD * D_MODEL), jnp.float32, -wo_bound, wo_bound)

    # inputs
    x = jax.random.normal(kx, (B, N, D_MODEL), dtype=jnp.float32)
    pos = jnp.tile(jnp.linspace(0.0, 1.0, N, dtype=jnp.float32)[None, :, None], (B, 1, 1))

    out = jax.jit(linear_mha_forward)(x, pos, wq, wk, wv, wo)
    out = jax.block_until_ready(out)

    ref = reference(x, pos, wq, wk, wv, wo)
    np.testing.assert_allclose(np.asarray(out), np.asarray(ref), rtol=1e-2, atol=1e-4)

    print("KERNEL_OK")
</pallas_src>

<mosaic_0001>
module attributes {stable_mosaic.version = 11 : i64} {
  func.func @_linear_mha_kernel(%arg0: i32, %arg1: memref<1x64x32xf32, #tpu.memory_space<vmem>>, %arg2: memref<32x512xf32, #tpu.memory_space<vmem>>, %arg3: memref<128x128xf32, #tpu.memory_space<vmem>>, %arg4: memref<1x64x1xf32, #tpu.memory_space<vmem>>, %arg5: memref<128x128xf32, #tpu.memory_space<vmem>>, %arg6: memref<128x128xf32, #tpu.memory_space<vmem>>, %arg7: memref<128x128xf32, #tpu.memory_space<vmem>>, %arg8: memref<1x64x128xf32, #tpu.memory_space<vmem>>) attributes {dimension_semantics = [#tpu.dimension_semantics<parallel>], iteration_bounds = array<i64: 2>, scalar_prefetch = 0 : i64, scratch_operands = 0 : i64, tpu.core_type = #tpu.core_type<tc>, window_params = [{transform_indices = @transform_0, window_bounds = array<i64: 1, 64, 32>}, {pipeline_mode = #tpu.pipeline_mode<synchronous>, transform_indices = @transform_1, window_bounds = array<i64: 32, 512>}, {pipeline_mode = #tpu.pipeline_mode<synchronous>, transform_indices = @transform_2, window_bounds = array<i64: 128, 128>}, {transform_indices = @transform_3, window_bounds = array<i64: 1, 64, 1>}, {pipeline_mode = #tpu.pipeline_mode<synchronous>, transform_indices = @transform_4, window_bounds = array<i64: 128, 128>}, {pipeline_mode = #tpu.pipeline_mode<synchronous>, transform_indices = @transform_5, window_bounds = array<i64: 128, 128>}, {pipeline_mode = #tpu.pipeline_mode<synchronous>, transform_indices = @transform_6, window_bounds = array<i64: 128, 128>}, {transform_indices = @transform_7, window_bounds = array<i64: 1, 64, 128>}]} {
    %c0 = arith.constant 0 : index
    %c0_0 = arith.constant 0 : index
    %c0_1 = arith.constant 0 : index
    %0 = vector.load %arg1[%c0, %c0_0, %c0_1] : memref<1x64x32xf32, #tpu.memory_space<vmem>>, vector<1x64x32xf32>
    %1 = vector.shape_cast %0 : vector<1x64x32xf32> to vector<64x32xf32>
    %c0_2 = arith.constant 0 : index
    %c0_3 = arith.constant 0 : index
    %c0_4 = arith.constant 0 : index
    %2 = vector.load %arg4[%c0_2, %c0_3, %c0_4] : memref<1x64x1xf32, #tpu.memory_space<vmem>>, vector<1x64x1xf32>
    %3 = vector.shape_cast %2 : vector<1x64x1xf32> to vector<64x1xf32>
    %c0_5 = arith.constant 0 : index
    %c0_6 = arith.constant 0 : index
    %4 = vector.load %arg5[%c0_5, %c0_6] : memref<128x128xf32, #tpu.memory_space<vmem>>, vector<128x128xf32>
    %c0_7 = arith.constant 0 : index
    %c0_8 = arith.constant 0 : index
    %5 = vector.load %arg6[%c0_7, %c0_8] : memref<128x128xf32, #tpu.memory_space<vmem>>, vector<128x128xf32>
    %c0_9 = arith.constant 0 : index
    %c0_10 = arith.constant 0 : index
    %6 = vector.load %arg7[%c0_9, %c0_10] : memref<128x128xf32, #tpu.memory_space<vmem>>, vector<128x128xf32>
    %7 = tpu.iota {dimensions = array<i32: 1>} : vector<1x128xi32>
    %c16_i32 = arith.constant 16 : i32
    %c0_i32 = arith.constant 0 : i32
    %8 = arith.cmpi eq, %c16_i32, %c0_i32 : i32
    %c1_i32 = arith.constant 1 : i32
    %9 = arith.select %8, %c1_i32, %c16_i32 : i32
    %10 = vector.broadcast %9 : i32 to vector<1x128xi32>
    %11 = arith.remsi %7, %10 : vector<1x128xi32>
    %c0_i32_11 = arith.constant 0 : i32
    %12 = vector.broadcast %c0_i32_11 : i32 to vector<1x128xi32>
    %13 = arith.cmpi ne, %11, %12 : vector<1x128xi32>
    %c0_i32_12 = arith.constant 0 : i32
    %14 = vector.broadcast %c0_i32_12 : i32 to vector<1x128xi32>
    %15 = arith.cmpi slt, %11, %14 : vector<1x128xi32>
    %c0_i32_13 = arith.constant 0 : i32
    %16 = arith.cmpi slt, %9, %c0_i32_13 : i32
    %17 = vector.broadcast %16 : i1 to vector<1x128xi1>
    %18 = vector.broadcast %17 : vector<1x128xi1> to vector<1x128xi1>
    %19 = arith.xori %15, %18 : vector<1x128xi1>
    %20 = arith.andi %19, %13 : vector<1x128xi1>
    %21 = vector.broadcast %9 : i32 to vector<1x128xi32>
    %22 = arith.addi %11, %21 : vector<1x128xi32>
    %23 = arith.select %20, %22, %11 : vector<1x128xi1>, vector<1x128xi32>
    %24 = arith.sitofp %23 : vector<1x128xi32> to vector<1x128xf32>
    %cst = arith.constant -0.575646281 : f32
    %25 = vector.broadcast %cst : f32 to vector<1x128xf32>
    %26 = arith.mulf %24, %25 : vector<1x128xf32>
    %27 = math.exp %26 : vector<1x128xf32>
    %cst_14 = arith.constant 6.400000e+01 : f32
    %28 = vector.broadcast %cst_14 : f32 to vector<64x1xf32>
    %29 = arith.mulf %3, %28 : vector<64x1xf32>
    %30 = vector.broadcast %29 : vector<64x1xf32> to vector<64x128xf32>
    %31 = vector.broadcast %27 : vector<1x128xf32> to vector<64x128xf32>
    %32 = arith.mulf %30, %31 : vector<64x128xf32>
    %33 = math.cos %32 : vector<64x128xf32>
    %34 = math.sin %32 : vector<64x128xf32>
    %c0_15 = arith.constant 0 : index
    %c0_16 = arith.constant 0 : index
    %35 = vector.load %arg2[%c0_15, %c0_16] : memref<32x512xf32, #tpu.memory_space<vmem>>, vector<32x512xf32>
    %cst_17 = arith.constant dense<0.000000e+00> : vector<64x512xf32>
    %36 = tpu.matmul %1, %35, %cst_17 {dimension_numbers = #tpu.dot_dimension_numbers<[1], [0], [0], [1], [0, 0, 1, 1], [], []>, precision = #tpu.contract_precision<fp32>} : vector<64x32xf32>, vector<32x512xf32>, vector<64x512xf32> -> vector<64x512xf32>
    %37 = vector.extract_strided_slice %36 {offsets = [0, 0], sizes = [64, 128], strides = [1, 1]} : vector<64x512xf32> to vector<64x128xf32>
    %38 = vector.extract_strided_slice %36 {offsets = [0, 128], sizes = [64, 128], strides = [1, 1]} : vector<64x512xf32> to vector<64x128xf32>
    %39 = vector.extract_strided_slice %36 {offsets = [0, 256], sizes = [64, 128], strides = [1, 1]} : vector<64x512xf32> to vector<64x128xf32>
    %40 = vector.extract_strided_slice %36 {offsets = [0, 384], sizes = [64, 128], strides = [1, 1]} : vector<64x512xf32> to vector<64x128xf32>
    %41 = tpu.concatenate %39, %40 in 0 : vector<64x128xf32>, vector<64x128xf32> -> vector<128x128xf32>
    %cst_18 = arith.constant dense<0.000000e+00> : vector<128x128xf32>
    %42 = tpu.matmul %41, %4, %cst_18 {dimension_numbers = #tpu.dot_dimension_numbers<[1], [0], [0], [1], [0, 0, 1, 1], [], []>, precision = #tpu.contract_precision<fp32>} : vector<128x128xf32>, vector<128x128xf32>, vector<128x128xf32> -> vector<128x128xf32>
    %43 = arith.subf %41, %42 : vector<128x128xf32>
    %44 = arith.mulf %43, %43 : vector<128x128xf32>
    %cst_19 = arith.constant dense<0.000000e+00> : vector<128x128xf32>
    %45 = tpu.matmul %44, %4, %cst_19 {dimension_numbers = #tpu.dot_dimension_numbers<[1], [0], [0], [1], [0, 0, 1, 1], [], []>, precision = #tpu.contract_precision<fp32>} : vector<128x128xf32>, vector<128x128xf32>, vector<128x128xf32> -> vector<128x128xf32>
    %cst_20 = arith.constant 9.99999974E-6 : f32
    %46 = vector.broadcast %cst_20 : f32 to vector<128x128xf32>
    %47 = arith.addf %45, %46 : vector<128x128xf32>
    %48 = math.rsqrt %47 : vector<128x128xf32>
    %49 = arith.mulf %43, %48 : vector<128x128xf32>
    %50 = vector.extract_strided_slice %49 {offsets = [0, 0], sizes = [64, 128], strides = [1, 1]} : vector<128x128xf32> to vector<64x128xf32>
    %51 = vector.extract_strided_slice %49 {offsets = [64, 0], sizes = [64, 128], strides = [1, 1]} : vector<128x128xf32> to vector<64x128xf32>
    %52 = arith.mulf %37, %33 : vector<64x128xf32>
    %53 = arith.mulf %38, %34 : vector<64x128xf32>
    %54 = arith.addf %52, %53 : vector<64x128xf32>
    %55 = arith.mulf %50, %33 : vector<64x128xf32>
    %cst_21 = arith.constant dense<0.000000e+00> : vector<64x128xf32>
    %56 = tpu.matmul %50, %6, %cst_21 {dimension_numbers = #tpu.dot_dimension_numbers<[1], [0], [0], [1], [0, 0, 1, 1], [], []>, precision = #tpu.contract_precision<fp32>} : vector<64x128xf32>, vector<128x128xf32>, vector<64x128xf32> -> vector<64x128xf32>
    %57 = arith.mulf %56, %34 : vector<64x128xf32>
    %58 = arith.addf %55, %57 : vector<64x128xf32>
    %cst_22 = arith.constant dense<0.000000e+00> : vector<128x128xf32>
    %59 = tpu.matmul %58, %51, %cst_22 {dimension_numbers = #tpu.dot_dimension_numbers<[0], [0], [1], [1], [0, 1, 1, 1], [], []>, precision = #tpu.contract_precision<fp32>} : vector<64x128xf32>, vector<64x128xf32>, vector<128x128xf32> -> vector<128x128xf32>
    %60 = arith.mulf %59, %5 : vector<128x128xf32>
    %cst_23 = arith.constant dense<0.000000e+00> : vector<64x128xf32>
    %61 = tpu.matmul %54, %60, %cst_23 {dimension_numbers = #tpu.dot_dimension_numbers<[1], [0], [0], [1], [0, 0, 1, 1], [], []>, precision = #tpu.contract_precision<fp32>} : vector<64x128xf32>, vector<128x128xf32>, vector<64x128xf32> -> vector<64x128xf32>
    %c0_24 = arith.constant 0 : index
    %c0_25 = arith.constant 0 : index
    %62 = vector.load %arg3[%c0_24, %c0_25] : memref<128x128xf32, #tpu.memory_space<vmem>>, vector<128x128xf32>
    %cst_26 = arith.constant dense<0.000000e+00> : vector<64x128xf32>
    %63 = tpu.matmul %61, %62, %cst_26 {dimension_numbers = #tpu.dot_dimension_numbers<[1], [0], [0], [1], [0, 0, 1, 1], [], []>, precision = #tpu.contract_precision<fp32>} : vector<64x128xf32>, vector<128x128xf32>, vector<64x128xf32> -> vector<64x128xf32>
    %c0_27 = arith.constant 0 : index
    %c0_28 = arith.constant 0 : index
    %c0_29 = arith.constant 0 : index
    %64 = vector.load %arg8[%c0_27, %c0_28, %c0_29] : memref<1x64x128xf32, #tpu.memory_space<vmem>>, vector<1x64x128xf32>
    %65 = vector.shape_cast %64 : vector<1x64x128xf32> to vector<64x128xf32>
    %66 = vector.shape_cast %63 : vector<64x128xf32> to vector<1x64x128xf32>
    tpu.vector_store %arg8[%c0_27, %c0_28, %c0_29], %66 {strides = array<i32>} : memref<1x64x128xf32, #tpu.memory_space<vmem>>, vector<1x64x128xf32>,
    return
  }
  func.func @transform_0(%arg0: i32) -> (i32, i32, i32) {
    %c0_i32 = arith.constant 0 : i32
    %c0_i32_0 = arith.constant 0 : i32
    %c0_i32_1 = arith.constant 0 : i32
    return %arg0, %c0_i32, %c0_i32_0 : i32, i32, i32
  }
  func.func @transform_1(%arg0: i32) -> (i32, i32) {
    %c0_i32 = arith.constant 0 : i32
    %c0_i32_0 = arith.constant 0 : i32
    %c0_i32_1 = arith.constant 0 : i32
    return %c0_i32, %c0_i32_0 : i32, i32
  }
  func.func @transform_2(%arg0: i32) -> (i32, i32) {
    %c0_i32 = arith.constant 0 : i32
    %c0_i32_0 = arith.constant 0 : i32
    %c0_i32_1 = arith.constant 0 : i32
    return %c0_i32, %c0_i32_0 : i32, i32
  }
  func.func @transform_3(%arg0: i32) -> (i32, i32, i32) {
    %c0_i32 = arith.constant 0 : i32
    %c0_i32_0 = arith.constant 0 : i32
    %c0_i32_1 = arith.constant 0 : i32
    return %arg0, %c0_i32, %c0_i32_0 : i32, i32, i32
  }
  func.func @transform_4(%arg0: i32) -> (i32, i32) {
    %c0_i32 = arith.constant 0 : i32
    %c0_i32_0 = arith.constant 0 : i32
    %c0_i32_1 = arith.constant 0 : i32
    return %c0_i32, %c0_i32_0 : i32, i32
  }
  func.func @transform_5(%arg0: i32) -> (i32, i32) {
    %c0_i32 = arith.constant 0 : i32
    %c0_i32_0 = arith.constant 0 : i32
    %c0_i32_1 = arith.constant 0 : i32
    return %c0_i32, %c0_i32_0 : i32, i32
  }
  func.func @transform_6(%arg0: i32) -> (i32, i32) {
    %c0_i32 = arith.constant 0 : i32
    %c0_i32_0 = arith.constant 0 : i32
    %c0_i32_1 = arith.constant 0 : i32
    return %c0_i32, %c0_i32_0 : i32, i32
  }
  func.func @transform_7(%arg0: i32) -> (i32, i32, i32) {
    %c0_i32 = arith.constant 0 : i32
    %c0_i32_0 = arith.constant 0 : i32
    %c0_i32_1 = arith.constant 0 : i32
    return %arg0, %c0_i32, %c0_i32_0 : i32, i32, i32
  }
}

</mosaic_0001>

<bundles_post_ra>
// kernel: linear_mha_forward.1
= control target key start
LH: loop header
LB: loop body
LE: loop exit
PB: predicated region body
PF: predicated region fallthrough
CT: control target
= control target key end

     0   :  { %s13702_s24 = smov 0   ;;  %s19878_s0 = inlined_call_operand.vmem [shape: f32[2,64,32], index: 0, kind: input, shape index: {}]   ;;  %s19879_s1 = inlined_call_operand.vmem [shape: f32[32,512], index: 1, kind: input, shape index: {}]   ;;  %s19880_s2 = inlined_call_operand.vmem [shape: f32[128,128], index: 2, kind: input, shape index: {}]   ;;  %s19881_s3 = inlined_call_operand.vmem [shape: f32[2,64,1], index: 3, kind: input, shape index: {}]   ;;  %s19882_s4 = inlined_call_operand.vmem [shape: f32[128,128], index: 4, kind: input, shape index: {}]   ;;  %s19883_s5 = inlined_call_operand.vmem [shape: f32[128,128], index: 5, kind: input, shape index: {}]   ;;  %s19884_s6 = inlined_call_operand.vmem [shape: f32[128,128], index: 6, kind: input, shape index: {}]   ;;  %s19885_s7 = inlined_call_operand.vmem [shape: f32[2,64,128], index: 7, kind: output, shape index: {}]  }
   0x1 LB: > { %s10786_s25 = sadd.s32 4294967295, %s13652_s24   ;;  %p10790_p0 = scmp.ge.s32.totalorder %s13652_s24, 1  ;;  %s13652_s24 = sphi %s13702_s24, %s17_s24  }
   0x2   : > { %p247_p1 = scmp.lt.s32.totalorder %s13652_s24, 3 }
   0x4   : > { %p248_p2 = pnand %p10790_p0, %p247_p1 }
   0x6   : > { %251 = sbr.rel (%p248_p2) target bundleno = 2432 (0x980), region = 48 }
   0xb   : > { %v2106_v0 = vld [vmem:[%s19879_s1 + $0x68] sm:$0xff]  ;;  %v2105_v1 = vld [vmem:[%s19879_s1 + $0x60] sm:$0xff]  ;;  %p13719_p3 = scmp.lt.s32.totalorder %s10786_s25, 1  ;;  %vm2109_vm0 = vcmask 261120   ;;  %v13654_v9 = vmov 0.0  }
   0xc   : > { %v2102_v2 = vld [vmem:[%s19879_s1 + $0x48] sm:$0xff]  ;;  %v13723_v3 = vand.u32 4294901760, %v2106_v0  ;;  %v13725_v4 = vand.u32 4294901760, %v2105_v1  ;;  %v2101_v6 = vld [vmem:[%s19879_s1 + $0x40] sm:$0xff]  ;;  %2206 = vmatprep.mubr.f32.mxu0 %v13654_v9  ;;  %2399 = vmatprep.mubr.f32.mxu1 %v13654_v9 }
   0xd   : > { %v13727_v5 = vand.u32 4294901760, %v2102_v2  ;;  %v2098_v7 = vld [vmem:[%s19879_s1 + $0x28] sm:$0xff]  ;;  %v2097_v8 = vld [vmem:[%s19879_s1 + $0x20] sm:$0xff]  ;;  %v13740_v10 = vand.u32 4294901760, %v2101_v6  ;;  %s21346_s25 = smov (!%p13719_p3, %s10786_s25), 1 }
   0xe   : > { %v13742_v11 = vand.u32 4294901760, %v2098_v7  ;;  %v13744_v12 = vand.u32 4294901760, %v2097_v8  ;;  %v2094_v13 = vld [vmem:[%s19879_s1 + $0x8] sm:$0xff]  ;;  %v2093_v14 = vld [vmem:[%s19879_s1] sm:$0xff]  ;;  %2159 = vmatprep.subr.mxu0 %v13723_v3  ;;  %v13756_v15 = vsub.f32 %v2106_v0, %v13723_v3  ;;  %v13759_v16 = vsub.f32 %v2105_v1, %v13725_v4  ;;  %s13778_s20 = sshll.u32 %s21346_s25, 6 }
   0xf   : > { %v13762_v17 = vsub.f32 %v2102_v2, %v13727_v5  ;;  %v13764_v18 = vand.u32 4294901760, %v2094_v13  ;;  %2161 = vmatpush1.msra.mxu0 %v13725_v4  ;;  %v13768_v19 = vsub.f32 %v2101_v6, %v13740_v10  ;;  %v13773_v21 = vand.u32 4294901760, %v2093_v14  ;;  %s13791_s23 = scalar_lea.vmem %s19878_s0, %s13778_s20  ;;  %s13944_s27 = scalar_lea.vmem %s19881_s3, %s13778_s20 }
  0x10   : > { %v13771_v20 = vsub.f32 %v2098_v7, %v13742_v11  ;;  %v13776_v22 = vsub.f32 %v2097_v8, %v13744_v12  ;;  %2163 = vmatprep.subr.mxu0 %v13727_v5  ;;  %v2321_v23 = vand.u32 4294901760, %v13756_v15  ;;  %v2327_v24 = vand.u32 4294901760, %v13759_v16  ;;  %v299_v30 = vld [vmem:[%s13791_s23] sm:$0xff]  ;;  %v300_v40 = vld [vmem:[%s13791_s23 + $0x8] sm:$0xff]  ;;  %v301_v41 = vld [vmem:[%s13791_s23 + $0x10] sm:$0xff] }
  0x11   : > { %v2333_v25 = vand.u32 4294901760, %v13762_v17  ;;  %v13785_v26 = vsub.f32 %v2094_v13, %v13764_v18  ;;  %2165 = vmatpush1.msra.mxu0 %v13740_v10  ;;  %v2339_v27 = vand.u32 4294901760, %v13768_v19  ;;  %v13799_v31 = vsub.f32 %v2093_v14, %v13773_v21  ;;  %v302_v46 = vld [vmem:[%s13791_s23 + $0x18] sm:$0xff]  ;;  %v303_v50 = vld [vmem:[%s13791_s23 + $0x20] sm:$0xff]  ;;  %v304_v59 = vld [vmem:[%s13791_s23 + $0x28] sm:$0xff] }
  0x12   : > { %v2345_v28 = vand.u32 4294901760, %v13771_v20  ;;  %v2351_v29 = vand.u32 4294901760, %v13776_v22  ;;  %v2322_v32 = vsub.f32 %v13756_v15, %v2321_v23  ;;  %v2328_v33 = vsub.f32 %v13759_v16, %v2327_v24  ;;  %2167 = vmatprep.subr.mxu0 %v13742_v11 }
  0x13   : > { %v2334_v34 = vsub.f32 %v13762_v17, %v2333_v25  ;;  %v2357_v35 = vand.u32 4294901760, %v13785_v26  ;;  %2169 = vmatpush1.msra.mxu0 %v13744_v12  ;;  %v2340_v36 = vsub.f32 %v13768_v19, %v2339_v27  ;;  %v2111_v39 = vsel %vm2109_vm0, %v299_v30, 0 }
  0x14   : > { %v2346_v37 = vsub.f32 %v13771_v20, %v2345_v28  ;;  %v2352_v38 = vsub.f32 %v13776_v22, %v2351_v29  ;;  %v2323_v42 = vand.u32 4294901760, %v2322_v32  ;;  %v2329_v43 = vand.u32 4294901760, %v2328_v33  ;;  %2171 = vmatprep.subr.mxu0 %v13764_v18 }
  0x15   : > { %v2335_v44 = vand.u32 4294901760, %v2334_v34  ;;  %v2358_v45 = vsub.f32 %v13785_v26, %v2357_v35  ;;  %v2341_v47 = vand.u32 4294901760, %v2340_v36  ;;  %2173 = vmatpush1.msra.mxu0 %v13773_v21  ;;  %v13831_v49 = vand.u32 4294901760, %v2111_v39  ;;  %v305_v36 = vld [vmem:[%s13791_s23 + $0x30] sm:$0xff] }
  0x16   : > { %v2347_v48 = vand.u32 4294901760, %v2346_v37  ;;  %2324 = vmatprep.subr.mxu1 %v2323_v42  ;;  %v2353_v51 = vand.u32 4294901760, %v2352_v38  ;;  %2482 = vmatprep.subr.mxu0 %v13756_v15  ;;  %v2363_v52 = vand.u32 4294901760, %v13799_v31  ;;  %v2114_v53 = vsel %vm2109_vm0, %v300_v40, 0 }
  0x17   : > { %v2117_v54 = vsel %vm2109_vm0, %v301_v41, 0  ;;  %2330 = vmatpush1.msra.mxu1 %v2329_v43  ;;  %v13839_v55 = vsub.f32 %v2111_v39, %v13831_v49  ;;  %v13841_v56 = vand.u32 4294901760, %v2114_v53  ;;  %v2120_v58 = vsel %vm2109_vm0, %v302_v46, 0  ;;  %v306_v43 = vld [vmem:[%s13791_s23 + $0x38] sm:$0xff] }
  0x18   : > { %v13843_v57 = vand.u32 4294901760, %v2117_v54  ;;  %2336 = vmatprep.subr.mxu1 %v2335_v44  ;;  %v2359_v60 = vand.u32 4294901760, %v2358_v45  ;;  %v2364_v61 = vsub.f32 %v13799_v31, %v2363_v52  ;;  %v13850_v62 = vand.u32 4294901760, %v2120_v58 }
  0x19   : > { %v2123_v63 = vsel %vm2109_vm0, %v303_v50, 0  ;;  %2342 = vmatpush1.msra.mxu1 %v2341_v47  ;;  %v13854_v0 = vand.u32 4294901760, %v13839_v55  ;;  %v13857_v1 = vsub.f32 %v2114_v53, %v13841_v56  ;;  %v2126_v8 = vsel %vm2109_vm0, %v304_v59, 0 }
  0x1a   : > { %v13860_v2 = vsub.f32 %v2117_v54, %v13843_v57  ;;  %2348 = vmatprep.subr.mxu1 %v2347_v48  ;;  %v2365_v6 = vand.u32 4294901760, %v2364_v61  ;;  %v13862_v7 = vand.u32 4294901760, %v2123_v63  ;;  %v13874_v32 = vsub.f32 %v2120_v58, %v13850_v62 }
  0x1b   : > { %2354 = vmatpush1.msra.mxu1 %v2353_v51  ;;  %v2210_v13 = vsub.f32 %v13839_v55, %v13854_v0  ;;  %v13868_v14 = vand.u32 4294901760, %v13857_v1  ;;  %v13883_v37 = vand.u32 4294901760, %v2126_v8  ;;  %v2129_v42 = vsel %vm2109_vm0, %v305_v36, 0  ;;  %v308_v36 = vld [vmem:[%s13944_s27 + $0x8] sm:$0xff] }
  0x1c   : > { %v13871_v30 = vand.u32 4294901760, %v13860_v2  ;;  %2360 = vmatprep.subr.mxu1 %v2359_v60  ;;  %v13892_v40 = vand.u32 4294901760, %v13874_v32  ;;  %v13895_v41 = vsub.f32 %v2123_v63, %v13862_v7  ;;  %v13917_v48 = vand.u32 4294901760, %v2129_v42  ;;  %v307_v60 = vld [vmem:[%s13944_s27] sm:$0xff] }
  0x1d   : > { %v13876_v33 = vand.u32 4294901760, %v2210_v13  ;;  %2366 = vmatpush1.msra.mxu1 %v2365_v6  ;;  %v2221_v34 = vsub.f32 %v13857_v1, %v13868_v14  ;;  %v13906_v44 = vsub.f32 %v2126_v8, %v13883_v37  ;;  %v2132_v50 = vsel %vm2109_vm0, %v306_v43, 0  ;;  %v309_v13 = vld [vmem:[%s13944_s27 + $0x10] sm:$0xff] }
  0x1e   : > { %2401 = vmatmul.mubr.f32.vlgmr.msra.gmra.mxu1 %v13831_v49  ;;  %2626 = vmatprep.subr.mxu1 %v13723_v3  ;;  %v2232_v39 = vsub.f32 %v13860_v2, %v13871_v30  ;;  %v2243_v46 = vsub.f32 %v13874_v32, %v13892_v40  ;;  %v13915_v47 = vand.u32 4294901760, %v13895_v41  ;;  %v13936_v58 = vsub.f32 %v2129_v42, %v13917_v48 }
  0x1f   : > { %2212 = vmatmul.mubr.f32.vlgmr.msra.gmra.mxu0 %v13876_v33  ;;  %2628 = vmatpush1.msra.mxu1 %v13725_v4  ;;  %v13887_v38 = vand.u32 4294901760, %v2221_v34  ;;  %v13927_v51 = vand.u32 4294901760, %v13906_v44  ;;  %v13938_v59 = vand.u32 4294901760, %v2132_v50  ;;  %v381_v34 = vmul.f32 64.0, %v307_v60 }
  0x20   : > { %2485 = vmatpush1.msra.mxu0 %v13759_v16  ;;  %2217 = vmatprep.mubr.f32.mxu0 %v13654_v9  ;;  %v13909_v45 = vand.u32 4294901760, %v2232_v39  ;;  %v13930_v53 = vand.u32 4294901760, %v2243_v46  ;;  %v2254_v54 = vsub.f32 %v13895_v41, %v13915_v47  ;;  %v13960_v6 = vand.u32 4294901760, %v13936_v58  ;;  %v2103_v16 = vld [vmem:[%s19879_s1 + $0x50] sm:$0xff] }
  0x21   : > { %2406 = vmatprep.mubr.f32.mxu1 %v13654_v9  ;;  %2488 = vmatprep.subr.mxu0 %v13762_v17  ;;  %v2265_v63 = vsub.f32 %v13906_v44, %v13927_v51  ;;  %v13963_v8 = vsub.f32 %v2132_v50, %v13938_v59  ;;  %v383_v39 = vmul.f32 64.0, %v309_v13  ;;  %v382_v46 = vmul.f32 64.0, %v308_v36  ;;  %v312_v13 = vld [vmem:[%s13944_s27 + $0x28] sm:$0xff] }
  0x22   : > { %2408 = vmatmul.mubr.f32.gmra.mxu1 %v13841_v56  ;;  %2491 = vmatpush1.msra.mxu0 %v13768_v19  ;;  %v13954_v61 = vand.u32 4294901760, %v2254_v54  ;;  %v2276_v43 = vsub.f32 %v13936_v58, %v13960_v6  ;;  %v311_v54 = vld [vmem:[%s13944_s27 + $0x20] sm:$0xff]  ;;  %v386_v36 = vmul.f32 64.0, %v312_v13  ;;  %v14077_v19 = vand.u32 4294901760, %v2103_v16 }
  0x23   : > { %2223 = vmatmul.mubr.f32.gmra.mxu0 %v13887_v38  ;;  %2413 = vmatprep.mubr.f32.mxu1 %v13654_v9  ;;  %v13975_v42 = vand.u32 4294901760, %v2265_v63  ;;  %v13981_v15 = vand.u32 4294901760, %v13963_v8 }
  0x24   : > { %2228 = vmatprep.mubr.f32.mxu0 %v13654_v9  ;;  %2630 = vmatprep.subr.mxu1 %v13727_v5  ;;  %v13988_v60 = vand.u32 4294901760, %v2276_v43  ;;  %v2108_v43 = vld [vmem:[%s19879_s1 + $0x78] sm:$0xff] }
  0x25   : > { %2632 = vmatpush1.msra.mxu1 %v13740_v10  ;;  %2494 = vmatprep.subr.mxu0 %v13771_v20  ;;  %v2287_v63 = vsub.f32 %v13963_v8, %v13981_v15  ;;  %v2100_v20 = vld [vmem:[%s19879_s1 + $0x38] sm:$0xff] }
  0x26   : > { %2415 = vmatmul.mubr.f32.gmra.mxu1 %v13843_v57  ;;  %2497 = vmatpush1.msra.mxu0 %v13776_v22 }
  0x27   : > { %2234 = vmatmul.mubr.f32.gmra.mxu0 %v13909_v45  ;;  %2420 = vmatprep.mubr.f32.mxu1 %v13654_v9 }
  0x28   : > { %2239 = vmatprep.mubr.f32.mxu0 %v13654_v9  ;;  %2634 = vmatprep.subr.mxu1 %v13742_v11 }
  0x29   : > { %2636 = vmatpush1.msra.mxu1 %v13744_v12  ;;  %2500 = vmatprep.subr.mxu0 %v13785_v26  ;;  %v14096_v26 = vsub.f32 %v2103_v16, %v14077_v19 }
  0x2a   : > { %2422 = vmatmul.mubr.f32.gmra.mxu1 %v13850_v62  ;;  %2503 = vmatpush1.msra.mxu0 %v13799_v31 }
  0x2b   : > { %2245 = vmatmul.mubr.f32.gmra.mxu0 %v13930_v53  ;;  %2427 = vmatprep.mubr.f32.mxu1 %v13654_v9 }
  0x2c   : > { %2250 = vmatprep.mubr.f32.mxu0 %v13654_v9  ;;  %2638 = vmatprep.subr.mxu1 %v13764_v18 }
  0x2d   : > { %2640 = vmatpush1.msra.mxu1 %v13773_v21  ;;  %2773 = vmatprep.subr.mxu0 %v2321_v23  ;;  %v310_v23 = vld [vmem:[%s13944_s27 + $0x18] sm:$0xff] }
  0x2e   : > { %2429 = vmatmul.mubr.f32.gmra.mxu1 %v13862_v7  ;;  %2916 = vmatprep.subr.mxu1 %v13723_v3  ;;  %v13655_v3 = vmov 0   ;;  %v384_v50 = vmul.f32 64.0, %v310_v23  ;;  %v13998_v23 = vand.u32 4294901760, %v2287_v63 }
  0x2f   : > { %2256 = vmatmul.mubr.f32.gmra.mxu0 %v13954_v61  ;;  %2434 = vmatprep.mubr.f32.mxu1 %v13654_v9 }
  0x30   : > { %2261 = vmatprep.mubr.f32.mxu0 %v13654_v9  ;;  %13578 = vset.pattern.permute.xlu0 %v13655_v3 }
  0x31   : > { %391 = vperm.xlu0 %13578, %v381_v34   ;;  %13579 = vset.pattern.permute.xlu1 %v13655_v3  ;;  %v385_v34 = vmul.f32 64.0, %v311_v54  ;;  %v314_v3 = vld [vmem:[%s13944_s27 + $0x38] sm:$0xff] }
  0x32   : > { %2436 = vmatmul.mubr.f32.gmra.mxu1 %v13883_v37  ;;  %401 = vperm.xlu1 %13579, %v383_v39   ;;  %v313_v39 = vld [vmem:[%s13944_s27 + $0x30] sm:$0xff]  ;;  %v388_v54 = vmul.f32 64.0, %v314_v3  ;;  %s19865_s27 = scalar_lea.vmem %s19885_s7, %s13778_s20 }
  0x33   : > { %2267 = vmatmul.mubr.f32.gmra.mxu0 %v13975_v42  ;;  %2441 = vmatprep.mubr.f32.mxu1 %v13654_v9 }
  0x34   : > { %2272 = vmatprep.mubr.f32.mxu0 %v13654_v9 }
  0x35   : > { %396 = vperm.xlu0 %13578, %v382_v46   ;;  %v387_v46 = vmul.f32 64.0, %v313_v39 }
  0x36   : > { %2443 = vmatmul.mubr.f32.gmra.mxu1 %v13917_v48  ;;  %406 = vperm.xlu1 %13579, %v384_v50   ;;  %v14007_v50 = vand.u32 4294901760, %v2108_v43 }
  0x37   : > { %2278 = vmatmul.mubr.f32.gmra.mxu0 %v13988_v60  ;;  %2448 = vmatprep.mubr.f32.mxu1 %v13654_v9 }
  0x38   : > { %2283 = vmatprep.mubr.f32.mxu0 %v13654_v9  ;;  %v14014_v63 = vsub.f32 %v2108_v43, %v14007_v50 }
  0x39   : > { %411 = vperm.xlu0 %13578, %v385_v34  }
  0x3a   : > { %2450 = vmatmul.mubr.f32.gmra.mxu1 %v13938_v59  ;;  %416 = vperm.xlu1 %13579, %v386_v36   ;;  %v3207_v13 = vand.u32 4294901760, %v14014_v63  ;;  %v3225_v36 = vand.u32 4294901760, %v14096_v26 }
  0x3b   : > { %2289 = vmatmul.mubr.f32.gmra.mxu0 %v13998_v23  ;;  %2673 = vmatprep.mubr.f32.mxu1 %v13654_v9 }
  0x3c   : > { %2536 = vmatprep.mubr.f32.mxu0 %v13654_v9 }
  0x3d   : > { %421 = vperm.xlu0 %13578, %v387_v46  }
  0x3e   : > { %2677 = vmatmul.mubr.f32.vlgmr.msra.gmra.mxu1 %v13854_v0  ;;  %426 = vperm.xlu1 %13579, %v388_v54  }
  0x3f   : > { %2539 = vmatmul.mubr.f32.vlgmr.msra.gmra.mxu0 %v13839_v55  ;;  %2918 = vmatpush1.msra.mxu1 %v13725_v4  ;;  %v3208_v4 = vsub.f32 %v14014_v63, %v3207_v13 }
  0x40   : > { %2777 = vmatpush1.msra.mxu0 %v2327_v24  ;;  %2544 = vmatprep.mubr.f32.mxu0 %v13654_v9 }
  0x41   : > { %2682 = vmatprep.mubr.f32.mxu1 %v13654_v9  ;;  %2781 = vmatprep.subr.mxu0 %v2333_v25  ;;  %v14093_v25 = vand.u32 4294901760, %v2100_v20 }
  0x42   : > { %2686 = vmatmul.mubr.f32.gmra.mxu1 %v13868_v14  ;;  %2785 = vmatpush1.msra.mxu0 %v2339_v27 }
  0x43   : > { %2547 = vmatmul.mubr.f32.gmra.mxu0 %v13857_v1  ;;  %2691 = vmatprep.mubr.f32.mxu1 %v13654_v9 }
  0x44   : > { %2552 = vmatprep.mubr.f32.mxu0 %v13654_v9  ;;  %2920 = vmatprep.subr.mxu1 %v13727_v5  ;;  %v2107_v5 = vld [vmem:[%s19879_s1 + $0x70] sm:$0xff] }
  0x45   : > { %2922 = vmatpush1.msra.mxu1 %v13740_v10  ;;  %2789 = vmatprep.subr.mxu0 %v2345_v28  ;;  %v3209_v10 = vand.u32 4294901760, %v3208_v4  ;;  %v2096_v28 = vld [vmem:[%s19879_s1 + $0x18] sm:$0xff] }
  0x46   : > { %2695 = vmatmul.mubr.f32.gmra.mxu1 %v13871_v30  ;;  %2793 = vmatpush1.msra.mxu0 %v2351_v29  ;;  %v2095_v29 = vld [vmem:[%s19879_s1 + $0x10] sm:$0xff]  ;;  %v14117_v34 = vand.u32 4294901760, %v2096_v28 }
  0x47   : > { %2555 = vmatmul.mubr.f32.gmra.mxu0 %v13860_v2  ;;  %2700 = vmatprep.mubr.f32.mxu1 %v13654_v9  ;;  %v14123_v43 = vand.u32 4294901760, %v2095_v29 }
  0x48   : > { %2560 = vmatprep.mubr.f32.mxu0 %v13654_v9  ;;  %2924 = vmatprep.subr.mxu1 %v13742_v11  ;;  %v14056_v11 = vand.u32 4294901760, %v2107_v5  ;;  %v14134_v4 = vsub.f32 %v2096_v28, %v14117_v34 }
  0x49   : > { %2926 = vmatpush1.msra.mxu1 %v13744_v12  ;;  %2797 = vmatprep.subr.mxu0 %v2357_v35  ;;  %v2104_v12 = vld [vmem:[%s19879_s1 + $0x58] sm:$0xff] }
  0x4a   : > { %2704 = vmatmul.mubr.f32.gmra.mxu1 %v13892_v40  ;;  %2801 = vmatpush1.msra.mxu0 %v2363_v52  ;;  %v14072_v17 = vsub.f32 %v2107_v5, %v14056_v11  ;;  %v14115_v52 = vsub.f32 %v2100_v20, %v14093_v25  ;;  %v3226_v5 = vsub.f32 %v14096_v26, %v3225_v36 }
  0x4b   : > { %2563 = vmatmul.mubr.f32.gmra.mxu0 %v13874_v32  ;;  %2709 = vmatprep.mubr.f32.mxu1 %v13654_v9 }
  0x4c   : > { %2568 = vmatprep.mubr.f32.mxu0 %v13654_v9  ;;  %2928 = vmatprep.subr.mxu1 %v13764_v18  ;;  %v14075_v18 = vand.u32 4294901760, %v2104_v12  ;;  %v3213_v22 = vand.u32 4294901760, %v14072_v17  ;;  %v3231_v54 = vand.u32 4294901760, %v14115_v52  ;;  %v3227_v28 = vand.u32 4294901760, %v3226_v5 }
  0x4d   : > { %2930 = vmatpush1.msra.mxu1 %v13773_v21  ;;  %3045 = vmatprep.subr.mxu0 %v14007_v50  ;;  %v2099_v21 = vld [vmem:[%s19879_s1 + $0x30] sm:$0xff] }
  0x4e   : > { %2713 = vmatmul.mubr.f32.gmra.mxu1 %v13915_v47  ;;  %3210 = vmatprep.subr.mxu1 %v3209_v10  ;;  %v14091_v24 = vsub.f32 %v2104_v12, %v14075_v18  ;;  %v14098_v27 = vand.u32 4294901760, %v2099_v21  ;;  %v3214_v31 = vsub.f32 %v14072_v17, %v3213_v22  ;;  %v14141_v12 = vsub.f32 %v2095_v29, %v14123_v43 }
  0x4f   : > { %2571 = vmatmul.mubr.f32.gmra.mxu0 %v13895_v41  ;;  %2718 = vmatprep.mubr.f32.mxu1 %v13654_v9  ;;  %v3232_v20 = vsub.f32 %v14115_v52, %v3231_v54 }
  0x50   : > { %2576 = vmatprep.mubr.f32.mxu0 %v13654_v9  ;;  %v3219_v35 = vand.u32 4294901760, %v14091_v24  ;;  %v14121_v39 = vsub.f32 %v2099_v21, %v14098_v27  ;;  %v3215_v3 = vand.u32 4294901760, %v3214_v31  ;;  %v3243_v21 = vand.u32 4294901760, %v14134_v4 }
  0x51   : > { %v3249_v31 = vand.u32 4294901760, %v14141_v12 }
  0x52   : > { %2722 = vmatmul.mubr.f32.gmra.mxu1 %v13927_v51  ;;  %v3220_v46 = vsub.f32 %v14091_v24, %v3219_v35  ;;  %v19886_v10 = vand.u32 4294901760, %v14121_v39 }
  0x53   : > { %2579 = vmatmul.mubr.f32.gmra.mxu0 %v13906_v44  ;;  %2727 = vmatprep.mubr.f32.mxu1 %v13654_v9 }
  0x54   : > { %2584 = vmatprep.mubr.f32.mxu0 %v13654_v9  ;;  %v3221_v16 = vand.u32 4294901760, %v3220_v46  ;;  %v3238_v29 = vsub.f32 %v14121_v39, %v19886_v10  ;;  %v3244_v46 = vsub.f32 %v14134_v4, %v3243_v21  ;;  %v3250_v10 = vsub.f32 %v14141_v12, %v3249_v31 }
  0x56   : > { %2731 = vmatmul.mubr.f32.gmra.mxu1 %v13960_v6  ;;  %v3239_v5 = vand.u32 4294901760, %v3238_v29 }
  0x57   : > { %2587 = vmatmul.mubr.f32.gmra.mxu0 %v13936_v58  ;;  %2736 = vmatprep.mubr.f32.mxu1 %v13654_v9 }
  0x58   : > { %2592 = vmatprep.mubr.f32.mxu0 %v13654_v9 }
  0x5a   : > { %2740 = vmatmul.mubr.f32.gmra.mxu1 %v13981_v15 }
  0x5b   : > { %2595 = vmatmul.mubr.f32.gmra.mxu0 %v13963_v8  ;;  %2963 = vmatprep.mubr.f32.mxu1 %v13654_v9 }
  0x5c   : > { %2834 = vmatprep.mubr.f32.mxu0 %v13654_v9 }
  0x5e   : > { %2965 = vmatmul.mubr.f32.vlgmr.msra.gmra.mxu1 %v13831_v49 }
  0x5f   : > { %2836 = vmatmul.mubr.f32.vlgmr.msra.gmra.mxu0 %v13831_v49  ;;  %3216 = vmatpush1.msra.mxu1 %v3215_v3  ;;  %v3233_v3 = vand.u32 4294901760, %v3232_v20  ;;  %v3251_v20 = vand.u32 4294901760, %v3250_v10 }
  0x60   : > { %3047 = vmatpush1.msra.mxu0 %v14056_v11  ;;  %2841 = vmatprep.mubr.f32.mxu0 %v13654_v9 }
  0x61   : > { %2970 = vmatprep.mubr.f32.mxu1 %v13654_v9  ;;  %3049 = vmatprep.subr.mxu0 %v14075_v18 }
  0x62   : > { %2972 = vmatmul.mubr.f32.gmra.mxu1 %v13841_v56  ;;  %3051 = vmatpush1.msra.mxu0 %v14077_v19 }
  0x63   : > { %2843 = vmatmul.mubr.f32.gmra.mxu0 %v13841_v56  ;;  %2977 = vmatprep.mubr.f32.mxu1 %v13654_v9 }
  0x64   : > { %2848 = vmatprep.mubr.f32.mxu0 %v13654_v9  ;;  %3222 = vmatprep.subr.mxu1 %v3221_v16  ;;  %v3245_v16 = vand.u32 4294901760, %v3244_v46 }
  0x65   : > { %3228 = vmatpush1.msra.mxu1 %v3227_v28  ;;  %3053 = vmatprep.subr.mxu0 %v14093_v25 }
  0x66   : > { %2979 = vmatmul.mubr.f32.gmra.mxu1 %v13843_v57  ;;  %3055 = vmatpush1.msra.mxu0 %v14098_v27 }
  0x67   : > { %2850 = vmatmul.mubr.f32.gmra.mxu0 %v13843_v57  ;;  %2984 = vmatprep.mubr.f32.mxu1 %v13654_v9 }
  0x68   : > { %2855 = vmatprep.mubr.f32.mxu0 %v13654_v9  ;;  %3234 = vmatprep.subr.mxu1 %v3233_v3 }
  0x69   : > { %3240 = vmatpush1.msra.mxu1 %v3239_v5  ;;  %3057 = vmatprep.subr.mxu0 %v14117_v34 }
  0x6a   : > { %2986 = vmatmul.mubr.f32.gmra.mxu1 %v13850_v62  ;;  %3059 = vmatpush1.msra.mxu0 %v14123_v43 }
  0x6b   : > { %2857 = vmatmul.mubr.f32.gmra.mxu0 %v13850_v62  ;;  %2991 = vmatprep.mubr.f32.mxu1 %v13654_v9 }
  0x6c   : > { %2862 = vmatprep.mubr.f32.mxu0 %v13654_v9  ;;  %3246 = vmatprep.subr.mxu1 %v3245_v16 }
  0x6d   : > { %3252 = vmatpush1.msra.mxu1 %v3251_v20  ;;  %3368 = vmatprep.subr.mxu0 %v14014_v63 }
  0x6e   : > { %2993 = vmatmul.mubr.f32.gmra.mxu1 %v13862_v7  ;;  %3512 = vmatprep.subr.mxu1 %v14007_v50 }
  0x6f   : > { %2864 = vmatmul.mubr.f32.gmra.mxu0 %v13862_v7  ;;  %2998 = vmatprep.mubr.f32.mxu1 %v13654_v9 }
  0x70   : > { %2869 = vmatprep.mubr.f32.mxu0 %v13654_v9 }
  0x72   : > { %3000 = vmatmul.mubr.f32.gmra.mxu1 %v13883_v37 }
  0x73   : > { %2871 = vmatmul.mubr.f32.gmra.mxu0 %v13883_v37  ;;  %3005 = vmatprep.mubr.f32.mxu1 %v13654_v9 }
  0x74   : > { %2876 = vmatprep.mubr.f32.mxu0 %v13654_v9 }
  0x76   : > { %3007 = vmatmul.mubr.f32.gmra.mxu1 %v13917_v48 }
  0x77   : > { %2878 = vmatmul.mubr.f32.gmra.mxu0 %v13917_v48  ;;  %3012 = vmatprep.mubr.f32.mxu1 %v13654_v9 }
  0x78   : > { %2883 = vmatprep.mubr.f32.mxu0 %v13654_v9 }
  0x7a   : > { %3014 = vmatmul.mubr.f32.gmra.mxu1 %v13938_v59 }
  0x7b   : > { %2885 = vmatmul.mubr.f32.gmra.mxu0 %v13938_v59  ;;  %3285 = vmatprep.mubr.f32.mxu1 %v13654_v9 }
  0x7c   : > { %3092 = vmatprep.mubr.f32.mxu0 %v13654_v9 }
  0x7e   : > { %3287 = vmatmul.mubr.f32.vlgmr.msra.gmra.mxu1 %v13831_v49 }
  0x7f   : > { %3098 = vmatmul.mubr.f32.vlgmr.msra.gmra.mxu0 %v13876_v33  ;;  %3514 = vmatpush1.msra.mxu1 %v14056_v11 }
  0x80   : > { %3371 = vmatpush1.msra.mxu0 %v14072_v17  ;;  %3103 = vmatprep.mubr.f32.mxu0 %v13654_v9 }
  0x81   : > { %3292 = vmatprep.mubr.f32.mxu1 %v13654_v9  ;;  %3374 = vmatprep.subr.mxu0 %v14091_v24 }
  0x82   : > { %3294 = vmatmul.mubr.f32.gmra.mxu1 %v13841_v56  ;;  %3377 = vmatpush1.msra.mxu0 %v14096_v26 }
  0x83   : > { %3109 = vmatmul.mubr.f32.gmra.mxu0 %v13887_v38  ;;  %3299 = vmatprep.mubr.f32.mxu1 %v13654_v9 }
  0x84   : > { %3114 = vmatprep.mubr.f32.mxu0 %v13654_v9  ;;  %3516 = vmatprep.subr.mxu1 %v14075_v18 }
  0x85   : > { %3518 = vmatpush1.msra.mxu1 %v14077_v19  ;;  %3380 = vmatprep.subr.mxu0 %v14115_v52 }
  0x86   : > { %3301 = vmatmul.mubr.f32.gmra.mxu1 %v13843_v57  ;;  %3383 = vmatpush1.msra.mxu0 %v14121_v39 }
  0x87   : > { %3120 = vmatmul.mubr.f32.gmra.mxu0 %v13909_v45  ;;  %3306 = vmatprep.mubr.f32.mxu1 %v13654_v9 }
  0x88   : > { %3125 = vmatprep.mubr.f32.mxu0 %v13654_v9  ;;  %3520 = vmatprep.subr.mxu1 %v14093_v25 }
  0x89   : > { %3522 = vmatpush1.msra.mxu1 %v14098_v27  ;;  %3386 = vmatprep.subr.mxu0 %v14134_v4 }
  0x8a   : > { %3308 = vmatmul.mubr.f32.gmra.mxu1 %v13850_v62  ;;  %3389 = vmatpush1.msra.mxu0 %v14141_v12 }
  0x8b   : > { %3131 = vmatmul.mubr.f32.gmra.mxu0 %v13930_v53  ;;  %3313 = vmatprep.mubr.f32.mxu1 %v13654_v9 }
  0x8c   : > { %3136 = vmatprep.mubr.f32.mxu0 %v13654_v9  ;;  %3524 = vmatprep.subr.mxu1 %v14117_v34 }
  0x8d   : > { %3526 = vmatpush1.msra.mxu1 %v14123_v43  ;;  %3659 = vmatprep.subr.mxu0 %v3207_v13 }
  0x8e   : > { %3315 = vmatmul.mubr.f32.gmra.mxu1 %v13862_v7  ;;  %3802 = vmatprep.subr.mxu1 %v14007_v50 }
  0x8f   : > { %3142 = vmatmul.mubr.f32.gmra.mxu0 %v13954_v61  ;;  %3320 = vmatprep.mubr.f32.mxu1 %v13654_v9 }
  0x90   : > { %3147 = vmatprep.mubr.f32.mxu0 %v13654_v9 }
  0x92   : > { %3322 = vmatmul.mubr.f32.gmra.mxu1 %v13883_v37 }
  0x93   : > { %3153 = vmatmul.mubr.f32.gmra.mxu0 %v13975_v42  ;;  %3327 = vmatprep.mubr.f32.mxu1 %v13654_v9 }
  0x94   : > { %3158 = vmatprep.mubr.f32.mxu0 %v13654_v9 }
  0x96   : > { %3329 = vmatmul.mubr.f32.gmra.mxu1 %v13917_v48 }
  0x97   : > { %3164 = vmatmul.mubr.f32.gmra.mxu0 %v13988_v60  ;;  %3334 = vmatprep.mubr.f32.mxu1 %v13654_v9 }
  0x98   : > { %3169 = vmatprep.mubr.f32.mxu0 %v13654_v9 }
  0x9a   : > { %3336 = vmatmul.mubr.f32.gmra.mxu1 %v13938_v59 }
  0x9b   : > { %3175 = vmatmul.mubr.f32.gmra.mxu0 %v13998_v23  ;;  %3559 = vmatprep.mubr.f32.mxu1 %v13654_v9 }
  0x9c   : > { %3422 = vmatprep.mubr.f32.mxu0 %v13654_v9 }
  0x9e   : > { %3563 = vmatmul.mubr.f32.vlgmr.msra.gmra.mxu1 %v13854_v0 }
  0x9f   : > { %3425 = vmatmul.mubr.f32.vlgmr.msra.gmra.mxu0 %v13839_v55  ;;  %3804 = vmatpush1.msra.mxu1 %v14056_v11  ;;  %v20400_v55 = vand.u32 4294901760, %v14121_v39 }
  0xa0   : > { %3663 = vmatpush1.msra.mxu0 %v3213_v22  ;;  %3430 = vmatprep.mubr.f32.mxu0 %v13654_v9 }
  0xa1   : > { %3568 = vmatprep.mubr.f32.mxu1 %v13654_v9  ;;  %3667 = vmatprep.subr.mxu0 %v3219_v35 }
  0xa2   : > { %3572 = vmatmul.mubr.f32.gmra.mxu1 %v13868_v14  ;;  %3671 = vmatpush1.msra.mxu0 %v3225_v36 }
  0xa3   : > { %3433 = vmatmul.mubr.f32.gmra.mxu0 %v13857_v1  ;;  %3577 = vmatprep.mubr.f32.mxu1 %v13654_v9 }
  0xa4   : > { %3438 = vmatprep.mubr.f32.mxu0 %v13654_v9  ;;  %3806 = vmatprep.subr.mxu1 %v14075_v18 }
  0xa5   : > { %3808 = vmatpush1.msra.mxu1 %v14077_v19  ;;  %3675 = vmatprep.subr.mxu0 %v3231_v54 }
  0xa6   : > { %3581 = vmatmul.mubr.f32.gmra.mxu1 %v13871_v30  ;;  %3679 = vmatpush1.msra.mxu0 %v20400_v55 }
  0xa7   : > { %3441 = vmatmul.mubr.f32.gmra.mxu0 %v13860_v2  ;;  %3586 = vmatprep.mubr.f32.mxu1 %v13654_v9 }
  0xa8   : > { %3446 = vmatprep.mubr.f32.mxu0 %v13654_v9  ;;  %3810 = vmatprep.subr.mxu1 %v14093_v25 }
  0xa9   : > { %3812 = vmatpush1.msra.mxu1 %v14098_v27  ;;  %3683 = vmatprep.subr.mxu0 %v3243_v21 }
  0xaa   : > { %3590 = vmatmul.mubr.f32.gmra.mxu1 %v13892_v40  ;;  %3687 = vmatpush1.msra.mxu0 %v3249_v31 }
  0xab   : > { %3449 = vmatmul.mubr.f32.gmra.mxu0 %v13874_v32  ;;  %3595 = vmatprep.mubr.f32.mxu1 %v13654_v9 }
  0xac   : > { %3454 = vmatprep.mubr.f32.mxu0 %v13654_v9  ;;  %3814 = vmatprep.subr.mxu1 %v14117_v34 }
  0xad   : > { %3816 = vmatpush1.msra.mxu1 %v14123_v43 }
  0xae   : > { %3599 = vmatmul.mubr.f32.gmra.mxu1 %v13915_v47 }
  0xaf   : > { %3457 = vmatmul.mubr.f32.gmra.mxu0 %v13895_v41  ;;  %3604 = vmatprep.mubr.f32.mxu1 %v13654_v9 }
  0xb0   : > { %3462 = vmatprep.mubr.f32.mxu0 %v13654_v9 }
  0xb2   : > { %3608 = vmatmul.mubr.f32.gmra.mxu1 %v13927_v51 }
  0xb3   : > { %3465 = vmatmul.mubr.f32.gmra.mxu0 %v13906_v44  ;;  %3613 = vmatprep.mubr.f32.mxu1 %v13654_v9 }
  0xb4   : > { %3470 = vmatprep.mubr.f32.mxu0 %v13654_v9 }
  0xb6   : > { %3617 = vmatmul.mubr.f32.gmra.mxu1 %v13960_v6 }
  0xb7   : > { %3473 = vmatmul.mubr.f32.gmra.mxu0 %v13936_v58  ;;  %3622 = vmatprep.mubr.f32.mxu1 %v13654_v9 }
  0xb8   : > { %3478 = vmatprep.mubr.f32.mxu0 %v13654_v9 }
  0xba   : > { %3626 = vmatmul.mubr.f32.gmra.mxu1 %v13981_v15 }
  0xbb   : > { %3481 = vmatmul.mubr.f32.gmra.mxu0 %v13963_v8  ;;  %3849 = vmatprep.mubr.f32.mxu1 %v13654_v9 }
  0xbc   : > { %3720 = vmatprep.mubr.f32.mxu0 %v13654_v9 }
  0xbe   : > { %3851 = vmatmul.mubr.f32.vlgmr.msra.gmra.mxu1 %v13831_v49 }
  0xbf   : > { %3722 = vmatmul.mubr.f32.vlgmr.msra.gmra.mxu0 %v13831_v49  ;;  %3856 = vmatprep.mubr.f32.mxu1 %v13654_v9 }
  0xc0   : > { %3727 = vmatprep.mubr.f32.mxu0 %v13654_v9 }
  0xc2   : > { %3858 = vmatmul.mubr.f32.gmra.mxu1 %v13841_v56 }
  0xc3   : > { %3729 = vmatmul.mubr.f32.gmra.mxu0 %v13841_v56  ;;  %3863 = vmatprep.mubr.f32.mxu1 %v13654_v9 }
  0xc4   : > { %3734 = vmatprep.mubr.f32.mxu0 %v13654_v9 }
  0xc6   : > { %3865 = vmatmul.mubr.f32.gmra.mxu1 %v13843_v57 }
  0xc7   : > { %3736 = vmatmul.mubr.f32.gmra.mxu0 %v13843_v57  ;;  %3870 = vmatprep.mubr.f32.mxu1 %v13654_v9 }
  0xc8   : > { %3741 = vmatprep.mubr.f32.mxu0 %v13654_v9 }
  0xca   : > { %3872 = vmatmul.mubr.f32.gmra.mxu1 %v13850_v62 }
  0xcb   : > { %3743 = vmatmul.mubr.f32.gmra.mxu0 %v13850_v62  ;;  %3877 = vmatprep.mubr.f32.mxu1 %v13654_v9 }
  0xcc   : > { %3748 = vmatprep.mubr.f32.mxu0 %v13654_v9 }
  0xce   : > { %3879 = vmatmul.mubr.f32.gmra.mxu1 %v13862_v7 }
  0xcf   : > { %3750 = vmatmul.mubr.f32.gmra.mxu0 %v13862_v7  ;;  %3884 = vmatprep.mubr.f32.mxu1 %v13654_v9 }
  0xd0   : > { %3755 = vmatprep.mubr.f32.mxu0 %v13654_v9 }
  0xd2   : > { %3886 = vmatmul.mubr.f32.gmra.mxu1 %v13883_v37 }
  0xd3   : > { %3757 = vmatmul.mubr.f32.gmra.mxu0 %v13883_v37  ;;  %3891 = vmatprep.mubr.f32.mxu1 %v13654_v9 }
  0xd4   : > { %3762 = vmatprep.mubr.f32.mxu0 %v13654_v9 }
  0xd6   : > { %3893 = vmatmul.mubr.f32.gmra.mxu1 %v13917_v48 }
  0xd7   : > { %3764 = vmatmul.mubr.f32.gmra.mxu0 %v13917_v48  ;;  %3898 = vmatprep.mubr.f32.mxu1 %v13654_v9 }
  0xd8   : > { %3769 = vmatprep.mubr.f32.mxu0 %v13654_v9 }
  0xda   : > { %3900 = vmatmul.mubr.f32.gmra.mxu1 %v13938_v59 }
  0xdb   : > { %3771 = vmatmul.mubr.f32.gmra.mxu0 %v13938_v59 }
  0xde   : > { %v2402_v49 = vpop.f32.mrf.mxu1 }
  0xdf   : > { %v2213_v56 = vpop.f32.mrf.mxu0 }
  0xe0   : > { %v14330_v57 = vpop.f32.mrf.mxu1  ;;  %v14370_v8 = vadd.f32 %v2402_v49, %v2213_v56 }
  0xe1   : > { %20401 = vst [vmem:[#allocation2_spill] sm:$0xff] %v14330_v57  ;;  %v14332_v62 = vpop.f32.mrf.mxu0 }
  0xe2   : > { %20402 = vst [vmem:[#allocation3_spill] sm:$0xff] %v14332_v62  ;;  %v2409_v0 = vpop.f32.mrf.mxu1 }
  0xe3   : > { %v2224_v1 = vpop.f32.mrf.mxu0 }
  0xe4   : > { %v14334_v2 = vpop.f32.mrf.mxu1  ;;  %v14386_v11 = vadd.f32 %v2409_v0, %v2224_v1 }
  0xe5   : > { %20403 = vst [vmem:[#allocation4_spill] sm:$0xff] %v14334_v2  ;;  %v14336_v7 = vpop.f32.mrf.mxu0 }
  0xe6   : > { %20404 = vst [vmem:[#allocation5_spill] sm:$0xff] %v14336_v7  ;;  %v14338_v14 = vpop.f32.mrf.mxu1 }
  0xe7   : > { %v2235_v30 = vpop.f32.mrf.mxu0 }
  0xe8   : > { %v14340_v9 = vpop.f32.mrf.mxu1 }
  0xe9   : > { %20405 = vst [vmem:[#allocation6_spill] sm:$0xff] %v14340_v9  ;;  %v14342_v32 = vpop.f32.mrf.mxu0 }
  0xea   : > { %20406 = vst [vmem:[#allocation7_spill] sm:$0xff] %v14342_v32  ;;  %v2423_v33 = vpop.f32.mrf.mxu1 }
  0xeb   : > { %v2246_v37 = vpop.f32.mrf.mxu0 }
  0xec   : > { %v14344_v38 = vpop.f32.mrf.mxu1 }
  0xed   : > { %20407 = vst [vmem:[#allocation8_spill] sm:$0xff] %v14344_v38  ;;  %v14346_v40 = vpop.f32.mrf.mxu0 }
  0xee   : > { %20408 = vst [vmem:[#allocation9_spill] sm:$0xff] %v14346_v40  ;;  %v14348_v41 = vpop.f32.mrf.mxu1 }
  0xef   : > { %20409 = vst [vmem:[#allocation10_spill] sm:$0xff] %v14348_v41  ;;  %v14350_v44 = vpop.f32.mrf.mxu0 }
  0xf0   : > { %20410 = vst [vmem:[#allocation11_spill] sm:$0xff] %v14350_v44  ;;  %v14352_v45 = vpop.f32.mrf.mxu1 }
  0xf1   : > { %20411 = vst [vmem:[#allocation12_spill] sm:$0xff] %v14352_v45  ;;  %v14354_v47 = vpop.f32.mrf.mxu0 }
  0xf2   : > { %20412 = vst [vmem:[#allocation13_spill] sm:$0xff] %v14354_v47  ;;  %v14356_v48 = vpop.f32.mrf.mxu1 }
  0xf3   : > { %20413 = vst [vmem:[#allocation14_spill] sm:$0xff] %v14356_v48  ;;  %v14358_v51 = vpop.f32.mrf.mxu0 }
  0xf4   : > { %20414 = vst [vmem:[#allocation15_spill] sm:$0xff] %v14358_v51  ;;  %v14360_v53 = vpop.f32.mrf.mxu1 }
  0xf5   : > { %20415 = vst [vmem:[#allocation16_spill] sm:$0xff] %v14360_v53  ;;  %v14362_v58 = vpop.f32.mrf.mxu0 }
  0xf6   : > { %20416 = vst [vmem:[#allocation17_spill] sm:$0xff] %v14362_v58  ;;  %v14364_v59 = vpop.f32.mrf.mxu1 }
  0xf7   : > { %20417 = vst [vmem:[#allocation18_spill] sm:$0xff] %v14364_v59  ;;  %v14366_v61 = vpop.f32.mrf.mxu0 }
  0xf8   : > { %20418 = vst [vmem:[#allocation19_spill] sm:$0xff] %v14366_v61  ;;  %v14368_v6 = vpop.f32.mrf.mxu1 }
  0xf9   : > { %20419 = vst [vmem:[#allocation20_spill] sm:$0xff] %v14368_v6  ;;  %v14372_v42 = vpop.f32.mrf.mxu0 }
  0xfa   : > { %20420 = vst [vmem:[#allocation21_spill] sm:$0xff] %v14372_v42  ;;  %v14374_v15 = vpop.f32.mrf.mxu1 }
  0xfb   : > { %v14376_v60 = vpop.f32.mrf.mxu0 }
  0xfc   : > { %v14378_v23 = vpop.f32.mrf.mxu1 }
  0xfd   : > { %20421 = vst [vmem:[#allocation22_spill] sm:$0xff] %v14378_v23  ;;  %v14380_v50 = vpop.f32.mrf.mxu0 }
  0xfe   : > { %20422 = vst [vmem:[#allocation23_spill] sm:$0xff] %v14380_v50  ;;  %v14382_v63 = vpop.f32.mrf.mxu1 }
  0xff   : > { %v14384_v13 = vpop.f32.mrf.mxu0 }
 0x100   : > { %v14388_v17 = vpop.f32.mrf.mxu1 }
 0x101   : > { %20423 = vst [vmem:[#allocation24_spill] sm:$0xff] %v14388_v17  ;;  %v14390_v18 = vpop.f32.mrf.mxu0 }
 0x102   : > { %20424 = vst [vmem:[#allocation25_spill] sm:$0xff] %v14390_v18  ;;  %v14392_v19 = vpop.f32.mrf.mxu1 }
 0x103   : > { %v14394_v22 = vpop.f32.mrf.mxu0 }
 0x104   : > { %v14396_v24 = vpop.f32.mrf.mxu1 }
 0x105   : > { %20425 = vst [vmem:[#allocation26_spill] sm:$0xff] %v14396_v24  ;;  %v14398_v25 = vpop.f32.mrf.mxu0 }
 0x106   : > { %20426 = vst [vmem:[#allocation27_spill] sm:$0xff] %v14398_v25  ;;  %v14400_v26 = vpop.f32.mrf.mxu1 }
 0x107   : > { %20427 = vst [vmem:[#allocation28_spill] sm:$0xff] %v14400_v26  ;;  %v14402_v27 = vpop.f32.mrf.mxu0 }
 0x108   : > { %20428 = vst [vmem:[#allocation29_spill] sm:$0xff] %v14402_v27  ;;  %v14404_v35 = vpop.f32.mrf.mxu1 }
 0x109   : > { %20429 = vst [vmem:[#allocation30_spill] sm:$0xff] %v14404_v35  ;;  %v14406_v52 = vpop.f32.mrf.mxu0 }
 0x10a   : > { %20430 = vst [vmem:[#allocation31_spill] sm:$0xff] %v14406_v52  ;;  %v14408_v34 = vpop.f32.mrf.mxu1 }
 0x10b   : > { %20431 = vst [vmem:[#allocation32_spill] sm:$0xff] %v14408_v34  ;;  %v14410_v36 = vpop.f32.mrf.mxu0 }
 0x10c   : > { %20432 = vst [vmem:[#allocation33_spill] sm:$0xff] %v14410_v36  ;;  %v14412_v39 = vpop.f32.mrf.mxu1  ;;  %v2452_v36 = vadd.f32 %v14374_v15, %v14376_v60 }
 0x10d   : > { %20433 = vst [vmem:[#allocation34_spill] sm:$0xff] %v14412_v39  ;;  %v14414_v43 = vpop.f32.mrf.mxu0 }
 0x10e   : > { %20434 = vst [vmem:[#allocation35_spill] sm:$0xff] %v14414_v43  ;;  %v14416_v54 = vpop.f32.mrf.mxu1 }
 0x10f   : > { %20435 = vst [vmem:[#allocation36_spill] sm:$0xff] %v14416_v54  ;;  %v14418_v4 = vpop.f32.mrf.mxu0 }
 0x110   : > { %20436 = vst [vmem:[#allocation37_spill] sm:$0xff] %v14418_v4  ;;  %v14420_v10 = vpop.f32.mrf.mxu1 }
 0x111   : > { %20437 = vst [vmem:[#allocation38_spill] sm:$0xff] %v14420_v10  ;;  %v14422_v12 = vpop.f32.mrf.mxu0 }
 0x112   : > { %20438 = vst [vmem:[#allocation39_spill] sm:$0xff] %v14422_v12  ;;  %v14424_v21 = vpop.f32.mrf.mxu1 }
 0x113   : > { %20439 = vst [vmem:[#allocation40_spill] sm:$0xff] %v14424_v21  ;;  %v14426_v28 = vpop.f32.mrf.mxu0 }
 0x114   : > { %20440 = vst [vmem:[#allocation41_spill] sm:$0xff] %v14426_v28  ;;  %v14428_v29 = vpop.f32.mrf.mxu1 }
 0x115   : > { %20441 = vst [vmem:[#allocation42_spill] sm:$0xff] %v14428_v29  ;;  %v14430_v31 = vpop.f32.mrf.mxu0 }
 0x116   : > { %20442 = vst [vmem:[#allocation43_spill] sm:$0xff] %v14430_v31  ;;  %v14432_v3 = vpop.f32.mrf.mxu1 }
 0x117   : > { %20443 = vst [vmem:[#allocation44_spill] sm:$0xff] %v14432_v3  ;;  %v14434_v46 = vpop.f32.mrf.mxu0 }
 0x118   : > { %20444 = vst [vmem:[#allocation45_spill] sm:$0xff] %v14434_v46  ;;  %v14436_v5 = vpop.f32.mrf.mxu1 }
 0x119   : > { %20445 = vst [vmem:[#allocation46_spill] sm:$0xff] %v14436_v5  ;;  %v14438_v16 = vpop.f32.mrf.mxu0  ;;  %v14459_v5 = vadd.f32 %v14338_v14, %v2235_v30 }
 0x11a   : > { %20446 = vst [vmem:[#allocation47_spill] sm:$0xff] %v14438_v16  ;;  %v14440_v20 = vpop.f32.mrf.mxu1 }
 0x11b   : > { %v14442_v55 = vpop.f32.mrf.mxu0  ;;  %20452 = vst [vmem:[#allocation53_spill] sm:$0xff] %v14459_v5 }
 0x11c   : > { %v14444_v49 = vpop.f32.mrf.mxu1  ;;  %v2597_v43 = vadd.f32 %v14442_v55, %v2452_v36 }
 0x11d   : > { %20447 = vst [vmem:[#allocation48_spill] sm:$0xff] %v14444_v49  ;;  %v14446_v56 = vpop.f32.mrf.mxu0  ;;  %v14465_v49 = vadd.f32 %v2423_v33, %v2246_v37 }
 0x11e   : > { %20448 = vst [vmem:[#allocation49_spill] sm:$0xff] %v14446_v56  ;;  %v14448_v0 = vpop.f32.mrf.mxu1  ;;  %v14585_v40 = vadd.f32 %v14440_v20, %v2597_v43 }
 0x11f   : > { %v14450_v1 = vpop.f32.mrf.mxu0  ;;  %20454 = vst [vmem:[#allocation55_spill] sm:$0xff] %v14465_v49 }
 0x120   : > { %v14452_v29 = vpop.f32.mrf.mxu1  ;;  %20488 = vst [vmem:[#allocation89_spill] sm:$0xff] %v14585_v40 }
 0x121   : > { %20449 = vst [vmem:[#allocation50_spill] sm:$0xff] %v14452_v29  ;;  %v14454_v3 = vpop.f32.mrf.mxu0 }
 0x122   : > { %20450 = vst [vmem:[#allocation51_spill] sm:$0xff] %v14454_v3  ;;  %v14456_v21 = vpop.f32.mrf.mxu1 }
 0x123   : > { %20451 = vst [vmem:[#allocation52_spill] sm:$0xff] %v14456_v21  ;;  %v14461_v16 = vpop.f32.mrf.mxu0 }
 0x124   : > { %v14463_v46 = vpop.f32.mrf.mxu1 }
 0x125   : > { %20453 = vst [vmem:[#allocation54_spill] sm:$0xff] %v14463_v46  ;;  %v14467_v56 = vpop.f32.mrf.mxu0 }
 0x126   : > { %20455 = vst [vmem:[#allocation56_spill] sm:$0xff] %v14467_v56  ;;  %v14469_v31 = vpop.f32.mrf.mxu1 }
 0x127   : > { %20456 = vst [vmem:[#allocation57_spill] sm:$0xff] %v14469_v31  ;;  %v14471_v10 = vpop.f32.mrf.mxu0 }
 0x128   : > { %20457 = vst [vmem:[#allocation58_spill] sm:$0xff] %v14471_v10  ;;  %v14473_v28 = vpop.f32.mrf.mxu1 }
 0x129   : > { %20458 = vst [vmem:[#allocation59_spill] sm:$0xff] %v14473_v28  ;;  %v14475_v54 = vpop.f32.mrf.mxu0 }
 0x12a   : > { %20459 = vst [vmem:[#allocation60_spill] sm:$0xff] %v14475_v54  ;;  %v14477_v23 = vpop.f32.mrf.mxu1 }
 0x12b   : > { %20460 = vst [vmem:[#allocation61_spill] sm:$0xff] %v14477_v23  ;;  %v14479_v14 = vpop.f32.mrf.mxu0 }
 0x12c   : > { %20461 = vst [vmem:[#allocation62_spill] sm:$0xff] %v14479_v14  ;;  %v14481_v30 = vpop.f32.mrf.mxu1 }
 0x12d   : > { %20462 = vst [vmem:[#allocation63_spill] sm:$0xff] %v14481_v30  ;;  %v14483_v50 = vpop.f32.mrf.mxu0 }
 0x12e   : > { %20463 = vst [vmem:[#allocation64_spill] sm:$0xff] %v14483_v50  ;;  %v14485_v33 = vpop.f32.mrf.mxu1 }
 0x12f   : > { %20464 = vst [vmem:[#allocation65_spill] sm:$0xff] %v14485_v33  ;;  %v14487_v37 = vpop.f32.mrf.mxu0 }
 0x130   : > { %20465 = vst [vmem:[#allocation66_spill] sm:$0xff] %v14487_v37  ;;  %v14489_v6 = vpop.f32.mrf.mxu1 }
 0x131   : > { %20466 = vst [vmem:[#allocation67_spill] sm:$0xff] %v14489_v6  ;;  %v14491_v42 = vpop.f32.mrf.mxu0 }
 0x132   : > { %20467 = vst [vmem:[#allocation68_spill] sm:$0xff] %v14491_v42  ;;  %v14493_v59 = vpop.f32.mrf.mxu1 }
 0x133   : > { %20468 = vst [vmem:[#allocation69_spill] sm:$0xff] %v14493_v59  ;;  %v14495_v61 = vpop.f32.mrf.mxu0 }
 0x134   : > { %20469 = vst [vmem:[#allocation70_spill] sm:$0xff] %v14495_v61  ;;  %v14497_v53 = vpop.f32.mrf.mxu1 }
 0x135   : > { %20470 = vst [vmem:[#allocation71_spill] sm:$0xff] %v14497_v53  ;;  %v14499_v23 = vpop.f32.mrf.mxu0  ;;  %v2541_v53 = vadd.f32 %v14384_v13, %v14370_v8 }
 0x136   : > { %20471 = vst [vmem:[#allocation72_spill] sm:$0xff] %v14499_v23  ;;  %v14501_v14 = vpop.f32.mrf.mxu1 }
 0x137   : > { %20472 = vst [vmem:[#allocation73_spill] sm:$0xff] %v14501_v14  ;;  %v14503_v30 = vpop.f32.mrf.mxu0  ;;  %v2679_v28 = vadd.f32 %v14382_v63, %v2541_v53 }
 0x138   : > { %20473 = vst [vmem:[#allocation74_spill] sm:$0xff] %v14503_v30  ;;  %v14505_v58 = vpop.f32.mrf.mxu1 }
 0x139   : > { %20474 = vst [vmem:[#allocation75_spill] sm:$0xff] %v14505_v58  ;;  %v14507_v33 = vpop.f32.mrf.mxu0  ;;  %v2838_v46 = vadd.f32 %v14450_v1, %v2679_v28 }
 0x13a   : > { %20475 = vst [vmem:[#allocation76_spill] sm:$0xff] %v14507_v33  ;;  %v14509_v37 = vpop.f32.mrf.mxu1 }
 0x13b   : > { %20476 = vst [vmem:[#allocation77_spill] sm:$0xff] %v14509_v37  ;;  %v14511_v6 = vpop.f32.mrf.mxu0  ;;  %v2549_v37 = vadd.f32 %v14394_v22, %v14386_v11  ;;  %v14593_v53 = vadd.f32 %v14448_v0, %v2838_v46 }
 0x13c   : > { %20477 = vst [vmem:[#allocation78_spill] sm:$0xff] %v14511_v6  ;;  %v14513_v42 = vpop.f32.mrf.mxu1 }
 0x13d   : > { %20478 = vst [vmem:[#allocation79_spill] sm:$0xff] %v14513_v42  ;;  %v14515_v59 = vpop.f32.mrf.mxu0  ;;  %v2688_v15 = vadd.f32 %v14392_v19, %v2549_v37  ;;  %20490 = vst [vmem:[#allocation91_spill] sm:$0xff] %v14593_v53 }
 0x13e   : > { %20479 = vst [vmem:[#allocation80_spill] sm:$0xff] %v14515_v59  ;;  %v14517_v61 = vpop.f32.mrf.mxu1 }
 0x13f   : > { %v14521_v14 = vpop.f32.mrf.mxu0  ;;  %v14598_v36 = vadd.f32 %v14461_v16, %v2688_v15 }
 0x140   : > { %v14523_v30 = vpop.f32.mrf.mxu1 }
 0x141   : > { %v14525_v58 = vpop.f32.mrf.mxu0  ;;  %20492 = vst [vmem:[#allocation93_spill] sm:$0xff] %v14598_v36 }
 0x142   : > { %v14529_v33 = vpop.f32.mrf.mxu1 }
 0x143   : > { %v14531_v6 = vpop.f32.mrf.mxu0 }
 0x144   : > { %v14533_v42 = vpop.f32.mrf.mxu1 }
 0x145   : > { %v14535_v59 = vpop.f32.mrf.mxu0 }
 0x146   : > { %v14537_v23 = vpop.f32.mrf.mxu1 }
 0x147   : > { %v14539_v8 = vpop.f32.mrf.mxu0 }
 0x148   : > { %v14541_v13 = vpop.f32.mrf.mxu1 }
 0x149   : > { %v14543_v48 = vpop.f32.mrf.mxu0 }
 0x14a   : > { %v14545_v51 = vpop.f32.mrf.mxu1 }
 0x14b   : > { %v14547_v50 = vpop.f32.mrf.mxu0 }
 0x14c   : > { %v14549_v11 = vpop.f32.mrf.mxu1 }
 0x14d   : > { %20480 = vst [vmem:[#allocation81_spill] sm:$0xff] %v14549_v11  ;;  %v14551_v22 = vpop.f32.mrf.mxu0 }
 0x14e   : > { %20481 = vst [vmem:[#allocation82_spill] sm:$0xff] %v14551_v22  ;;  %v14553_v12 = vpop.f32.mrf.mxu1  ;;  %v3289_v22 = vadd.f32 %v14517_v61, %v14521_v14 }
 0x14f   : > { %v14555_v34 = vpop.f32.mrf.mxu0 }
 0x150   : > { %v14557_v4 = vpop.f32.mrf.mxu1 }
 0x151   : > { %20482 = vst [vmem:[#allocation83_spill] sm:$0xff] %v14557_v4  ;;  %v14559_v39 = vpop.f32.mrf.mxu0 }
 0x152   : > { %20483 = vst [vmem:[#allocation84_spill] sm:$0xff] %v14559_v39  ;;  %v14561_v45 = vpop.f32.mrf.mxu1 }
 0x153   : > { %v14563_v47 = vpop.f32.mrf.mxu0 }
 0x154   : > { %v14565_v31 = vpop.f32.mrf.mxu1 }
 0x155   : > { %20484 = vst [vmem:[#allocation85_spill] sm:$0xff] %v14565_v31  ;;  %v14567_v41 = vpop.f32.mrf.mxu0 }
 0x156   : > { %20485 = vst [vmem:[#allocation86_spill] sm:$0xff] %v14567_v41  ;;  %v14569_v44 = vpop.f32.mrf.mxu1  ;;  %v327_v41 = vld [vmem:[%s19882_s4 + $0x60] sm:$0xff] }
 0x157   : > { %v14573_v49 = vpop.f32.mrf.mxu0 }
 0x158   : > { %v14576_v21 = vpop.f32.mrf.mxu1 }
 0x159   : > { %20486 = vst [vmem:[#allocation87_spill] sm:$0xff] %v14576_v21  ;;  %v14579_v10 = vpop.f32.mrf.mxu0 }
 0x15a   : > { %20487 = vst [vmem:[#allocation88_spill] sm:$0xff] %v14579_v10  ;;  %v14582_v38 = vpop.f32.mrf.mxu1  ;;  %v329_v10 = vld [vmem:[%s19882_s4 + $0x70] sm:$0xff] }
 0x15b   : > { %v14587_v54 = vpop.f32.mrf.mxu0 }
 0x15c   : > { %v14590_v60 = vpop.f32.mrf.mxu1 }
 0x15d   : > { %20489 = vst [vmem:[#allocation90_spill] sm:$0xff] %v14590_v60  ;;  %v14595_v63 = vpop.f32.mrf.mxu0 }
 0x15e   : > { %20491 = vst [vmem:[#allocation92_spill] sm:$0xff] %v14595_v63  ;;  %v14600_v28 = vpop.f32.mrf.mxu1 }
 0x15f   : > { %v14602_v55 = vpop.f32.mrf.mxu0 }
 0x160   : > { %v14604_v43 = vpop.f32.mrf.mxu1 }
 0x161   : > { %20493 = vst [vmem:[#allocation94_spill] sm:$0xff] %v14604_v43  ;;  %v14606_v20 = vpop.f32.mrf.mxu0 }
 0x162   : > { %v14608_v1 = vpop.f32.mrf.mxu1 }
 0x163   : > { %v14610_v19 = vpop.f32.mrf.mxu0 }
 0x164   : > { %v14614_v46 = vpop.f32.mrf.mxu1 }
 0x165   : > { %v14612_v37 = vpop.f32.mrf.mxu0  ;;  %20495 = vst [vmem:[#allocation96_spill] sm:$0xff] %v14614_v46  ;;  %v14713_v46 = vand.u32 4294901760, %v327_v41 }
 0x166   : > { %20494 = vst [vmem:[#allocation95_spill] sm:$0xff] %v14612_v37  ;;  %v14618_v16 = vpop.f32.mrf.mxu1 }
 0x167   : > { %v14616_v0 = vpop.f32.mrf.mxu0  ;;  %20518 = vst [vmem:[#allocation119_spill] sm:$0xff] %v14713_v46  ;;  %v14730_v39 = vsub.f32 %v327_v41, %v14713_v46  ;;  %v324_v41 = vld [vmem:[%s19882_s4 + $0x48] sm:$0xff] }
 0x168   : > { %v14622_v40 = vpop.f32.mrf.mxu1 }
 0x169   : > { %v14620_v15 = vpop.f32.mrf.mxu0  ;;  %20497 = vst [vmem:[#allocation98_spill] sm:$0xff] %v14622_v40  ;;  %20522 = vst [vmem:[#allocation123_spill] sm:$0xff] %v14730_v39 }
 0x16a   : > { %20496 = vst [vmem:[#allocation97_spill] sm:$0xff] %v14620_v15  ;;  %v14626_v26 = vpop.f32.mrf.mxu1 }
 0x16b   : > { %v14624_v36 = vpop.f32.mrf.mxu0 }
 0x16c   : > { %v14630_v35 = vpop.f32.mrf.mxu1 }
 0x16d   : > { %v14628_v56 = vpop.f32.mrf.mxu0  ;;  %20499 = vst [vmem:[#allocation100_spill] sm:$0xff] %v14630_v35  ;;  %v328_v35 = vld [vmem:[%s19882_s4 + $0x68] sm:$0xff] }
 0x16e   : > { %20498 = vst [vmem:[#allocation99_spill] sm:$0xff] %v14628_v56  ;;  %v14634_v5 = vpop.f32.mrf.mxu1  ;;  %v326_v56 = vld [vmem:[%s19882_s4 + $0x58] sm:$0xff] }
 0x16f   : > { %v14632_v27 = vpop.f32.mrf.mxu0  ;;  %v14732_v15 = vand.u32 4294901760, %v326_v56 }
 0x170   : > { %v14638_v52 = vpop.f32.mrf.mxu1 }
 0x171   : > { %v14636_v24 = vpop.f32.mrf.mxu0  ;;  %20501 = vst [vmem:[#allocation102_spill] sm:$0xff] %v14638_v52  ;;  %20523 = vst [vmem:[#allocation124_spill] sm:$0xff] %v14732_v15 }
 0x172   : > { %20500 = vst [vmem:[#allocation101_spill] sm:$0xff] %v14636_v24  ;;  %v14642_v9 = vpop.f32.mrf.mxu1 }
 0x173   : > { %v14640_v25 = vpop.f32.mrf.mxu0 }
 0x174   : > { %v14646_v2 = vpop.f32.mrf.mxu1 }
 0x175   : > { %v14644_v32 = vpop.f32.mrf.mxu0  ;;  %20503 = vst [vmem:[#allocation104_spill] sm:$0xff] %v14646_v2 }
 0x176   : > { %20502 = vst [vmem:[#allocation103_spill] sm:$0xff] %v14644_v32  ;;  %v14650_v53 = vpop.f32.mrf.mxu1 }
 0x177   : > { %v14648_v7 = vpop.f32.mrf.mxu0 }
 0x178   : > { %v14654_v3 = vpop.f32.mrf.mxu1 }
 0x179   : > { %v14652_v29 = vpop.f32.mrf.mxu0  ;;  %20505 = vst [vmem:[#allocation106_spill] sm:$0xff] %v14654_v3 }
 0x17a   : > { %20504 = vst [vmem:[#allocation105_spill] sm:$0xff] %v14652_v29  ;;  %v14658_v18 = vpop.f32.mrf.mxu1 }
 0x17b   : > { %v14656_v17 = vpop.f32.mrf.mxu0  ;;  %20506 = vst [vmem:[#allocation107_spill] sm:$0xff] %v14658_v18 }
 0x17c   : > { %v14662_v62 = vpop.f32.mrf.mxu1 }
 0x17d   : > { %v14660_v57 = vpop.f32.mrf.mxu0  ;;  %20508 = vst [vmem:[#allocation109_spill] sm:$0xff] %v14662_v62 }
 0x17e   : > { %20507 = vst [vmem:[#allocation108_spill] sm:$0xff] %v14660_v57  ;;  %v14666_v63 = vpop.f32.mrf.mxu1  ;;  %v330_v57 = vld [vmem:[%s19882_s4 + $0x78] sm:$0xff] }
 0x17f   : > { %v14664_v60 = vpop.f32.mrf.mxu0  ;;  %v14683_v62 = vand.u32 4294901760, %v330_v57 }
 0x180   : > { %v14670_v32 = vpop.f32.mrf.mxu1 }
 0x181   : > { %v14668_v2 = vpop.f32.mrf.mxu0  ;;  %20510 = vst [vmem:[#allocation111_spill] sm:$0xff] %v14670_v32  ;;  %20513 = vst [vmem:[#allocation114_spill] sm:$0xff] %v14683_v62  ;;  %v14697_v24 = vsub.f32 %v330_v57, %v14683_v62  ;;  %11826 = vmatprep.subr.mxu0 %v14683_v62  ;;  %v14704_v32 = vand.u32 4294901760, %v328_v35  ;;  %v325_v57 = vld [vmem:[%s19882_s4 + $0x50] sm:$0xff] }
 0x182   : > { %20509 = vst [vmem:[#allocation110_spill] sm:$0xff] %v14668_v2  ;;  %v14674_v29 = vpop.f32.mrf.mxu1  ;;  %11827 = vmatpush3.msra.mxu0 %v14683_v62 }
 0x183   : > { %v14672_v52 = vpop.f32.mrf.mxu0  ;;  %20514 = vst [vmem:[#allocation115_spill] sm:$0xff] %v14697_v24  ;;  %20516 = vst [vmem:[#allocation117_spill] sm:$0xff] %v14704_v32  ;;  %v14711_v40 = vand.u32 4294901760, %v14697_v24  ;;  %v14724_v4 = vsub.f32 %v328_v35, %v14704_v32 }
 0x184   : > { %v14681_v21 = vpop.f32.mrf.mxu1 }
 0x185   : > { %v14676_v3 = vpop.f32.mrf.mxu0  ;;  %20512 = vst [vmem:[#allocation113_spill] sm:$0xff] %v14681_v21  ;;  %20517 = vst [vmem:[#allocation118_spill] sm:$0xff] %v14711_v40  ;;  %v4151_v62 = vsub.f32 %v14697_v24, %v14711_v40  ;;  %v14741_v35 = vand.u32 4294901760, %v14724_v4 }
 0x186   : > { %20511 = vst [vmem:[#allocation112_spill] sm:$0xff] %v14676_v3  ;;  %v14700_v21 = vpop.f32.mrf.mxu1  ;;  %v14702_v3 = vand.u32 4294901760, %v329_v10  ;;  %20521 = vst [vmem:[#allocation122_spill] sm:$0xff] %v14724_v4 }
 0x187   : > { %v14691_v31 = vpop.f32.mrf.mxu0  ;;  %20526 = vst [vmem:[#allocation127_spill] sm:$0xff] %v14741_v35  ;;  %v14749_v40 = vand.u32 4294901760, %v4151_v62  ;;  %v4165_v62 = vsub.f32 %v14724_v4, %v14741_v35 }
 0x188   : > { %20515 = vst [vmem:[#allocation116_spill] sm:$0xff] %v14702_v3  ;;  %v14721_v18 = vsub.f32 %v329_v10, %v14702_v3  ;;  %11828 = vmatprep.subr.mxu0 %v14702_v3  ;;  %v14735_v43 = vpop.f32.mrf.mxu1 }
 0x189   : > { %v14718_v2 = vpop.f32.mrf.mxu0  ;;  %11829 = vmatpush3.msra.mxu0 %v14702_v3  ;;  %20524 = vst [vmem:[#allocation125_spill] sm:$0xff] %v14735_v43  ;;  %20528 = vst [vmem:[#allocation129_spill] sm:$0xff] %v14749_v40  ;;  %v14752_v3 = vand.u32 4294901760, %v14730_v39  ;;  %v14755_v43 = vsub.f32 %v326_v56, %v14732_v15  ;;  %v323_v56 = vld [vmem:[%s19882_s4 + $0x40] sm:$0xff]  ;;  %11882 = vmatprep.subr.mxu1 %v14749_v40 }
 0x18a   : > { %20519 = vst [vmem:[#allocation120_spill] sm:$0xff] %v14718_v2  ;;  %20520 = vst [vmem:[#allocation121_spill] sm:$0xff] %v14721_v18  ;;  %v14738_v10 = vand.u32 4294901760, %v14721_v18  ;;  %v14743_v2 = vand.u32 4294901760, %v325_v57  ;;  %11830 = vmatprep.subr.mxu0 %v14704_v32  ;;  %v14785_v35 = vpop.f32.mrf.mxu1  ;;  %11883 = vmatpush3.msra.mxu1 %v14749_v40 }
 0x18b   : > { %20529 = vst [vmem:[#allocation130_spill] sm:$0xff] %v14752_v3  ;;  %20530 = vst [vmem:[#allocation131_spill] sm:$0xff] %v14755_v43  ;;  %11831 = vmatpush3.msra.mxu0 %v14704_v32  ;;  %v14758_v11 = vpop.f32.mrf.mxu0  ;;  %v4172_v61 = vsub.f32 %v14730_v39, %v14752_v3  ;;  %v14777_v14 = vand.u32 4294901760, %v14755_v43  ;;  %v3427_v32 = vadd.f32 %v14602_v55, %v3289_v22  ;;  %v14791_v3 = vand.u32 4294901760, %v4165_v62 }
 0x18c   : > { %20525 = vst [vmem:[#allocation126_spill] sm:$0xff] %v14738_v10  ;;  %20527 = vst [vmem:[#allocation128_spill] sm:$0xff] %v14743_v2  ;;  %v4158_v37 = vsub.f32 %v14721_v18, %v14738_v10  ;;  %v14767_v24 = vsub.f32 %v325_v57, %v14743_v2  ;;  %11832 = vmatprep.subr.mxu0 %v14713_v46  ;;  %v14779_v10 = vand.u32 4294901760, %v324_v41  ;;  %v322_v57 = vld [vmem:[%s19882_s4 + $0x38] sm:$0xff]  ;;  %v14806_v55 = vand.u32 4294901760, %v323_v56 }
 0x18d   : > { %20532 = vst [vmem:[#allocation133_spill] sm:$0xff] %v14777_v14  ;;  %11833 = vmatpush3.msra.mxu0 %v14713_v46  ;;  %20535 = vst [vmem:[#allocation136_spill] sm:$0xff] %v14791_v3  ;;  %v14799_v46 = vadd.f32 %v14523_v30, %v14525_v58  ;;  %v4179_v18 = vsub.f32 %v14755_v43, %v14777_v14  ;;  %v14812_v62 = vpop.f32.mrf.mxu0  ;;  %v3296_v58 = vadd.f32 %v14529_v33, %v14531_v6 }
 0x18e   : > { %20531 = vst [vmem:[#allocation132_spill] sm:$0xff] %v14767_v24  ;;  %20533 = vst [vmem:[#allocation134_spill] sm:$0xff] %v14779_v10  ;;  %v14789_v4 = vand.u32 4294901760, %v4158_v37  ;;  %v14794_v39 = vand.u32 4294901760, %v14767_v24  ;;  %11834 = vmatprep.subr.mxu0 %v14732_v15  ;;  %v14804_v22 = vsub.f32 %v324_v41, %v14779_v10  ;;  %v321_v37 = vld [vmem:[%s19882_s4 + $0x30] sm:$0xff]  ;;  %v14817_v30 = vand.u32 4294901760, %v4172_v61 }
 0x18f   : > { %20538 = vst [vmem:[#allocation139_spill] sm:$0xff] %v14806_v55  ;;  %11835 = vmatpush3.msra.mxu0 %v14732_v15  ;;  %v14821_v40 = vand.u32 4294901760, %v322_v57  ;;  %v14826_v14 = vadd.f32 %v14533_v42, %v14535_v59  ;;  %v3303_v43 = vadd.f32 %v14537_v23, %v14539_v8  ;;  %v14835_v33 = vsub.f32 %v323_v56, %v14806_v55  ;;  %v320_v61 = vld [vmem:[%s19882_s4 + $0x28] sm:$0xff]  ;;  %v319_v56 = vld [vmem:[%s19882_s4 + $0x20] sm:$0xff] }
 0x190   : > { %20534 = vst [vmem:[#allocation135_spill] sm:$0xff] %v14789_v4  ;;  %20536 = vst [vmem:[#allocation137_spill] sm:$0xff] %v14794_v39  ;;  %11884 = vmatprep.subr.mxu1 %v14789_v4  ;;  %v4186_v41 = vsub.f32 %v14767_v24, %v14794_v39  ;;  %11836 = vmatprep.subr.mxu0 %v14743_v2  ;;  %v14832_v6 = vand.u32 4294901760, %v14804_v22  ;;  %v14841_v39 = vpop.f32.mrf.mxu1  ;;  %v3565_v59 = vadd.f32 %v14600_v28, %v3427_v32 }
 0x191   : > { %20537 = vst [vmem:[#allocation138_spill] sm:$0xff] %v14804_v22  ;;  %20539 = vst [vmem:[#allocation140_spill] sm:$0xff] %v14817_v30  ;;  %11885 = vmatpush3.msra.mxu1 %v14789_v4  ;;  %11837 = vmatpush3.msra.mxu0 %v14743_v2  ;;  %v14845_v42 = vand.u32 4294901760, %v4179_v18  ;;  %v14848_v23 = vsub.f32 %v322_v57, %v14821_v40  ;;  %v14850_v8 = vand.u32 4294901760, %v321_v37  ;;  %v14863_v28 = vand.u32 4294901760, %v14835_v33  ;;  %v14866_v57 = vpop.f32.mrf.mxu0 }
 0x192   : > { %20540 = vst [vmem:[#allocation141_spill] sm:$0xff] %v14821_v40  ;;  %20541 = vst [vmem:[#allocation142_spill] sm:$0xff] %v14832_v6  ;;  %11886 = vmatprep.subr.mxu1 %v14791_v3  ;;  %11838 = vmatprep.subr.mxu0 %v14779_v10  ;;  %v3435_v4 = vadd.f32 %v14610_v19, %v3296_v58  ;;  %v14858_v32 = vand.u32 4294901760, %v4186_v41  ;;  %v4193_v18 = vsub.f32 %v14804_v22, %v14832_v6 }
 0x193   : > { %20542 = vst [vmem:[#allocation143_spill] sm:$0xff] %v14835_v33  ;;  %20543 = vst [vmem:[#allocation144_spill] sm:$0xff] %v14845_v42  ;;  %11887 = vmatpush3.msra.mxu1 %v14791_v3  ;;  %11839 = vmatpush3.msra.mxu0 %v14779_v10  ;;  %v14870_v24 = vand.u32 4294901760, %v14848_v23  ;;  %v14873_v19 = vsub.f32 %v321_v37, %v14850_v8  ;;  %v14875_v58 = vand.u32 4294901760, %v320_v61  ;;  %v318_v3 = vld [vmem:[%s19882_s4 + $0x18] sm:$0xff]  ;;  %v14889_v10 = vand.u32 4294901760, %v319_v56 }
 0x194   : > { %20544 = vst [vmem:[#allocation145_spill] sm:$0xff] %v14848_v23  ;;  %20545 = vst [vmem:[#allocation146_spill] sm:$0xff] %v14850_v8  ;;  %11888 = vmatprep.subr.mxu1 %v14817_v30  ;;  %v3724_v41 = vadd.f32 %v14664_v60, %v3565_v59  ;;  %11840 = vmatprep.subr.mxu0 %v14806_v55  ;;  %v3310_v6 = vadd.f32 %v14545_v51, %v14547_v50  ;;  %v14885_v22 = vand.u32 4294901760, %v4193_v18  ;;  %v14892_v60 = vpop.f32.mrf.mxu1 }
 0x195   : > { %20546 = vst [vmem:[#allocation147_spill] sm:$0xff] %v14858_v32  ;;  %20547 = vst [vmem:[#allocation148_spill] sm:$0xff] %v14863_v28  ;;  %11889 = vmatpush3.msra.mxu1 %v14817_v30  ;;  %v4200_v37 = vsub.f32 %v14835_v33, %v14863_v28  ;;  %11841 = vmatpush3.msra.mxu0 %v14806_v55  ;;  %v4207_v59 = vsub.f32 %v14848_v23, %v14870_v24  ;;  %v14898_v51 = vand.u32 4294901760, %v14873_v19 }
 0x196   : > { %20548 = vst [vmem:[#allocation149_spill] sm:$0xff] %v14870_v24  ;;  %20549 = vst [vmem:[#allocation150_spill] sm:$0xff] %v14873_v19  ;;  %11890 = vmatprep.subr.mxu1 %v14845_v42  ;;  %v14901_v50 = vsub.f32 %v320_v61, %v14875_v58  ;;  %v14904_v18 = vadd.f32 %v14666_v63, %v3724_v41  ;;  %11842 = vmatprep.subr.mxu0 %v14821_v40  ;;  %v14913_v24 = vand.u32 4294901760, %v318_v3  ;;  %v317_v63 = vld [vmem:[%s19882_s4 + $0x10] sm:$0xff]  ;;  %v14919_v61 = vpop.f32.mrf.mxu0 }
 0x197   : > { %20550 = vst [vmem:[#allocation151_spill] sm:$0xff] %v14875_v58  ;;  %20551 = vst [vmem:[#allocation152_spill] sm:$0xff] %v14885_v22  ;;  %v3574_v30 = vadd.f32 %v14608_v1, %v3435_v4  ;;  %v3443_v28 = vadd.f32 %v14616_v0, %v3303_v43  ;;  %11891 = vmatpush3.msra.mxu1 %v14845_v42  ;;  %v14911_v33 = vsub.f32 %v319_v56, %v14889_v10 }
 0x198   : > { %20552 = vst [vmem:[#allocation153_spill] sm:$0xff] %v14889_v10  ;;  %20553 = vst [vmem:[#allocation154_spill] sm:$0xff] %v14898_v51  ;;  %11843 = vmatpush3.msra.mxu0 %v14821_v40  ;;  %11892 = vmatprep.subr.mxu1 %v14858_v32  ;;  %v14922_v4 = vand.u32 4294901760, %v4200_v37  ;;  %v4214_v43 = vsub.f32 %v14873_v19, %v14898_v51  ;;  %v14927_v1 = vand.u32 4294901760, %v14901_v50  ;;  %v14930_v0 = vand.u32 4294901760, %v14904_v18  ;;  %v316_v51 = vld [vmem:[%s19882_s4 + $0x8] sm:$0xff]  ;;  %v14947_v19 = vpop.f32.mrf.mxu1 }
 0x199   : > { %20554 = vst [vmem:[#allocation155_spill] sm:$0xff] %v14901_v50  ;;  %20555 = vst [vmem:[#allocation156_spill] sm:$0xff] %v14904_v18  ;;  %11844 = vmatprep.subr.mxu0 %v14850_v8  ;;  %v3317_v56 = vadd.f32 %v14553_v12, %v14555_v34  ;;  %11893 = vmatpush3.msra.mxu1 %v14858_v32  ;;  %v14937_v41 = vand.u32 4294901760, %v14911_v33  ;;  %v14940_v37 = vsub.f32 %v318_v3, %v14913_v24 }
 0x19a   : > { %20556 = vst [vmem:[#allocation157_spill] sm:$0xff] %v14911_v33  ;;  %20557 = vst [vmem:[#allocation158_spill] sm:$0xff] %v14913_v24  ;;  %v3731_v42 = vadd.f32 %v14672_v52, %v3574_v30  ;;  %11845 = vmatpush3.msra.mxu0 %v14850_v8  ;;  %v3324_v34 = vadd.f32 %v14561_v45, %v14563_v47  ;;  %11894 = vmatprep.subr.mxu1 %v14885_v22  ;;  %v14952_v12 = vand.u32 4294901760, %v4207_v59  ;;  %v14969_v47 = vpop.f32.mrf.mxu0 }
 0x19b   : > { %20558 = vst [vmem:[#allocation159_spill] sm:$0xff] %v14922_v4  ;;  %20559 = vst [vmem:[#allocation160_spill] sm:$0xff] %v14927_v1  ;;  %v4221_v3 = vsub.f32 %v14901_v50, %v14927_v1  ;;  %v14956_v32 = vand.u32 4294901760, %v317_v63  ;;  %11846 = vmatprep.subr.mxu0 %v14875_v58  ;;  %v3583_v52 = vadd.f32 %v14618_v16, %v3443_v28  ;;  %11895 = vmatpush3.msra.mxu1 %v14885_v22  ;;  %v14995_v22 = vpop.f32.mrf.mxu1 }
 0x19c   : > { %20560 = vst [vmem:[#allocation161_spill] sm:$0xff] %v14937_v41  ;;  %20561 = vst [vmem:[#allocation162_spill] sm:$0xff] %v14940_v37  ;;  %v3451_v30 = vadd.f32 %v14624_v36, %v3310_v6  ;;  %v14963_v23 = vand.u32 4294901760, %v14940_v37  ;;  %v14966_v45 = vadd.f32 %v14674_v29, %v3731_v42  ;;  %11914 = vmatprep.mubr.f32.mxu1 %v14930_v0  ;;  %11896 = vmatprep.subr.mxu1 %v14922_v4  ;;  %v315_v29 = vld [vmem:[%s19882_s4] sm:$0xff] }
 0x19d   : > { %20562 = vst [vmem:[#allocation163_spill] sm:$0xff] %v14952_v12  ;;  %20563 = vst [vmem:[#allocation164_spill] sm:$0xff] %v14956_v32  ;;  %v14972_v59 = vand.u32 4294901760, %v4214_v43  ;;  %v4228_v16 = vsub.f32 %v14911_v33, %v14937_v41  ;;  %v14977_v36 = vsub.f32 %v317_v63, %v14956_v32  ;;  %v14979_v6 = vand.u32 4294901760, %v316_v51  ;;  %11847 = vmatpush3.msra.mxu0 %v14875_v58 }
 0x19e   : > { %20564 = vst [vmem:[#allocation165_spill] sm:$0xff] %v14963_v23  ;;  %20565 = vst [vmem:[#allocation166_spill] sm:$0xff] %v14966_v45  ;;  %v3331_v42 = vadd.f32 %v14569_v44, %v14573_v49  ;;  %v3459_v28 = vadd.f32 %v14632_v27, %v3317_v56  ;;  %11897 = vmatpush3.msra.mxu1 %v14922_v4  ;;  %v14989_v43 = vand.u32 4294901760, %v4221_v3  ;;  %v14992_v63 = vand.u32 4294901760, %v14966_v45 }
 0x19f   : > { %20566 = vst [vmem:[#allocation167_spill] sm:$0xff] %v14972_v59  ;;  %20567 = vst [vmem:[#allocation168_spill] sm:$0xff] %v14977_v36  ;;  %11848 = vmatprep.subr.mxu0 %v14889_v10  ;;  %11898 = vmatprep.subr.mxu1 %v14952_v12  ;;  %v4235_v41 = vsub.f32 %v14940_v37, %v14963_v23  ;;  %v15001_v44 = vand.u32 4294901760, %v14977_v36  ;;  %v15004_v27 = vsub.f32 %v316_v51, %v14979_v6  ;;  %v15021_v51 = vpop.f32.mrf.mxu0 }
 0x1a0   : > { %20568 = vst [vmem:[#allocation169_spill] sm:$0xff] %v14979_v6  ;;  %20569 = vst [vmem:[#allocation170_spill] sm:$0xff] %v14989_v43  ;;  %v3738_v49 = vadd.f32 %v14691_v31, %v3583_v52  ;;  %11849 = vmatpush3.msra.mxu0 %v14889_v10  ;;  %v3592_v56 = vadd.f32 %v14626_v26, %v3451_v30  ;;  %11899 = vmatpush3.msra.mxu1 %v14952_v12  ;;  %v15018_v23 = vand.u32 4294901760, %v315_v29 }
 0x1a1   : > { %20570 = vst [vmem:[#allocation171_spill] sm:$0xff] %v15001_v44  ;;  %20571 = vst [vmem:[#allocation172_spill] sm:$0xff] %v15004_v27  ;;  %v15012_v3 = vsub.f32 %v14904_v18, %v14930_v0  ;;  %v15016_v4 = vsub.f32 %v14966_v45, %v14992_v63  ;;  %11850 = vmatprep.subr.mxu0 %v14913_v24  ;;  %11900 = vmatprep.subr.mxu1 %v14972_v59  ;;  %v15024_v31 = vand.u32 4294901760, %v4228_v16 }
 0x1a2   : > { %20572 = vst [vmem:[#allocation173_spill] sm:$0xff] %v15018_v23  ;;  %v4242_v26 = vsub.f32 %v14977_v36, %v15001_v44  ;;  %v15029_v52 = vand.u32 4294901760, %v15004_v27  ;;  %v15032_v30 = vadd.f32 %v14700_v21, %v3738_v49  ;;  %11851 = vmatpush3.msra.mxu0 %v14913_v24  ;;  %v3467_v18 = vadd.f32 %v14640_v25, %v3324_v34  ;;  %v15043_v44 = vpop.f32.mrf.mxu1 }
 0x1a3   : > { %20573 = vst [vmem:[#allocation174_spill] sm:$0xff] %v15024_v31  ;;  %11901 = vmatpush3.msra.mxu1 %v14972_v59  ;;  %v19963_v45 = vand.u32 4294901760, %v15016_v4  ;;  %v15039_v16 = vsub.f32 %v315_v29, %v15018_v23  ;;  %v3745_v12 = vadd.f32 %v14758_v11, %v3592_v56  ;;  %11852 = vmatprep.subr.mxu0 %v14956_v32  ;;  %v15048_v49 = vand.u32 4294901760, %v4235_v41  ;;  %v3765_v29 = vpop.f32.mrf.mxu0 }
 0x1a4   : > { %20574 = vst [vmem:[#allocation175_spill] sm:$0xff] %v15029_v52  ;;  %20575 = vst [vmem:[#allocation176_spill] sm:$0xff] %v15032_v30  ;;  %v3305_v21 = vadd.f32 %v14541_v13, %v14543_v48  ;;  %11902 = vmatprep.subr.mxu1 %v14989_v43  ;;  %v4249_v25 = vsub.f32 %v15004_v27, %v15029_v52  ;;  %v15053_v34 = vand.u32 4294901760, %v15032_v30  ;;  %11853 = vmatpush3.msra.mxu0 %v14956_v32 }
 0x1a5   : > { %20576 = vst [vmem:[#allocation177_spill] sm:$0xff] %v15039_v16  ;;  %20577 = vst [vmem:[#allocation178_spill] sm:$0xff] %v15048_v49  ;;  %v3475_v11 = vadd.f32 %v14648_v7, %v3331_v42  ;;  %11903 = vmatpush3.msra.mxu1 %v14989_v43  ;;  %v4000_v48 = vsub.f32 %v15016_v4, %v19963_v45  ;;  %v15062_v13 = vand.u32 4294901760, %v15039_v16  ;;  %11854 = vmatprep.subr.mxu0 %v14979_v6 }
 0x1a6   : > { %20578 = vst [vmem:[#allocation179_spill] sm:$0xff] %v15053_v34  ;;  %v15065_v41 = vadd.f32 %v14785_v35, %v3745_v12  ;;  %v3338_v56 = vadd.f32 %v14582_v38, %v14587_v54  ;;  %v3601_v7 = vadd.f32 %v14634_v5, %v3459_v28  ;;  %11904 = vmatprep.subr.mxu1 %v15024_v31  ;;  %v15072_v42 = vand.u32 4294901760, %v4242_v26  ;;  %v3894_v5 = vpop.f32.mrf.mxu1 }
 0x1a7   : > { %20579 = vst [vmem:[#allocation180_spill] sm:$0xff] %v15062_v13  ;;  %v19969_v45 = vand.u32 4294901760, %v15012_v3  ;;  %11855 = vmatpush3.msra.mxu0 %v14979_v6  ;;  %v3610_v43 = vadd.f32 %v14642_v9, %v3467_v18  ;;  %11905 = vmatpush3.msra.mxu1 %v15024_v31  ;;  %v15080_v35 = vsub.f32 %v15032_v30, %v15053_v34  ;;  %v15091_v9 = vand.u32 4294901760, %v4249_v25 }
 0x1a8   : > { %20580 = vst [vmem:[#allocation181_spill] sm:$0xff] %v15065_v41  ;;  %20581 = vst [vmem:[#allocation182_spill] sm:$0xff] %v15072_v42  ;;  %v4256_v38 = vsub.f32 %v15039_v16, %v15062_v13  ;;  %v15085_v54 = vand.u32 4294901760, %v15065_v41  ;;  %11856 = vmatprep.subr.mxu0 %v15018_v23  ;;  %v3429_v12 = vadd.f32 %v14606_v20, %v14799_v46  ;;  %11906 = vmatprep.subr.mxu1 %v15048_v49  ;;  %v15102_v46 = vpop.f32.mrf.mxu0 }
 0x1a9   : > { %20583 = vst [vmem:[#allocation184_spill] sm:$0xff] %v15091_v9  ;;  %v3990_v18 = vsub.f32 %v15012_v3, %v19969_v45  ;;  %v3752_v28 = vadd.f32 %v14866_v57, %v3601_v7  ;;  %v3619_v26 = vadd.f32 %v14650_v53, %v3475_v11  ;;  %v3483_v30 = vadd.f32 %v14656_v17, %v3338_v56  ;;  %v20586_v11 = vld [vmem:[#allocation115_spill] sm:$0xff]  ;;  %v20589_v45 = vld [vmem:[#allocation82_spill] sm:$0xff] }
 0x1aa   : > { %20582 = vst [vmem:[#allocation183_spill] sm:$0xff] %v15085_v54  ;;  %11907 = vmatpush3.msra.mxu1 %v15048_v49  ;;  %v4001_v31 = vand.u32 4294901760, %v4000_v48  ;;  %11857 = vmatpush3.msra.mxu0 %v15018_v23  ;;  %v3759_v20 = vadd.f32 %v14969_v47, %v3610_v43  ;;  %v15105_v25 = vand.u32 4294901760, %v4256_v38  ;;  %v15109_v57 = vsub.f32 %v15065_v41, %v15085_v54  ;;  %v20587_v48 = vld [vmem:[#allocation95_spill] sm:$0xff]  ;;  %v15122_v38 = vpop.f32.mrf.mxu1  ;;  %v20592_v49 = vld [vmem:[#allocation97_spill] sm:$0xff] }
 0x1ab   : > { %11908 = vmatprep.subr.mxu1 %v15072_v42  ;;  %v3991_v53 = vand.u32 4294901760, %v3990_v18  ;;  %v15112_v17 = vadd.f32 %v14892_v60, %v3752_v28  ;;  %11938 = vmatprep.subr.mxu0 %v20586_v11  ;;  %v3437_v56 = vadd.f32 %v20587_v48, %v14826_v14  ;;  %v19975_v43 = vand.u32 4294901760, %v15080_v35  ;;  %v20590_v18 = vld [vmem:[#allocation81_spill] sm:$0xff]  ;;  %v20591_v60 = vld [vmem:[#allocation94_spill] sm:$0xff] }
 0x1ac   : > { %20584 = vst [vmem:[#allocation185_spill] sm:$0xff] %v15105_v25  ;;  %11909 = vmatpush3.msra.mxu1 %v15072_v42  ;;  %v15119_v47 = vadd.f32 %v14995_v22, %v3759_v20  ;;  %v3766_v7 = vadd.f32 %v3765_v29, %v3619_v26  ;;  %v3312_v41 = vadd.f32 %v20590_v18, %v20589_v45  ;;  %v20594_v22 = vld [vmem:[#allocation84_spill] sm:$0xff]  ;;  %v20595_v20 = vld [vmem:[#allocation83_spill] sm:$0xff] }
 0x1ad   : > { %20585 = vst [vmem:[#allocation186_spill] sm:$0xff] %v15112_v17  ;;  %v3567_v28 = vadd.f32 %v20591_v60, %v3429_v12  ;;  %v3445_v59 = vadd.f32 %v20592_v49, %v3305_v21  ;;  %11910 = vmatprep.subr.mxu1 %v15091_v9  ;;  %11858 = vmatprep.mubr.f32.mxu0 %v3991_v53  ;;  %v15130_v14 = vand.u32 4294901760, %v15112_v17  ;;  %v3772_v49 = vpop.f32.mrf.mxu0  ;;  %v20597_v12 = vld [vmem:[#allocation107_spill] sm:$0xff]  ;;  %v20598_v53 = vld [vmem:[#allocation110_spill] sm:$0xff]  ;;  %v20607_v42 = vld [vmem:[#allocation112_spill] sm:$0xff] }
 0x1ae   : > { %20588 = vst [vmem:[#allocation95_spill] sm:$0xff] %v15119_v47  ;;  %v3319_v48 = vadd.f32 %v20595_v20, %v20594_v22  ;;  %11911 = vmatpush3.msra.mxu1 %v15091_v9  ;;  %11859 = vmatmul.mubr.f32.vlgmr.msra.gmra.mxu0 %v4001_v31  ;;  %v15136_v29 = vand.u32 4294901760, %v15119_v47  ;;  %v4010_v45 = vsub.f32 %v15080_v35, %v19975_v43  ;;  %v20599_v22 = vld [vmem:[#allocation96_spill] sm:$0xff]  ;;  %v20602_v31 = vld [vmem:[#allocation114_spill] sm:$0xff] }
 0x1af   : > { %20593 = vst [vmem:[#allocation82_spill] sm:$0xff] %v15130_v14  ;;  %v15141_v21 = vadd.f32 %v3894_v5, %v3766_v7  ;;  %v3628_v26 = vadd.f32 %v20597_v12, %v3483_v30  ;;  %v3726_v18 = vadd.f32 %v20598_v53, %v3567_v28  ;;  %11912 = vmatprep.subr.mxu1 %v15105_v25  ;;  %v3901_v28 = vpop.f32.mrf.mxu1  ;;  %v20600_v12 = vld [vmem:[#allocation121_spill] sm:$0xff]  ;;  %v20601_v53 = vld [vmem:[#allocation98_spill] sm:$0xff] }
 0x1b0   : > { %v15148_v60 = vsub.f32 %v15112_v17, %v15130_v14  ;;  %11939 = vmatpush3.msra.mxu0 %v20586_v11  ;;  %v3576_v20 = vadd.f32 %v20599_v22, %v3437_v56  ;;  %11913 = vmatpush3.msra.mxu1 %v15105_v25  ;;  %v15156_v5 = vsub.f32 %v15119_v47, %v15136_v29  ;;  %v4011_v30 = vand.u32 4294901760, %v4010_v45  ;;  %v20604_v47 = vld [vmem:[#allocation99_spill] sm:$0xff] }
 0x1b1   : > { %20596 = vst [vmem:[#allocation81_spill] sm:$0xff] %v15141_v21  ;;  %v15159_v7 = vand.u32 4294901760, %v15141_v21  ;;  %11940 = vmatprep.subr.mxu0 %v20600_v12  ;;  %v3585_v43 = vadd.f32 %v20601_v53, %v3445_v59  ;;  %11915 = vmatmul.mubr.f32.vlgmr.msra.gmra.mxu1 %v14992_v63  ;;  %v20603_v56 = vand.u32 4294901760, %v15109_v57  ;;  %v3773_v17 = vadd.f32 %v3772_v49, %v3628_v26  ;;  %v20605_v25 = vld [vmem:[#allocation111_spill] sm:$0xff]  ;;  %v20611_v53 = vld [vmem:[#allocation122_spill] sm:$0xff] }
 0x1b2   : > { %11994 = vmatprep.subr.mxu1 %v20602_v31  ;;  %v3453_v11 = vadd.f32 %v20604_v47, %v3312_v41  ;;  %11917 = vmatprep.mubr.f32.mxu1 %v15053_v34  ;;  %v19987_v59 = vand.u32 4294901760, %v15148_v60  ;;  %v15177_v9 = vadd.f32 %v20605_v25, %v3726_v18  ;;  %v3733_v13 = vadd.f32 %v20607_v42, %v3576_v20  ;;  %v20609_v47 = vld [vmem:[#allocation101_spill] sm:$0xff]  ;;  %v20613_v18 = vld [vmem:[#allocation120_spill] sm:$0xff] }
 0x1b3   : > { %v4020_v22 = vsub.f32 %v15109_v57, %v20603_v56  ;;  %11861 = vmatprep.mubr.f32.mxu0 %v4011_v30  ;;  %v15172_v45 = vsub.f32 %v15141_v21, %v15159_v7  ;;  %11995 = vmatpush3.msra.mxu1 %v20602_v31  ;;  %v15181_v41 = vadd.f32 %v3901_v28, %v3773_v17  ;;  %v20610_v30 = vld [vmem:[#allocation116_spill] sm:$0xff]  ;;  %v20612_v25 = vand.u32 4294901760, %v15156_v5  ;;  %v20614_v28 = vld [vmem:[#allocation86_spill] sm:$0xff]  ;;  %v20619_v21 = vld [vmem:[#allocation117_spill] sm:$0xff] }
 0x1b4   : > { %20606 = vst [vmem:[#allocation94_spill] sm:$0xff] %v15177_v9  ;;  %11941 = vmatpush3.msra.mxu0 %v20600_v12  ;;  %v3461_v26 = vadd.f32 %v20609_v47, %v3319_v48  ;;  %11996 = vmatprep.subr.mxu1 %v20610_v30  ;;  %v4030_v56 = vsub.f32 %v15148_v60, %v19987_v59  ;;  %v20616_v59 = vld [vmem:[#allocation100_spill] sm:$0xff] }
 0x1b5   : > { %v4021_v49 = vand.u32 4294901760, %v4020_v22  ;;  %20608 = vst [vmem:[#allocation97_spill] sm:$0xff] %v15181_v41  ;;  %11942 = vmatprep.subr.mxu0 %v20611_v53  ;;  %v4040_v42 = vsub.f32 %v15156_v5, %v20612_v25  ;;  %v3740_v20 = vadd.f32 %v20613_v18, %v3585_v43  ;;  %11918 = vmatmul.mubr.f32.gmra.mxu1 %v15085_v54  ;;  %v15196_v17 = vand.u32 4294901760, %v15181_v41  ;;  %v20615_v22 = vld [vmem:[#allocation85_spill] sm:$0xff]  ;;  %v20623_v54 = vld [vmem:[#allocation103_spill] sm:$0xff] }
 0x1b6   : > { %v3326_v47 = vadd.f32 %v20615_v22, %v20614_v28  ;;  %v3594_v12 = vadd.f32 %v20616_v59, %v3453_v11  ;;  %11920 = vmatprep.mubr.f32.mxu1 %v15130_v14  ;;  %11997 = vmatpush3.msra.mxu1 %v20610_v30  ;;  %v4031_v25 = vand.u32 4294901760, %v4030_v56  ;;  %v15205_v43 = vand.u32 4294901760, %v15177_v9  ;;  %v20617_v18 = vld [vmem:[#allocation113_spill] sm:$0xff]  ;;  %v20620_v11 = vld [vmem:[#allocation88_spill] sm:$0xff]  ;;  %v20621_v59 = vld [vmem:[#allocation87_spill] sm:$0xff] }
 0x1b7   : > { %11862 = vmatmul.mubr.f32.gmra.mxu0 %v4021_v49  ;;  %v15208_v49 = vadd.f32 %v20617_v18, %v3733_v13  ;;  %11998 = vmatprep.subr.mxu1 %v20619_v21  ;;  %v15213_v48 = vsub.f32 %v15181_v41, %v15196_v17  ;;  %v4041_v28 = vand.u32 4294901760, %v4040_v42  ;;  %v3333_v22 = vadd.f32 %v20621_v59, %v20620_v11  ;;  %v20622_v14 = vld [vmem:[#allocation102_spill] sm:$0xff]  ;;  %v20624_v13 = vld [vmem:[#allocation125_spill] sm:$0xff]  ;;  %v20626_v42 = vld [vmem:[#allocation119_spill] sm:$0xff] }
 0x1b8   : > { %11943 = vmatpush3.msra.mxu0 %v20611_v53  ;;  %v3603_v56 = vadd.f32 %v20622_v14, %v3461_v26  ;;  %v3469_v52 = vadd.f32 %v20623_v54, %v3326_v47  ;;  %11999 = vmatpush3.msra.mxu1 %v20619_v21  ;;  %v15222_v18 = vadd.f32 %v20624_v13, %v3740_v20  ;;  %v20627_v53 = vand.u32 4294901760, %v15172_v45  ;;  %v20628_v59 = vld [vmem:[#allocation105_spill] sm:$0xff]  ;;  %v20629_v26 = vld [vmem:[#allocation92_spill] sm:$0xff]  ;;  %v20630_v20 = vld [vmem:[#allocation90_spill] sm:$0xff] }
 0x1b9   : > { %20618 = vst [vmem:[#allocation84_spill] sm:$0xff] %v15208_v49  ;;  %11864 = vmatprep.mubr.f32.mxu0 %v4031_v25  ;;  %v3747_v34 = vadd.f32 %v14812_v62, %v3594_v12  ;;  %11921 = vmatmul.mubr.f32.gmra.mxu1 %v15136_v29  ;;  %v3477_v14 = vadd.f32 %v20628_v59, %v3333_v22  ;;  %v15238_v62 = vand.u32 4294901760, %v15208_v49  ;;  %v20631_v25 = vld [vmem:[#allocation104_spill] sm:$0xff]  ;;  %v20632_v13 = vld [vmem:[#allocation123_spill] sm:$0xff] }
 0x1ba   : > { %20625 = vst [vmem:[#allocation83_spill] sm:$0xff] %v15222_v18  ;;  %12000 = vmatprep.subr.mxu1 %v20626_v42  ;;  %v4050_v11 = vsub.f32 %v15172_v45, %v20627_v53  ;;  %11923 = vmatprep.mubr.f32.mxu1 %v15159_v7  ;;  %v15235_v54 = vsub.f32 %v15177_v9, %v15205_v43  ;;  %v20000_v53 = vand.u32 4294901760, %v15213_v48  ;;  %v15249_v59 = vand.u32 4294901760, %v15222_v18 }
 0x1bb   : > { %12001 = vmatpush3.msra.mxu1 %v20626_v42  ;;  %v3754_v12 = vadd.f32 %v14919_v61, %v3603_v56  ;;  %11865 = vmatmul.mubr.f32.gmra.mxu0 %v4041_v28  ;;  %v3340_v47 = vadd.f32 %v20630_v20, %v20629_v26  ;;  %v3612_v22 = vadd.f32 %v20631_v25, %v3469_v52  ;;  %v20634_v28 = vld [vmem:[#allocation106_spill] sm:$0xff]  ;;  %v20635_v26 = vld [vmem:[#allocation108_spill] sm:$0xff] }
 0x1bc   : > { %12002 = vmatprep.subr.mxu1 %v14732_v15  ;;  %11944 = vmatprep.subr.mxu0 %v20632_v13  ;;  %v15252_v9 = vadd.f32 %v14841_v39, %v3747_v34  ;;  %v4051_v61 = vand.u32 4294901760, %v4050_v11  ;;  %v3621_v56 = vadd.f32 %v20634_v28, %v3477_v14  ;;  %v15263_v25 = vsub.f32 %v15208_v49, %v15238_v62  ;;  %v20637_v34 = vld [vmem:[#allocation134_spill] sm:$0xff]  ;;  %v20638_v14 = vld [vmem:[#allocation131_spill] sm:$0xff] }
 0x1bd   : > { %12003 = vmatpush3.msra.mxu1 %v14732_v15  ;;  %v3485_v20 = vadd.f32 %v20635_v26, %v3340_v47  ;;  %v3761_v52 = vadd.f32 %v15021_v51, %v3612_v22  ;;  %v15266_v39 = vadd.f32 %v14947_v19, %v3754_v12  ;;  %11945 = vmatpush3.msra.mxu0 %v20632_v13  ;;  %v20639_v22 = vld [vmem:[#allocation109_spill] sm:$0xff] }
 0x1be   : > { %20633 = vst [vmem:[#allocation107_spill] sm:$0xff] %v15252_v9  ;;  %12004 = vmatprep.subr.mxu1 %v14743_v2  ;;  %11924 = vmatmul.mubr.f32.gmra.mxu1 %v15196_v17  ;;  %v4060_v11 = vsub.f32 %v15213_v48, %v20000_v53  ;;  %v15278_v47 = vsub.f32 %v15222_v18, %v15249_v59  ;;  %v15281_v19 = vand.u32 4294901760, %v15252_v9  ;;  %v3774_v53 = vpop.f32.mrf.mxu0 }
 0x1bf   : > { %12005 = vmatpush3.msra.mxu1 %v14743_v2  ;;  %11926 = vmatprep.mubr.f32.mxu1 %v15205_v43  ;;  %20636 = vst [vmem:[#allocation110_spill] sm:$0xff] %v15266_v39  ;;  %v3768_v12 = vadd.f32 %v15102_v46, %v3621_v56  ;;  %v3630_v28 = vadd.f32 %v20639_v22, %v3485_v20  ;;  %v15292_v51 = vand.u32 4294901760, %v15266_v39  ;;  %v20642_v20 = vld [vmem:[#allocation132_spill] sm:$0xff] }
 0x1c0   : > { %12006 = vmatprep.subr.mxu1 %v20637_v34  ;;  %11946 = vmatprep.subr.mxu0 %v20638_v14  ;;  %v15287_v26 = vadd.f32 %v15043_v44, %v3761_v52  ;;  %v4061_v46 = vand.u32 4294901760, %v4060_v11  ;;  %v15304_v52 = vsub.f32 %v15252_v9, %v15281_v19  ;;  %v20644_v44 = vld [vmem:[#allocation138_spill] sm:$0xff] }
 0x1c1   : > { %12007 = vmatpush3.msra.mxu1 %v20637_v34  ;;  %11867 = vmatprep.mubr.f32.mxu0 %v4051_v61  ;;  %v20641_v61 = vand.u32 4294901760, %v15235_v54  ;;  %v15307_v22 = vadd.f32 %v15122_v38, %v3768_v12  ;;  %v15316_v13 = vsub.f32 %v15266_v39, %v15292_v51 }
 0x1c2   : > { %12008 = vmatprep.subr.mxu1 %v14806_v55  ;;  %20640 = vst [vmem:[#allocation96_spill] sm:$0xff] %v15287_v26  ;;  %11947 = vmatpush3.msra.mxu0 %v20638_v14  ;;  %v3775_v14 = vadd.f32 %v3774_v53, %v3630_v28  ;;  %v15319_v18 = vand.u32 4294901760, %v15287_v26  ;;  %v20645_v53 = vand.u32 4294901760, %v15263_v25 }
 0x1c3   : > { %12009 = vmatpush3.msra.mxu1 %v14806_v55  ;;  %v4070_v56 = vsub.f32 %v15235_v54, %v20641_v61  ;;  %11948 = vmatprep.subr.mxu0 %v20642_v20  ;;  %20643 = vst [vmem:[#allocation98_spill] sm:$0xff] %v15307_v22  ;;  %v3903_v61 = vpop.f32.mrf.mxu1  ;;  %v15328_v28 = vand.u32 4294901760, %v15307_v22 }
 0x1c4   : > { %11927 = vmatmul.mubr.f32.gmra.mxu1 %v15238_v62  ;;  %12010 = vmatprep.subr.mxu1 %v14821_v40  ;;  %v4080_v12 = vsub.f32 %v15263_v25, %v20645_v53  ;;  %v15330_v11 = vadd.f32 %v3903_v61, %v3775_v14  ;;  %v20648_v53 = vld [vmem:[#allocation143_spill] sm:$0xff]  ;;  %v20010_v61 = vand.u32 4294901760, %v15316_v13 }
 0x1c5   : > { %11929 = vmatprep.mubr.f32.mxu1 %v15249_v59  ;;  %12011 = vmatpush3.msra.mxu1 %v14821_v40  ;;  %v4071_v38 = vand.u32 4294901760, %v4070_v56 }
 0x1c6   : > { %11949 = vmatpush3.msra.mxu0 %v20642_v20  ;;  %12012 = vmatprep.subr.mxu1 %v14850_v8  ;;  %20646 = vst [vmem:[#allocation99_spill] sm:$0xff] %v15330_v11  ;;  %v20647_v20 = vand.u32 4294901760, %v15278_v47  ;;  %v4081_v14 = vand.u32 4294901760, %v4080_v12  ;;  %v15353_v56 = vand.u32 4294901760, %v15330_v11 }
 0x1c7   : > { %11950 = vmatprep.subr.mxu0 %v20644_v44  ;;  %12013 = vmatpush3.msra.mxu1 %v14850_v8 }
 0x1c8   : > { %11868 = vmatmul.mubr.f32.gmra.mxu0 %v4061_v46  ;;  %11930 = vmatmul.mubr.f32.gmra.mxu1 %v15281_v19  ;;  %v4090_v46 = vsub.f32 %v15278_v47, %v20647_v20  ;;  %v20649_v20 = vld [vmem:[#allocation145_spill] sm:$0xff] }
 0x1c9   : > { %11951 = vmatpush3.msra.mxu0 %v20644_v44  ;;  %12014 = vmatprep.subr.mxu1 %v14875_v58  ;;  %v15341_v44 = vsub.f32 %v15287_v26, %v15319_v18 }
 0x1ca   : > { %11870 = vmatprep.mubr.f32.mxu0 %v4071_v38  ;;  %11932 = vmatprep.mubr.f32.mxu1 %v15292_v51  ;;  %v15350_v38 = vsub.f32 %v15307_v22, %v15328_v28  ;;  %v4091_v26 = vand.u32 4294901760, %v4090_v46  ;;  %v4110_v22 = vsub.f32 %v15316_v13, %v20010_v61  ;;  %v20651_v46 = vld [vmem:[#allocation150_spill] sm:$0xff] }
 0x1cb   : > { %11952 = vmatprep.subr.mxu0 %v20648_v53  ;;  %12015 = vmatpush3.msra.mxu1 %v14875_v58  ;;  %v20014_v39 = vand.u32 4294901760, %v15341_v44 }
 0x1cc   : > { %11953 = vmatpush3.msra.mxu0 %v20648_v53  ;;  %12016 = vmatprep.subr.mxu1 %v14889_v10  ;;  %v20650_v53 = vand.u32 4294901760, %v15304_v52  ;;  %v4111_v61 = vand.u32 4294901760, %v4110_v22  ;;  %v20652_v22 = vand.u32 4294901760, %v15012_v3 }
 0x1cd   : > { %11954 = vmatprep.subr.mxu0 %v20649_v20  ;;  %12017 = vmatpush3.msra.mxu1 %v14889_v10 }
 0x1ce   : > { %11871 = vmatmul.mubr.f32.gmra.mxu0 %v4081_v14  ;;  %v4100_v12 = vsub.f32 %v15304_v52, %v20650_v53  ;;  %11933 = vmatmul.mubr.f32.gmra.mxu1 %v15319_v18  ;;  %v15370_v53 = vsub.f32 %v15330_v11, %v15353_v56 }
 0x1cf   : > { %11955 = vmatpush3.msra.mxu0 %v20649_v20  ;;  %12018 = vmatprep.subr.mxu1 %v14913_v24  ;;  %v4120_v20 = vsub.f32 %v15341_v44, %v20014_v39  ;;  %v20653_v39 = vand.u32 4294901760, %v15016_v4 }
 0x1d0   : > { %11873 = vmatprep.mubr.f32.mxu0 %v4091_v26  ;;  %11935 = vmatprep.mubr.f32.mxu1 %v15328_v28  ;;  %v4101_v14 = vand.u32 4294901760, %v4100_v12  ;;  %v20013_v26 = vand.u32 4294901760, %v15350_v38 }
 0x1d1   : > { %11956 = vmatprep.subr.mxu0 %v20651_v46  ;;  %12019 = vmatpush3.msra.mxu1 %v14913_v24 }
 0x1d2   : > { %11957 = vmatpush3.msra.mxu0 %v20651_v46  ;;  %12020 = vmatprep.subr.mxu1 %v14956_v32  ;;  %v4130_v12 = vsub.f32 %v15350_v38, %v20013_v26  ;;  %v4139_v46 = vand.u32 4294901760, %v15370_v53 }
 0x1d3   : > { %11958 = vmatprep.subr.mxu0 %v14901_v50  ;;  %12021 = vmatpush3.msra.mxu1 %v14956_v32 }
 0x1d4   : > { %11874 = vmatmul.mubr.f32.gmra.mxu0 %v4101_v14  ;;  %11936 = vmatmul.mubr.f32.gmra.mxu1 %v15353_v56  ;;  %v4121_v14 = vand.u32 4294901760, %v4120_v20  ;;  %v4140_v26 = vsub.f32 %v15370_v53, %v4139_v46  ;;  %v20654_v20 = vand.u32 4294901760, %v15080_v35 }
 0x1d5   : > { %11959 = vmatpush3.msra.mxu0 %v14901_v50  ;;  %12022 = vmatprep.subr.mxu1 %v14979_v6 }
 0x1d6   : > { %11876 = vmatprep.mubr.f32.mxu0 %v4111_v61  ;;  %11960 = vmatprep.subr.mxu0 %v14911_v33  ;;  %v4131_v61 = vand.u32 4294901760, %v4130_v12  ;;  %v4141_v12 = vand.u32 4294901760, %v4140_v26  ;;  %v20656_v26 = vand.u32 4294901760, %v15148_v60 }
 0x1d7   : > { %12023 = vmatpush3.msra.mxu1 %v14979_v6  ;;  %12026 = vmatprep.mubr.f32.mxu1 %v20652_v22  ;;  %v20657_v22 = vld [vmem:[#allocation118_spill] sm:$0xff] }
 0x1d8   : > { %11961 = vmatpush3.msra.mxu0 %v14911_v33  ;;  %12024 = vmatprep.subr.mxu1 %v15018_v23 }
 0x1d9   : > { %11962 = vmatprep.subr.mxu0 %v14940_v37  ;;  %12025 = vmatpush3.msra.mxu1 %v15018_v23 }
 0x1da   : > { %11877 = vmatmul.mubr.f32.gmra.mxu0 %v4121_v14  ;;  %12027 = vmatmul.mubr.f32.vlgmr.msra.gmra.mxu1 %v20653_v39  ;;  %v20655_v39 = vand.u32 4294901760, %v15109_v57  ;;  %v20658_v14 = vand.u32 4294901760, %v15156_v5 }
 0x1db   : > { %11963 = vmatpush3.msra.mxu0 %v14940_v37  ;;  %12106 = vmatprep.subr.mxu1 %v20602_v31 }
 0x1dc   : > { %11879 = vmatprep.mubr.f32.mxu0 %v4131_v61  ;;  %11964 = vmatprep.subr.mxu0 %v14977_v36  ;;  %v20660_v61 = vld [vmem:[#allocation126_spill] sm:$0xff] }
 0x1dd   : > { %12029 = vmatprep.mubr.f32.mxu1 %v20654_v20  ;;  %12107 = vmatpush3.msra.mxu1 %v20602_v31  ;;  %v20662_v20 = vand.u32 4294901760, %v15213_v48 }
 0x1de   : > { %11965 = vmatpush3.msra.mxu0 %v14977_v36  ;;  %12108 = vmatprep.subr.mxu1 %v20610_v30 }
 0x1df   : > { %11966 = vmatprep.subr.mxu0 %v15004_v27  ;;  %12109 = vmatpush3.msra.mxu1 %v20610_v30 }
 0x1e0   : > { %11880 = vmatmul.mubr.f32.gmra.mxu0 %v4141_v12  ;;  %12030 = vmatmul.mubr.f32.gmra.mxu1 %v20655_v39  ;;  %v20664_v12 = vld [vmem:[#allocation130_spill] sm:$0xff]  ;;  %v20666_v39 = vand.u32 4294901760, %v15263_v25 }
 0x1e1   : > { %11967 = vmatpush3.msra.mxu0 %v15004_v27  ;;  %12110 = vmatprep.subr.mxu1 %v20619_v21 }
 0x1e2   : > { %11968 = vmatprep.subr.mxu0 %v15039_v16  ;;  %11970 = vmatprep.mubr.f32.mxu0 %v15012_v3  ;;  %v20659_v3 = vand.u32 4294901760, %v15172_v45 }
 0x1e3   : > { %12032 = vmatprep.mubr.f32.mxu1 %v20656_v26  ;;  %12111 = vmatpush3.msra.mxu1 %v20619_v21  ;;  %v20668_v26 = vld [vmem:[#allocation137_spill] sm:$0xff] }
 0x1e4   : > { %11969 = vmatpush3.msra.mxu0 %v15039_v16  ;;  %12112 = vmatprep.subr.mxu1 %v20626_v42 }
 0x1e5   : > { %12050 = vmatprep.subr.mxu0 %v20657_v22  ;;  %12113 = vmatpush3.msra.mxu1 %v20626_v42 }
 0x1e6   : > { %11971 = vmatmul.mubr.f32.vlgmr.msra.gmra.mxu0 %v15016_v4  ;;  %12033 = vmatmul.mubr.f32.gmra.mxu1 %v20658_v14  ;;  %v20661_v4 = vld [vmem:[#allocation127_spill] sm:$0xff]  ;;  %v20670_v14 = vand.u32 4294901760, %v15304_v52 }
 0x1e7   : > { %12051 = vmatpush3.msra.mxu0 %v20657_v22  ;;  %12114 = vmatprep.subr.mxu1 %v14732_v15 }
 0x1e8   : > { %11973 = vmatprep.mubr.f32.mxu0 %v15080_v35  ;;  %12035 = vmatprep.mubr.f32.mxu1 %v20659_v3  ;;  %v20663_v35 = vand.u32 4294901760, %v15235_v54  ;;  %v20672_v3 = vld [vmem:[#allocation148_spill] sm:$0xff] }
 0x1e9   : > { %12052 = vmatprep.subr.mxu0 %v20660_v61  ;;  %12115 = vmatpush3.msra.mxu1 %v14732_v15 }
 0x1ea   : > { %12053 = vmatpush3.msra.mxu0 %v20660_v61  ;;  %12116 = vmatprep.subr.mxu1 %v14743_v2 }
 0x1eb   : > { %12054 = vmatprep.subr.mxu0 %v20661_v4  ;;  %12117 = vmatpush3.msra.mxu1 %v14743_v2 }
 0x1ec   : > { %11974 = vmatmul.mubr.f32.gmra.mxu0 %v15109_v57  ;;  %12036 = vmatmul.mubr.f32.gmra.mxu1 %v20662_v20  ;;  %v20665_v57 = vld [vmem:[#allocation133_spill] sm:$0xff]  ;;  %v20674_v20 = vand.u32 4294901760, %v15341_v44 }
 0x1ed   : > { %12055 = vmatpush3.msra.mxu0 %v20661_v4  ;;  %12118 = vmatprep.subr.mxu1 %v20637_v34 }
 0x1ee   : > { %11976 = vmatprep.mubr.f32.mxu0 %v15148_v60  ;;  %12038 = vmatprep.mubr.f32.mxu1 %v20663_v35  ;;  %v20667_v60 = vand.u32 4294901760, %v15278_v47  ;;  %v20676_v35 = vld [vmem:[#allocation154_spill] sm:$0xff] }
 0x1ef   : > { %12056 = vmatprep.subr.mxu0 %v20664_v12  ;;  %12119 = vmatpush3.msra.mxu1 %v20637_v34 }
 0x1f0   : > { %12057 = vmatpush3.msra.mxu0 %v20664_v12  ;;  %12120 = vmatprep.subr.mxu1 %v14806_v55 }
 0x1f1   : > { %12058 = vmatprep.subr.mxu0 %v20665_v57  ;;  %12121 = vmatpush3.msra.mxu1 %v14806_v55 }
 0x1f2   : > { %11977 = vmatmul.mubr.f32.gmra.mxu0 %v15156_v5  ;;  %12039 = vmatmul.mubr.f32.gmra.mxu1 %v20666_v39  ;;  %v20669_v5 = vld [vmem:[#allocation142_spill] sm:$0xff]  ;;  %v20682_v39 = vld [vmem:[#allocation183_spill] sm:$0xff] }
 0x1f3   : > { %12059 = vmatpush3.msra.mxu0 %v20665_v57  ;;  %12122 = vmatprep.subr.mxu1 %v14821_v40 }
 0x1f4   : > { %11979 = vmatprep.mubr.f32.mxu0 %v15172_v45  ;;  %12041 = vmatprep.mubr.f32.mxu1 %v20667_v60  ;;  %v20671_v45 = vand.u32 4294901760, %v15316_v13  ;;  %v20684_v60 = vld [vmem:[#allocation82_spill] sm:$0xff] }
 0x1f5   : > { %12060 = vmatprep.subr.mxu0 %v20668_v26  ;;  %12123 = vmatpush3.msra.mxu1 %v14821_v40 }
 0x1f6   : > { %12061 = vmatpush3.msra.mxu0 %v20668_v26  ;;  %12124 = vmatprep.subr.mxu1 %v14850_v8 }
 0x1f7   : > { %12062 = vmatprep.subr.mxu0 %v20669_v5  ;;  %12125 = vmatpush3.msra.mxu1 %v14850_v8 }
 0x1f8   : > { %11980 = vmatmul.mubr.f32.gmra.mxu0 %v15213_v48  ;;  %12042 = vmatmul.mubr.f32.gmra.mxu1 %v20670_v14  ;;  %v20673_v48 = vld [vmem:[#allocation149_spill] sm:$0xff]  ;;  %v20689_v14 = vld [vmem:[#allocation144_spill] sm:$0xff] }
 0x1f9   : > { %12063 = vmatpush3.msra.mxu0 %v20669_v5  ;;  %12126 = vmatprep.subr.mxu1 %v14875_v58 }
 0x1fa   : > { %11982 = vmatprep.mubr.f32.mxu0 %v15235_v54  ;;  %12044 = vmatprep.mubr.f32.mxu1 %v20671_v45  ;;  %v20675_v54 = vand.u32 4294901760, %v15350_v38  ;;  %v20701_v45 = vld [vmem:[#allocation115_spill] sm:$0xff] }
 0x1fb   : > { %12064 = vmatprep.subr.mxu0 %v20672_v3  ;;  %12127 = vmatpush3.msra.mxu1 %v14875_v58 }
 0x1fc   : > { %12065 = vmatpush3.msra.mxu0 %v20672_v3  ;;  %12128 = vmatprep.subr.mxu1 %v14889_v10 }
 0x1fd   : > { %12066 = vmatprep.subr.mxu0 %v20673_v48  ;;  %12129 = vmatpush3.msra.mxu1 %v14889_v10 }
 0x1fe   : > { %11983 = vmatmul.mubr.f32.gmra.mxu0 %v15263_v25  ;;  %12045 = vmatmul.mubr.f32.gmra.mxu1 %v20674_v20  ;;  %v20677_v25 = vld [vmem:[#allocation161_spill] sm:$0xff] }
 0x1ff   : > { %12067 = vmatpush3.msra.mxu0 %v20673_v48  ;;  %12130 = vmatprep.subr.mxu1 %v14913_v24 }
 0x200   : > { %11985 = vmatprep.mubr.f32.mxu0 %v15278_v47  ;;  %12047 = vmatprep.mubr.f32.mxu1 %v20675_v54  ;;  %v20678_v47 = vld [vmem:[#allocation165_spill] sm:$0xff] }
 0x201   : > { %12068 = vmatprep.subr.mxu0 %v20676_v35  ;;  %12131 = vmatpush3.msra.mxu1 %v14913_v24 }
 0x202   : > { %12069 = vmatpush3.msra.mxu0 %v20676_v35  ;;  %12132 = vmatprep.subr.mxu1 %v14956_v32 }
 0x203   : > { %12070 = vmatprep.subr.mxu0 %v14927_v1  ;;  %12133 = vmatpush3.msra.mxu1 %v14956_v32 }
 0x204   : > { %11986 = vmatmul.mubr.f32.gmra.mxu0 %v15304_v52  ;;  %12048 = vmatmul.mubr.f32.gmra.mxu1 %v4139_v46  ;;  %v20680_v52 = vld [vmem:[#allocation179_spill] sm:$0xff] }
 0x205   : > { %12071 = vmatpush3.msra.mxu0 %v14927_v1  ;;  %12134 = vmatprep.subr.mxu1 %v14979_v6  ;;  %v20681_v46 = vld [vmem:[#allocation175_spill] sm:$0xff] }
 0x206   : > { %11988 = vmatprep.mubr.f32.mxu0 %v15316_v13  ;;  %12072 = vmatprep.subr.mxu0 %v20677_v25  ;;  %v20679_v13 = vld [vmem:[#allocation171_spill] sm:$0xff] }
 0x207   : > { %12135 = vmatpush3.msra.mxu1 %v14979_v6  ;;  %12138 = vmatprep.mubr.f32.mxu1 %v14930_v0 }
 0x208   : > { %12073 = vmatpush3.msra.mxu0 %v20677_v25  ;;  %12136 = vmatprep.subr.mxu1 %v15018_v23 }
 0x209   : > { %12074 = vmatprep.subr.mxu0 %v20678_v47  ;;  %12137 = vmatpush3.msra.mxu1 %v15018_v23 }
 0x20a   : > { %11989 = vmatmul.mubr.f32.gmra.mxu0 %v15341_v44  ;;  %12139 = vmatmul.mubr.f32.vlgmr.msra.gmra.mxu1 %v14992_v63  ;;  %v20683_v44 = vld [vmem:[#allocation180_spill] sm:$0xff] }
 0x20b   : > { %12075 = vmatpush3.msra.mxu0 %v20678_v47  ;;  %11991 = vmatprep.mubr.f32.mxu0 %v15350_v38  ;;  %v20685_v38 = vld [vmem:[#allocation129_spill] sm:$0xff] }
 0x20c   : > { %12076 = vmatprep.subr.mxu0 %v20679_v13  ;;  %12141 = vmatprep.mubr.f32.mxu1 %v20680_v52 }
 0x20d   : > { %12077 = vmatpush3.msra.mxu0 %v20679_v13  ;;  %12218 = vmatprep.subr.mxu1 %v20685_v38 }
 0x20e   : > { %12078 = vmatprep.subr.mxu0 %v20681_v46  ;;  %11992 = vmatmul.mubr.f32.gmra.mxu0 %v15370_v53  ;;  %v20686_v53 = vld [vmem:[#allocation135_spill] sm:$0xff] }
 0x20f   : > { %12079 = vmatpush3.msra.mxu0 %v20681_v46  ;;  %12142 = vmatmul.mubr.f32.gmra.mxu1 %v20682_v39 }
 0x210   : > { %12080 = vmatprep.subr.mxu0 %v20683_v44  ;;  %12082 = vmatprep.mubr.f32.mxu0 %v14930_v0  ;;  %v20687_v0 = vld [vmem:[#allocation136_spill] sm:$0xff] }
 0x211   : > { %12144 = vmatprep.mubr.f32.mxu1 %v20684_v60  ;;  %12081 = vmatpush3.msra.mxu0 %v20683_v44 }
 0x212   : > { %12083 = vmatmul.mubr.f32.vlgmr.msra.gmra.mxu0 %v14992_v63  ;;  %12219 = vmatpush3.msra.mxu1 %v20685_v38  ;;  %v20688_v63 = vld [vmem:[#allocation140_spill] sm:$0xff] }
 0x213   : > { %12145 = vmatmul.mubr.f32.gmra.mxu1 %v15136_v29  ;;  %12085 = vmatprep.mubr.f32.mxu0 %v20680_v52 }
 0x214   : > { %12147 = vmatprep.mubr.f32.mxu1 %v15159_v7  ;;  %12220 = vmatprep.subr.mxu1 %v20686_v53 }
 0x215   : > { %12162 = vmatprep.subr.mxu0 %v20602_v31  ;;  %12221 = vmatpush3.msra.mxu1 %v20686_v53 }
 0x216   : > { %12086 = vmatmul.mubr.f32.gmra.mxu0 %v20682_v39  ;;  %12222 = vmatprep.subr.mxu1 %v20687_v0 }
 0x217   : > { %12148 = vmatmul.mubr.f32.gmra.mxu1 %v15196_v17  ;;  %12088 = vmatprep.mubr.f32.mxu0 %v20684_v60 }
 0x218   : > { %12150 = vmatprep.mubr.f32.mxu1 %v15205_v43  ;;  %12223 = vmatpush3.msra.mxu1 %v20687_v0 }
 0x219   : > { %12163 = vmatpush3.msra.mxu0 %v20602_v31  ;;  %12224 = vmatprep.subr.mxu1 %v20688_v63 }
 0x21a   : > { %12089 = vmatmul.mubr.f32.gmra.mxu0 %v15136_v29  ;;  %12225 = vmatpush3.msra.mxu1 %v20688_v63  ;;  %v20690_v29 = vld [vmem:[#allocation147_spill] sm:$0xff] }
 0x21b   : > { %12151 = vmatmul.mubr.f32.gmra.mxu1 %v15238_v62  ;;  %12091 = vmatprep.mubr.f32.mxu0 %v15159_v7  ;;  %v20691_v7 = vld [vmem:[#allocation152_spill] sm:$0xff] }
 0x21c   : > { %12153 = vmatprep.mubr.f32.mxu1 %v15249_v59  ;;  %12226 = vmatprep.subr.mxu1 %v20689_v14 }
 0x21d   : > { %12164 = vmatprep.subr.mxu0 %v20610_v30  ;;  %12227 = vmatpush3.msra.mxu1 %v20689_v14 }
 0x21e   : > { %12092 = vmatmul.mubr.f32.gmra.mxu0 %v15196_v17  ;;  %12228 = vmatprep.subr.mxu1 %v20690_v29  ;;  %v20692_v17 = vld [vmem:[#allocation159_spill] sm:$0xff] }
 0x21f   : > { %12154 = vmatmul.mubr.f32.gmra.mxu1 %v15281_v19  ;;  %12094 = vmatprep.mubr.f32.mxu0 %v15205_v43  ;;  %v20693_v43 = vld [vmem:[#allocation163_spill] sm:$0xff] }
 0x220   : > { %12156 = vmatprep.mubr.f32.mxu1 %v15292_v51  ;;  %12165 = vmatpush3.msra.mxu0 %v20610_v30 }
 0x221   : > { %12166 = vmatprep.subr.mxu0 %v20619_v21  ;;  %12229 = vmatpush3.msra.mxu1 %v20690_v29 }
 0x222   : > { %12095 = vmatmul.mubr.f32.gmra.mxu0 %v15238_v62  ;;  %12230 = vmatprep.subr.mxu1 %v20691_v7  ;;  %v20694_v62 = vld [vmem:[#allocation167_spill] sm:$0xff] }
 0x223   : > { %12157 = vmatmul.mubr.f32.gmra.mxu1 %v15319_v18  ;;  %12097 = vmatprep.mubr.f32.mxu0 %v15249_v59  ;;  %v20696_v59 = vld [vmem:[#allocation174_spill] sm:$0xff] }
 0x224   : > { %12159 = vmatprep.mubr.f32.mxu1 %v15328_v28  ;;  %12167 = vmatpush3.msra.mxu0 %v20619_v21 }
 0x225   : > { %12168 = vmatprep.subr.mxu0 %v20626_v42  ;;  %12231 = vmatpush3.msra.mxu1 %v20691_v7 }
 0x226   : > { %12098 = vmatmul.mubr.f32.gmra.mxu0 %v15281_v19  ;;  %12232 = vmatprep.subr.mxu1 %v20692_v17  ;;  %v20698_v19 = vld [vmem:[#allocation182_spill] sm:$0xff] }
 0x227   : > { %12160 = vmatmul.mubr.f32.gmra.mxu1 %v15353_v56  ;;  %12100 = vmatprep.mubr.f32.mxu0 %v15292_v51  ;;  %v20697_v51 = vld [vmem:[#allocation178_spill] sm:$0xff] }
 0x228   : > { %12169 = vmatpush3.msra.mxu0 %v20626_v42  ;;  %12233 = vmatpush3.msra.mxu1 %v20692_v17 }
 0x229   : > { %12170 = vmatprep.subr.mxu0 %v14732_v15  ;;  %12234 = vmatprep.subr.mxu1 %v20693_v43 }
 0x22a   : > { %12101 = vmatmul.mubr.f32.gmra.mxu0 %v15319_v18  ;;  %12235 = vmatpush3.msra.mxu1 %v20693_v43  ;;  %v20695_v18 = vld [vmem:[#allocation170_spill] sm:$0xff] }
 0x22b   : > { %12103 = vmatprep.mubr.f32.mxu0 %v15328_v28  ;;  %12171 = vmatpush3.msra.mxu0 %v14732_v15  ;;  %v20699_v28 = vld [vmem:[#allocation184_spill] sm:$0xff] }
 0x22c   : > { %12172 = vmatprep.subr.mxu0 %v14743_v2  ;;  %12236 = vmatprep.subr.mxu1 %v20694_v62 }
 0x22d   : > { %12173 = vmatpush3.msra.mxu0 %v14743_v2  ;;  %12237 = vmatpush3.msra.mxu1 %v20694_v62 }
 0x22e   : > { %12104 = vmatmul.mubr.f32.gmra.mxu0 %v15353_v56  ;;  %12174 = vmatprep.subr.mxu0 %v20637_v34  ;;  %v20700_v56 = vld [vmem:[#allocation185_spill] sm:$0xff] }
 0x22f   : > { %12175 = vmatpush3.msra.mxu0 %v20637_v34  ;;  %12238 = vmatprep.subr.mxu1 %v20695_v18 }
 0x230   : > { %12176 = vmatprep.subr.mxu0 %v14806_v55  ;;  %12239 = vmatpush3.msra.mxu1 %v20695_v18 }
 0x231   : > { %12177 = vmatpush3.msra.mxu0 %v14806_v55  ;;  %12240 = vmatprep.subr.mxu1 %v20696_v59 }
 0x232   : > { %12178 = vmatprep.subr.mxu0 %v14821_v40  ;;  %12241 = vmatpush3.msra.mxu1 %v20696_v59 }
 0x233   : > { %12179 = vmatpush3.msra.mxu0 %v14821_v40  ;;  %12242 = vmatprep.subr.mxu1 %v20697_v51 }
 0x234   : > { %12180 = vmatprep.subr.mxu0 %v14850_v8  ;;  %12243 = vmatpush3.msra.mxu1 %v20697_v51 }
 0x235   : > { %12181 = vmatpush3.msra.mxu0 %v14850_v8  ;;  %12244 = vmatprep.subr.mxu1 %v20698_v19 }
 0x236   : > { %12182 = vmatprep.subr.mxu0 %v14875_v58  ;;  %12245 = vmatpush3.msra.mxu1 %v20698_v19 }
 0x237   : > { %12183 = vmatpush3.msra.mxu0 %v14875_v58  ;;  %12246 = vmatprep.subr.mxu1 %v20699_v28 }
 0x238   : > { %12184 = vmatprep.subr.mxu0 %v14889_v10  ;;  %12247 = vmatpush3.msra.mxu1 %v20699_v28 }
 0x239   : > { %12185 = vmatpush3.msra.mxu0 %v14889_v10  ;;  %12248 = vmatprep.subr.mxu1 %v20700_v56 }
 0x23a   : > { %12186 = vmatprep.subr.mxu0 %v14913_v24  ;;  %12249 = vmatpush3.msra.mxu1 %v20700_v56 }
 0x23b   : > { %12187 = vmatpush3.msra.mxu0 %v14913_v24  ;;  %12330 = vmatprep.subr.mxu1 %v20602_v31 }
 0x23c   : > { %12188 = vmatprep.subr.mxu0 %v14956_v32 }
 0x23d   : > { %12189 = vmatpush3.msra.mxu0 %v14956_v32 }
 0x23e   : > { %12190 = vmatprep.subr.mxu0 %v14979_v6 }
 0x23f   : > { %12191 = vmatpush3.msra.mxu0 %v14979_v6 }
 0x240   : > { %12192 = vmatprep.subr.mxu0 %v15018_v23 }
 0x241   : > { %12193 = vmatpush3.msra.mxu0 %v15018_v23 }
 0x242   : > { %12274 = vmatprep.subr.mxu0 %v20701_v45 }
 0x26e   : > { %v15618_v52 = vpop.f32.mrf.mxu0 }
 0x270   : > { %v15624_v38 = vpop.f32.mrf.mxu0 }
 0x271   : > { %v15614_v20 = vpop.f32.mrf.mxu1 }
 0x272   : > { %v4301_v45 = vadd.f32 %v15614_v20, %v15618_v52 }
 0x273   : > { %v15616_v54 = vpop.f32.mrf.mxu1 }
 0x274   : > { %v4295_v21 = vadd.f32 %v15616_v54, %v15624_v38 }
 0x275   : > { %v15620_v39 = vpop.f32.mrf.mxu1 }
 0x277   : > { %v15622_v60 = vpop.f32.mrf.mxu1  ;;  %v15628_v0 = vpop.f32.mrf.mxu0 }
 0x279   : > { %v15626_v53 = vpop.f32.mrf.mxu1  ;;  %v15634_v29 = vpop.f32.mrf.mxu0 }
 0x27b   : > { %v15630_v63 = vpop.f32.mrf.mxu1  ;;  %v15638_v17 = vpop.f32.mrf.mxu0 }
 0x27c   : > { %v4325_v20 = vadd.f32 %v15626_v53, %v15638_v17 }
 0x27d   : > { %v15640_v62 = vpop.f32.mrf.mxu0 }
 0x27e   : > { %v15632_v14 = vpop.f32.mrf.mxu1 }
 0x280   : > { %v15636_v7 = vpop.f32.mrf.mxu1 }
 0x284   : > { %v11928_v43 = vpop.f32.mrf.mxu1 }
 0x286   : > { %v15642_v18 = vpop.f32.mrf.mxu1 }
 0x288   : > { %v15644_v59 = vpop.f32.mrf.mxu0  ;;  %v11931_v51 = vpop.f32.mrf.mxu1 }
 0x289   : > { %v4337_v38 = vadd.f32 %v15632_v14, %v15644_v59 }
 0x28a   : > { %v15646_v19 = vpop.f32.mrf.mxu0  ;;  %v15648_v28 = vpop.f32.mrf.mxu1 }
 0x28e   : > { %v11872_v56 = vpop.f32.mrf.mxu0  ;;  %v11934_v46 = vpop.f32.mrf.mxu1 }
 0x28f   : > { %v15650_v44 = vadd.f32 %v11928_v43, %v11872_v56 }
 0x290   : > { %v15652_v13 = vpop.f32.mrf.mxu0  ;;  %v15654_v47 = vpop.f32.mrf.mxu1 }
 0x294   : > { %v11875_v25 = vpop.f32.mrf.mxu0  ;;  %v11937_v35 = vpop.f32.mrf.mxu1 }
 0x295   : > { %v15656_v1 = vadd.f32 %v11931_v51, %v11875_v25 }
 0x296   : > { %v15658_v48 = vpop.f32.mrf.mxu0  ;;  %v15660_v3 = vpop.f32.mrf.mxu1 }
 0x29a   : > { %v11878_v5 = vpop.f32.mrf.mxu0  ;;  %v12028_v57 = vpop.f32.mrf.mxu1 }
 0x29b   : > { %v15662_v26 = vadd.f32 %v11934_v46, %v11878_v5 }
 0x29c   : > { %v4113_v12 = vpop.f32.mrf.mxu0  ;;  %v4682_v43 = vpop.f32.mrf.mxu1 }
 0x2a0   : > { %v11881_v56 = vpop.f32.mrf.mxu0  ;;  %v15666_v61 = vpop.f32.mrf.mxu1 }
 0x2a1   : > { %v15664_v4 = vadd.f32 %v11937_v35, %v11881_v56 }
 0x2a2   : > { %v4133_v22 = vpop.f32.mrf.mxu0  ;;  %v15668_v16 = vpop.f32.mrf.mxu1 }
 0x2a3   : > { %20702 = vst [vmem:[#allocation111_spill] sm:$0xff] %v15664_v4  ;;  %v15722_v17 = vadd.f32 %v15660_v3, %v4133_v22 }
 0x2a6   : > { %v11972_v25 = vpop.f32.mrf.mxu0  ;;  %v15670_v51 = vpop.f32.mrf.mxu1 }
 0x2a7   : > { %v4496_v30 = vadd.f32 %v11972_v25, %v4301_v45  ;;  %v4319_v45 = vadd.f32 %v15630_v63, %v15640_v62 }
 0x2a8   : > { %v4488_v27 = vpop.f32.mrf.mxu0  ;;  %v15672_v36 = vpop.f32.mrf.mxu1 }
 0x2a9   : > { %v4691_v54 = vadd.f32 %v12028_v57, %v4496_v30  ;;  %v4355_v30 = vadd.f32 %v15648_v28, %v15658_v48 }
 0x2ac   : > { %v11975_v37 = vpop.f32.mrf.mxu0  ;;  %v15674_v5 = vpop.f32.mrf.mxu1 }
 0x2ae   : > { %v4502_v46 = vpop.f32.mrf.mxu0  ;;  %v15676_v23 = vpop.f32.mrf.mxu1 }
 0x2b2   : > { %v11978_v33 = vpop.f32.mrf.mxu0  ;;  %v15678_v35 = vpop.f32.mrf.mxu1 }
 0x2b4   : > { %v4516_v56 = vpop.f32.mrf.mxu0  ;;  %v15680_v6 = vpop.f32.mrf.mxu1 }
 0x2b5   : > { %v4517_v57 = vadd.f32 %v4516_v56, %v4319_v45  ;;  %v20710_v56 = vld [vmem:[#allocation181_spill] sm:$0xff] }
 0x2b8   : > { %v11981_v50 = vpop.f32.mrf.mxu0  ;;  %v15682_v32 = vpop.f32.mrf.mxu1 }
 0x2b9   : > { %v4538_v63 = vadd.f32 %v11981_v50, %v4337_v38 }
 0x2ba   : > { %v4530_v24 = vpop.f32.mrf.mxu0  ;;  %v15684_v10 = vpop.f32.mrf.mxu1 }
 0x2bb   : > { %20703 = vst [vmem:[#allocation112_spill] sm:$0xff] %v15684_v10 }
 0x2be   : > { %v11984_v58 = vpop.f32.mrf.mxu0  ;;  %v15686_v8 = vpop.f32.mrf.mxu1 }
 0x2bf   : > { %20704 = vst [vmem:[#allocation101_spill] sm:$0xff] %v15686_v8 }
 0x2c0   : > { %v4544_v11 = vpop.f32.mrf.mxu0  ;;  %v15688_v40 = vpop.f32.mrf.mxu1 }
 0x2c1   : > { %20705 = vst [vmem:[#allocation120_spill] sm:$0xff] %v15688_v40  ;;  %v4489_v40 = vadd.f32 %v4488_v27, %v4295_v21  ;;  %v4331_v27 = vadd.f32 %v15636_v7, %v15646_v19  ;;  %v20708_v19 = vld [vmem:[#allocation166_spill] sm:$0xff] }
 0x2c2   : > { %v20711_v45 = vld [vmem:[#allocation112_spill] sm:$0xff] }
 0x2c4   : > { %v11987_v55 = vpop.f32.mrf.mxu0  ;;  %v15690_v34 = vpop.f32.mrf.mxu1 }
 0x2c5   : > { %20706 = vst [vmem:[#allocation86_spill] sm:$0xff] %v15690_v34  ;;  %v4313_v34 = vadd.f32 %v15620_v39, %v15628_v0  ;;  %v4524_v0 = vadd.f32 %v11978_v33, %v4325_v20  ;;  %v4531_v33 = vadd.f32 %v4530_v24, %v4331_v27  ;;  %v4715_v24 = vadd.f32 %v15672_v36, %v4517_v57  ;;  %v20712_v27 = vld [vmem:[#allocation176_spill] sm:$0xff] }
 0x2c6   : > { %v4558_v9 = vpop.f32.mrf.mxu0  ;;  %v15692_v2 = vpop.f32.mrf.mxu1 }
 0x2c7   : > { %20707 = vst [vmem:[#allocation85_spill] sm:$0xff] %v15692_v2  ;;  %v4307_v2 = vadd.f32 %v15622_v60, %v15634_v29  ;;  %v4510_v52 = vadd.f32 %v11975_v37, %v4313_v34  ;;  %v4343_v60 = vadd.f32 %v15642_v18, %v15652_v13  ;;  %v4683_v37 = vadd.f32 %v4682_v43, %v4489_v40 }
 0x2c8   : > { %v4367_v34 = vadd.f32 %v15654_v47, %v4113_v12  ;;  %v4552_v18 = vadd.f32 %v11984_v58, %v15650_v44  ;;  %v4723_v22 = vadd.f32 %v15670_v51, %v4524_v0  ;;  %v4559_v3 = vadd.f32 %v4558_v9, %v4355_v30 }
 0x2c9   : > { %v4503_v21 = vadd.f32 %v4502_v46, %v4307_v2  ;;  %v4707_v13 = vadd.f32 %v15666_v61, %v4510_v52  ;;  %v4545_v40 = vadd.f32 %v4544_v11, %v4343_v60  ;;  %v4739_v58 = vadd.f32 %v15674_v5, %v4538_v63  ;;  %v20713_v60 = vld [vmem:[#allocation111_spill] sm:$0xff] }
 0x2ca   : > { %v11990_v15 = vpop.f32.mrf.mxu0  ;;  %v12140_v49 = vpop.f32.mrf.mxu1 }
 0x2cb   : > { %v4699_v48 = vadd.f32 %v15668_v16, %v4503_v21  ;;  %v20709_v16 = vld [vmem:[#allocation156_spill] sm:$0xff]  ;;  %v4580_v46 = vadd.f32 %v11990_v15, %v15662_v26  ;;  %v4747_v36 = vadd.f32 %v15680_v6, %v4545_v40 }
 0x2cc   : > { %v15696_v42 = vpop.f32.mrf.mxu0  ;;  %v5098_v41 = vpop.f32.mrf.mxu1 }
 0x2ce   : > { %v15700_v31 = vpop.f32.mrf.mxu0 }
 0x2cf   : > { %v12143_v8 = vpop.f32.mrf.mxu1 }
 0x2d0   : > { %v15706_v4 = vpop.f32.mrf.mxu0 }
 0x2d1   : > { %v5110_v10 = vpop.f32.mrf.mxu1 }
 0x2d2   : > { %v12084_v39 = vpop.f32.mrf.mxu0 }
 0x2d3   : > { %v4928_v29 = vadd.f32 %v12084_v39, %v4691_v54  ;;  %v12146_v53 = vpop.f32.mrf.mxu1  ;;  %v4573_v54 = vadd.f32 %v15696_v42, %v4367_v34  ;;  %v15765_v42 = vadd.f32 %v15700_v31, %v20713_v60 }
 0x2d4   : > { %v4921_v14 = vpop.f32.mrf.mxu0 }
 0x2d5   : > { %v5105_v2 = vadd.f32 %v12140_v49, %v4928_v29  ;;  %v4922_v7 = vadd.f32 %v4921_v14, %v4683_v37  ;;  %v5122_v62 = vpop.f32.mrf.mxu1  ;;  %v4566_v49 = vadd.f32 %v11987_v55, %v15656_v1  ;;  %v4731_v55 = vadd.f32 %v15676_v23, %v4531_v33  ;;  %v20714_v37 = vld [vmem:[#allocation101_spill] sm:$0xff] }
 0x2d6   : > { %v12087_v59 = vpop.f32.mrf.mxu0  ;;  %v4755_v1 = vadd.f32 %v15678_v35, %v4552_v18  ;;  %v15753_v35 = vadd.f32 %v20711_v45, %v4559_v3  ;;  %v15770_v30 = vadd.f32 %v20714_v37, %v4580_v46  ;;  %v20716_v18 = vld [vmem:[#allocation120_spill] sm:$0xff]  ;;  %v20726_v37 = vld [vmem:[#allocation119_spill] sm:$0xff] }
 0x2d7   : > { %v15728_v12 = vsub.f32 %v20708_v19, %v5105_v2  ;;  %v5099_v50 = vadd.f32 %v5098_v41, %v4922_v7  ;;  %v4940_v47 = vadd.f32 %v12087_v59, %v4707_v13  ;;  %v12149_v28 = vpop.f32.mrf.mxu1  ;;  %v4771_v23 = vadd.f32 %v15682_v32, %v4566_v49  ;;  %v20715_v7 = vld [vmem:[#allocation95_spill] sm:$0xff]  ;;  %v20717_v59 = vld [vmem:[#allocation186_spill] sm:$0xff] }
 0x2d8   : > { %v4933_v43 = vpop.f32.mrf.mxu0  ;;  %v15785_v40 = vadd.f32 %v20716_v18, %v4573_v54  ;;  %v20719_v49 = vld [vmem:[#allocation114_spill] sm:$0xff]  ;;  %v20725_v54 = vld [vmem:[#allocation117_spill] sm:$0xff] }
 0x2d9   : > { %v5209_v11 = vmul.f32 %v15728_v12, %v15728_v12  ;;  %v15737_v61 = vsub.f32 %v20709_v16, %v5099_v50  ;;  %v5117_v44 = vadd.f32 %v12143_v8, %v4940_v47  ;;  %v4934_v41 = vadd.f32 %v4933_v43, %v4699_v48  ;;  %v5134_v25 = vpop.f32.mrf.mxu1  ;;  %v20720_v16 = vld [vmem:[#allocation97_spill] sm:$0xff] }
 0x2da   : > { %v12090_v51 = vpop.f32.mrf.mxu0  ;;  %v4587_v47 = vadd.f32 %v15706_v4, %v15722_v17  ;;  %v20722_v17 = vld [vmem:[#allocation116_spill] sm:$0xff] }
 0x2db   : > { %v15743_v9 = vand.u32 4294901760, %v5209_v11  ;;  %v5208_v5 = vmul.f32 %v15737_v61, %v15737_v61  ;;  %v15748_v20 = vsub.f32 %v20710_v56, %v5117_v44  ;;  %v5111_v8 = vadd.f32 %v5110_v10, %v4934_v41  ;;  %v12152_v52 = vpop.f32.mrf.mxu1 }
 0x2dc   : > { %v4952_v15 = vadd.f32 %v12090_v51, %v4723_v22  ;;  %v4945_v26 = vpop.f32.mrf.mxu0 }
 0x2dd   : > { %v15756_v6 = vsub.f32 %v5209_v11, %v15743_v9  ;;  %v5211_v38 = vmul.f32 %v15748_v20, %v15748_v20  ;;  %v15761_v21 = vsub.f32 %v20712_v27, %v5111_v8  ;;  %v4946_v10 = vadd.f32 %v4945_v26, %v4715_v24  ;;  %v5146_v39 = vpop.f32.mrf.mxu1 }
 0x2de   : > { %v5129_v0 = vadd.f32 %v12146_v53, %v4952_v15  ;;  %v12093_v32 = vpop.f32.mrf.mxu0  ;;  %v15767_v29 = vand.u32 4294901760, %v5208_v5 }
 0x2df   : > { %v20081_v34 = vand.u32 4294901760, %v15756_v6  ;;  %v5210_v57 = vmul.f32 %v15761_v21, %v15761_v21  ;;  %v5123_v63 = vadd.f32 %v5122_v62, %v4946_v10  ;;  %v4964_v14 = vadd.f32 %v12093_v32, %v4739_v58  ;;  %v12155_v2 = vpop.f32.mrf.mxu1 }
 0x2e0   : > { %v15776_v13 = vsub.f32 %v20715_v7, %v5129_v0  ;;  %12250 = vmatprep.mubr.f32.mxu1 %v15767_v29  ;;  %v4957_v31 = vpop.f32.mrf.mxu0  ;;  %v15779_v53 = vand.u32 4294901760, %v5211_v38  ;;  %v15782_v33 = vsub.f32 %v5208_v5, %v15767_v29 }
 0x2e1   : > { %v5318_v62 = vsub.f32 %v15756_v6, %v20081_v34  ;;  %v15791_v48 = vsub.f32 %v20717_v59, %v5123_v63  ;;  %v5141_v19 = vadd.f32 %v12149_v28, %v4964_v14  ;;  %v4958_v50 = vadd.f32 %v4957_v31, %v4731_v55  ;;  %12251 = vmatmul.mubr.f32.vlgmr.msra.gmra.mxu1 %v15743_v9  ;;  %v5158_v22 = vpop.f32.mrf.mxu1 }
 0x2e2   : > { %12331 = vmatpush3.msra.mxu1 %v20719_v49  ;;  %v12096_v3 = vpop.f32.mrf.mxu0  ;;  %v15797_v43 = vand.u32 4294901760, %v5210_v57  ;;  %v20082_v24 = vand.u32 4294901760, %v15782_v33  ;;  %v15801_v58 = vsub.f32 %v5211_v38, %v15779_v53  ;;  %v5213_v28 = vmul.f32 %v15776_v13, %v15776_v13 }
 0x2e3   : > { %20718 = vst [vmem:[#allocation100_spill] sm:$0xff] %v15791_v48  ;;  %v5212_v11 = vmul.f32 %v15791_v48, %v15791_v48  ;;  %v15808_v44 = vsub.f32 %v20720_v16, %v5141_v19  ;;  %v5135_v4 = vadd.f32 %v5134_v25, %v4958_v50  ;;  %12332 = vmatprep.subr.mxu1 %v20722_v17  ;;  %v5319_v41 = vand.u32 4294901760, %v5318_v62  ;;  %v20723_v25 = vld [vmem:[#allocation81_spill] sm:$0xff]  ;;  %v12158_v45 = vpop.f32.mrf.mxu1  ;;  %v20732_v16 = vld [vmem:[#allocation124_spill] sm:$0xff] }
 0x2e4   : > { %v4976_v46 = vadd.f32 %v12096_v3, %v4755_v1  ;;  %12253 = vmatprep.mubr.f32.mxu1 %v15797_v43  ;;  %12333 = vmatpush3.msra.mxu1 %v20722_v17  ;;  %v4969_v51 = vpop.f32.mrf.mxu0  ;;  %v5308_v55 = vsub.f32 %v15782_v33, %v20082_v24  ;;  %v15817_v5 = vsub.f32 %v5210_v57, %v15797_v43  ;;  %v20077_v60 = vand.u32 4294901760, %v15801_v58  ;;  %v20731_v3 = vld [vmem:[#allocation115_spill] sm:$0xff] }
 0x2e5   : > { %20721 = vst [vmem:[#allocation113_spill] sm:$0xff] %v15808_v44  ;;  %v15821_v56 = vmul.f32 %v15808_v44, %v15808_v44  ;;  %v15824_v8 = vsub.f32 %v20723_v25, %v5135_v4  ;;  %v4970_v1 = vadd.f32 %v4969_v51, %v4747_v36  ;;  %12254 = vmatmul.mubr.f32.gmra.mxu1 %v15779_v53  ;;  %v15828_v15 = vand.u32 4294901760, %v5212_v11  ;;  %v5170_v50 = vpop.f32.mrf.mxu1  ;;  %v20734_v25 = vld [vmem:[#allocation121_spill] sm:$0xff] }
 0x2e6   : > { %12334 = vmatprep.subr.mxu1 %v20725_v54  ;;  %v5153_v26 = vadd.f32 %v12152_v52, %v4976_v46  ;;  %v12099_v38 = vpop.f32.mrf.mxu0  ;;  %v5309_v27 = vand.u32 4294901760, %v5308_v55  ;;  %v20080_v10 = vand.u32 4294901760, %v15817_v5  ;;  %v15837_v57 = vand.u32 4294901760, %v5213_v28  ;;  %v20727_v52 = vld [vmem:[#allocation84_spill] sm:$0xff] }
 0x2e7   : > { %20724 = vst [vmem:[#allocation88_spill] sm:$0xff] %v15824_v8  ;;  %12335 = vmatpush3.msra.mxu1 %v20725_v54  ;;  %v5214_v0 = vmul.f32 %v15824_v8, %v15824_v8  ;;  %v5147_v36 = vadd.f32 %v5146_v39, %v4970_v1  ;;  %v4988_v32 = vadd.f32 %v12099_v38, %v4771_v23  ;;  %v20729_v39 = vld [vmem:[#allocation94_spill] sm:$0xff]  ;;  %v20735_v1 = vld [vmem:[#allocation85_spill] sm:$0xff]  ;;  %v20773_v44 = vand.u32 4294901760, %v15756_v6 }
 0x2e8   : > { %12336 = vmatprep.subr.mxu1 %v20726_v37  ;;  %12256 = vmatprep.mubr.f32.mxu1 %v15828_v15  ;;  %v15840_v63 = vsub.f32 %v20727_v52, %v5153_v26  ;;  %v4981_v14 = vpop.f32.mrf.mxu0  ;;  %v5328_v7 = vsub.f32 %v15817_v5, %v20080_v10  ;;  %v5338_v23 = vsub.f32 %v15801_v58, %v20077_v60  ;;  %v20749_v60 = vld [vmem:[#allocation131_spill] sm:$0xff]  ;;  %v20772_v8 = vld [vmem:[#allocation162_spill] sm:$0xff] }
 0x2e9   : > { %12194 = vmatprep.mubr.f32.mxu0 %v5309_v27  ;;  %12337 = vmatpush3.msra.mxu1 %v20726_v37  ;;  %v15850_v31 = vsub.f32 %v20729_v39, %v5147_v36  ;;  %v5165_v18 = vadd.f32 %v12155_v2, %v4988_v32  ;;  %v4982_v62 = vadd.f32 %v4981_v14, %v15753_v35  ;;  %v15854_v59 = vand.u32 4294901760, %v5214_v0  ;;  %v20733_v2 = vld [vmem:[#allocation86_spill] sm:$0xff]  ;;  %v20736_v27 = vld [vmem:[#allocation128_spill] sm:$0xff]  ;;  %v20737_v32 = vld [vmem:[#allocation107_spill] sm:$0xff]  ;;  %v12161_v39 = vpop.f32.mrf.mxu1 }
 0x2ea   : > { %20728 = vst [vmem:[#allocation87_spill] sm:$0xff] %v15840_v63  ;;  %12195 = vmatmul.mubr.f32.vlgmr.msra.gmra.mxu0 %v5319_v41  ;;  %12257 = vmatmul.mubr.f32.gmra.mxu1 %v15837_v57  ;;  %v15858_v19 = vmul.f32 %v15840_v63, %v15840_v63  ;;  %v12102_v4 = vpop.f32.mrf.mxu0  ;;  %v5329_v46 = vand.u32 4294901760, %v5328_v7  ;;  %v4803_v51 = vadd.f32 %v20733_v2, %v15765_v42  ;;  %v20739_v14 = vld [vmem:[#allocation83_spill] sm:$0xff]  ;;  %v5339_v7 = vand.u32 4294901760, %v5338_v23 }
 0x2eb   : > { %20730 = vst [vmem:[#allocation102_spill] sm:$0xff] %v15850_v31  ;;  %12275 = vmatpush3.msra.mxu0 %v20731_v3  ;;  %12338 = vmatprep.subr.mxu1 %v20732_v16  ;;  %v15865_v35 = vsub.f32 %v5212_v11, %v15828_v15  ;;  %v5216_v41 = vmul.f32 %v15850_v31, %v15850_v31  ;;  %v15876_v11 = vand.u32 4294901760, %v15821_v56 }
 0x2ec   : > { %v5159_v55 = vadd.f32 %v5158_v22, %v4982_v62  ;;  %12276 = vmatprep.subr.mxu0 %v20734_v25  ;;  %12339 = vmatpush3.msra.mxu1 %v20732_v16  ;;  %v4795_v26 = vadd.f32 %v20735_v1, %v4587_v47  ;;  %v5000_v38 = vadd.f32 %v12102_v4, %v15770_v30  ;;  %v4993_v42 = vpop.f32.mrf.mxu0  ;;  %v20741_v62 = vld [vmem:[#allocation122_spill] sm:$0xff]  ;;  %v15897_v4 = vand.u32 4294901760, %v15858_v19 }
 0x2ed   : > { %12277 = vmatpush3.msra.mxu0 %v20734_v25  ;;  %12340 = vmatprep.subr.mxu1 %v20736_v27  ;;  %v20076_v36 = vand.u32 4294901760, %v15865_v35  ;;  %v15880_v22 = vsub.f32 %v5213_v28, %v15837_v57  ;;  %v15883_v52 = vsub.f32 %v20737_v32, %v5165_v18  ;;  %v4994_v30 = vadd.f32 %v4993_v42, %v15785_v40  ;;  %v20742_v25 = vld [vmem:[#allocation134_spill] sm:$0xff] }
 0x2ee   : > { %v15886_v47 = vsub.f32 %v20739_v14, %v5159_v55  ;;  %12197 = vmatprep.mubr.f32.mxu0 %v5329_v46  ;;  %12259 = vmatprep.mubr.f32.mxu1 %v15854_v59  ;;  %v12105_v3 = vpop.f32.mrf.mxu0  ;;  %v15900_v46 = vsub.f32 %v5214_v0, %v15854_v59  ;;  %v5177_v23 = vadd.f32 %v12158_v45, %v5000_v38  ;;  %v15905_v55 = vand.u32 4294901760, %v5216_v41 }
 0x2ef   : > { %20738 = vst [vmem:[#allocation103_spill] sm:$0xff] %v15883_v52  ;;  %12278 = vmatprep.subr.mxu0 %v20741_v62  ;;  %12341 = vmatpush3.msra.mxu1 %v20736_v27  ;;  %v5348_v28 = vsub.f32 %v15865_v35, %v20076_v36  ;;  %v20075_v18 = vand.u32 4294901760, %v15880_v22  ;;  %v5171_v2 = vadd.f32 %v5170_v50, %v4994_v30  ;;  %v20743_v50 = vld [vmem:[#allocation110_spill] sm:$0xff]  ;;  %v20745_v30 = vld [vmem:[#allocation123_spill] sm:$0xff] }
 0x2f0   : > { %20740 = vst [vmem:[#allocation125_spill] sm:$0xff] %v15886_v47  ;;  %v5218_v40 = vmul.f32 %v15886_v47, %v15886_v47  ;;  %12198 = vmatmul.mubr.f32.gmra.mxu0 %v5339_v7  ;;  %12260 = vmatmul.mubr.f32.gmra.mxu1 %v15876_v11  ;;  %v5012_v1 = vadd.f32 %v12105_v3, %v4803_v51  ;;  %v5005_v32 = vpop.f32.mrf.mxu0  ;;  %v20078_v14 = vand.u32 4294901760, %v15900_v46  ;;  %v5182_v51 = vpop.f32.mrf.mxu1  ;;  %v20764_v47 = vld [vmem:[#allocation150_spill] sm:$0xff] }
 0x2f1   : > { %12279 = vmatpush3.msra.mxu0 %v20741_v62  ;;  %12342 = vmatprep.subr.mxu1 %v20742_v25  ;;  %v5349_v42 = vand.u32 4294901760, %v5348_v28  ;;  %v5358_v0 = vsub.f32 %v15880_v22, %v20075_v18  ;;  %v5219_v45 = vmul.f32 %v15883_v52, %v15883_v52  ;;  %v15916_v38 = vsub.f32 %v20743_v50, %v5171_v2  ;;  %v20746_v62 = vld [vmem:[#allocation139_spill] sm:$0xff]  ;;  %v20747_v50 = vld [vmem:[#allocation96_spill] sm:$0xff] }
 0x2f2   : > { %12280 = vmatprep.subr.mxu0 %v20745_v30  ;;  %12343 = vmatpush3.msra.mxu1 %v20742_v25  ;;  %v5006_v7 = vadd.f32 %v5005_v32, %v4795_v26  ;;  %v5368_v3 = vsub.f32 %v15900_v46, %v20078_v14  ;;  %v15925_v28 = vand.u32 4294901760, %v5218_v40  ;;  %v15929_v2 = vsub.f32 %v15821_v56, %v15876_v11 }
 0x2f3   : > { %20744 = vst [vmem:[#allocation105_spill] sm:$0xff] %v15916_v38  ;;  %12281 = vmatpush3.msra.mxu0 %v20745_v30  ;;  %12344 = vmatprep.subr.mxu1 %v20746_v62  ;;  %v15932_v18 = vsub.f32 %v20747_v50, %v5177_v23  ;;  %v5220_v26 = vmul.f32 %v15916_v38, %v15916_v38  ;;  %v5359_v30 = vand.u32 4294901760, %v5358_v0  ;;  %v20750_v50 = vld [vmem:[#allocation98_spill] sm:$0xff]  ;;  %v20752_v0 = vld [vmem:[#allocation141_spill] sm:$0xff] }
 0x2f4   : > { %12200 = vmatprep.mubr.f32.mxu0 %v5349_v42  ;;  %12262 = vmatprep.mubr.f32.mxu1 %v15905_v55  ;;  %v5183_v32 = vadd.f32 %v5182_v51, %v5006_v7  ;;  %v5189_v36 = vadd.f32 %v12161_v39, %v5012_v1  ;;  %v20079_v14 = vand.u32 4294901760, %v15929_v2  ;;  %v15941_v56 = vsub.f32 %v5216_v41, %v15905_v55  ;;  %v20762_v38 = vld [vmem:[#allocation145_spill] sm:$0xff] }
 0x2f5   : > { %20748 = vst [vmem:[#allocation92_spill] sm:$0xff] %v15932_v18  ;;  %12282 = vmatprep.subr.mxu0 %v20749_v60  ;;  %12345 = vmatpush3.msra.mxu1 %v20746_v62  ;;  %v15945_v23 = vsub.f32 %v15858_v19, %v15897_v4  ;;  %v5369_v39 = vand.u32 4294901760, %v5368_v3  ;;  %v15951_v1 = vand.u32 4294901760, %v5219_v45  ;;  %v15960_v7 = vsub.f32 %v5218_v40, %v15925_v28 }
 0x2f6   : > { %v15948_v42 = vsub.f32 %v20750_v50, %v5183_v32  ;;  %12201 = vmatmul.mubr.f32.gmra.mxu0 %v5359_v30  ;;  %12263 = vmatmul.mubr.f32.gmra.mxu1 %v15897_v4  ;;  %v5378_v41 = vsub.f32 %v15929_v2, %v20079_v14  ;;  %v20083_v19 = vand.u32 4294901760, %v15941_v56  ;;  %v5221_v51 = vmul.f32 %v15932_v18, %v15932_v18  ;;  %v20753_v32 = vld [vmem:[#allocation132_spill] sm:$0xff]  ;;  %v20754_v30 = vld [vmem:[#allocation99_spill] sm:$0xff]  ;;  %v20756_v14 = vld [vmem:[#allocation146_spill] sm:$0xff] }
 0x2f7   : > { %12283 = vmatpush3.msra.mxu0 %v20749_v60  ;;  %12346 = vmatprep.subr.mxu1 %v20752_v0  ;;  %v15966_v3 = vand.u32 4294901760, %v5220_v26  ;;  %v20084_v60 = vand.u32 4294901760, %v15945_v23  ;;  %v15970_v50 = vsub.f32 %v20754_v30, %v5189_v36  ;;  %v15982_v36 = vsub.f32 %v5219_v45, %v15951_v1  ;;  %v20757_v30 = vld [vmem:[#allocation138_spill] sm:$0xff]  ;;  %v20758_v45 = vld [vmem:[#allocation151_spill] sm:$0xff] }
 0x2f8   : > { %20751 = vst [vmem:[#allocation90_spill] sm:$0xff] %v15948_v42  ;;  %12284 = vmatprep.subr.mxu0 %v20753_v32  ;;  %12347 = vmatpush3.msra.mxu1 %v20752_v0  ;;  %v5388_v40 = vsub.f32 %v15941_v56, %v20083_v19  ;;  %v5222_v10 = vmul.f32 %v15948_v42, %v15948_v42  ;;  %v5379_v34 = vand.u32 4294901760, %v5378_v41  ;;  %v15990_v19 = vand.u32 4294901760, %v5221_v51 }
 0x2f9   : > { %20755 = vst [vmem:[#allocation104_spill] sm:$0xff] %v15970_v50  ;;  %12285 = vmatpush3.msra.mxu0 %v20753_v32  ;;  %12348 = vmatprep.subr.mxu1 %v20756_v14  ;;  %v15993_v41 = vsub.f32 %v5220_v26, %v15966_v3  ;;  %v5223_v24 = vmul.f32 %v15970_v50, %v15970_v50  ;;  %v20091_v26 = vand.u32 4294901760, %v15982_v36  ;;  %v20767_v50 = vld [vmem:[#allocation155_spill] sm:$0xff] }
 0x2fa   : > { %12203 = vmatprep.mubr.f32.mxu0 %v5369_v39  ;;  %12265 = vmatprep.mubr.f32.mxu1 %v15925_v28  ;;  %v5389_v32 = vand.u32 4294901760, %v5388_v40  ;;  %v5398_v39 = vsub.f32 %v15945_v23, %v20084_v60  ;;  %v20760_v40 = vand.u32 4294901760, %v15960_v7  ;;  %v16004_v31 = vand.u32 4294901760, %v5222_v10 }
 0x2fb   : > { %12286 = vmatprep.subr.mxu0 %v20757_v30  ;;  %12349 = vmatpush3.msra.mxu1 %v20756_v14  ;;  %v16012_v52 = vsub.f32 %v5221_v51, %v15990_v19  ;;  %v20763_v51 = vld [vmem:[#allocation158_spill] sm:$0xff] }
 0x2fc   : > { %12204 = vmatmul.mubr.f32.gmra.mxu0 %v5379_v34  ;;  %12266 = vmatmul.mubr.f32.gmra.mxu1 %v15951_v1  ;;  %v20759_v34 = vld [vmem:[#allocation143_spill] sm:$0xff]  ;;  %v5408_v60 = vsub.f32 %v15960_v7, %v20760_v40  ;;  %v5399_v63 = vand.u32 4294901760, %v5398_v39  ;;  %v16023_v39 = vsub.f32 %v5222_v10, %v16004_v31 }
 0x2fd   : > { %12287 = vmatpush3.msra.mxu0 %v20757_v30  ;;  %12350 = vmatprep.subr.mxu1 %v20758_v45  ;;  %v20761_v30 = vld [vmem:[#allocation153_spill] sm:$0xff]  ;;  %v20094_v18 = vand.u32 4294901760, %v16012_v52 }
 0x2fe   : > { %12288 = vmatprep.subr.mxu0 %v20759_v34  ;;  %12351 = vmatpush3.msra.mxu1 %v20758_v45  ;;  %v5409_v40 = vand.u32 4294901760, %v5408_v60 }
 0x2ff   : > { %12289 = vmatpush3.msra.mxu0 %v20759_v34  ;;  %12352 = vmatprep.subr.mxu1 %v20761_v30  ;;  %v16020_v34 = vand.u32 4294901760, %v5223_v24 }
 0x300   : > { %12206 = vmatprep.mubr.f32.mxu0 %v5389_v32  ;;  %12268 = vmatprep.mubr.f32.mxu1 %v15966_v3  ;;  %v5418_v32 = vsub.f32 %v15982_v36, %v20091_v26  ;;  %v20766_v26 = vld [vmem:[#allocation164_spill] sm:$0xff] }
 0x301   : > { %12290 = vmatprep.subr.mxu0 %v20762_v38  ;;  %12353 = vmatpush3.msra.mxu1 %v20761_v30  ;;  %v16038_v42 = vsub.f32 %v5223_v24, %v16020_v34 }
 0x302   : > { %12207 = vmatmul.mubr.f32.gmra.mxu0 %v5399_v63  ;;  %12269 = vmatmul.mubr.f32.gmra.mxu1 %v15990_v19  ;;  %v20765_v63 = vand.u32 4294901760, %v15993_v41  ;;  %v5419_v10 = vand.u32 4294901760, %v5418_v32  ;;  %v20769_v32 = vld [vmem:[#allocation157_spill] sm:$0xff] }
 0x303   : > { %12291 = vmatpush3.msra.mxu0 %v20762_v38  ;;  %12354 = vmatprep.subr.mxu1 %v20763_v51  ;;  %v20097_v38 = vand.u32 4294901760, %v16023_v39 }
 0x304   : > { %12292 = vmatprep.subr.mxu0 %v20764_v47  ;;  %12355 = vmatpush3.msra.mxu1 %v20763_v51  ;;  %v5428_v60 = vsub.f32 %v15993_v41, %v20765_v63 }
 0x305   : > { %12293 = vmatpush3.msra.mxu0 %v20764_v47  ;;  %12356 = vmatprep.subr.mxu1 %v20766_v26  ;;  %v5438_v47 = vsub.f32 %v16012_v52, %v20094_v18  ;;  %v5448_v24 = vsub.f32 %v16023_v39, %v20097_v38  ;;  %v20771_v18 = vld [vmem:[#allocation173_spill] sm:$0xff] }
 0x306   : > { %12209 = vmatprep.mubr.f32.mxu0 %v5409_v40  ;;  %12271 = vmatprep.mubr.f32.mxu1 %v16004_v31  ;;  %v5429_v63 = vand.u32 4294901760, %v5428_v60  ;;  %v20768_v40 = vld [vmem:[#allocation169_spill] sm:$0xff]  ;;  %v20770_v60 = vand.u32 4294901760, %v15782_v33 }
 0x307   : > { %12294 = vmatprep.subr.mxu0 %v20767_v50  ;;  %12357 = vmatpush3.msra.mxu1 %v20766_v26  ;;  %v5449_v38 = vand.u32 4294901760, %v5448_v24  ;;  %v20778_v24 = vld [vmem:[#allocation177_spill] sm:$0xff] }
 0x308   : > { %12210 = vmatmul.mubr.f32.gmra.mxu0 %v5419_v10  ;;  %12272 = vmatmul.mubr.f32.gmra.mxu1 %v16020_v34  ;;  %v5457_v10 = vand.u32 4294901760, %v16038_v42 }
 0x309   : > { %12295 = vmatpush3.msra.mxu0 %v20767_v50  ;;  %12358 = vmatprep.subr.mxu1 %v20768_v40  ;;  %v5439_v50 = vand.u32 4294901760, %v5438_v47  ;;  %v20776_v47 = vld [vmem:[#allocation172_spill] sm:$0xff] }
 0x30a   : > { %12296 = vmatprep.subr.mxu0 %v20769_v32  ;;  %12359 = vmatpush3.msra.mxu1 %v20768_v40  ;;  %v5458_v48 = vsub.f32 %v16038_v42, %v5457_v10 }
 0x30b   : > { %12362 = vmatprep.mubr.f32.mxu1 %v20770_v60  ;;  %12297 = vmatpush3.msra.mxu0 %v20769_v32  ;;  %v20774_v32 = vld [vmem:[#allocation168_spill] sm:$0xff] }
 0x30c   : > { %12360 = vmatprep.subr.mxu1 %v20771_v18  ;;  %12212 = vmatprep.mubr.f32.mxu0 %v5429_v63  ;;  %v20775_v63 = vand.u32 4294901760, %v15817_v5 }
 0x30d   : > { %12298 = vmatprep.subr.mxu0 %v20772_v8  ;;  %12361 = vmatpush3.msra.mxu1 %v20771_v18 }
 0x30e   : > { %12213 = vmatmul.mubr.f32.gmra.mxu0 %v5439_v50  ;;  %12363 = vmatmul.mubr.f32.vlgmr.msra.gmra.mxu1 %v20773_v44  ;;  %v5459_v44 = vand.u32 4294901760, %v5458_v48  ;;  %v20780_v48 = vld [vmem:[#allocation118_spill] sm:$0xff] }
 0x30f   : > { %12299 = vmatpush3.msra.mxu0 %v20772_v8  ;;  %12442 = vmatprep.subr.mxu1 %v20719_v49  ;;  %v20777_v8 = vand.u32 4294901760, %v15801_v58 }
 0x310   : > { %12300 = vmatprep.subr.mxu0 %v20774_v32  ;;  %12365 = vmatprep.mubr.f32.mxu1 %v20775_v63 }
 0x311   : > { %12443 = vmatpush3.msra.mxu1 %v20719_v49  ;;  %12301 = vmatpush3.msra.mxu0 %v20774_v32  ;;  %v20779_v49 = vand.u32 4294901760, %v15865_v35  ;;  %v356_v32 = vld [vmem:[%s19884_s6 + $0x48] sm:$0xff] }
 0x312   : > { %12444 = vmatprep.subr.mxu1 %v20722_v17  ;;  %12215 = vmatprep.mubr.f32.mxu0 %v5449_v38 }
 0x313   : > { %12302 = vmatprep.subr.mxu0 %v20776_v47  ;;  %12445 = vmatpush3.msra.mxu1 %v20722_v17  ;;  %v20781_v17 = vand.u32 4294901760, %v15880_v22 }
 0x314   : > { %12216 = vmatmul.mubr.f32.gmra.mxu0 %v5459_v44  ;;  %12366 = vmatmul.mubr.f32.gmra.mxu1 %v20777_v8  ;;  %v16292_v8 = vand.u32 4294901760, %v356_v32 }
 0x315   : > { %12303 = vmatpush3.msra.mxu0 %v20776_v47  ;;  %12446 = vmatprep.subr.mxu1 %v20725_v54 }
 0x316   : > { %12304 = vmatprep.subr.mxu0 %v20778_v24  ;;  %12306 = vmatprep.mubr.f32.mxu0 %v15782_v33  ;;  %v20782_v33 = vand.u32 4294901760, %v15900_v46  ;;  %20815 = vst [vmem:[#allocation140_spill] sm:$0xff] %v16292_v8 }
 0x317   : > { %12368 = vmatprep.mubr.f32.mxu1 %v20779_v49  ;;  %12447 = vmatpush3.msra.mxu1 %v20725_v54  ;;  %v20783_v54 = vld [vmem:[#allocation126_spill] sm:$0xff] }
 0x318   : > { %12305 = vmatpush3.msra.mxu0 %v20778_v24  ;;  %12448 = vmatprep.subr.mxu1 %v20726_v37  ;;  %v355_v49 = vld [vmem:[%s19884_s6 + $0x40] sm:$0xff] }
 0x319   : > { %12386 = vmatprep.subr.mxu0 %v20780_v48  ;;  %12449 = vmatpush3.msra.mxu1 %v20726_v37  ;;  %v20785_v37 = vand.u32 4294901760, %v15929_v2 }
 0x31a   : > { %12307 = vmatmul.mubr.f32.vlgmr.msra.gmra.mxu0 %v15756_v6  ;;  %12369 = vmatmul.mubr.f32.gmra.mxu1 %v20781_v17  ;;  %v20784_v6 = vld [vmem:[#allocation127_spill] sm:$0xff] }
 0x31b   : > { %12387 = vmatpush3.msra.mxu0 %v20780_v48  ;;  %12450 = vmatprep.subr.mxu1 %v20732_v16 }
 0x31c   : > { %12309 = vmatprep.mubr.f32.mxu0 %v15817_v5  ;;  %12371 = vmatprep.mubr.f32.mxu1 %v20782_v33  ;;  %v20786_v5 = vand.u32 4294901760, %v15941_v56  ;;  %v16306_v33 = vsub.f32 %v356_v32, %v16292_v8 }
 0x31d   : > { %12388 = vmatprep.subr.mxu0 %v20783_v54  ;;  %12451 = vmatpush3.msra.mxu1 %v20732_v16  ;;  %v20787_v16 = vld [vmem:[#allocation130_spill] sm:$0xff] }
 0x31e   : > { %12389 = vmatpush3.msra.mxu0 %v20783_v54  ;;  %12452 = vmatprep.subr.mxu1 %v20736_v27  ;;  %20818 = vst [vmem:[#allocation152_spill] sm:$0xff] %v16306_v33  ;;  %v16308_v54 = vand.u32 4294901760, %v355_v49 }
 0x31f   : > { %12390 = vmatprep.subr.mxu0 %v20784_v6  ;;  %12453 = vmatpush3.msra.mxu1 %v20736_v27  ;;  %v20789_v27 = vand.u32 4294901760, %v15945_v23 }
 0x320   : > { %12310 = vmatmul.mubr.f32.gmra.mxu0 %v15801_v58  ;;  %12372 = vmatmul.mubr.f32.gmra.mxu1 %v20785_v37  ;;  %v20788_v58 = vld [vmem:[#allocation133_spill] sm:$0xff]  ;;  %20819 = vst [vmem:[#allocation159_spill] sm:$0xff] %v16308_v54 }
 0x321   : > { %12391 = vmatpush3.msra.mxu0 %v20784_v6  ;;  %12454 = vmatprep.subr.mxu1 %v20742_v25  ;;  %v354_v37 = vld [vmem:[%s19884_s6 + $0x38] sm:$0xff] }
 0x322   : > { %12312 = vmatprep.mubr.f32.mxu0 %v15865_v35  ;;  %12374 = vmatprep.mubr.f32.mxu1 %v20786_v5  ;;  %v20790_v35 = vand.u32 4294901760, %v15960_v7 }
 0x323   : > { %12392 = vmatprep.subr.mxu0 %v20787_v16  ;;  %12455 = vmatpush3.msra.mxu1 %v20742_v25  ;;  %v20791_v25 = vld [vmem:[#allocation137_spill] sm:$0xff] }
 0x324   : > { %12393 = vmatpush3.msra.mxu0 %v20787_v16  ;;  %12456 = vmatprep.subr.mxu1 %v20746_v62  ;;  %v16320_v16 = vand.u32 4294901760, %v16306_v33 }
 0x325   : > { %12394 = vmatprep.subr.mxu0 %v20788_v58  ;;  %12457 = vmatpush3.msra.mxu1 %v20746_v62  ;;  %v20793_v62 = vand.u32 4294901760, %v15982_v36 }
 0x326   : > { %12313 = vmatmul.mubr.f32.gmra.mxu0 %v15880_v22  ;;  %12375 = vmatmul.mubr.f32.gmra.mxu1 %v20789_v27  ;;  %v20792_v22 = vld [vmem:[#allocation142_spill] sm:$0xff]  ;;  %20820 = vst [vmem:[#allocation163_spill] sm:$0xff] %v16320_v16  ;;  %v16325_v27 = vand.u32 4294901760, %v354_v37 }
 0x327   : > { %12395 = vmatpush3.msra.mxu0 %v20788_v58  ;;  %12458 = vmatprep.subr.mxu1 %v20752_v0  ;;  %v16323_v58 = vsub.f32 %v355_v49, %v16308_v54 }
 0x328   : > { %12315 = vmatprep.mubr.f32.mxu0 %v15900_v46  ;;  %12377 = vmatprep.mubr.f32.mxu1 %v20790_v35  ;;  %v20794_v46 = vand.u32 4294901760, %v15993_v41  ;;  %20822 = vst [vmem:[#allocation170_spill] sm:$0xff] %v16325_v27 }
 0x329   : > { %12396 = vmatprep.subr.mxu0 %v20791_v25  ;;  %12459 = vmatpush3.msra.mxu1 %v20752_v0  ;;  %v20795_v0 = vld [vmem:[#allocation148_spill] sm:$0xff]  ;;  %20821 = vst [vmem:[#allocation167_spill] sm:$0xff] %v16323_v58 }
 0x32a   : > { %12397 = vmatpush3.msra.mxu0 %v20791_v25  ;;  %12460 = vmatprep.subr.mxu1 %v20756_v14  ;;  %v353_v25 = vld [vmem:[%s19884_s6 + $0x30] sm:$0xff] }
 0x32b   : > { %12398 = vmatprep.subr.mxu0 %v20792_v22  ;;  %12461 = vmatpush3.msra.mxu1 %v20756_v14  ;;  %v20796_v14 = vld [vmem:[#allocation149_spill] sm:$0xff] }
 0x32c   : > { %12316 = vmatmul.mubr.f32.gmra.mxu0 %v15929_v2  ;;  %12378 = vmatmul.mubr.f32.gmra.mxu1 %v20793_v62  ;;  %v20797_v2 = vand.u32 4294901760, %v16012_v52  ;;  %v6781_v62 = vsub.f32 %v16306_v33, %v16320_v16 }
 0x32d   : > { %12399 = vmatpush3.msra.mxu0 %v20792_v22  ;;  %12462 = vmatprep.subr.mxu1 %v20758_v45 }
 0x32e   : > { %12318 = vmatprep.mubr.f32.mxu0 %v15941_v56  ;;  %12380 = vmatprep.mubr.f32.mxu1 %v20794_v46  ;;  %v20798_v56 = vand.u32 4294901760, %v16023_v39  ;;  %v16335_v46 = vand.u32 4294901760, %v16323_v58 }
 0x32f   : > { %12400 = vmatprep.subr.mxu0 %v20795_v0  ;;  %12463 = vmatpush3.msra.mxu1 %v20758_v45  ;;  %v20799_v45 = vld [vmem:[#allocation154_spill] sm:$0xff] }
 0x330   : > { %12401 = vmatpush3.msra.mxu0 %v20795_v0  ;;  %12464 = vmatprep.subr.mxu1 %v20761_v30  ;;  %20823 = vst [vmem:[#allocation174_spill] sm:$0xff] %v16335_v46  ;;  %v16338_v0 = vsub.f32 %v354_v37, %v16325_v27 }
 0x331   : > { %12402 = vmatprep.subr.mxu0 %v20796_v14  ;;  %12465 = vmatpush3.msra.mxu1 %v20761_v30 }
 0x332   : > { %12319 = vmatmul.mubr.f32.gmra.mxu0 %v15945_v23  ;;  %12381 = vmatmul.mubr.f32.gmra.mxu1 %v20797_v2  ;;  %v20800_v23 = vld [vmem:[#allocation160_spill] sm:$0xff]  ;;  %20824 = vst [vmem:[#allocation178_spill] sm:$0xff] %v16338_v0  ;;  %v352_v2 = vld [vmem:[%s19884_s6 + $0x28] sm:$0xff] }
 0x333   : > { %12403 = vmatpush3.msra.mxu0 %v20796_v14  ;;  %12466 = vmatprep.subr.mxu1 %v20763_v51  ;;  %v16341_v14 = vand.u32 4294901760, %v353_v25 }
 0x334   : > { %12321 = vmatprep.mubr.f32.mxu0 %v15960_v7  ;;  %12383 = vmatprep.mubr.f32.mxu1 %v20798_v56  ;;  %v20801_v7 = vld [vmem:[#allocation161_spill] sm:$0xff]  ;;  %v6782_v56 = vand.u32 4294901760, %v6781_v62 }
 0x335   : > { %12404 = vmatprep.subr.mxu0 %v20799_v45  ;;  %12467 = vmatpush3.msra.mxu1 %v20763_v51  ;;  %v357_v51 = vld [vmem:[%s19884_s6 + $0x50] sm:$0xff]  ;;  %20825 = vst [vmem:[#allocation182_spill] sm:$0xff] %v16341_v14 }
 0x336   : > { %12405 = vmatpush3.msra.mxu0 %v20799_v45  ;;  %12468 = vmatprep.subr.mxu1 %v20766_v26  ;;  %v16278_v60 = vand.u32 4294901760, %v357_v51  ;;  %v6788_v45 = vsub.f32 %v16323_v58, %v16335_v46 }
 0x337   : > { %12406 = vmatprep.subr.mxu0 %v20800_v23  ;;  %12469 = vmatpush3.msra.mxu1 %v20766_v26  ;;  %v20804_v26 = vld [vmem:[#allocation175_spill] sm:$0xff] }
 0x338   : > { %12322 = vmatmul.mubr.f32.gmra.mxu0 %v15982_v36  ;;  %12384 = vmatmul.mubr.f32.gmra.mxu1 %v5457_v10  ;;  %v20802_v36 = vld [vmem:[#allocation165_spill] sm:$0xff]  ;;  %20812 = vst [vmem:[#allocation129_spill] sm:$0xff] %v16278_v60  ;;  %v16290_v47 = vsub.f32 %v357_v51, %v16278_v60 }
 0x339   : > { %12407 = vmatpush3.msra.mxu0 %v20800_v23  ;;  %12470 = vmatprep.subr.mxu1 %v20768_v40  ;;  %v16350_v23 = vand.u32 4294901760, %v16338_v0 }
 0x33a   : > { %12324 = vmatprep.mubr.f32.mxu0 %v15993_v41  ;;  %12408 = vmatprep.subr.mxu0 %v20801_v7  ;;  %v20803_v41 = vld [vmem:[#allocation171_spill] sm:$0xff]  ;;  %20814 = vst [vmem:[#allocation136_spill] sm:$0xff] %v16290_v47  ;;  %v16303_v17 = vand.u32 4294901760, %v16290_v47 }
 0x33b   : > { %12471 = vmatpush3.msra.mxu1 %v20768_v40  ;;  %12474 = vmatprep.mubr.f32.mxu1 %v15767_v29  ;;  %20826 = vst [vmem:[#allocation184_spill] sm:$0xff] %v16350_v23 }
 0x33c   : > { %12409 = vmatpush3.msra.mxu0 %v20801_v7  ;;  %12472 = vmatprep.subr.mxu1 %v20771_v18  ;;  %20817 = vst [vmem:[#allocation147_spill] sm:$0xff] %v16303_v17  ;;  %v6774_v5 = vsub.f32 %v16290_v47, %v16303_v17  ;;  %v16352_v7 = vand.u32 4294901760, %v352_v2 }
 0x33d   : > { %12410 = vmatprep.subr.mxu0 %v20802_v36  ;;  %12473 = vmatpush3.msra.mxu1 %v20771_v18  ;;  %v359_v18 = vld [vmem:[%s19884_s6 + $0x60] sm:$0xff] }
 0x33e   : > { %12325 = vmatmul.mubr.f32.gmra.mxu0 %v16012_v52  ;;  %12475 = vmatmul.mubr.f32.vlgmr.msra.gmra.mxu1 %v15743_v9  ;;  %v20805_v52 = vld [vmem:[#allocation180_spill] sm:$0xff]  ;;  %v6775_v22 = vand.u32 4294901760, %v6774_v5  ;;  %20827 = vst [vmem:[#allocation185_spill] sm:$0xff] %v16352_v7 }
 0x33f   : > { %12411 = vmatpush3.msra.mxu0 %v20802_v36  ;;  %12327 = vmatprep.mubr.f32.mxu0 %v16023_v39  ;;  %v16356_v36 = vsub.f32 %v353_v25, %v16341_v14 }
 0x340   : > { %12412 = vmatprep.subr.mxu0 %v20803_v41  ;;  %12477 = vmatprep.mubr.f32.mxu1 %v15797_v43 }
 0x341   : > { %12413 = vmatpush3.msra.mxu0 %v20803_v41  ;;  %20828 = vst [vmem:[#allocation166_spill] sm:$0xff] %v16356_v36  ;;  %v351_v41 = vld [vmem:[%s19884_s6 + $0x20] sm:$0xff] }
 0x342   : > { %12414 = vmatprep.subr.mxu0 %v20804_v26  ;;  %12328 = vmatmul.mubr.f32.gmra.mxu0 %v16038_v42  ;;  %v16251_v42 = vand.u32 4294901760, %v359_v18 }
 0x343   : > { %12415 = vmatpush3.msra.mxu0 %v20804_v26  ;;  %12478 = vmatmul.mubr.f32.gmra.mxu1 %v15779_v53  ;;  %v6789_v26 = vand.u32 4294901760, %v6788_v45 }
 0x344   : > { %12416 = vmatprep.subr.mxu0 %v20805_v52  ;;  %12418 = vmatprep.mubr.f32.mxu0 %v15767_v29 }
 0x345   : > { %12480 = vmatprep.mubr.f32.mxu1 %v15828_v15  ;;  %12417 = vmatpush3.msra.mxu0 %v20805_v52  ;;  %v6795_v52 = vsub.f32 %v16338_v0, %v16350_v23 }
 0x346   : > { %12419 = vmatmul.mubr.f32.vlgmr.msra.gmra.mxu0 %v15743_v9  ;;  %v362_v9 = vld [vmem:[%s19884_s6 + $0x78] sm:$0xff] }
 0x347   : > { %12481 = vmatmul.mubr.f32.gmra.mxu1 %v15837_v57  ;;  %12421 = vmatprep.mubr.f32.mxu0 %v15797_v43  ;;  %v16215_v29 = vand.u32 4294901760, %v362_v9 }
 0x348   : > { %12483 = vmatprep.mubr.f32.mxu1 %v15854_v59 }
 0x349   : > { %v16221_v43 = vsub.f32 %v362_v9, %v16215_v29  ;;  %12498 = vmatprep.subr.mxu0 %v16215_v29  ;;  %v16365_v9 = vsub.f32 %v352_v2, %v16352_v7 }
 0x34a   : > { %12422 = vmatmul.mubr.f32.gmra.mxu0 %v15779_v53  ;;  %v361_v53 = vld [vmem:[%s19884_s6 + $0x70] sm:$0xff] }
 0x34b   : > { %12484 = vmatmul.mubr.f32.gmra.mxu1 %v15876_v11  ;;  %12424 = vmatprep.mubr.f32.mxu0 %v15828_v15  ;;  %v16223_v15 = vand.u32 4294901760, %v361_v53  ;;  %20829 = vst [vmem:[#allocation156_spill] sm:$0xff] %v16365_v9 }
 0x34c   : > { %12486 = vmatprep.mubr.f32.mxu1 %v15905_v55  ;;  %12499 = vmatpush3.msra.mxu0 %v16215_v29 }
 0x34d   : > { %12500 = vmatprep.subr.mxu0 %v16223_v15 }
 0x34e   : > { %12425 = vmatmul.mubr.f32.gmra.mxu0 %v15837_v57  ;;  %v360_v57 = vld [vmem:[%s19884_s6 + $0x68] sm:$0xff] }
 0x34f   : > { %12487 = vmatmul.mubr.f32.gmra.mxu1 %v15897_v4  ;;  %12427 = vmatprep.mubr.f32.mxu0 %v15854_v59  ;;  %v16234_v59 = vsub.f32 %v361_v53, %v16223_v15  ;;  %v16367_v53 = vand.u32 4294901760, %v351_v41 }
 0x350   : > { %12489 = vmatprep.mubr.f32.mxu1 %v15925_v28  ;;  %12501 = vmatpush3.msra.mxu0 %v16223_v15 }
 0x351   : > { %20830 = vst [vmem:[#allocation181_spill] sm:$0xff] %v16367_v53 }
 0x352   : > { %12428 = vmatmul.mubr.f32.gmra.mxu0 %v15876_v11  ;;  %v16236_v11 = vand.u32 4294901760, %v360_v57 }
 0x353   : > { %12490 = vmatmul.mubr.f32.gmra.mxu1 %v15951_v1  ;;  %12430 = vmatprep.mubr.f32.mxu0 %v15905_v55  ;;  %v16246_v55 = vand.u32 4294901760, %v16234_v59 }
 0x354   : > { %12492 = vmatprep.mubr.f32.mxu1 %v15966_v3  ;;  %12502 = vmatprep.subr.mxu0 %v16236_v11 }
 0x355   : > { %20807 = vst [vmem:[#allocation108_spill] sm:$0xff] %v16246_v55  ;;  %12503 = vmatpush3.msra.mxu0 %v16236_v11 }
 0x356   : > { %12431 = vmatmul.mubr.f32.gmra.mxu0 %v15897_v4  ;;  %12504 = vmatprep.subr.mxu0 %v16251_v42 }
 0x357   : > { %12493 = vmatmul.mubr.f32.gmra.mxu1 %v15990_v19  ;;  %12433 = vmatprep.mubr.f32.mxu0 %v15925_v28  ;;  %v16249_v28 = vsub.f32 %v360_v57, %v16236_v11  ;;  %v16371_v57 = vand.u32 4294901760, %v16356_v36 }
 0x358   : > { %12495 = vmatprep.mubr.f32.mxu1 %v16004_v31  ;;  %12505 = vmatpush3.msra.mxu0 %v16251_v42 }
 0x359   : > { %20808 = vst [vmem:[#allocation109_spill] sm:$0xff] %v16249_v28  ;;  %v16261_v30 = vand.u32 4294901760, %v16249_v28  ;;  %20831 = vst [vmem:[#allocation112_spill] sm:$0xff] %v16371_v57  ;;  %v6802_v51 = vsub.f32 %v16356_v36, %v16371_v57 }
 0x35a   : > { %12434 = vmatmul.mubr.f32.gmra.mxu0 %v15951_v1  ;;  %v358_v1 = vld [vmem:[%s19884_s6 + $0x58] sm:$0xff] }
 0x35b   : > { %12496 = vmatmul.mubr.f32.gmra.mxu1 %v16020_v34  ;;  %12436 = vmatprep.mubr.f32.mxu0 %v15966_v3  ;;  %v6746_v3 = vsub.f32 %v16234_v59, %v16246_v55  ;;  %20809 = vst [vmem:[#allocation179_spill] sm:$0xff] %v16261_v30  ;;  %v16267_v39 = vand.u32 4294901760, %v358_v1  ;;  %v6753_v40 = vsub.f32 %v16249_v28, %v16261_v30  ;;  %v6803_v49 = vand.u32 4294901760, %v6802_v51 }
 0x35d   : > { %v6747_v38 = vand.u32 4294901760, %v6746_v3  ;;  %v16281_v50 = vsub.f32 %v358_v1, %v16267_v39  ;;  %12506 = vmatprep.subr.mxu0 %v16267_v39  ;;  %v6754_v63 = vand.u32 4294901760, %v6753_v40  ;;  %v16378_v1 = vand.u32 4294901760, %v16365_v9 }
 0x35e   : > { %12437 = vmatmul.mubr.f32.gmra.mxu0 %v15990_v19 }
 0x35f   : > { %12439 = vmatprep.mubr.f32.mxu0 %v16004_v31  ;;  %v16231_v31 = vand.u32 4294901760, %v16221_v43  ;;  %20813 = vst [vmem:[#allocation135_spill] sm:$0xff] %v16281_v50  ;;  %12507 = vmatpush3.msra.mxu0 %v16267_v39  ;;  %v16296_v24 = vand.u32 4294901760, %v16281_v50  ;;  %20832 = vst [vmem:[#allocation176_spill] sm:$0xff] %v16378_v1  ;;  %v6809_v40 = vsub.f32 %v16365_v9, %v16378_v1 }
 0x360   : > { %12508 = vmatprep.subr.mxu0 %v16278_v60 }
 0x361   : > { %20806 = vst [vmem:[#allocation106_spill] sm:$0xff] %v16231_v31  ;;  %v6739_v4 = vsub.f32 %v16221_v43, %v16231_v31  ;;  %20816 = vst [vmem:[#allocation144_spill] sm:$0xff] %v16296_v24  ;;  %12509 = vmatpush3.msra.mxu0 %v16278_v60  ;;  %v6767_v6 = vsub.f32 %v16281_v50, %v16296_v24 }
 0x362   : > { %12440 = vmatmul.mubr.f32.gmra.mxu0 %v16020_v34  ;;  %v16264_v34 = vsub.f32 %v359_v18, %v16251_v42  ;;  %12510 = vmatprep.subr.mxu0 %v16292_v8  ;;  %v350_v18 = vld [vmem:[%s19884_s6 + $0x18] sm:$0xff] }
 0x363   : > { %v6740_v19 = vand.u32 4294901760, %v6739_v4  ;;  %12511 = vmatpush3.msra.mxu0 %v16292_v8  ;;  %v6768_v35 = vand.u32 4294901760, %v6767_v6  ;;  %v6796_v4 = vand.u32 4294901760, %v6795_v52  ;;  %v16383_v3 = vand.u32 4294901760, %v350_v18 }
 0x364   : > { %20810 = vst [vmem:[#allocation183_spill] sm:$0xff] %v16264_v34  ;;  %v16276_v10 = vand.u32 4294901760, %v16264_v34  ;;  %12512 = vmatprep.subr.mxu0 %v16308_v54  ;;  %v6810_v6 = vand.u32 4294901760, %v6809_v40 }
 0x365   : > { %12542 = vmatprep.subr.mxu1 %v6740_v19  ;;  %12513 = vmatpush3.msra.mxu0 %v16308_v54  ;;  %20834 = vst [vmem:[#allocation101_spill] sm:$0xff] %v16383_v3 }
 0x366   : > { %20811 = vst [vmem:[#allocation82_spill] sm:$0xff] %v16276_v10  ;;  %12543 = vmatpush3.msra.mxu1 %v6740_v19  ;;  %v6760_v44 = vsub.f32 %v16264_v34, %v16276_v10  ;;  %12514 = vmatprep.subr.mxu0 %v16325_v27  ;;  %v16381_v19 = vsub.f32 %v351_v41, %v16367_v53 }
 0x367   : > { %12544 = vmatprep.subr.mxu1 %v6747_v38  ;;  %12515 = vmatpush3.msra.mxu0 %v16325_v27 }
 0x368   : > { %12545 = vmatpush3.msra.mxu1 %v6747_v38  ;;  %v6761_v48 = vand.u32 4294901760, %v6760_v44  ;;  %12516 = vmatprep.subr.mxu0 %v16341_v14  ;;  %20833 = vst [vmem:[#allocation111_spill] sm:$0xff] %v16381_v19  ;;  %v349_v38 = vld [vmem:[%s19884_s6 + $0x10] sm:$0xff]  ;;  %v16395_v32 = vand.u32 4294901760, %v16381_v19 }
 0x369   : > { %12546 = vmatprep.subr.mxu1 %v6754_v63  ;;  %12517 = vmatpush3.msra.mxu0 %v16341_v14  ;;  %v16400_v44 = vand.u32 4294901760, %v349_v38 }
 0x36a   : > { %12547 = vmatpush3.msra.mxu1 %v6754_v63  ;;  %12518 = vmatprep.subr.mxu0 %v16352_v7  ;;  %20835 = vst [vmem:[#allocation95_spill] sm:$0xff] %v16395_v32  ;;  %v16398_v63 = vsub.f32 %v350_v18, %v16383_v3  ;;  %v6816_v37 = vsub.f32 %v16381_v19, %v16395_v32 }
 0x36b   : > { %12548 = vmatprep.subr.mxu1 %v6761_v48  ;;  %12519 = vmatpush3.msra.mxu0 %v16352_v7  ;;  %20837 = vst [vmem:[#allocation186_spill] sm:$0xff] %v16400_v44 }
 0x36c   : > { %12549 = vmatpush3.msra.mxu1 %v6761_v48  ;;  %12520 = vmatprep.subr.mxu0 %v16367_v53  ;;  %20836 = vst [vmem:[#allocation120_spill] sm:$0xff] %v16398_v63  ;;  %v348_v48 = vld [vmem:[%s19884_s6 + $0x8] sm:$0xff]  ;;  %v16410_v5 = vand.u32 4294901760, %v16398_v63  ;;  %v6817_v62 = vand.u32 4294901760, %v6816_v37 }
 0x36d   : > { %12550 = vmatprep.subr.mxu1 %v6768_v35  ;;  %12521 = vmatpush3.msra.mxu0 %v16367_v53  ;;  %v16416_v25 = vand.u32 4294901760, %v348_v48 }
 0x36e   : > { %12551 = vmatpush3.msra.mxu1 %v6768_v35  ;;  %12522 = vmatprep.subr.mxu0 %v16383_v3  ;;  %20838 = vst [vmem:[#allocation114_spill] sm:$0xff] %v16410_v5  ;;  %v16413_v35 = vsub.f32 %v349_v38, %v16400_v44  ;;  %v6823_v2 = vsub.f32 %v16398_v63, %v16410_v5 }
 0x36f   : > { %12552 = vmatprep.subr.mxu1 %v6775_v22  ;;  %12523 = vmatpush3.msra.mxu0 %v16383_v3  ;;  %20840 = vst [vmem:[#allocation116_spill] sm:$0xff] %v16416_v25  ;;  %v16431_v41 = vsub.f32 %v348_v48, %v16416_v25 }
 0x370   : > { %12553 = vmatpush3.msra.mxu1 %v6775_v22  ;;  %20839 = vst [vmem:[#allocation97_spill] sm:$0xff] %v16413_v35  ;;  %v347_v22 = vld [vmem:[%s19884_s6] sm:$0xff]  ;;  %12524 = vmatprep.subr.mxu0 %v16400_v44 }
 0x371   : > { %12554 = vmatprep.subr.mxu1 %v6782_v56  ;;  %v16427_v45 = vand.u32 4294901760, %v347_v22  ;;  %12525 = vmatpush3.msra.mxu0 %v16400_v44  ;;  %20843 = vst [vmem:[#allocation119_spill] sm:$0xff] %v16431_v41 }
 0x372   : > { %12555 = vmatpush3.msra.mxu1 %v6782_v56  ;;  %v16425_v56 = vand.u32 4294901760, %v16413_v35  ;;  %12526 = vmatprep.subr.mxu0 %v16416_v25 }
 0x373   : > { %12556 = vmatprep.subr.mxu1 %v6789_v26  ;;  %20842 = vst [vmem:[#allocation117_spill] sm:$0xff] %v16427_v45  ;;  %v16437_v18 = vsub.f32 %v347_v22, %v16427_v45  ;;  %12527 = vmatpush3.msra.mxu0 %v16416_v25 }
 0x374   : > { %12557 = vmatpush3.msra.mxu1 %v6789_v26  ;;  %20841 = vst [vmem:[#allocation81_spill] sm:$0xff] %v16425_v56  ;;  %v6824_v26 = vand.u32 4294901760, %v6823_v2  ;;  %v6830_v52 = vsub.f32 %v16413_v35, %v16425_v56  ;;  %12528 = vmatprep.subr.mxu0 %v16427_v45 }
 0x375   : > { %12558 = vmatprep.subr.mxu1 %v6796_v4  ;;  %20844 = vst [vmem:[#allocation84_spill] sm:$0xff] %v16437_v18  ;;  %v16445_v38 = vand.u32 4294901760, %v16437_v18  ;;  %12529 = vmatpush3.msra.mxu0 %v16427_v45 }
 0x376   : > { %12559 = vmatpush3.msra.mxu1 %v6796_v4  ;;  %v16441_v4 = vand.u32 4294901760, %v16431_v41  ;;  %v6831_v51 = vand.u32 4294901760, %v6830_v52  ;;  %12586 = vmatprep.subr.mxu0 %v16221_v43 }
 0x377   : > { %12560 = vmatprep.subr.mxu1 %v6803_v49  ;;  %20846 = vst [vmem:[#allocation115_spill] sm:$0xff] %v16445_v38 }
 0x378   : > { %12561 = vmatpush3.msra.mxu1 %v6803_v49  ;;  %20845 = vst [vmem:[#allocation94_spill] sm:$0xff] %v16441_v4  ;;  %v6837_v40 = vsub.f32 %v16431_v41, %v16441_v4  ;;  %v6844_v49 = vsub.f32 %v16437_v18, %v16445_v38 }
 0x379   : > { %12562 = vmatprep.subr.mxu1 %v6810_v6 }
 0x37a   : > { %12563 = vmatpush3.msra.mxu1 %v6810_v6  ;;  %v6838_v48 = vand.u32 4294901760, %v6837_v40  ;;  %v6845_v6 = vand.u32 4294901760, %v6844_v49 }
 0x37b   : > { %12564 = vmatprep.subr.mxu1 %v6817_v62 }
 0x37c   : > { %12565 = vmatpush3.msra.mxu1 %v6817_v62 }
 0x37d   : > { %12566 = vmatprep.subr.mxu1 %v6824_v26 }
 0x37e   : > { %12567 = vmatpush3.msra.mxu1 %v6824_v26 }
 0x37f   : > { %12568 = vmatprep.subr.mxu1 %v6831_v51 }
 0x380   : > { %12569 = vmatpush3.msra.mxu1 %v6831_v51 }
 0x381   : > { %12570 = vmatprep.subr.mxu1 %v6838_v48 }
 0x382   : > { %12571 = vmatpush3.msra.mxu1 %v6838_v48 }
 0x383   : > { %12572 = vmatprep.subr.mxu1 %v6845_v6 }
 0x384   : > { %12573 = vmatpush3.msra.mxu1 %v6845_v6 }
 0x385   : > { %12630 = vmatprep.subr.mxu1 %v16215_v29 }
 0x3a1   : > { %v16453_v37 = vpop.f32.mrf.mxu1 }
 0x3a3   : > { %v16456_v22 = vpop.f32.mrf.mxu1 }
 0x3a5   : > { %v16458_v62 = vpop.f32.mrf.mxu1 }
 0x3a7   : > { %v16460_v2 = vpop.f32.mrf.mxu1 }
 0x3aa   : > { %v16462_v26 = vpop.f32.mrf.mxu0  ;;  %v16464_v52 = vpop.f32.mrf.mxu1 }
 0x3ab   : > { %v5322_v28 = vadd.f32 1e-05, %v16462_v26 }
 0x3ac   : > { %v16466_v51 = vpop.f32.mrf.mxu0  ;;  %v16468_v40 = vpop.f32.mrf.mxu1 }
 0x3b0   : > { %v16470_v49 = vpop.f32.mrf.mxu0  ;;  %v16472_v48 = vpop.f32.mrf.mxu1 }
 0x3b2   : > { %v16474_v6 = vpop.f32.mrf.mxu0  ;;  %v16476_v38 = vpop.f32.mrf.mxu1 }
 0x3b6   : > { %v16478_v4 = vpop.f32.mrf.mxu0  ;;  %v12264_v56 = vpop.f32.mrf.mxu1 }
 0x3b8   : > { %v16480_v5 = vpop.f32.mrf.mxu0  ;;  %v16482_v32 = vpop.f32.mrf.mxu1 }
 0x3b9   : > { %20847 = vst [vmem:[#allocation124_spill] sm:$0xff] %v16482_v32 }
 0x3bc   : > { %v16484_v1 = vpop.f32.mrf.mxu0  ;;  %v12267_v57 = vpop.f32.mrf.mxu1 }
 0x3be   : > { %v16486_v23 = vpop.f32.mrf.mxu0  ;;  %v16488_v46 = vpop.f32.mrf.mxu1 }
 0x3bf   : > { %20848 = vst [vmem:[#allocation86_spill] sm:$0xff] %v16488_v46 }
 0x3c2   : > { %v12208_v16 = vpop.f32.mrf.mxu0  ;;  %v12270_v17 = vpop.f32.mrf.mxu1 }
 0x3c3   : > { %v5402_v24 = vadd.f32 1e-05, %v12208_v16 }
 0x3c4   : > { %v16490_v10 = vpop.f32.mrf.mxu0  ;;  %v16492_v30 = vpop.f32.mrf.mxu1 }
 0x3c5   : > { %20849 = vst [vmem:[#allocation121_spill] sm:$0xff] %v16490_v10  ;;  %20850 = vst [vmem:[#allocation85_spill] sm:$0xff] %v16492_v30  ;;  %v5667_v55 = vadd.f32 %v12264_v56, %v5402_v24 }
 0x3c8   : > { %v12211_v31 = vpop.f32.mrf.mxu0  ;;  %v12273_v18 = vpop.f32.mrf.mxu1 }
 0x3c9   : > { %v5422_v41 = vadd.f32 1e-05, %v12211_v31 }
 0x3ca   : > { %v16494_v35 = vpop.f32.mrf.mxu0  ;;  %v16496_v32 = vpop.f32.mrf.mxu1 }
 0x3cb   : > { %20851 = vst [vmem:[#allocation128_spill] sm:$0xff] %v16494_v35  ;;  %20852 = vst [vmem:[#allocation107_spill] sm:$0xff] %v16496_v32  ;;  %v5679_v63 = vadd.f32 %v12267_v57, %v5422_v41 }
 0x3ce   : > { %v12214_v45 = vpop.f32.mrf.mxu0  ;;  %v12364_v19 = vpop.f32.mrf.mxu1 }
 0x3cf   : > { %v5442_v25 = vadd.f32 1e-05, %v12214_v45 }
 0x3d0   : > { %v16498_v46 = vpop.f32.mrf.mxu0  ;;  %v16500_v9 = vpop.f32.mrf.mxu1 }
 0x3d1   : > { %20853 = vst [vmem:[#allocation83_spill] sm:$0xff] %v16498_v46  ;;  %v5691_v16 = vadd.f32 %v12270_v17, %v5442_v25 }
 0x3d4   : > { %v12217_v10 = vpop.f32.mrf.mxu0  ;;  %v16502_v44 = vpop.f32.mrf.mxu1 }
 0x3d5   : > { %v5462_v24 = vadd.f32 1e-05, %v12217_v10 }
 0x3d6   : > { %v16504_v56 = vpop.f32.mrf.mxu0  ;;  %v16506_v31 = vpop.f32.mrf.mxu1 }
 0x3d7   : > { %20854 = vst [vmem:[#allocation122_spill] sm:$0xff] %v16504_v56  ;;  %v5703_v35 = vadd.f32 %v12273_v18, %v5462_v24 }
 0x3da   : > { %v12308_v36 = vpop.f32.mrf.mxu0  ;;  %v16508_v30 = vpop.f32.mrf.mxu1 }
 0x3dc   : > { %v5806_v57 = vpop.f32.mrf.mxu0  ;;  %v16510_v41 = vpop.f32.mrf.mxu1 }
 0x3e0   : > { %v12311_v45 = vpop.f32.mrf.mxu0  ;;  %v16512_v3 = vpop.f32.mrf.mxu1 }
 0x3e2   : > { %v5820_v0 = vpop.f32.mrf.mxu0  ;;  %v16514_v17 = vpop.f32.mrf.mxu1 }
 0x3e6   : > { %v12314_v25 = vpop.f32.mrf.mxu0  ;;  %v12376_v53 = vpop.f32.mrf.mxu1 }
 0x3e8   : > { %v5834_v10 = vpop.f32.mrf.mxu0  ;;  %v16516_v58 = vpop.f32.mrf.mxu1 }
 0x3e9   : > { %20855 = vst [vmem:[#allocation134_spill] sm:$0xff] %v16516_v58 }
 0x3ec   : > { %v16518_v46 = vpop.f32.mrf.mxu0  ;;  %v12379_v18 = vpop.f32.mrf.mxu1 }
 0x3ee   : > { %v16520_v24 = vpop.f32.mrf.mxu0  ;;  %v16522_v32 = vpop.f32.mrf.mxu1 }
 0x3ef   : > { %20856 = vst [vmem:[#allocation110_spill] sm:$0xff] %v16522_v32  ;;  %v5312_v32 = vadd.f32 1e-05, %v16466_v51 }
 0x3f2   : > { %v12320_v7 = vpop.f32.mrf.mxu0  ;;  %v12382_v33 = vpop.f32.mrf.mxu1 }
 0x3f3   : > { %v5870_v47 = vadd.f32 %v12320_v7, %v5667_v55 }
 0x3f4   : > { %v16524_v56 = vpop.f32.mrf.mxu0  ;;  %v16526_v14 = vpop.f32.mrf.mxu1 }
 0x3f5   : > { %20857 = vst [vmem:[#allocation123_spill] sm:$0xff] %v16524_v56  ;;  %20858 = vst [vmem:[#allocation139_spill] sm:$0xff] %v16526_v14  ;;  %v16528_v27 = vadd.f32 %v12376_v53, %v5870_v47  ;;  %v5342_v56 = vadd.f32 1e-05, %v16470_v49  ;;  %v5619_v47 = vadd.f32 %v16453_v37, %v5322_v28  ;;  %v5613_v14 = vadd.f32 %v16456_v22, %v5312_v32 }
 0x3f6   : > { %v5352_v28 = vadd.f32 1e-05, %v16480_v5  ;;  %v5372_v5 = vadd.f32 1e-05, %v16486_v23 }
 0x3f7   : > { %20859 = vst [vmem:[#allocation96_spill] sm:$0xff] %v16528_v27 }
 0x3f8   : > { %v12323_v50 = vpop.f32.mrf.mxu0  ;;  %v12385_v54 = vpop.f32.mrf.mxu1  ;;  %v5649_v23 = vadd.f32 %v16476_v38, %v5372_v5 }
 0x3f9   : > { %v5884_v34 = vadd.f32 %v12323_v50, %v5679_v63  ;;  %v5332_v63 = vadd.f32 1e-05, %v16474_v6 }
 0x3fa   : > { %v16530_v58 = vpop.f32.mrf.mxu0  ;;  %v16532_v8 = vpop.f32.mrf.mxu1 }
 0x3fb   : > { %20860 = vst [vmem:[#allocation131_spill] sm:$0xff] %v16530_v58  ;;  %20861 = vst [vmem:[#allocation98_spill] sm:$0xff] %v16532_v8  ;;  %v16535_v60 = vadd.f32 %v12379_v18, %v5884_v34  ;;  %v5814_v58 = vadd.f32 %v12308_v36, %v5619_v47  ;;  %v5362_v34 = vadd.f32 1e-05, %v16478_v4  ;;  %v5807_v18 = vadd.f32 %v5806_v57, %v5613_v14 }
 0x3fc   : > { %v5625_v6 = vadd.f32 %v16460_v2, %v5332_v63 }
 0x3fd   : > { %20862 = vst [vmem:[#allocation141_spill] sm:$0xff] %v16535_v60  ;;  %v5631_v60 = vadd.f32 %v16458_v62, %v5342_v56  ;;  %v6009_v36 = vadd.f32 %v12364_v19, %v5814_v58  ;;  %v5643_v32 = vadd.f32 %v16464_v52, %v5362_v34  ;;  %v5849_v34 = vadd.f32 %v16520_v24, %v5649_v23 }
 0x3fe   : > { %v12326_v55 = vpop.f32.mrf.mxu0  ;;  %v12476_v7 = vpop.f32.mrf.mxu1  ;;  %v5821_v22 = vadd.f32 %v5820_v0, %v5625_v6  ;;  %v363_v6 = vlaneseq }
 0x3ff   : > { %v5898_v53 = vadd.f32 %v12326_v55, %v5691_v16  ;;  %v5828_v16 = vadd.f32 %v12311_v45, %v5631_v60  ;;  %v5842_v56 = vadd.f32 %v12314_v25, %v5643_v32  ;;  %v5637_v60 = vadd.f32 %v16468_v40, %v5352_v28 }
 0x400   : > { %v16540_v27 = vpop.f32.mrf.mxu0  ;;  %v6416_v50 = vpop.f32.mrf.mxu1 }
 0x401   : > { %v16544_v26 = vadd.f32 %v12382_v33, %v5898_v53  ;;  %v5382_v33 = vadd.f32 1e-05, %v16484_v1  ;;  %v5835_v19 = vadd.f32 %v5834_v10, %v5637_v60  ;;  %v6041_v40 = vadd.f32 %v16508_v30, %v5842_v56 }
 0x402   : > { %v12329_v51 = vpop.f32.mrf.mxu0 }
 0x403   : > { %v5912_v49 = vadd.f32 %v12329_v51, %v5703_v35  ;;  %v12479_v8 = vpop.f32.mrf.mxu1  ;;  %v6001_v35 = vadd.f32 %v16500_v9, %v5807_v18  ;;  %v5655_v1 = vadd.f32 %v16472_v48, %v5382_v33  ;;  %v6017_v9 = vadd.f32 %v16506_v31, %v5821_v22 }
 0x404   : > { %v16549_v37 = vpop.f32.mrf.mxu0  ;;  %v6033_v48 = vadd.f32 %v16510_v41, %v5835_v19 }
 0x405   : > { %v16552_v55 = vadd.f32 %v12385_v54, %v5912_v49  ;;  %v6428_v4 = vpop.f32.mrf.mxu1  ;;  %v6025_v54 = vadd.f32 %v16502_v44, %v5828_v16  ;;  %v6049_v16 = vadd.f32 %v16514_v17, %v5849_v34 }
 0x406   : > { %v12420_v14 = vpop.f32.mrf.mxu0 }
 0x407   : > { %v6246_v62 = vadd.f32 %v12420_v14, %v6009_v36  ;;  %v12482_v52 = vpop.f32.mrf.mxu1  ;;  %v364_v14 = vand.u32 127, %v363_v6 }
 0x408   : > { %v6239_v57 = vpop.f32.mrf.mxu0 }
 0x409   : > { %v6423_v2 = vadd.f32 %v12476_v7, %v6246_v62  ;;  %v6240_v58 = vadd.f32 %v6239_v57, %v6001_v35  ;;  %v5856_v7 = vadd.f32 %v16518_v46, %v5655_v1  ;;  %v6440_v10 = vpop.f32.mrf.mxu1  ;;  %v369_v17 = vand.u32 15, %v364_v14 }
 0x40a   : > { %v12423_v45 = vpop.f32.mrf.mxu0 }
 0x40b   : > { %13580 = vrsqrt.f32 %v6423_v2  ;;  %v6417_v0 = vadd.f32 %v6416_v50, %v6240_v58  ;;  %v6258_v47 = vadd.f32 %v12423_v45, %v6025_v54  ;;  %v6057_v30 = vadd.f32 %v16512_v3, %v5856_v7  ;;  %v12485_v49 = vpop.f32.mrf.mxu1 }
 0x40c   : > { %v6251_v25 = vpop.f32.mrf.mxu0  ;;  %v377_v58 = vcvt.s32.f32 %v369_v17 }
 0x40d   : > { %13582 = vrsqrt.f32 %v6417_v0  ;;  %v6435_v53 = vadd.f32 %v12479_v8, %v6258_v47  ;;  %v6252_v44 = vadd.f32 %v6251_v25, %v6017_v9  ;;  %v6452_v33 = vpop.f32.mrf.mxu1  ;;  %v20868_v47 = vld [vmem:[#allocation100_spill] sm:$0xff] }
 0x40e   : > { %v12426_v63 = vpop.f32.mrf.mxu0 }
 0x40f   : > { %13584 = vrsqrt.f32 %v6435_v53  ;;  %v6429_v50 = vadd.f32 %v6428_v4, %v6252_v44  ;;  %v6270_v51 = vadd.f32 %v12426_v63, %v6041_v40  ;;  %v378_v40 = vmul.f32 -0.5756463, %v377_v58 }
 0x410   : > { %v6263_v31 = vpop.f32.mrf.mxu0 }
 0x411   : > { %13586 = vrsqrt.f32 %v6429_v50  ;;  %v6447_v38 = vadd.f32 %v12482_v52, %v6270_v51  ;;  %v6264_v18 = vadd.f32 %v6263_v31, %v6033_v48  ;;  %v20870_v51 = vld [vmem:[#allocation113_spill] sm:$0xff] }
 0x412   : > { %v12429_v46 = vpop.f32.mrf.mxu0 }
 0x413   : > { %13588 = vrsqrt.f32 %v6447_v38  ;;  %v6441_v8 = vadd.f32 %v6440_v10, %v6264_v18  ;;  %v6282_v28 = vadd.f32 %v12429_v46, %v6057_v30  ;;  %v20872_v18 = vld [vmem:[#allocation88_spill] sm:$0xff]  ;;  %v379_v46 = vmul.f32 1.442695, %v378_v40 }
 0x414   : > { %v6275_v41 = vpop.f32.mrf.mxu0 }
 0x415   : > { %13590 = vrsqrt.f32 %v6441_v8  ;;  %v6459_v24 = vadd.f32 %v12485_v49, %v6282_v28  ;;  %v6276_v36 = vadd.f32 %v6275_v41, %v6049_v16 }
 0x416   : > { %v16622_v7 = vpop.f32.mrf.mxu0 }
 0x417   : > { %13592 = vrsqrt.f32 %v6459_v24  ;;  %v6453_v32 = vadd.f32 %v6452_v33, %v6276_v36  ;;  %v16676_v33 = vpop.f32.mrf.mxu1 }
 0x418   : > { %v13581_v4 = vpop.eup %13580  ;;  %v16655_v8 = vpop.f32.mrf.mxu0 }
 0x419   : > { %v16570_v22 = vmul.f32 %v13581_v4, %v15728_v12  ;;  %13594 = vrsqrt.f32 %v6453_v32  ;;  %v20875_v4 = vld [vmem:[#allocation129_spill] sm:$0xff]  ;;  %v16700_v58 = vpop.f32.mrf.mxu1 }
 0x41a   : > { %v13583_v3 = vpop.eup %13582  ;;  %13596 = vpow2.f32 %v379_v46  ;;  %v16690_v17 = vpop.f32.mrf.mxu0  ;;  %v20880_v46 = vld [vmem:[#allocation135_spill] sm:$0xff] }
 0x41b   : > { %20863 = vst [vmem:[#allocation132_spill] sm:$0xff] %v16570_v22  ;;  %v16573_v62 = vmul.f32 %v13583_v3, %v15737_v61  ;;  %v16576_v5 = vand.u32 4294901760, %v16570_v22 }
 0x41c   : > { %v13585_v35 = vpop.eup %13584 }
 0x41d   : > { %20864 = vst [vmem:[#allocation99_spill] sm:$0xff] %v16573_v62  ;;  %v16579_v56 = vand.u32 4294901760, %v16573_v62  ;;  %v16582_v57 = vmul.f32 %v13585_v35, %v15748_v20  ;;  %v16586_v12 = vsub.f32 %v16570_v22, %v16576_v5 }
 0x41e   : > { %v13587_v60 = vpop.eup %13586 }
 0x41f   : > { %20865 = vst [vmem:[#allocation146_spill] sm:$0xff] %v16582_v57  ;;  %12574 = vmatprep.mubr.f32.mxu1 %v16579_v56  ;;  %v16590_v61 = vmul.f32 %v13587_v60, %v15761_v21  ;;  %v16594_v54 = vand.u32 4294901760, %v16582_v57  ;;  %v16598_v20 = vsub.f32 %v16573_v62, %v16579_v56  ;;  %v20187_v19 = vand.u32 4294901760, %v16586_v12  ;;  %v20908_v62 = vld [vmem:[#allocation131_spill] sm:$0xff] }
 0x420   : > { %v13589_v2 = vpop.eup %13588  ;;  %12575 = vmatmul.mubr.f32.vlgmr.msra.gmra.mxu1 %v16576_v5 }
 0x421   : > { %20866 = vst [vmem:[#allocation138_spill] sm:$0xff] %v16590_v61  ;;  %12631 = vmatpush3.msra.mxu1 %v16215_v29  ;;  %v16603_v1 = vand.u32 4294901760, %v16590_v61  ;;  %v6657_v52 = vand.u32 4294901760, %v16598_v20  ;;  %v16608_v45 = vmul.f32 %v13589_v2, %v15776_v13  ;;  %v16612_v0 = vsub.f32 %v16582_v57, %v16594_v54 }
 0x422   : > { %v13591_v21 = vpop.eup %13590  ;;  %12632 = vmatprep.subr.mxu1 %v16223_v15  ;;  %v6668_v23 = vsub.f32 %v16586_v12, %v20187_v19 }
 0x423   : > { %20867 = vst [vmem:[#allocation151_spill] sm:$0xff] %v16608_v45  ;;  %12633 = vmatpush3.msra.mxu1 %v16223_v15  ;;  %12577 = vmatprep.mubr.f32.mxu1 %v16603_v1  ;;  %v16617_v9 = vmul.f32 %v13591_v21, %v20868_v47  ;;  %v6658_v13 = vsub.f32 %v16598_v20, %v6657_v52  ;;  %v16630_v53 = vand.u32 4294901760, %v16608_v45  ;;  %v20185_v50 = vand.u32 4294901760, %v16612_v0  ;;  %v20876_v21 = vld [vmem:[#allocation109_spill] sm:$0xff]  ;;  %v20877_v47 = vld [vmem:[#allocation140_spill] sm:$0xff] }
 0x424   : > { %v13593_v25 = vpop.eup %13592  ;;  %12634 = vmatprep.subr.mxu1 %v16236_v11  ;;  %12578 = vmatmul.mubr.f32.gmra.mxu1 %v16594_v54  ;;  %v16634_v44 = vsub.f32 %v16590_v61, %v16603_v1  ;;  %v6669_v38 = vand.u32 4294901760, %v6668_v23  ;;  %v20899_v61 = vld [vmem:[#allocation156_spill] sm:$0xff] }
 0x425   : > { %20869 = vst [vmem:[#allocation143_spill] sm:$0xff] %v16617_v9  ;;  %12635 = vmatpush3.msra.mxu1 %v16236_v11  ;;  %v16638_v10 = vand.u32 4294901760, %v16617_v9  ;;  %v6659_v48 = vand.u32 4294901760, %v6658_v13  ;;  %v16644_v31 = vmul.f32 %v13593_v25, %v20870_v51  ;;  %v16666_v6 = vsub.f32 %v16608_v45, %v16630_v53  ;;  %v16708_v25 = vpop.f32.mrf.mxu0  ;;  %v16718_v51 = vpop.f32.mrf.mxu1 }
 0x426   : > { %v13595_v63 = vpop.eup %13594  ;;  %12636 = vmatprep.subr.mxu1 %v16251_v42  ;;  %v20186_v34 = vand.u32 4294901760, %v16634_v44  ;;  %v6688_v24 = vsub.f32 %v16612_v0, %v20185_v50  ;;  %v20890_v50 = vld [vmem:[#allocation167_spill] sm:$0xff] }
 0x427   : > { %20871 = vst [vmem:[#allocation153_spill] sm:$0xff] %v16644_v31  ;;  %12637 = vmatpush3.msra.mxu1 %v16251_v42  ;;  %12580 = vmatprep.mubr.f32.mxu1 %v16638_v10  ;;  %v16649_v30 = vmul.f32 %v13595_v63, %v20872_v18  ;;  %v16653_v49 = vsub.f32 %v16617_v9, %v16638_v10  ;;  %v16662_v16 = vand.u32 4294901760, %v16644_v31  ;;  %v20183_v3 = vand.u32 4294901760, %v16666_v6  ;;  %v20878_v63 = vld [vmem:[#allocation183_spill] sm:$0xff]  ;;  %v16724_v18 = vpop.f32.mrf.mxu0 }
 0x428   : > { %12530 = vmatprep.mubr.f32.mxu0 %v6659_v48  ;;  %12638 = vmatprep.subr.mxu1 %v16267_v39  ;;  %v6678_v28 = vsub.f32 %v16634_v44, %v20186_v34  ;;  %v6689_v60 = vand.u32 4294901760, %v6688_v24  ;;  %v20879_v48 = vld [vmem:[#allocation159_spill] sm:$0xff]  ;;  %v20891_v34 = vld [vmem:[#allocation181_spill] sm:$0xff] }
 0x429   : > { %20873 = vst [vmem:[#allocation145_spill] sm:$0xff] %v16649_v30  ;;  %20874 = vst [vmem:[#allocation158_spill] sm:$0xff] %v16662_v16  ;;  %12531 = vmatmul.mubr.f32.vlgmr.msra.gmra.mxu0 %v6669_v38  ;;  %12581 = vmatmul.mubr.f32.gmra.mxu1 %v16630_v53  ;;  %v16670_v41 = vand.u32 4294901760, %v16649_v30  ;;  %v20184_v36 = vand.u32 4294901760, %v16653_v49  ;;  %v6708_v23 = vsub.f32 %v16666_v6, %v20183_v3 }
 0x42a   : > { %12587 = vmatpush3.msra.mxu0 %v16221_v43  ;;  %12639 = vmatpush3.msra.mxu1 %v16267_v39  ;;  %v6679_v32 = vand.u32 4294901760, %v6678_v28  ;;  %v16696_v43 = vsub.f32 %v16644_v31, %v16662_v16  ;;  %v20881_v28 = vld [vmem:[#allocation170_spill] sm:$0xff] }
 0x42b   : > { %12588 = vmatprep.subr.mxu0 %v16234_v59  ;;  %12640 = vmatprep.subr.mxu1 %v20875_v4  ;;  %v6698_v14 = vsub.f32 %v16653_v49, %v20184_v36  ;;  %v16688_v35 = vsub.f32 %v16649_v30, %v16670_v41  ;;  %v6709_v38 = vand.u32 4294901760, %v6708_v23  ;;  %v16739_v23 = vpop.f32.mrf.mxu0  ;;  %v20895_v31 = vld [vmem:[#allocation166_spill] sm:$0xff] }
 0x42c   : > { %12589 = vmatpush3.msra.mxu0 %v16234_v59  ;;  %12641 = vmatpush3.msra.mxu1 %v20875_v4  ;;  %v20181_v13 = vand.u32 4294901760, %v16696_v43 }
 0x42d   : > { %12533 = vmatprep.mubr.f32.mxu0 %v6679_v32  ;;  %12583 = vmatprep.mubr.f32.mxu1 %v16670_v41  ;;  %v20182_v2 = vand.u32 4294901760, %v16688_v35  ;;  %v6699_v59 = vand.u32 4294901760, %v6698_v14  ;;  %v20882_v14 = vld [vmem:[#allocation182_spill] sm:$0xff]  ;;  %v12441_v36 = vpop.f32.mrf.mxu0 }
 0x42e   : > { %12590 = vmatprep.subr.mxu0 %v20876_v21  ;;  %12642 = vmatprep.subr.mxu1 %v20877_v47  ;;  %v6728_v32 = vsub.f32 %v16696_v43, %v20181_v13  ;;  %v20885_v13 = vld [vmem:[#allocation152_spill] sm:$0xff] }
 0x42f   : > { %12534 = vmatmul.mubr.f32.gmra.mxu0 %v6689_v60  ;;  %12584 = vmatmul.mubr.f32.gmra.mxu1 %v16662_v16  ;;  %v6718_v40 = vsub.f32 %v16688_v35, %v20182_v2  ;;  %v20883_v60 = vld [vmem:[#allocation122_spill] sm:$0xff]  ;;  %v6323_v19 = vpop.f32.mrf.mxu0 }
 0x430   : > { %12591 = vmatpush3.msra.mxu0 %v20876_v21  ;;  %12643 = vmatpush3.msra.mxu1 %v20877_v47  ;;  %v5452_v21 = vadd.f32 1e-05, %v20883_v60  ;;  %v20887_v60 = vld [vmem:[#allocation107_spill] sm:$0xff] }
 0x431   : > { %12592 = vmatprep.subr.mxu0 %v20878_v63  ;;  %12644 = vmatprep.subr.mxu1 %v20879_v48  ;;  %v6719_v24 = vand.u32 4294901760, %v6718_v40  ;;  %v6729_v40 = vand.u32 4294901760, %v6728_v32  ;;  %v20889_v32 = vld [vmem:[#allocation83_spill] sm:$0xff] }
 0x432   : > { %12662 = vmatprep.mubr.f32.mxu1 %v6657_v52  ;;  %12593 = vmatpush3.msra.mxu0 %v20878_v63  ;;  %v16732_v52 = vpop.f32.mrf.mxu1  ;;  %v16742_v63 = vpop.eup %13596  ;;  %v5697_v3 = vadd.f32 %v20887_v60, %v5452_v21  ;;  %v20894_v60 = vld [vmem:[#allocation85_spill] sm:$0xff] }
 0x433   : > { %12645 = vmatpush3.msra.mxu1 %v20879_v48  ;;  %12536 = vmatprep.mubr.f32.mxu0 %v6699_v59  ;;  %v20884_v59 = vld [vmem:[#allocation136_spill] sm:$0xff] }
 0x434   : > { %12594 = vmatprep.subr.mxu0 %v20880_v46  ;;  %12646 = vmatprep.subr.mxu1 %v20881_v28  ;;  %v12494_v2 = vpop.f32.mrf.mxu1 }
 0x435   : > { %12537 = vmatmul.mubr.f32.gmra.mxu0 %v6709_v38  ;;  %12647 = vmatpush3.msra.mxu1 %v20881_v28  ;;  %v392_v38 = vpop.permute.xlu0 %391 }
 0x436   : > { %12595 = vmatpush3.msra.mxu0 %v20880_v46  ;;  %12648 = vmatprep.subr.mxu1 %v20882_v14  ;;  %v20886_v46 = vld [vmem:[#allocation185_spill] sm:$0xff]  ;;  %v6488_v21 = vpop.f32.mrf.mxu1 }
 0x437   : > { %12596 = vmatprep.subr.mxu0 %v20884_v59  ;;  %12649 = vmatpush3.msra.mxu1 %v20882_v14 }
 0x438   : > { %12597 = vmatpush3.msra.mxu0 %v20884_v59  ;;  %12539 = vmatprep.mubr.f32.mxu0 %v6719_v24  ;;  %v16751_v24 = vmul.f32 %v16742_v63, %v392_v38  ;;  %v5432_v59 = vadd.f32 1e-05, %v20889_v32  ;;  %v12497_v57 = vpop.f32.mrf.mxu1 }
 0x439   : > { %12598 = vmatprep.subr.mxu0 %v20885_v13  ;;  %12650 = vmatprep.subr.mxu1 %v20886_v46 }
 0x43a   : > { %12540 = vmatmul.mubr.f32.gmra.mxu0 %v6729_v40  ;;  %12651 = vmatpush3.msra.mxu1 %v20886_v46  ;;  %20888 = vst [vmem:[#allocation150_spill] sm:$0xff] %v16751_v24  ;;  %v5905_v40 = vadd.f32 %v16549_v37, %v5697_v3  ;;  %v440_v38 = vand.u32 2139095040, %v16751_v24  ;;  %v5685_v32 = vadd.f32 %v20894_v60, %v5432_v59  ;;  %v20896_v37 = vld [vmem:[#allocation186_spill] sm:$0xff]  ;;  %v20900_v59 = vld [vmem:[#allocation116_spill] sm:$0xff] }
 0x43b   : > { %12599 = vmatpush3.msra.mxu0 %v20885_v13  ;;  %12618 = vmatprep.mubr.f32.mxu0 %v16598_v20  ;;  %v20892_v13 = vld [vmem:[#allocation178_spill] sm:$0xff]  ;;  %v20893_v20 = vld [vmem:[#allocation101_spill] sm:$0xff] }
 0x43c   : > { %12600 = vmatprep.subr.mxu0 %v20890_v50  ;;  %12652 = vmatprep.subr.mxu1 %v20891_v34  ;;  %v20897_v3 = vld [vmem:[#allocation98_spill] sm:$0xff]  ;;  %v5891_v9 = vadd.f32 %v16540_v27, %v5685_v32 }
 0x43d   : > { %12601 = vmatpush3.msra.mxu0 %v20890_v50  ;;  %12653 = vmatpush3.msra.mxu1 %v20891_v34  ;;  %v6330_v50 = vadd.f32 %v12441_v36, %v16552_v55  ;;  %v6113_v30 = vadd.f32 %v20897_v3, %v5905_v40  ;;  %v441_v55 = vshrl.u32 %v440_v38, 23  ;;  %v20901_v36 = vld [vmem:[#allocation111_spill] sm:$0xff]  ;;  %v20903_v27 = vld [vmem:[#allocation86_spill] sm:$0xff]  ;;  %v6500_v3 = vpop.f32.mrf.mxu1  ;;  %v20906_v38 = vand.u32 4294901760, %v16586_v12 }
 0x43e   : > { %12602 = vmatprep.subr.mxu0 %v20892_v13  ;;  %12654 = vmatprep.subr.mxu1 %v20893_v20 }
 0x43f   : > { %12603 = vmatpush3.msra.mxu0 %v20892_v13  ;;  %12655 = vmatpush3.msra.mxu1 %v20893_v20  ;;  %v20898_v13 = vld [vmem:[#allocation128_spill] sm:$0xff]  ;;  %v6324_v60 = vadd.f32 %v6323_v19, %v6113_v30  ;;  %v6507_v40 = vadd.f32 %v12497_v57, %v6330_v50  ;;  %v6318_v19 = vadd.f32 %v16724_v18, %v16544_v26  ;;  %v20904_v30 = vld [vmem:[#allocation139_spill] sm:$0xff]  ;;  %v10797_v57 = vadd.s32 4294967169, %v441_v55  ;;  %v397_v50 = vpop.permute.xlu0 %396  ;;  %v20910_v18 = vld [vmem:[#allocation97_spill] sm:$0xff] }
 0x440   : > { %12604 = vmatprep.subr.mxu0 %v20895_v31  ;;  %12656 = vmatprep.subr.mxu1 %v20896_v37  ;;  %v5412_v45 = vadd.f32 1e-05, %v20898_v13  ;;  %v20905_v13 = vld [vmem:[#allocation120_spill] sm:$0xff]  ;;  %v16801_v55 = vmul.f32 %v16742_v63, %v397_v50  ;;  %v20200_v50 = vand.u32 2147483647, %v16751_v24 }
 0x441   : > { %12605 = vmatpush3.msra.mxu0 %v20895_v31  ;;  %12657 = vmatpush3.msra.mxu1 %v20896_v37  ;;  %v20902_v31 = vld [vmem:[#allocation117_spill] sm:$0xff]  ;;  %v6501_v22 = vadd.f32 %v6500_v3, %v6324_v60  ;;  %13598 = vrsqrt.f32 %v6507_v40  ;;  %v6495_v60 = vadd.f32 %v12494_v2, %v6318_v19  ;;  %v20915_v40 = vand.u32 4294901760, %v16612_v0  ;;  %v20916_v3 = vld [vmem:[#allocation124_spill] sm:$0xff] }
 0x442   : > { %12606 = vmatprep.subr.mxu0 %v20899_v61  ;;  %12658 = vmatprep.subr.mxu1 %v20900_v59  ;;  %v5673_v32 = vadd.f32 %v20903_v27, %v5412_v45  ;;  %v20907_v45 = vld [vmem:[#allocation121_spill] sm:$0xff]  ;;  %20911 = vst [vmem:[#allocation164_spill] sm:$0xff] %v16801_v55  ;;  %v447_v2 = vadd.s32 1, %v10797_v57  ;;  %v20920_v57 = vld [vmem:[#allocation84_spill] sm:$0xff] }
 0x443   : > { %12607 = vmatpush3.msra.mxu0 %v20899_v61  ;;  %12659 = vmatpush3.msra.mxu1 %v20900_v59  ;;  %v6097_v61 = vadd.f32 %v20904_v30, %v5891_v9  ;;  %v5392_v27 = vadd.f32 1e-05, %v20907_v45  ;;  %v20909_v9 = vand.u32 4294901760, %v16634_v44  ;;  %13600 = vrsqrt.f32 %v6501_v22  ;;  %v20917_v30 = vld [vmem:[#allocation110_spill] sm:$0xff]  ;;  %v20919_v22 = vld [vmem:[#allocation123_spill] sm:$0xff] }
 0x444   : > { %12608 = vmatprep.subr.mxu0 %v20901_v36  ;;  %12660 = vmatprep.subr.mxu1 %v20902_v31  ;;  %v5877_v16 = vadd.f32 %v20908_v62, %v5673_v32  ;;  %13602 = vrsqrt.f32 %v6495_v60  ;;  %vm448_vm1 = vcmp.gt.s32.totalorder %v447_v2, 0 }
 0x445   : > { %12609 = vmatpush3.msra.mxu0 %v20901_v36  ;;  %12661 = vmatpush3.msra.mxu1 %v20902_v31  ;;  %v402_v36 = vpop.permute.xlu1 %401  ;;  %v6312_v26 = vadd.f32 %v16739_v23, %v6097_v61  ;;  %v20913_v23 = vld [vmem:[#allocation141_spill] sm:$0xff]  ;;  %v5661_v19 = vadd.f32 %v20916_v3, %v5392_v27  ;;  %v20923_v27 = vld [vmem:[#allocation106_spill] sm:$0xff] }
 0x446   : > { %12610 = vmatprep.subr.mxu0 %v20905_v13  ;;  %12663 = vmatmul.mubr.f32.vlgmr.msra.gmra.mxu1 %v20906_v38  ;;  %v16804_v62 = vmul.f32 %v16742_v63, %v402_v36  ;;  %v6306_v32 = vadd.f32 %v16690_v17, %v20913_v23  ;;  %v20922_v36 = vld [vmem:[#allocation96_spill] sm:$0xff] }
 0x447   : > { %12718 = vmatprep.subr.mxu1 %v16215_v29  ;;  %12611 = vmatpush3.msra.mxu0 %v20905_v13  ;;  %v6489_v61 = vadd.f32 %v6488_v21, %v6312_v26  ;;  %v20918_v13 = vand.u32 4294901760, %v16653_v49  ;;  %v5863_v17 = vadd.f32 %v20919_v22, %v5661_v19  ;;  %v6294_v45 = vadd.f32 %v16622_v7, %v20922_v36 }
 0x448   : > { %12665 = vmatprep.mubr.f32.mxu1 %v20909_v9  ;;  %12719 = vmatpush3.msra.mxu1 %v16215_v29  ;;  %20912 = vst [vmem:[#allocation155_spill] sm:$0xff] %v16804_v62  ;;  %v20914_v29 = vld [vmem:[#allocation119_spill] sm:$0xff]  ;;  %v6483_v21 = vadd.f32 %v16718_v51, %v6306_v32  ;;  %v20924_v51 = vld [vmem:[#allocation134_spill] sm:$0xff]  ;;  %v20925_v9 = vand.u32 4294901760, %v16688_v35  ;;  %v444_v7 = vand.u32 8388607, %v20200_v50 }
 0x449   : > { %12612 = vmatprep.subr.mxu0 %v20910_v18  ;;  %12720 = vmatprep.subr.mxu1 %v16223_v15  ;;  %13604 = vrsqrt.f32 %v6489_v61  ;;  %v20198_v60 = vand.u32 2147483647, %v16804_v62  ;;  %v20926_v32 = vld [vmem:[#allocation108_spill] sm:$0xff] }
 0x44a   : > { %12613 = vmatpush3.msra.mxu0 %v20910_v18  ;;  %12721 = vmatpush3.msra.mxu1 %v16223_v15  ;;  %v6081_v15 = vadd.f32 %v20917_v30, %v5877_v16  ;;  %v543_v16 = vand.u32 2139095040, %v16801_v55  ;;  %13606 = vrsqrt.f32 %v6483_v21  ;;  %v407_v30 = vpop.permute.xlu1 %406  ;;  %v20929_v61 = vld [vmem:[#allocation104_spill] sm:$0xff] }
 0x44b   : > { %12614 = vmatprep.subr.mxu0 %v20914_v29  ;;  %12666 = vmatmul.mubr.f32.gmra.mxu1 %v20915_v40  ;;  %v20927_v40 = vand.u32 4294901760, %v16696_v43 }
 0x44c   : > { %12722 = vmatprep.subr.mxu1 %v16236_v11  ;;  %12615 = vmatpush3.msra.mxu0 %v20914_v29  ;;  %v6300_v38 = vadd.f32 %v16708_v25, %v6081_v15  ;;  %v20921_v25 = vand.u32 4294901760, %v16666_v6  ;;  %v544_v18 = vshrl.u32 %v543_v16, 23 }
 0x44d   : > { %12668 = vmatprep.mubr.f32.mxu1 %v20918_v13  ;;  %12723 = vmatpush3.msra.mxu1 %v16236_v11  ;;  %v646_v11 = vand.u32 2139095040, %v16804_v62 }
 0x44e   : > { %12616 = vmatprep.subr.mxu0 %v20920_v57  ;;  %12724 = vmatprep.subr.mxu1 %v16251_v42  ;;  %v6477_v26 = vadd.f32 %v16732_v52, %v6300_v38  ;;  %v13599_v29 = vpop.eup %13598  ;;  %v16875_v38 = vmul.f32 %v16742_v63, %v407_v30 }
 0x44f   : > { %12617 = vmatpush3.msra.mxu0 %v20920_v57  ;;  %12725 = vmatpush3.msra.mxu1 %v16251_v42  ;;  %v6065_v42 = vadd.f32 %v20924_v51, %v5863_v17  ;;  %v647_v23 = vshrl.u32 %v646_v11, 23  ;;  %v6541_v13 = vmul.f32 %v13599_v29, %v20929_v61  ;;  %v20930_v17 = vld [vmem:[#allocation82_spill] sm:$0xff]  ;;  %v20205_v51 = vmov 2475754826  }
 0x450   : > { %12619 = vmatmul.mubr.f32.vlgmr.msra.gmra.mxu0 %v16586_v12  ;;  %12669 = vmatmul.mubr.f32.gmra.mxu1 %v20921_v25  ;;  %v449_v12 = vsel %vm448_vm1, %v447_v2, 0  ;;  %13608 = vrsqrt.f32 %v6477_v26  ;;  %v20928_v2 = vld [vmem:[#allocation179_spill] sm:$0xff]  ;;  %v13601_v3 = vpop.eup %13600  ;;  %v20932_v25 = vld [vmem:[#allocation144_spill] sm:$0xff] }
 0x451   : > { %12674 = vmatprep.subr.mxu0 %v20923_v27  ;;  %12726 = vmatprep.subr.mxu1 %v16267_v39  ;;  %v6288_v52 = vadd.f32 %v16655_v8, %v6065_v42  ;;  %v10801_v8 = vadd.s32 4294967169, %v544_v18  ;;  %v10805_v19 = vadd.s32 4294967169, %v647_v23  ;;  %v16897_v26 = vshrl.u32 %v449_v12, 5 }
 0x452   : > { %12621 = vmatprep.mubr.f32.mxu0 %v16634_v44  ;;  %12671 = vmatprep.mubr.f32.mxu1 %v20925_v9  ;;  %v6471_v44 = vadd.f32 %v16676_v33, %v6294_v45  ;;  %v445_v33 = vor.u32 8388608, %v444_v7  ;;  %v20201_v45 = vmov 683565275   ;;  %v20217_v9 = vmov 2102212464  }
 0x453   : > { %12675 = vmatpush3.msra.mxu0 %v20923_v27  ;;  %12727 = vmatpush3.msra.mxu1 %v16267_v39  ;;  %v16851_v39 = vand.u32 31, %v449_v12  ;;  %v6465_v15 = vadd.f32 %v16700_v58, %v6288_v52  ;;  %v13603_v58 = vpop.eup %13602  ;;  %v653_v11 = vadd.s32 1, %v10805_v19  ;;  %v20207_v7 = vmov 920167782   ;;  %v20934_v52 = vld [vmem:[#allocation92_spill] sm:$0xff] }
 0x454   : > { %12676 = vmatprep.subr.mxu0 %v20926_v32  ;;  %12728 = vmatprep.subr.mxu1 %v20875_v4  ;;  %13610 = vrsqrt.f32 %v6471_v44  ;;  %v16880_v16 = vshll.u32 %v445_v33, 8  ;;  %v20935_v44 = vld [vmem:[#allocation147_spill] sm:$0xff]  ;;  %v20937_v33 = vld [vmem:[#allocation105_spill] sm:$0xff]  ;;  %vm472_vm4 = vcmp.lt.s32.totalorder %v16897_v26, 4  ;;  %vm469_vm5 = vcmp.lt.s32.totalorder %v16897_v26, 1 }
 0x455   : > { %12677 = vmatpush3.msra.mxu0 %v20926_v32  ;;  %12729 = vmatpush3.msra.mxu1 %v20875_v4  ;;  %v16860_v4 = vand.u32 8388607, %v20198_v60  ;;  %v16870_v22 = vsub.s32 32, %v16851_v39  ;;  %13612 = vrsqrt.f32 %v6465_v15  ;;  %v454_v27 = vshll.u32 %v20201_v45, %v16851_v39 }
 0x456   : > { %12622 = vmatmul.mubr.f32.gmra.mxu0 %v16612_v0  ;;  %12672 = vmatmul.mubr.f32.gmra.mxu1 %v20927_v40  ;;  %v20199_v0 = vand.u32 2147483647, %v16801_v55  ;;  %v13605_v36 = vpop.eup %13604  ;;  %v463_v18 = vshll.u32 %v20217_v9, %v16851_v39  ;;  %v6539_v32 = vmul.f32 %v13603_v58, %v20934_v52  ;;  %v466_v12 = vshll.u32 %v20207_v7, %v16851_v39 }
 0x457   : > { %12678 = vmatprep.subr.mxu0 %v20928_v2  ;;  %12730 = vmatprep.subr.mxu1 %v20877_v47  ;;  %v464_v23 = vshrl.u32 %v20207_v7, %v16870_v22  ;;  %v13607_v40 = vpop.eup %13606  ;;  %vm654_vm3 = vcmp.gt.s32.totalorder %v653_v11, 0  ;;  %v6538_v19 = vmul.f32 %v13605_v36, %v20937_v33  ;;  %v461_v15 = vshrl.u32 %v20217_v9, %v16870_v22 }
 0x458   : > { %12624 = vmatprep.mubr.f32.mxu0 %v16653_v49  ;;  %12679 = vmatpush3.msra.mxu0 %v20928_v2  ;;  %v550_v49 = vadd.s32 1, %v10801_v8  ;;  %v16891_v42 = vand.u32 8388607, %v20199_v0  ;;  %v20215_v8 = vmov 2131351028   ;;  %vm471_vm6 = vcmp.lt.s32.totalorder %v16897_v26, 3 }
 0x459   : > { %12731 = vmatpush3.msra.mxu1 %v20877_v47  ;;  %12750 = vmatprep.mubr.f32.mxu1 %v16579_v56  ;;  %v20931_v47 = vld [vmem:[#allocation90_spill] sm:$0xff]  ;;  %v20203_v2 = vmov 1326507024   ;;  %v460_v30 = vshll.u32 %v20215_v8, %v16851_v39  ;;  %v16953_v33 = vand.u32 4294901760, %v6538_v19  ;;  %vm470_vm7 = vcmp.lt.s32.totalorder %v16897_v26, 2 }
 0x45a   : > { %12680 = vmatprep.subr.mxu0 %v20930_v17  ;;  %12732 = vmatprep.subr.mxu1 %v20879_v48  ;;  %v6540_v57 = vmul.f32 %v13601_v3, %v20931_v47  ;;  %vm551_vm2 = vcmp.gt.s32.totalorder %v550_v49, 0  ;;  %v467_v3 = vshrl.u32 %v20203_v2, %v16870_v22  ;;  %v548_v61 = vor.u32 8388608, %v16891_v42 }
 0x45b   : > { %12681 = vmatpush3.msra.mxu0 %v20930_v17  ;;  %12733 = vmatpush3.msra.mxu1 %v20879_v48  ;;  %v457_v48 = vshll.u32 %v20205_v51, %v16851_v39  ;;  %v20938_v17 = vld [vmem:[#allocation163_spill] sm:$0xff]  ;;  %v465_v47 = vor.u32 %v464_v23, %v463_v18  ;;  %v16937_v39 = vand.u32 4294901760, %v6539_v32  ;;  %20944 = vst [vmem:[#allocation172_spill] sm:$0xff] %v16953_v33 }
 0x45c   : > { %12625 = vmatmul.mubr.f32.gmra.mxu0 %v16666_v6  ;;  %12682 = vmatprep.subr.mxu0 %v20932_v25  ;;  %v16895_v6 = vand.u32 4294901760, %v6541_v13  ;;  %v16912_v29 = vand.u32 4294901760, %v6540_v57  ;;  %v468_v52 = vor.u32 %v467_v3, %v466_v12  ;;  %v20948_v12 = vld [vmem:[#allocation125_spill] sm:$0xff] }
 0x45d   : > { %12734 = vmatprep.subr.mxu1 %v20881_v28  ;;  %12627 = vmatprep.mubr.f32.mxu0 %v16688_v35  ;;  %v455_v35 = vshrl.u32 %v20205_v51, %v16870_v22  ;;  %20940 = vst [vmem:[#allocation162_spill] sm:$0xff] %v16937_v39  ;;  %v13609_v36 = vpop.eup %13608 }
 0x45e   : > { %20933 = vst [vmem:[#allocation169_spill] sm:$0xff] %v16895_v6  ;;  %12683 = vmatpush3.msra.mxu0 %v20932_v25  ;;  %12735 = vmatpush3.msra.mxu1 %v20881_v28  ;;  %20936 = vst [vmem:[#allocation157_spill] sm:$0xff] %v16912_v29  ;;  %v458_v28 = vshrl.u32 %v20215_v8, %v16870_v22  ;;  %v16929_v58 = vsub.f32 %v6541_v13, %v16895_v6 }
 0x45f   : > { %12684 = vmatprep.subr.mxu0 %v20935_v44  ;;  %12736 = vmatprep.subr.mxu1 %v20882_v14  ;;  %v16944_v13 = vsub.f32 %v6540_v57, %v16912_v29  ;;  %v16947_v18 = vor.u32 %v455_v35, %v454_v27  ;;  %v478_v27 = vsel %vm472_vm4, %v465_v47, 920167782  ;;  %v16972_v35 = vsub.f32 %v6539_v32, %v16937_v39 }
 0x460   : > { %12685 = vmatpush3.msra.mxu0 %v20935_v44  ;;  %12737 = vmatpush3.msra.mxu1 %v20882_v14  ;;  %20939 = vst [vmem:[#allocation173_spill] sm:$0xff] %v16929_v58  ;;  %v16932_v14 = vsel %vm551_vm2, %v550_v49, 0  ;;  %v20942_v49 = vld [vmem:[#allocation103_spill] sm:$0xff]  ;;  %v16949_v23 = vor.u32 %v458_v28, %v457_v48  ;;  %v20943_v44 = vld [vmem:[#allocation174_spill] sm:$0xff]  ;;  %v20946_v48 = vld [vmem:[#allocation184_spill] sm:$0xff]  ;;  %v16975_v28 = vshll.u32 %v548_v61, 8 }
 0x461   : > { %12628 = vmatmul.mubr.f32.gmra.mxu0 %v16696_v43  ;;  %12686 = vmatprep.subr.mxu0 %v20938_v17  ;;  %v655_v43 = vsel %vm654_vm3, %v653_v11, 0  ;;  %20941 = vst [vmem:[#allocation168_spill] sm:$0xff] %v16944_v13  ;;  %v6537_v42 = vmul.f32 %v13607_v40, %v20942_v49  ;;  %v16955_v11 = vor.u32 %v461_v15, %v460_v30  ;;  %v13611_v57 = vpop.eup %13610  ;;  %20947 = vst [vmem:[#allocation118_spill] sm:$0xff] %v16972_v35  ;;  %v20951_v61 = vld [vmem:[#allocation112_spill] sm:$0xff] }
 0x462   : > { %12738 = vmatprep.subr.mxu1 %v20886_v46  ;;  %12687 = vmatpush3.msra.mxu0 %v20938_v17  ;;  %v6536_v40 = vmul.f32 %v13609_v36, %v20948_v12  ;;  %v16982_v3 = vand.u32 4294901760, %v16944_v13  ;;  %v477_v32 = vsel %vm469_vm5, %v16947_v18, %v16949_v23  ;;  %v482_v15 = vsel %vm472_vm4, %v468_v52, 1326507024  ;;  %v13613_v17 = vpop.eup %13612  ;;  %v20954_v12 = vld [vmem:[#allocation176_spill] sm:$0xff] }
 0x463   : > { %12706 = vmatprep.mubr.f32.mxu0 %v16579_v56  ;;  %12739 = vmatpush3.msra.mxu1 %v20886_v46  ;;  %v16959_v56 = vand.u32 31, %v16932_v14  ;;  %v16964_v46 = vand.u32 4294901760, %v16929_v58  ;;  %v16984_v30 = vand.u32 4294901760, %v6537_v42  ;;  %v479_v36 = vsel %vm471_vm6, %v16955_v11, %v478_v27 }
 0x464   : > { %12688 = vmatprep.subr.mxu0 %v20943_v44  ;;  %12740 = vmatprep.subr.mxu1 %v20891_v34  ;;  %20949 = vst [vmem:[#allocation126_spill] sm:$0xff] %v16982_v3  ;;  %v17017_v27 = vsel %vm469_vm5, %v16949_v23, %v16955_v11  ;;  %v17041_v0 = vsel %vm470_vm7, %v477_v32, %v479_v36  ;;  %v17060_v21 = vshrl.u32 %v16932_v14, 5 }
 0x465   : > { %12689 = vmatpush3.msra.mxu0 %v20943_v44  ;;  %12741 = vmatpush3.msra.mxu1 %v20891_v34  ;;  %20945 = vst [vmem:[#allocation177_spill] sm:$0xff] %v16964_v46  ;;  %v16977_v34 = vshrl.u32 %v655_v43, 5  ;;  %20950 = vst [vmem:[#allocation127_spill] sm:$0xff] %v16984_v30  ;;  %v17002_v49 = vsub.s32 32, %v16959_v56  ;;  %v7866_v52 = vsub.f32 %v16929_v58, %v16964_v46  ;;  %v20953_v44 = vld [vmem:[#allocation87_spill] sm:$0xff] }
 0x466   : > { %12690 = vmatprep.subr.mxu0 %v20946_v48  ;;  %12742 = vmatprep.subr.mxu1 %v20893_v20  ;;  %v17037_v60 = vsub.f32 %v6537_v42, %v16984_v30  ;;  %v566_v42 = vshll.u32 %v20217_v9, %v16959_v56  ;;  %v563_v25 = vshll.u32 %v20215_v8, %v16959_v56  ;;  %vm575_vm8 = vcmp.lt.s32.totalorder %v17060_v21, 4 }
 0x467   : > { %12691 = vmatpush3.msra.mxu0 %v20946_v48  ;;  %12743 = vmatpush3.msra.mxu1 %v20893_v20  ;;  %v16996_v20 = vsub.f32 %v6538_v19, %v16953_v33  ;;  %v6535_v48 = vmul.f32 %v13611_v57, %v20953_v44  ;;  %v17011_v19 = vshrl.u32 %v20201_v45, %v16870_v22  ;;  %v17030_v22 = vand.u32 31, %v655_v43 }
 0x468   : > { %12692 = vmatprep.subr.mxu0 %v20951_v61  ;;  %12744 = vmatprep.subr.mxu1 %v20896_v37  ;;  %v17028_v57 = vsel %vm471_vm6, %v465_v47, %v482_v15  ;;  %v7873_v44 = vsub.f32 %v16944_v13, %v16982_v3  ;;  %20957 = vst [vmem:[#allocation142_spill] sm:$0xff] %v17037_v60  ;;  %v20958_v15 = vld [vmem:[#allocation95_spill] sm:$0xff]  ;;  %v7867_v32 = vand.u32 4294901760, %v7866_v52  ;;  %v17077_v2 = vand.u32 4294901760, %v17037_v60 }
 0x469   : > { %20952 = vst [vmem:[#allocation130_spill] sm:$0xff] %v16996_v20  ;;  %12693 = vmatpush3.msra.mxu0 %v20951_v61  ;;  %12745 = vmatpush3.msra.mxu1 %v20896_v37  ;;  %v17022_v37 = vand.u32 4294901760, %v16972_v35  ;;  %v17024_v61 = vand.u32 4294901760, %v6536_v40  ;;  %v557_v47 = vshll.u32 %v20201_v45, %v16959_v56  ;;  %v17048_v43 = vand.u32 4294901760, %v16996_v20 }
 0x46a   : > { %12694 = vmatprep.subr.mxu0 %v20954_v12  ;;  %12746 = vmatprep.subr.mxu1 %v20900_v59  ;;  %v567_v50 = vshrl.u32 %v20207_v7, %v17002_v49  ;;  %v17057_v36 = vand.u32 4294901760, %v6535_v48  ;;  %v558_v45 = vshrl.u32 %v20205_v51, %v17002_v49  ;;  %v561_v14 = vshrl.u32 %v20215_v8, %v17002_v49  ;;  %v20968_v8 = vld [vmem:[#allocation81_spill] sm:$0xff] }
 0x46b   : > { %20955 = vst [vmem:[#allocation133_spill] sm:$0xff] %v17022_v37  ;;  %20956 = vst [vmem:[#allocation137_spill] sm:$0xff] %v17024_v61  ;;  %12695 = vmatpush3.msra.mxu0 %v20954_v12  ;;  %12747 = vmatpush3.msra.mxu1 %v20900_v59  ;;  %v20960_v59 = vld [vmem:[#allocation102_spill] sm:$0xff]  ;;  %v7874_v52 = vand.u32 4294901760, %v7873_v44  ;;  %v20966_v44 = vmov 920167782  }
 0x46c   : > { %12696 = vmatprep.subr.mxu0 %v20958_v15  ;;  %12748 = vmatprep.subr.mxu1 %v20902_v31  ;;  %20959 = vst [vmem:[#allocation148_spill] sm:$0xff] %v17048_v43  ;;  %v6534_v12 = vmul.f32 %v13613_v17, %v20960_v59  ;;  %20961 = vst [vmem:[#allocation149_spill] sm:$0xff] %v17057_v36  ;;  %v20962_v17 = vld [vmem:[#allocation114_spill] sm:$0xff]  ;;  %v7880_v59 = vsub.f32 %v16972_v35, %v17022_v37  ;;  %v20967_v3 = vand.u32 2139095040, %v16875_v38 }
 0x46d   : > { %12697 = vmatpush3.msra.mxu0 %v20958_v15  ;;  %12749 = vmatpush3.msra.mxu1 %v20902_v31  ;;  %v17069_v15 = vsub.f32 %v6536_v40, %v17024_v61  ;;  %v560_v31 = vshll.u32 %v20205_v51, %v16959_v56  ;;  %20964 = vst [vmem:[#allocation160_spill] sm:$0xff] %v17077_v2  ;;  %vm572_vm9 = vcmp.lt.s32.totalorder %v17060_v21, 1  ;;  %vm574_vm10 = vcmp.lt.s32.totalorder %v17060_v21, 3 }
 0x46e   : > { %12698 = vmatprep.subr.mxu0 %v20962_v17  ;;  %12751 = vmatmul.mubr.f32.vlgmr.msra.gmra.mxu1 %v16576_v5  ;;  %v564_v40 = vshrl.u32 %v20217_v9, %v17002_v49  ;;  %v7887_v51 = vsub.f32 %v16996_v20, %v17048_v43  ;;  %v17086_v7 = vand.u32 4294901760, %v6534_v12  ;;  %v17088_v37 = vor.u32 %v567_v50, %v566_v42 }
 0x46f   : > { %20963 = vst [vmem:[#allocation154_spill] sm:$0xff] %v17069_v15  ;;  %12802 = vmatprep.subr.mxu1 %v7867_v32  ;;  %12699 = vmatpush3.msra.mxu0 %v20962_v17  ;;  %v569_v17 = vshll.u32 %v20966_v44, %v16959_v56  ;;  %v750_v46 = vshrl.u32 %v20967_v3, 23  ;;  %v17096_v9 = vsub.f32 %v6535_v48, %v17057_v36  ;;  %v7881_v50 = vand.u32 4294901760, %v7880_v59  ;;  %v20972_v48 = vld [vmem:[#allocation94_spill] sm:$0xff] }
 0x470   : > { %12753 = vmatprep.mubr.f32.mxu1 %v16603_v1  ;;  %12803 = vmatpush3.msra.mxu1 %v7867_v32  ;;  %20965 = vst [vmem:[#allocation161_spill] sm:$0xff] %v17086_v7  ;;  %v17098_v32 = vor.u32 %v558_v45, %v557_v47  ;;  %v17103_v42 = vand.u32 4294901760, %v17069_v15  ;;  %v17105_v56 = vor.u32 %v561_v14, %v560_v31  ;;  %v20971_v3 = vmov 1326507024   ;;  %v20975_v14 = vld [vmem:[#allocation115_spill] sm:$0xff] }
 0x471   : > { %12700 = vmatprep.subr.mxu0 %v20968_v8  ;;  %12804 = vmatprep.subr.mxu1 %v7874_v52  ;;  %20969 = vst [vmem:[#allocation165_spill] sm:$0xff] %v17096_v9  ;;  %v570_v43 = vshrl.u32 %v20971_v3, %v17002_v49  ;;  %v17110_v20 = vsub.s32 32, %v17030_v22  ;;  %v7894_v45 = vsub.f32 %v17037_v60, %v17077_v2  ;;  %v7888_v47 = vand.u32 4294901760, %v7887_v51 }
 0x472   : > { %12701 = vmatpush3.msra.mxu0 %v20968_v8  ;;  %12805 = vmatpush3.msra.mxu1 %v7874_v52  ;;  %20970 = vst [vmem:[#allocation171_spill] sm:$0xff] %v17103_v42  ;;  %v17116_v8 = vor.u32 %v564_v40, %v563_v25  ;;  %v17121_v59 = vsub.f32 %v6534_v12, %v17086_v7  ;;  %v581_v25 = vsel %vm575_vm8, %v17088_v37, 920167782  ;;  %v17135_v51 = vand.u32 4294901760, %v17096_v9 }
 0x473   : > { %12702 = vmatprep.subr.mxu0 %v20972_v48  ;;  %12754 = vmatmul.mubr.f32.gmra.mxu1 %v16594_v54  ;;  %v17127_v31 = vsel %vm469_vm5, %v17011_v19, %v16947_v18  ;;  %v474_v12 = vsel %vm472_vm4, %v16955_v11, 2102212464  ;;  %v17142_v18 = vmul.u32.u64.low %v16880_v16, %v17041_v0  ;;  %v17143_v19 = vmul.u32.u64.high %v16880_v16, %v17041_v0, %v17142_v18 }
 0x474   : > { %12806 = vmatprep.subr.mxu1 %v7881_v50  ;;  %12703 = vmatpush3.msra.mxu0 %v20972_v48  ;;  %20973 = vst [vmem:[#allocation175_spill] sm:$0xff] %v17121_v59  ;;  %20974 = vst [vmem:[#allocation180_spill] sm:$0xff] %v17135_v51  ;;  %v7901_v52 = vsub.f32 %v17069_v15, %v17103_v42  ;;  %v17153_v40 = vsel %vm470_vm7, %v17017_v27, %v17028_v57  ;;  %v7895_v11 = vand.u32 4294901760, %v7894_v45  ;;  %v20976_v42 = vmov 683565275   ;;  %v412_v27 = vpop.permute.xlu0 %411 }
 0x475   : > { %12756 = vmatprep.mubr.f32.mxu1 %v16638_v10  ;;  %12807 = vmatpush3.msra.mxu1 %v7881_v50  ;;  %v571_v50 = vor.u32 %v570_v43, %v569_v17  ;;  %v580_v0 = vsel %vm572_vm9, %v17098_v32, %v17105_v56  ;;  %v582_v48 = vsel %vm574_vm10, %v17116_v8, %v581_v25  ;;  %v10809_v15 = vadd.s32 4294967169, %v750_v46 }
 0x476   : > { %12704 = vmatprep.subr.mxu0 %v20975_v14  ;;  %12808 = vmatprep.subr.mxu1 %v7888_v47  ;;  %v660_v2 = vshll.u32 %v20976_v42, %v17030_v22  ;;  %v17168_v57 = vand.u32 4294901760, %v17121_v59  ;;  %vm573_vm11 = vcmp.lt.s32.totalorder %v17060_v21, 2  ;;  %v20978_v43 = vmov 2102212464  }
 0x477   : > { %12705 = vmatpush3.msra.mxu0 %v20975_v14  ;;  %12809 = vmatpush3.msra.mxu1 %v7888_v47  ;;  %v669_v17 = vshll.u32 %v20978_v43, %v17030_v22  ;;  %v670_v45 = vshrl.u32 %v20966_v44, %v17110_v20  ;;  %v7908_v46 = vsub.f32 %v17096_v9, %v17135_v51  ;;  %v7902_v60 = vand.u32 4294901760, %v7901_v52 }
 0x478   : > { %12707 = vmatmul.mubr.f32.vlgmr.msra.gmra.mxu0 %v16576_v5  ;;  %12757 = vmatmul.mubr.f32.gmra.mxu1 %v16630_v53  ;;  %20977 = vst [vmem:[#allocation100_spill] sm:$0xff] %v17168_v57  ;;  %v20979_v5 = vmov 2475754826   ;;  %v672_v25 = vshll.u32 %v20966_v44, %v17030_v22  ;;  %v673_v14 = vshrl.u32 %v20971_v3, %v17110_v20  ;;  %v585_v35 = vsel %vm575_vm8, %v571_v50, 1326507024 }
 0x479   : > { %12762 = vmatprep.subr.mxu0 %v16895_v6  ;;  %12810 = vmatprep.subr.mxu1 %v7895_v11  ;;  %v661_v47 = vshrl.u32 %v20979_v5, %v17110_v20  ;;  %v663_v51 = vshll.u32 %v20979_v5, %v17030_v22  ;;  %v20980_v9 = vmov 2131351028   ;;  %v17193_v62 = vmul.f32 %v16742_v63, %v412_v27 }
 0x47a   : > { %12709 = vmatprep.mubr.f32.mxu0 %v16603_v1  ;;  %12759 = vmatprep.mubr.f32.mxu1 %v16670_v41  ;;  %v664_v13 = vshrl.u32 %v20980_v9, %v17110_v20  ;;  %v666_v1 = vshll.u32 %v20980_v9, %v17030_v22  ;;  %v667_v52 = vshrl.u32 %v20978_v43, %v17110_v20  ;;  %v756_v55 = vadd.s32 1, %v10809_v15 }
 0x47b   : > { %12763 = vmatpush3.msra.mxu0 %v16895_v6  ;;  %12811 = vmatpush3.msra.mxu1 %v7895_v11  ;;  %v7915_v50 = vsub.f32 %v17121_v59, %v17168_v57  ;;  %v17205_v27 = vmul.u32.u64.low %v16880_v16, %v17153_v40  ;;  %v17206_v24 = vmul.u32.u64.high %v16880_v16, %v17153_v40, %v17205_v27  ;;  %v671_v5 = vor.u32 %v670_v45, %v669_v17  ;;  %v20981_v40 = vld [vmem:[#allocation158_spill] sm:$0xff] }
 0x47c   : > { %12764 = vmatprep.subr.mxu0 %v16912_v29  ;;  %12812 = vmatprep.subr.mxu1 %v7902_v60  ;;  %v7909_v22 = vand.u32 4294901760, %v7908_v46  ;;  %v475_v15 = vsel %vm471_vm6, %v16949_v23, %v474_v12  ;;  %v584_v11 = vsel %vm572_vm9, %v17105_v56, %v17116_v8  ;;  %v674_v57 = vor.u32 %v673_v14, %v672_v25 }
 0x47d   : > { %12765 = vmatpush3.msra.mxu0 %v16912_v29  ;;  %12813 = vmatpush3.msra.mxu1 %v7902_v60  ;;  %vm678_vm12 = vcmp.lt.s32.totalorder %v16977_v34, 4  ;;  %v583_v60 = vsel %vm573_vm11, %v580_v0, %v582_v48  ;;  %v586_v17 = vsel %vm574_vm10, %v17088_v37, %v585_v35  ;;  %v17224_v23 = vor.u32 %v661_v47, %v660_v2 }
 0x47e   : > { %12710 = vmatmul.mubr.f32.gmra.mxu0 %v16594_v54  ;;  %12760 = vmatmul.mubr.f32.gmra.mxu1 %v20981_v40  ;;  %v852_v12 = vand.u32 2139095040, %v17193_v62  ;;  %v17228_v45 = vor.u32 %v664_v13, %v663_v51  ;;  %v668_v46 = vor.u32 %v667_v52, %v666_v1  ;;  %vm757_vm13 = vcmp.gt.s32.totalorder %v756_v55, 0  ;;  %v417_v13 = vpop.permute.xlu1 %416 }
 0x47f   : > { %12766 = vmatprep.subr.mxu0 %v16937_v39  ;;  %12814 = vmatprep.subr.mxu1 %v7909_v22  ;;  %v7916_v54 = vand.u32 4294901760, %v7915_v50  ;;  %v476_v35 = vsel %vm470_vm7, %v17127_v31, %v475_v15  ;;  %vm675_vm14 = vcmp.lt.s32.totalorder %v16977_v34, 1  ;;  %vm677_vm15 = vcmp.lt.s32.totalorder %v16977_v34, 3 }
 0x480   : > { %12712 = vmatprep.mubr.f32.mxu0 %v16638_v10  ;;  %12767 = vmatpush3.msra.mxu0 %v16937_v39  ;;  %v684_v2 = vsel %vm678_vm12, %v671_v5, 920167782  ;;  %v495_v10 = vadd.s32 1, %v17143_v19  ;;  %v556_v37 = vshrl.u32 %v20976_v42, %v17002_v49  ;;  %v587_v26 = vsel %vm573_vm11, %v584_v11, %v586_v17 }
 0x481   : > { %12815 = vmatpush3.msra.mxu1 %v7909_v22  ;;  %12768 = vmatprep.subr.mxu0 %v16953_v33  ;;  %v688_v31 = vsel %vm678_vm12, %v674_v57, 1326507024  ;;  %v17249_v51 = vmul.u32.u64.low %v16975_v28, %v583_v60  ;;  %v17250_v0 = vmul.u32.u64.high %v16975_v28, %v583_v60, %v17249_v51  ;;  %v758_v48 = vsel %vm757_vm13, %v756_v55, 0 }
 0x482   : > { %12816 = vmatprep.subr.mxu1 %v7916_v54  ;;  %12769 = vmatpush3.msra.mxu0 %v16953_v33  ;;  %v853_v47 = vshrl.u32 %v852_v12, 23  ;;  %vm676_vm0 = vcmp.lt.s32.totalorder %v16977_v34, 2  ;;  %v683_v49 = vsel %vm675_vm14, %v17224_v23, %v17228_v45  ;;  %v685_v57 = vsel %vm677_vm15, %v668_v46, %v684_v2 }
 0x483   : > { %12817 = vmatpush3.msra.mxu1 %v7916_v54  ;;  %12713 = vmatmul.mubr.f32.gmra.mxu0 %v16630_v53  ;;  %v17263_v25 = vmul.f32 %v16742_v63, %v417_v13  ;;  %v17268_v55 = vmul.u32.u64.low %v16975_v28, %v587_v26  ;;  %v17269_v53 = vmul.u32.u64.high %v16975_v28, %v587_v26, %v17268_v55  ;;  %v687_v14 = vsel %vm675_vm14, %v17228_v45, %v668_v46 }
 0x484   : > { %12770 = vmatprep.subr.mxu0 %v16984_v30  ;;  %12882 = vmatprep.subr.mxu1 %v16895_v6  ;;  %v689_v1 = vsel %vm677_vm15, %v671_v5, %v688_v31  ;;  %vm494_vm1 = vc.u32 %v17206_v24, %v17142_v18  ;;  %v577_v52 = vsel %vm575_vm8, %v17116_v8, 2102212464  ;;  %v20983_v50 = vor.u32 8388608, %v16860_v4 }
 0x485   : > { %20982 = vst [vmem:[#allocation113_spill] sm:$0xff] %v17263_v25  ;;  %12715 = vmatprep.mubr.f32.mxu0 %v16670_v41  ;;  %12771 = vmatpush3.msra.mxu0 %v16984_v30  ;;  %v760_v22 = vand.u32 31, %v758_v48  ;;  %v686_v5 = vsel %vm676_vm0, %v683_v49, %v685_v57  ;;  %v10813_v41 = vadd.s32 4294967169, %v853_v47  ;;  %v492_v15 = vmul.u32 %v16880_v16, %v476_v35 }
 0x486   : > { %v17285_v27 = vshll.u32 %v20983_v50, 8  ;;  %12772 = vmatprep.subr.mxu0 %v17024_v61  ;;  %v690_v11 = vsel %vm676_vm0, %v687_v14, %v689_v1  ;;  %v20249_v8 = vand.u32 2147483647, %v16875_v38  ;;  %v955_v4 = vand.u32 2139095040, %v17263_v25 }
 0x487   : > { %12773 = vmatpush3.msra.mxu0 %v17024_v61  ;;  %v496_v60 = vsel %vm494_vm1, %v495_v10, %v17143_v19  ;;  %v576_v17 = vsel %vm572_vm9, %v556_v37, %v17098_v32  ;;  %v578_v16 = vsel %vm574_vm10, %v17105_v56, %v577_v52  ;;  %v659_v12 = vshrl.u32 %v20976_v42, %v17110_v20  ;;  %v422_v37 = vpop.permute.xlu0 %421 }
 0x488   : > { %12716 = vmatmul.mubr.f32.gmra.mxu0 %v20981_v40  ;;  %12774 = vmatprep.subr.mxu0 %v17057_v36  ;;  %v680_v40 = vsel %vm678_vm12, %v668_v46, 2102212464  ;;  %v17311_v54 = vmul.u32.u64.low %v17285_v27, %v686_v5  ;;  %v17312_v35 = vmul.u32.u64.high %v17285_v27, %v686_v5, %v17311_v54  ;;  %v761_v19 = vsub.s32 32, %v760_v22 }
 0x489   : > { %12775 = vmatpush3.msra.mxu0 %v17057_v36  ;;  %v17317_v32 = vmul.u32.u64.low %v17285_v27, %v690_v11  ;;  %v17318_v2 = vmul.u32.u64.high %v17285_v27, %v690_v11, %v17317_v32  ;;  %v859_v56 = vadd.s32 1, %v10813_v41  ;;  %v17321_v20 = vadd.s32 %v496_v60, %v492_v15 }
 0x48a   : > { %12776 = vmatprep.subr.mxu0 %v17086_v7  ;;  %v579_v46 = vsel %vm573_vm11, %v576_v17, %v578_v16  ;;  %v17327_v13 = vand.u32 8388607, %v20249_v8  ;;  %v956_v10 = vshrl.u32 %v955_v4, 23  ;;  %vm597_vm2 = vc.u32 %v17269_v53, %v17249_v51 }
 0x48b   : > { %12777 = vmatpush3.msra.mxu0 %v17086_v7  ;;  %v598_v26 = vadd.s32 1, %v17250_v0  ;;  %v679_v31 = vsel %vm675_vm14, %v659_v12, %v17224_v23  ;;  %v681_v21 = vsel %vm677_vm15, %v17228_v45, %v680_v40  ;;  %v772_v47 = vshll.u32 %v20978_v43, %v760_v22 }
 0x48c   : > { %12842 = vmatprep.subr.mxu0 %v16929_v58  ;;  %v773_v49 = vshrl.u32 %v20966_v44, %v761_v19  ;;  %v775_v57 = vshll.u32 %v20966_v44, %v760_v22  ;;  %v776_v55 = vshrl.u32 %v20971_v3, %v761_v19  ;;  %v17343_v14 = vshrl.u32 %v758_v48, 5 }
 0x48d   : > { %v763_v1 = vshll.u32 %v20976_v42, %v760_v22  ;;  %vm860_vm3 = vcmp.gt.s32.totalorder %v859_v56, 0  ;;  %v17347_v52 = vmul.f32 %v16742_v63, %v422_v37  ;;  %v20985_v23 = vmov 2475754826  }
 0x48e   : > { %v764_v50 = vshrl.u32 %v20985_v23, %v761_v19  ;;  %v766_v45 = vshll.u32 %v20985_v23, %v760_v22  ;;  %v767_v5 = vshrl.u32 %v20980_v9, %v761_v19  ;;  %v10817_v41 = vadd.s32 4294967169, %v956_v10 }
 0x48f   : > { %20984 = vst [vmem:[#allocation88_spill] sm:$0xff] %v17347_v52  ;;  %v498_v15 = vadd.s32 536870912, %v17321_v20  ;;  %v595_v11 = vmul.u32 %v16975_v28, %v579_v46  ;;  %v769_v48 = vshll.u32 %v20980_v9, %v760_v22  ;;  %v770_v4 = vshrl.u32 %v20978_v43, %v761_v19 }
 0x490   : > { %v599_v60 = vsel %vm597_vm2, %v598_v26, %v17250_v0  ;;  %v774_v17 = vor.u32 %v773_v49, %v772_v47  ;;  %v777_v16 = vor.u32 %v776_v55, %v775_v57  ;;  %v861_v12 = vsel %vm860_vm3, %v859_v56, 0 }
 0x491   : > { %v682_v40 = vsel %vm676_vm0, %v679_v31, %v681_v21  ;;  %vm700_vm4 = vc.u32 %v17318_v2, %v17311_v54  ;;  %v701_v28 = vadd.s32 1, %v17312_v35  ;;  %vm781_vm5 = vcmp.lt.s32.totalorder %v17343_v14, 4 }
 0x492   : > { %v765_v22 = vor.u32 %v764_v50, %v763_v1  ;;  %v17366_v32 = vor.u32 %v767_v5, %v766_v45  ;;  %v962_v46 = vadd.s32 1, %v10817_v41  ;;  %v1058_v10 = vand.u32 2139095040, %v17347_v52 }
 0x493   : > { %v17369_v0 = vadd.s32 %v599_v60, %v595_v11  ;;  %v771_v37 = vor.u32 %v770_v4, %v769_v48  ;;  %vm778_vm6 = vcmp.lt.s32.totalorder %v17343_v14, 1  ;;  %v863_v34 = vand.u32 31, %v861_v12 }
 0x494   : > { %v698_v56 = vmul.u32 %v17285_v27, %v682_v40  ;;  %vm780_vm7 = vcmp.lt.s32.totalorder %v17343_v14, 3  ;;  %v787_v26 = vsel %vm781_vm5, %v774_v17, 920167782  ;;  %v791_v31 = vsel %vm781_vm5, %v777_v16, 1326507024 }
 0x495   : > { %v702_v21 = vsel %vm700_vm4, %v701_v28, %v17312_v35  ;;  %v754_v47 = vor.u32 8388608, %v17327_v13  ;;  %v762_v49 = vshrl.u32 %v20976_v42, %v761_v19  ;;  %v20248_v57 = vand.u32 2147483647, %v17193_v62 }
 0x496   : > { %vm779_vm8 = vcmp.lt.s32.totalorder %v17343_v14, 2  ;;  %v786_v27 = vsel %vm778_vm6, %v765_v22, %v17366_v32  ;;  %vm963_vm9 = vcmp.gt.s32.totalorder %v962_v46, 0  ;;  %v1059_v55 = vshrl.u32 %v1058_v10, 23 }
 0x497   : > { %v788_v1 = vsel %vm780_vm7, %v771_v37, %v787_v26  ;;  %v790_v35 = vsel %vm778_vm6, %v17366_v32, %v771_v37  ;;  %v792_v19 = vsel %vm780_vm7, %v774_v17, %v791_v31  ;;  %v17393_v13 = vsub.s32 32, %v863_v34 }
 0x498   : > { %v17395_v50 = vshrl.u32 %v498_v15, 30  ;;  %v17398_v45 = vadd.s32 536870912, %v17369_v0  ;;  %v17400_v5 = vadd.s32 %v702_v21, %v698_v56  ;;  %v17404_v41 = vsel %vm778_vm6, %v762_v49, %v765_v22 }
 0x499   : > { %v17406_v11 = vshll.u32 %v754_v47, 8  ;;  %v964_v48 = vsel %vm963_vm9, %v962_v46, 0  ;;  %v17410_v4 = vsel %vm779_vm8, %v786_v27, %v788_v1  ;;  %v17414_v15 = vsel %vm779_vm8, %v790_v35, %v792_v19  ;;  %v427_v27 = vpop.permute.xlu1 %426 }
 0x49a   : > { %v856_v60 = vand.u32 8388607, %v20248_v57  ;;  %v10821_v17 = vadd.s32 4294967169, %v1059_v55  ;;  %v875_v16 = vshll.u32 %v20978_v43, %v863_v34  ;;  %v876_v40 = vshrl.u32 %v20966_v44, %v17393_v13 }
 0x49b   : > { %v878_v28 = vshll.u32 %v20966_v44, %v863_v34  ;;  %v879_v22 = vshrl.u32 %v20971_v3, %v17393_v13  ;;  %v17424_v46 = vshrl.u32 %v861_v12, 5  ;;  %v866_v10 = vshll.u32 %v20976_v42, %v863_v34 }
 0x49c   : > { %v869_v56 = vshll.u32 %v20985_v23, %v863_v34  ;;  %v966_v26 = vand.u32 31, %v964_v48  ;;  %v867_v31 = vshrl.u32 %v20985_v23, %v17393_v13  ;;  %v870_v21 = vshrl.u32 %v20980_v9, %v17393_v13 }
 0x49d   : > { %v872_v47 = vshll.u32 %v20980_v9, %v863_v34  ;;  %v873_v49 = vshrl.u32 %v20978_v43, %v17393_v13  ;;  %v17437_v12 = vmul.u32.u64.low %v17406_v11, %v17414_v15  ;;  %v17438_v55 = vmul.u32.u64.high %v17406_v11, %v17414_v15, %v17437_v12 }
 0x49e   : > { %v1065_v35 = vadd.s32 1, %v10821_v17  ;;  %v17443_v19 = vmul.u32.u64.low %v17406_v11, %v17410_v4  ;;  %v17444_v57 = vmul.u32.u64.high %v17406_v11, %v17410_v4, %v17443_v19  ;;  %v877_v8 = vor.u32 %v876_v40, %v875_v16 }
 0x49f   : > { %v880_v34 = vor.u32 %v879_v22, %v878_v28  ;;  %v783_v59 = vsel %vm781_vm5, %v771_v37, 2102212464  ;;  %vm884_vm10 = vcmp.lt.s32.totalorder %v17424_v46, 4  ;;  %v17450_v7 = vsub.s32 32, %v966_v26 }
 0x4a0   : > { %v17453_v15 = vmul.f32 %v16742_v63, %v427_v27  ;;  %v857_v12 = vor.u32 8388608, %v856_v60  ;;  %v868_v17 = vor.u32 %v867_v31, %v866_v10  ;;  %v17455_v1 = vor.u32 %v870_v21, %v869_v56 }
 0x4a1   : > { %v874_v36 = vor.u32 %v873_v49, %v872_v47  ;;  %vm881_vm11 = vcmp.lt.s32.totalorder %v17424_v46, 1  ;;  %vm882_vm12 = vcmp.lt.s32.totalorder %v17424_v46, 2  ;;  %v20986_v4 = vand.u32 2147483647, %v17263_v25 }
 0x4a2   : > { %vm1066_vm13 = vcmp.gt.s32.totalorder %v1065_v35, 0  ;;  %vm883_vm14 = vcmp.lt.s32.totalorder %v17424_v46, 3  ;;  %v890_v37 = vsel %vm884_vm10, %v877_v8, 920167782  ;;  %v894_v63 = vsel %vm884_vm10, %v880_v34, 1326507024 }
 0x4a3   : > { %v959_v16 = vand.u32 8388607, %v20986_v4  ;;  %v978_v60 = vshll.u32 %v20978_v43, %v966_v26  ;;  %v979_v40 = vshrl.u32 %v20966_v44, %v17450_v7  ;;  %v981_v28 = vshll.u32 %v20966_v44, %v966_v26 }
 0x4a4   : > { %v982_v22 = vshrl.u32 %v20971_v3, %v17450_v7  ;;  %v1161_v10 = vand.u32 2139095040, %v17453_v15  ;;  %v889_v56 = vsel %vm881_vm11, %v868_v17, %v17455_v1  ;;  %v893_v31 = vsel %vm881_vm11, %v17455_v1, %v874_v36 }
 0x4a5   : > { %v17479_v21 = vshrl.u32 %v964_v48, 5  ;;  %v1067_v47 = vsel %vm1066_vm13, %v1065_v35, 0  ;;  %v891_v49 = vsel %vm883_vm14, %v874_v36, %v890_v37  ;;  %v895_v27 = vsel %vm883_vm14, %v877_v8, %v894_v63 }
 0x4a6   : > { %v969_v34 = vshll.u32 %v20976_v42, %v966_v26  ;;  %v970_v4 = vshrl.u32 %v20985_v23, %v17450_v7  ;;  %v972_v61 = vshll.u32 %v20985_v23, %v966_v26  ;;  %v973_v58 = vshrl.u32 %v20980_v9, %v17450_v7 }
 0x4a7   : > { %v975_v48 = vshll.u32 %v20980_v9, %v966_v26  ;;  %v976_v35 = vshrl.u32 %v20978_v43, %v17450_v7  ;;  %v980_v30 = vor.u32 %v979_v40, %v978_v60  ;;  %v983_v37 = vor.u32 %v982_v22, %v981_v28 }
 0x4a8   : > { %v1069_v33 = vand.u32 31, %v1067_v47  ;;  %v1162_v39 = vshrl.u32 %v1161_v10, 23  ;;  %v784_v8 = vsel %vm780_vm7, %v17366_v32, %v783_v59  ;;  %v17497_v63 = vshll.u32 %v857_v12, 8 }
 0x4a9   : > { %v960_v29 = vor.u32 8388608, %v959_v16  ;;  %vm987_vm15 = vcmp.lt.s32.totalorder %v17479_v21, 4  ;;  %v865_v6 = vshrl.u32 %v20976_v42, %v17393_v13  ;;  %v892_v26 = vsel %vm882_vm12, %v889_v56, %v891_v49 }
 0x4aa   : > { %v896_v60 = vsel %vm882_vm12, %v893_v31, %v895_v27  ;;  %v17506_v40 = vor.u32 %v970_v4, %v969_v34  ;;  %v17508_v28 = vor.u32 %v973_v58, %v972_v61  ;;  %v977_v22 = vor.u32 %v976_v35, %v975_v48 }
 0x4ab   : > { %vm984_vm0 = vcmp.lt.s32.totalorder %v17479_v21, 1  ;;  %vm986_vm1 = vcmp.lt.s32.totalorder %v17479_v21, 3  ;;  %v993_v59 = vsel %vm987_vm15, %v980_v30, 920167782  ;;  %v997_v32 = vsel %vm987_vm15, %v983_v37, 1326507024 }
 0x4ac   : > { %v17516_v13 = vsub.s32 32, %v1069_v33  ;;  %v10825_v12 = vadd.s32 4294967169, %v1162_v39  ;;  %v17521_v16 = vsel %vm779_vm8, %v17404_v41, %v784_v8  ;;  %v20271_v10 = vand.u32 2147483647, %v17347_v52 }
 0x4ad   : > { %v17524_v58 = vmul.u32.u64.low %v17497_v63, %v896_v60  ;;  %v17525_v61 = vmul.u32.u64.high %v17497_v63, %v896_v60, %v17524_v58  ;;  %v17529_v56 = vmul.u32.u64.low %v17497_v63, %v892_v26  ;;  %v17530_v31 = vmul.u32.u64.high %v17497_v63, %v892_v26, %v17529_v56 }
 0x4ae   : > { %vm985_vm2 = vcmp.lt.s32.totalorder %v17479_v21, 2  ;;  %v17534_v49 = vshll.u32 %v960_v29, 8  ;;  %v992_v39 = vsel %vm984_vm0, %v17506_v40, %v17508_v28  ;;  %v994_v14 = vsel %vm986_vm1, %v977_v22, %v993_v59 }
 0x4af   : > { %v996_v41 = vsel %vm984_vm0, %v17508_v28, %v977_v22  ;;  %v998_v27 = vsel %vm986_vm1, %v980_v30, %v997_v32  ;;  %v885_v34 = vsel %vm881_vm11, %v865_v6, %v868_v17  ;;  %v1081_v29 = vshll.u32 %v20978_v43, %v1069_v33 }
 0x4b0   : > { %v1082_v4 = vshrl.u32 %v20966_v44, %v17516_v13  ;;  %v1168_v48 = vadd.s32 1, %v10825_v12  ;;  %vm803_vm3 = vc.u32 %v17438_v55, %v17443_v19  ;;  %v886_v35 = vsel %vm884_vm10, %v874_v36, 2102212464 }
 0x4b1   : > { %v17556_v37 = vshrl.u32 %v1067_v47, 5  ;;  %v1084_v8 = vshll.u32 %v20966_v44, %v1069_v33  ;;  %v1085_v30 = vshrl.u32 %v20971_v3, %v17516_v13  ;;  %v995_v6 = vsel %vm985_vm2, %v992_v39, %v994_v14 }
 0x4b2   : > { %v999_v17 = vsel %vm985_vm2, %v996_v41, %v998_v27  ;;  %v1072_v26 = vshll.u32 %v20976_v42, %v1069_v33  ;;  %v1075_v60 = vshll.u32 %v20985_v23, %v1069_v33  ;;  %v1073_v36 = vshrl.u32 %v20985_v23, %v17516_v13 }
 0x4b3   : > { %v1076_v47 = vshrl.u32 %v20980_v9, %v17516_v13  ;;  %v1078_v59 = vshll.u32 %v20980_v9, %v1069_v33  ;;  %v1079_v32 = vshrl.u32 %v20978_v43, %v17516_v13  ;;  %v887_v12 = vsel %vm883_vm14, %v17455_v1, %v886_v35 }
 0x4b4   : > { %v1062_v58 = vand.u32 8388607, %v20271_v10  ;;  %v1083_v39 = vor.u32 %v1082_v4, %v1081_v29  ;;  %vm1169_vm4 = vcmp.gt.s32.totalorder %v1168_v48, 0  ;;  %v968_v14 = vshrl.u32 %v20976_v42, %v17450_v7 }
 0x4b5   : > { %v989_v41 = vsel %vm987_vm15, %v977_v22, 2102212464  ;;  %v1086_v27 = vor.u32 %v1085_v30, %v1084_v8  ;;  %vm1090_vm5 = vcmp.lt.s32.totalorder %v17556_v37, 4  ;;  %v1074_v29 = vor.u32 %v1073_v36, %v1072_v26 }
 0x4b6   : > { %v17585_v33 = vmul.u32.u64.low %v17534_v49, %v999_v17  ;;  %v17586_v25 = vmul.u32.u64.high %v17534_v49, %v999_v17, %v17585_v33  ;;  %v17589_v1 = vmul.u32.u64.low %v17534_v49, %v995_v6  ;;  %v17590_v35 = vmul.u32.u64.high %v17534_v49, %v995_v6, %v17589_v1 }
 0x4b7   : > { %v1077_v4 = vor.u32 %v1076_v47, %v1075_v60  ;;  %v1080_v10 = vor.u32 %v1079_v32, %v1078_v59  ;;  %v1170_v52 = vsel %vm1169_vm4, %v1168_v48, 0  ;;  %v804_v7 = vadd.s32 1, %v17444_v57 }
 0x4b8   : > { %vm1087_vm6 = vcmp.lt.s32.totalorder %v17556_v37, 1  ;;  %vm1089_vm7 = vcmp.lt.s32.totalorder %v17556_v37, 3  ;;  %v1096_v22 = vsel %vm1090_vm5, %v1083_v39, 920167782  ;;  %v888_v8 = vsel %vm882_vm12, %v885_v34, %v887_v12 }
 0x4b9   : > { %v907_v30 = vadd.s32 1, %v17530_v31  ;;  %v1063_v6 = vor.u32 8388608, %v1062_v58  ;;  %v1100_v17 = vsel %vm1090_vm5, %v1086_v27, 1326507024  ;;  %vm906_vm8 = vc.u32 %v17525_v61, %v17529_v56 }
 0x4ba   : > { %v988_v48 = vsel %vm984_vm0, %v968_v14, %v17506_v40  ;;  %v990_v26 = vsel %vm986_vm1, %v17508_v28, %v989_v41  ;;  %v1172_v60 = vand.u32 31, %v1170_v52  ;;  %v801_v46 = vmul.u32 %v17406_v11, %v17521_v16 }
 0x4bb   : > { %vm1088_vm9 = vcmp.lt.s32.totalorder %v17556_v37, 2  ;;  %v1095_v34 = vsel %vm1087_vm6, %v1074_v29, %v1077_v4  ;;  %v1097_v36 = vsel %vm1089_vm7, %v1080_v10, %v1096_v22  ;;  %v805_v40 = vsel %vm803_vm3, %v804_v7, %v17444_v57 }
 0x4bc   : > { %v904_v47 = vmul.u32 %v17497_v63, %v888_v8  ;;  %v1099_v28 = vsel %vm1087_vm6, %v1077_v4, %v1080_v10  ;;  %v1101_v11 = vsel %vm1089_vm7, %v1083_v39, %v1100_v17  ;;  %v908_v16 = vsel %vm906_vm8, %v907_v30, %v17530_v31 }
 0x4bd   : > { %v991_v59 = vsel %vm985_vm2, %v988_v48, %v990_v26  ;;  %v17630_v32 = vshll.u32 %v1063_v6, 8  ;;  %v500_v12 = vshll.u32 %v17395_v50, 30  ;;  %v17634_v58 = vshrl.u32 %v17398_v45, 30 }
 0x4be   : > { %v1098_v57 = vsel %vm1088_vm9, %v1095_v34, %v1097_v36  ;;  %v17638_v63 = vsub.s32 32, %v1172_v60  ;;  %v704_v14 = vadd.s32 536870912, %v17400_v5  ;;  %v17641_v39 = vadd.s32 %v805_v40, %v801_v46 }
 0x4bf   : > { %v1010_v31 = vadd.s32 1, %v17590_v35  ;;  %v1102_v21 = vsel %vm1088_vm9, %v1099_v28, %v1101_v11  ;;  %v17646_v41 = vadd.s32 %v908_v16, %v904_v47  ;;  %v1007_v27 = vmul.u32 %v17534_v49, %v991_v59 }
 0x4c0   : > { %vm1009_vm10 = vc.u32 %v17586_v25, %v17589_v1  ;;  %v1071_v45 = vshrl.u32 %v20976_v42, %v17516_v13  ;;  %v1092_v33 = vsel %vm1090_vm5, %v1080_v10, 2102212464  ;;  %v20276_v8 = vand.u32 2147483647, %v17453_v15 }
 0x4c1   : > { %v17656_v7 = vmul.u32.u64.low %v17630_v32, %v1098_v57  ;;  %v17657_v22 = vmul.u32.u64.high %v17630_v32, %v1098_v57, %v17656_v7  ;;  %v17662_v30 = vmul.u32.u64.low %v17630_v32, %v1102_v21  ;;  %v17663_v6 = vmul.u32.u64.high %v17630_v32, %v1102_v21, %v17662_v30 }
 0x4c2   : > { %v1184_v49 = vshll.u32 %v20978_v43, %v1172_v60  ;;  %v1185_v17 = vshrl.u32 %v20966_v44, %v17638_v63  ;;  %v1011_v13 = vsel %vm1009_vm10, %v1010_v31, %v17590_v35  ;;  %v17669_v48 = vshrl.u32 %v1170_v52, 5 }
 0x4c3   : > { %v1187_v10 = vshll.u32 %v20966_v44, %v1172_v60  ;;  %v1188_v26 = vshrl.u32 %v20971_v3, %v17638_v63  ;;  %v1091_v46 = vsel %vm1087_vm6, %v1071_v45, %v1074_v29  ;;  %v1093_v34 = vsel %vm1089_vm7, %v1077_v4, %v1092_v33 }
 0x4c4   : > { %v1175_v36 = vshll.u32 %v20976_v42, %v1172_v60  ;;  %v1178_v40 = vshll.u32 %v20985_v23, %v1172_v60  ;;  %v1176_v35 = vshrl.u32 %v20985_v23, %v17638_v63  ;;  %v1179_v52 = vshrl.u32 %v20980_v9, %v17638_v63 }
 0x4c5   : > { %v1181_v44 = vshll.u32 %v20980_v9, %v1172_v60  ;;  %v1182_v3 = vshrl.u32 %v20978_v43, %v17638_v63  ;;  %v17688_v29 = vsub.s32 %v17321_v20, %v500_v12  ;;  %v603_v4 = vshll.u32 %v17634_v58, 30 }
 0x4c6   : > { %v1186_v47 = vor.u32 %v1185_v17, %v1184_v49  ;;  %v807_v28 = vadd.s32 536870912, %v17641_v39  ;;  %v1165_v11 = vand.u32 8388607, %v20276_v8  ;;  %v1189_v23 = vor.u32 %v1188_v26, %v1187_v10 }
 0x4c7   : > { %vm1193_vm11 = vcmp.lt.s32.totalorder %v17669_v48, 4  ;;  %v17695_v16 = vshrl.u32 %v704_v14, 30  ;;  %v910_v9 = vadd.s32 536870912, %v17646_v41  ;;  %v1012_v60 = vadd.s32 %v1011_v13, %v1007_v27 }
 0x4c8   : > { %v1094_v43 = vsel %vm1088_vm9, %v1091_v46, %v1093_v34  ;;  %v1113_v20 = vadd.s32 1, %v17657_v22  ;;  %v1177_v59 = vor.u32 %v1176_v35, %v1175_v36  ;;  %v1180_v12 = vor.u32 %v1179_v52, %v1178_v40 }
 0x4c9   : > { %v1183_v57 = vor.u32 %v1182_v3, %v1181_v44  ;;  %vm1112_vm12 = vc.u32 %v17663_v6, %v17656_v7  ;;  %vm1190_vm13 = vcmp.lt.s32.totalorder %v17669_v48, 1  ;;  %vm1192_vm14 = vcmp.lt.s32.totalorder %v17669_v48, 3 }
 0x4ca   : > { %v1199_v14 = vsel %vm1193_vm11, %v1186_v47, 920167782  ;;  %v17708_v31 = vsub.s32 %v17369_v0, %v603_v4  ;;  %v17710_v37 = vshrl.u32 %v807_v28, 30  ;;  %v1166_v21 = vor.u32 8388608, %v1165_v11 }
 0x4cb   : > { %v1203_v27 = vsel %vm1193_vm11, %v1189_v23, 1326507024  ;;  %v503_v45 = vsub.s32 0, %v17688_v29  ;;  %v706_v33 = vshll.u32 %v17695_v16, 30  ;;  %v1013_v30 = vadd.s32 536870912, %v1012_v60 }
 0x4cc   : > { %v1110_v49 = vmul.u32 %v17630_v32, %v1094_v43  ;;  %v1114_v17 = vsel %vm1112_vm12, %v1113_v20, %v17657_v22  ;;  %vm1191_vm15 = vcmp.lt.s32.totalorder %v17669_v48, 2  ;;  %v1198_v0 = vsel %vm1190_vm13, %v1177_v59, %v1180_v12 }
 0x4cd   : > { %v1200_v13 = vsel %vm1192_vm14, %v1183_v57, %v1199_v14  ;;  %v17723_v10 = vshrl.u32 %v910_v9, 30  ;;  %v1202_v26 = vsel %vm1190_vm13, %v1180_v12, %v1183_v57  ;;  %v1204_v46 = vsel %vm1192_vm14, %v1186_v47, %v1203_v27 }
 0x4ce   : > { %v606_v32 = vsub.s32 0, %v17708_v31  ;;  %v809_v22 = vshll.u32 %v17710_v37, 30  ;;  %v1206_v34 = vshll.u32 %v1166_v21, 8  ;;  %v1115_v36 = vadd.s32 %v1114_v17, %v1110_v49 }
 0x4cf   : > { %v1201_v40 = vsel %vm1191_vm15, %v1198_v0, %v1200_v13  ;;  %v10798_v35 = vmin.u32 %v503_v45, %v17688_v29  ;;  %v17735_v52 = vsub.s32 %v17400_v5, %v706_v33  ;;  %v17737_v44 = vshrl.u32 %v1013_v30, 30 }
 0x4d0   : > { %v1205_v3 = vsel %vm1191_vm15, %v1202_v26, %v1204_v46  ;;  %v912_v4 = vshll.u32 %v17723_v10, 30  ;;  %v10802_v47 = vmin.u32 %v606_v32, %v17708_v31  ;;  %v17744_v28 = vsub.s32 %v17641_v39, %v809_v22 }
 0x4d1   : > { %v17746_v11 = vmul.u32.u64.low %v1206_v34, %v1201_v40  ;;  %v17747_v23 = vmul.u32.u64.high %v1206_v34, %v1201_v40, %v17746_v11  ;;  %v1116_v9 = vadd.s32 536870912, %v1115_v36  ;;  %v1174_v5 = vshrl.u32 %v20976_v42, %v17638_v63 }
 0x4d2   : > { %v17752_v43 = vmul.u32.u64.low %v1206_v34, %v1205_v3  ;;  %v17753_v20 = vmul.u32.u64.high %v1206_v34, %v1205_v3, %v17752_v43  ;;  %v505_v14 = vclz %v10798_v35  ;;  %v709_v21 = vsub.s32 0, %v17735_v52 }
 0x4d3   : > { %v1015_v27 = vshll.u32 %v17737_v44, 30  ;;  %v1195_v39 = vsel %vm1193_vm11, %v1183_v57, 2102212464  ;;  %v17760_v45 = vsub.s32 %v17646_v41, %v912_v4  ;;  %v608_v33 = vclz %v10802_v47 }
 0x4d4   : > { %v812_v30 = vsub.s32 0, %v17744_v28  ;;  %v17763_v49 = vshrl.u32 %v1116_v9, 30  ;;  %v1194_v42 = vsel %vm1190_vm13, %v1174_v5, %v1177_v59  ;;  %v1196_v63 = vsel %vm1192_vm14, %v1180_v12, %v1195_v39 }
 0x4d5   : > { %v10799_v17 = vadd.s32 4294967294, %v505_v14  ;;  %v10806_v0 = vmin.u32 %v709_v21, %v17735_v52  ;;  %v17770_v13 = vsub.s32 %v1012_v60, %v1015_v27  ;;  %v915_v57 = vsub.s32 0, %v17760_v45 }
 0x4d6   : > { %v10803_v41 = vadd.s32 4294967294, %v608_v33  ;;  %v1197_v26 = vsel %vm1191_vm15, %v1194_v42, %v1196_v63  ;;  %v1216_v46 = vadd.s32 1, %v17747_v23  ;;  %v10810_v32 = vmin.u32 %v812_v30, %v17744_v28 }
 0x4d7   : > { %v1118_v59 = vshll.u32 %v17763_v49, 30  ;;  %vm1215_vm0 = vc.u32 %v17753_v20, %v17746_v11  ;;  %vm10800_vm1 = vcmp.lt.s32.totalorder %v10799_v17, 0  ;;  %v711_v12 = vclz %v10806_v0 }
 0x4d8   : > { %v1018_v60 = vsub.s32 0, %v17770_v13  ;;  %v10814_v22 = vmin.u32 %v915_v57, %v17760_v45  ;;  %v1213_v40 = vmul.u32 %v1206_v34, %v1197_v26  ;;  %vm10804_vm2 = vcmp.lt.s32.totalorder %v10803_v41, 0 }
 0x4d9   : > { %v1217_v48 = vsel %vm1215_vm0, %v1216_v46, %v17747_v23  ;;  %v508_v35 = vsel %vm10800_vm1, 0, %v10799_v17  ;;  %v814_v3 = vclz %v10810_v32  ;;  %v17783_v4 = vsub.s32 %v1115_v36, %v1118_v59 }
 0x4da   : > { %v10807_v47 = vadd.s32 4294967294, %v711_v12  ;;  %v10818_v9 = vmin.u32 %v1018_v60, %v17770_v13  ;;  %v611_v5 = vsel %vm10804_vm2, 0, %v10803_v41  ;;  %v917_v43 = vclz %v10814_v22 }
 0x4db   : > { %v1218_v14 = vadd.s32 %v1217_v48, %v1213_v40  ;;  %v513_v21 = vsub.s32 4294967266, %v508_v35  ;;  %v10811_v27 = vadd.s32 4294967294, %v814_v3  ;;  %v1121_v39 = vsub.s32 0, %v17783_v4 }
 0x4dc   : > { %v616_v33 = vsub.s32 4294967266, %v611_v5  ;;  %vm10808_vm3 = vcmp.lt.s32.totalorder %v10807_v47, 0  ;;  %v1020_v34 = vclz %v10818_v9  ;;  %v10815_v30 = vadd.s32 4294967294, %v917_v43 }
 0x4dd   : > { %v1219_v42 = vadd.s32 536870912, %v1218_v14  ;;  %v493_v23 = vadd.s32 %v17142_v18, %v17206_v24  ;;  %v509_v36 = vsub.s32 32, %v508_v35  ;;  %v514_v63 = vadd.s32 127, %v513_v21 }
 0x4de   : > { %v596_v17 = vadd.s32 %v17249_v51, %v17269_v53  ;;  %v612_v0 = vsub.s32 32, %v611_v5  ;;  %v714_v57 = vsel %vm10808_vm3, 0, %v10807_v47  ;;  %vm10812_vm4 = vcmp.lt.s32.totalorder %v10811_v27, 0 }
 0x4df   : > { %v10822_v41 = vmin.u32 %v1121_v39, %v17783_v4  ;;  %v617_v26 = vadd.s32 127, %v616_v33  ;;  %v10819_v46 = vadd.s32 4294967294, %v1020_v34  ;;  %v510_v32 = vshll.u32 %v17688_v29, %v508_v35 }
 0x4e0   : > { %vm10816_vm5 = vcmp.lt.s32.totalorder %v10815_v30, 0  ;;  %v17793_v59 = vshrl.u32 %v1219_v42, 30  ;;  %v511_v12 = vshrl.u32 %v493_v23, %v509_v36  ;;  %v699_v24 = vadd.s32 %v17311_v54, %v17318_v2 }
 0x4e1   : > { %v719_v18 = vsub.s32 4294967266, %v714_v57  ;;  %v817_v60 = vsel %vm10812_vm4, 0, %v10811_v27  ;;  %v515_v22 = vshll.u32 %v514_v63, 23  ;;  %v613_v51 = vshll.u32 %v17708_v31, %v611_v5 }
 0x4e2   : > { %20987 = vst [vmem:[#allocation129_spill] sm:$0xff] %v17793_v59  ;;  %v614_v53 = vshrl.u32 %v596_v17, %v612_v0  ;;  %v1123_v40 = vclz %v10822_v41  ;;  %v618_v48 = vshll.u32 %v617_v26, 23  ;;  %v715_v3 = vsub.s32 32, %v714_v57 }
 0x4e3   : > { %v920_v47 = vsel %vm10816_vm5, 0, %v10815_v30  ;;  %vm10820_vm6 = vcmp.lt.s32.totalorder %v10819_v46, 0  ;;  %v822_v9 = vsub.s32 4294967266, %v817_v60  ;;  %v1221_v29 = vshll.u32 %v17793_v59, 30 }
 0x4e4   : > { %v512_v35 = vor.u32 %v511_v12, %v510_v32  ;;  %v720_v43 = vadd.s32 127, %v719_v18  ;;  %v516_v21 = vor.u32 4788187, %v515_v22  ;;  %v925_v39 = vsub.s32 4294967266, %v920_v47 }
 0x4e5   : > { %v1023_v33 = vsel %vm10820_vm6, 0, %v10819_v46  ;;  %v10823_v54 = vadd.s32 4294967294, %v1123_v40  ;;  %v615_v2 = vor.u32 %v614_v53, %v613_v51  ;;  %v619_v27 = vor.u32 4788187, %v618_v48 }
 0x4e6   : > { %v716_v34 = vshll.u32 %v17735_v52, %v714_v57  ;;  %v717_v31 = vshrl.u32 %v699_v24, %v715_v3  ;;  %v802_v5 = vadd.s32 %v17443_v19, %v17438_v55  ;;  %v818_v42 = vsub.s32 32, %v817_v60  ;;  %v17808_v24 = vpop.f32.mrf.mxu1 }
 0x4e7   : > { %v823_v30 = vadd.s32 127, %v822_v9  ;;  %v17802_v23 = vsub.s32 %v1218_v14, %v1221_v29  ;;  %v519_v36 = vcvt.s32.f32 %v512_v35  ;;  %v721_v63 = vshll.u32 %v720_v43, 23 }
 0x4e8   : > { %v1028_v17 = vsub.s32 4294967266, %v1023_v33  ;;  %v905_v0 = vadd.s32 %v17529_v56, %v17525_v61  ;;  %v921_v41 = vsub.s32 32, %v920_v47  ;;  %v926_v26 = vadd.s32 127, %v925_v39  ;;  %v17814_v35 = vpop.f32.mrf.mxu1 }
 0x4e9   : > { %vm10824_vm7 = vcmp.lt.s32.totalorder %v10823_v54, 0  ;;  %v517_v46 = vand.u32 2147483647, %v516_v21  ;;  %v620_v32 = vand.u32 2147483647, %v619_v27  ;;  %v622_v52 = vcvt.s32.f32 %v615_v2  ;;  %v17816_v43 = vpop.f32.mrf.mxu0  ;;  %v20988_v27 = vld [vmem:[#allocation150_spill] sm:$0xff] }
 0x4ea   : > { %v718_v57 = vor.u32 %v717_v31, %v716_v34  ;;  %v819_v12 = vshll.u32 %v17744_v28, %v817_v60  ;;  %v820_v55 = vshrl.u32 %v802_v5, %v818_v42  ;;  %v824_v19 = vshll.u32 %v823_v30, 23 }
 0x4eb   : > { %v1224_v14 = vsub.s32 0, %v17802_v23  ;;  %v1008_v18 = vadd.s32 %v17589_v1, %v17586_v25  ;;  %v1024_v22 = vsub.s32 32, %v1023_v33  ;;  %v1029_v61 = vadd.s32 127, %v1028_v17  ;;  %v17824_v17 = vpop.f32.mrf.mxu0 }
 0x4ec   : > { %v1126_v56 = vsel %vm10824_vm7, 0, %v10823_v54  ;;  %v722_v51 = vor.u32 4788187, %v721_v63  ;;  %v922_v53 = vshll.u32 %v17760_v45, %v920_v47  ;;  %v923_v40 = vshrl.u32 %v905_v0, %v921_v41  ;;  %v17822_v63 = vpop.f32.mrf.mxu1 }
 0x4ed   : > { %v927_v48 = vshll.u32 %v926_v26, 23  ;;  %v520_v3 = vmul.f32 %v519_v36, %v517_v46  ;;  %v623_v9 = vmul.f32 %v622_v52, %v620_v32  ;;  %v821_v28 = vor.u32 %v820_v55, %v819_v12  ;;  %v20989_v26 = vld [vmem:[#allocation164_spill] sm:$0xff] }
 0x4ee   : > { %v1131_v60 = vsub.s32 4294967266, %v1126_v56  ;;  %v10826_v29 = vmin.u32 %v1224_v14, %v17802_v23  ;;  %v825_v21 = vor.u32 4788187, %v824_v19  ;;  %v1025_v25 = vshll.u32 %v17770_v13, %v1023_v33 }
 0x4ef   : > { %v1026_v1 = vshrl.u32 %v1008_v18, %v1024_v22  ;;  %v1030_v39 = vshll.u32 %v1029_v61, 23  ;;  %v723_v54 = vand.u32 2147483647, %v722_v51  ;;  %v725_v2 = vcvt.s32.f32 %v718_v57  ;;  %v17842_v61 = vpop.f32.mrf.mxu1  ;;  %v17844_v51 = vpop.f32.mrf.mxu0 }
 0x4f0   : > { %v924_v45 = vor.u32 %v923_v40, %v922_v53  ;;  %v928_v47 = vor.u32 4788187, %v927_v48  ;;  %vm439_vm8 = vcmp.lt.s32.totalorder %v20988_v27, 0  ;;  %v521_v34 = vxor.u32 2147483648, %v520_v3 }
 0x4f1   : > { %v624_v31 = vxor.u32 2147483648, %v623_v9  ;;  %v1111_v5 = vadd.s32 %v17656_v7, %v17663_v6  ;;  %v1127_v42 = vsub.s32 32, %v1126_v56  ;;  %v1132_v30 = vadd.s32 127, %v1131_v60 }
 0x4f2   : > { %v1226_v36 = vclz %v10826_v29  ;;  %v826_v13 = vand.u32 2147483647, %v825_v21  ;;  %v828_v33 = vcvt.s32.f32 %v821_v28  ;;  %v1027_v0 = vor.u32 %v1026_v1, %v1025_v25  ;;  %v17855_v1 = vpop.f32.mrf.mxu1 }
 0x4f3   : > { %v1031_v41 = vor.u32 4788187, %v1030_v39  ;;  %vm542_vm9 = vcmp.lt.s32.totalorder %v20989_v26, 0  ;;  %v726_v46 = vmul.f32 %v725_v2, %v723_v54  ;;  %v929_v32 = vand.u32 2147483647, %v928_v47  ;;  %20997 = vst [vmem:[#allocation109_spill] sm:$0xff] %v17855_v1 }
 0x4f4   : > { %v931_v52 = vcvt.s32.f32 %v924_v45  ;;  %v20990_v57 = vand.u32 2147483647, %v20988_v27  ;;  %v522_v6 = vsel %vm439_vm8, %v521_v34, %v520_v3  ;;  %v20993_v12 = vand.u32 2147483647, %v20989_v26 }
 0x4f5   : > { %v1128_v19 = vshll.u32 %v17783_v4, %v1126_v56  ;;  %v1129_v14 = vshrl.u32 %v1111_v5, %v1127_v42  ;;  %v1133_v18 = vshll.u32 %v1132_v30, 23  ;;  %v10827_v22 = vadd.s32 4294967294, %v1226_v36  ;;  %v20996_v4 = vld [vmem:[#allocation155_spill] sm:$0xff] }
 0x4f6   : > { %vm17829_vm10 = vcmp.le.f32.partialorder %v20990_v57, 0.7853982  ;;  %vm17837_vm11 = vcmp.le.f32.partialorder %v20993_v12, 0.7853982  ;;  %v625_v53 = vsel %vm542_vm9, %v624_v31, %v623_v9  ;;  %v829_v40 = vmul.f32 %v828_v33, %v826_v13  ;;  %v17857_v9 = vpop.f32.mrf.mxu0  ;;  %v17876_v33 = vpop.f32.mrf.mxu1 }
 0x4f7   : > { %v1032_v48 = vand.u32 2147483647, %v1031_v41  ;;  %v1034_v3 = vcvt.s32.f32 %v1027_v0  ;;  %v525_v28 = vsel %vm17829_vm10, %v20988_v27, %v522_v6  ;;  %v727_v60 = vxor.u32 2147483648, %v726_v46  ;;  %21004 = vst [vmem:[#allocation140_spill] sm:$0xff] %v17876_v33 }
 0x4f8   : > { %v932_v29 = vmul.f32 %v931_v52, %v929_v32  ;;  %vm645_vm12 = vcmp.lt.s32.totalorder %v20996_v4, 0  ;;  %v628_v56 = vsel %vm17837_vm11, %v20989_v26, %v625_v53  ;;  %v1130_v21 = vor.u32 %v1129_v14, %v1128_v19  ;;  %v17878_v0 = vpop.f32.mrf.mxu0  ;;  %v21009_v19 = vld [vmem:[#allocation113_spill] sm:$0xff] }
 0x4f9   : > { %v1134_v25 = vor.u32 4788187, %v1133_v18  ;;  %vm10828_vm13 = vcmp.lt.s32.totalorder %v10827_v22, 0  ;;  %13614 = vcosq.f32 %v525_v28  ;;  %v20998_v39 = vand.u32 2147483647, %v20996_v4  ;;  %21005 = vst [vmem:[#allocation183_spill] sm:$0xff] %v17878_v0 }
 0x4fa   : > { %v830_v2 = vxor.u32 2147483648, %v829_v40  ;;  %v1035_v45 = vmul.f32 %v1034_v3, %v1032_v48  ;;  %13616 = vsinq.f32 %v525_v28  ;;  %v728_v47 = vsel %vm645_vm12, %v727_v60, %v726_v46  ;;  %v17907_v3 = vpop.f32.mrf.mxu1  ;;  %v17909_v28 = vpop.f32.mrf.mxu0 }
 0x4fb   : > { %vm17861_vm14 = vcmp.le.f32.partialorder %v20998_v39, 0.7853982  ;;  %vm748_vm15 = vcmp.lt.s32.totalorder %v16875_v38, 0  ;;  %v933_v34 = vxor.u32 2147483648, %v932_v29  ;;  %13618 = vsinq.f32 %v628_v56  ;;  %21013 = vst [vmem:[#allocation159_spill] sm:$0xff] %v17907_v3  ;;  %21014 = vst [vmem:[#allocation135_spill] sm:$0xff] %v17909_v28 }
 0x4fc   : > { %vm20277_vm0 = vcmp.lt.s32.totalorder %v17193_v62, 0  ;;  %v1229_v31 = vsel %vm10828_vm13, 0, %v10827_v22  ;;  %v523_v5 = vsub.s32 4, %v17395_v50  ;;  %13620 = vcosq.f32 %v628_v56 }
 0x4fd   : > { %v21001_v42 = vand.u32 2147483647, %v16875_v38  ;;  %v1135_v36 = vand.u32 2147483647, %v1134_v25  ;;  %v1137_v13 = vcvt.s32.f32 %v1130_v21  ;;  %v731_v41 = vsel %vm17861_vm14, %v20996_v4, %v728_v47 }
 0x4fe   : > { %v831_v46 = vsel %vm748_vm15, %v830_v2, %v829_v40  ;;  %v1036_v32 = vxor.u32 2147483648, %v1035_v45  ;;  %v626_v52 = vsub.s32 4, %v17634_v58  ;;  %v21006_v57 = vand.u32 2147483647, %v17193_v62 }
 0x4ff   : > { %vm17872_vm1 = vcmp.le.f32.partialorder %v21001_v42, 0.7853982  ;;  %v934_v12 = vsel %vm20277_vm0, %v933_v34, %v932_v29  ;;  %vm20275_vm3 = vcmp.lt.s32.totalorder %v21009_v19, 0  ;;  %v1234_v14 = vsub.s32 4294967266, %v1229_v31  ;;  %v17925_v34 = vpop.f32.mrf.mxu1 }
 0x500   : > { %vm17888_vm2 = vcmp.le.f32.partialorder %v21006_v57, 0.7853982  ;;  %v524_v18 = vsel %vm439_vm8, %v523_v5, %v17395_v50  ;;  %13622 = vcosq.f32 %v731_v41  ;;  %v834_v22 = vsel %vm17872_vm1, %v16875_v38, %v831_v46  ;;  %21015 = vst [vmem:[#allocation170_spill] sm:$0xff] %v17925_v34 }
 0x501   : > { %v21010_v53 = vand.u32 2147483647, %v21009_v19  ;;  %v1138_v48 = vmul.f32 %v1137_v13, %v1135_v36  ;;  %13624 = vsinq.f32 %v731_v41  ;;  %v937_v50 = vsel %vm17888_vm2, %v17193_v62, %v934_v12 }
 0x502   : > { %v1037_v60 = vsel %vm20275_vm3, %v1036_v32, %v1035_v45  ;;  %v627_v29 = vsel %vm542_vm9, %v626_v52, %v17634_v58  ;;  %v1214_v56 = vadd.s32 %v17746_v11, %v17753_v20  ;;  %v1230_v21 = vsub.s32 32, %v1229_v31  ;;  %v17927_v45 = vpop.f32.mrf.mxu0  ;;  %v21017_v11 = vld [vmem:[#allocation88_spill] sm:$0xff] }
 0x503   : > { %vm17903_vm4 = vcmp.le.f32.partialorder %v21010_v53, 0.7853982  ;;  %v1235_v25 = vadd.s32 127, %v1234_v14  ;;  %v526_v39 = vsel %vm17829_vm10, 0, %v524_v18  ;;  %13626 = vcosq.f32 %v834_v22  ;;  %21016 = vst [vmem:[#allocation182_spill] sm:$0xff] %v17927_v45 }
 0x504   : > { %13628 = vsinq.f32 %v834_v22  ;;  %v1139_v2 = vxor.u32 2147483648, %v1138_v48  ;;  %v629_v47 = vsel %vm17837_vm11, 0, %v627_v29  ;;  %v1040_v58 = vsel %vm17903_vm4, %v21009_v19, %v1037_v60  ;;  %v17947_v12 = vpop.f32.mrf.mxu0 }
 0x505   : > { %13630 = vcosq.f32 %v937_v50  ;;  %vm20274_vm5 = vcmp.lt.s32.totalorder %v21017_v11, 0  ;;  %v1354_v20 = vadd.s32 3, %v526_v39  ;;  %v1231_v5 = vshll.u32 %v17802_v23, %v1229_v31  ;;  %21022 = vst [vmem:[#allocation136_spill] sm:$0xff] %v17947_v12 }
 0x506   : > { %v13615_v7 = vpop.eup %13614  ;;  %v1232_v42 = vshrl.u32 %v1214_v56, %v1230_v21  ;;  %v1236_v36 = vshll.u32 %v1235_v25, 23  ;;  %v729_v55 = vsub.s32 4, %v17695_v16  ;;  %v17935_v13 = vpop.f32.mrf.mxu1  ;;  %13632 = vsinq.f32 %v937_v50 }
 0x507   : > { %v13617_v41 = vpop.eup %13616  ;;  %v1458_v46 = vadd.s32 3, %v629_v47  ;;  %13634 = vcosq.f32 %v1040_v58  ;;  %v21018_v52 = vand.u32 2147483647, %v21017_v11  ;;  %v21019_v57 = vmov 0 }
 0x508   : > { %v13619_v32 = vpop.eup %13618  ;;  %v1140_v23 = vsel %vm20274_vm5, %v1139_v2, %v1138_v48  ;;  %v17945_v31 = vand.u32 3, %v526_v39  ;;  %13636 = vsinq.f32 %v1040_v58  ;;  %v17949_v18 = vand.u32 3, %v1354_v20  ;;  %v17956_v56 = vpop.f32.mrf.mxu1 }
 0x509   : > { %vm17939_vm6 = vcmp.le.f32.partialorder %v21018_v52, 0.7853982  ;;  %v13621_v14 = vpop.eup %13620  ;;  %v17951_v22 = vand.u32 3, %v629_v47  ;;  %v1233_v53 = vor.u32 %v1232_v42, %v1231_v5  ;;  %v1237_v50 = vor.u32 4788187, %v1236_v36 }
 0x50a   : > { %v21020_v57 = vsel %vm17939_vm6, 4294967295, %v21019_v57  ;;  %v533_v60 = vxor.u32 2147483648, %v13617_v41  ;;  %v730_v29 = vsel %vm645_vm12, %v729_v55, %v17695_v16  ;;  %v17963_v21 = vsel %vm17939_vm6, %v21017_v11, %v1140_v23 }
 0x50b   : > { %21021 = vst [vmem:[#allocation122_spill] sm:$0xff] %v21020_v57  ;;  %v536_v25 = vxor.u32 2147483648, %v13615_v7  ;;  %v636_v39 = vxor.u32 2147483648, %v13619_v32  ;;  %v1459_v2 = vand.u32 3, %v1458_v46  ;;  %vm531_vm7 = vcmp.lt.s32.totalorder %v17945_v31, 2  ;;  %v17979_v55 = vpop.f32.mrf.mxu1 }
 0x50c   : > { %vm532_vm8 = vcmp.eq.s32.totalorder %v17945_v31, 0  ;;  %vm535_vm9 = vcmp.eq.s32.totalorder %v17945_v31, 2  ;;  %v639_v47 = vxor.u32 2147483648, %v13621_v14  ;;  %vm1357_vm10 = vcmp.eq.s32.totalorder %v17949_v18, 0  ;;  %21023 = vst [vmem:[#allocation152_spill] sm:$0xff] %v17979_v55 }
 0x50d   : > { %v17968_v16 = vpop.eup %13622  ;;  %vm1360_vm11 = vcmp.eq.s32.totalorder %v17949_v18, 2  ;;  %vm635_vm12 = vcmp.eq.s32.totalorder %v17951_v22, 0  ;;  %v732_v58 = vsel %vm17861_vm14, 0, %v730_v29  ;;  %v1238_v5 = vand.u32 2147483647, %v1237_v50 }
 0x50e   : > { %v17975_v20 = vpop.eup %13624  ;;  %v1240_v42 = vcvt.s32.f32 %v1233_v53  ;;  %vm638_vm13 = vcmp.eq.s32.totalorder %v17951_v22, 2  ;;  %v832_v36 = vsub.s32 4, %v17710_v37  ;;  %v534_v52 = vsel %vm532_vm8, %v13615_v7, %v533_v60 }
 0x50f   : > { %v537_v23 = vsel %vm535_vm9, %v536_v25, %v13617_v41  ;;  %vm1461_vm5 = vcmp.eq.s32.totalorder %v1459_v2, 0  ;;  %vm1464_vm3 = vcmp.eq.s32.totalorder %v1459_v2, 2  ;;  %vm1356_vm14 = vcmp.lt.s32.totalorder %v17949_v18, 2 }
 0x510   : > { %v17958_v48 = vpop.f32.mrf.mxu0  ;;  %v17983_v8 = vpop.eup %13626  ;;  %v1359_v54 = vsel %vm1357_vm10, %v13615_v7, %v533_v60  ;;  %v1362_v53 = vsel %vm1360_vm11, %v536_v25, %v13617_v41  ;;  %v736_v50 = vand.u32 3, %v732_v58  ;;  %vm634_vm0 = vcmp.lt.s32.totalorder %v17951_v22, 2 }
 0x511   : > { %v17990_v29 = vpop.eup %13628  ;;  %v637_v3 = vsel %vm635_vm12, %v13621_v14, %v636_v39  ;;  %v640_v45 = vsel %vm638_vm13, %v639_v47, %v13619_v32  ;;  %vm1460_vm8 = vcmp.lt.s32.totalorder %v1459_v2, 2  ;;  %v1241_v12 = vmul.f32 %v1240_v42, %v1238_v5  ;;  %v18002_v60 = vpop.f32.mrf.mxu1 }
 0x512   : > { %v17981_v46 = vpop.f32.mrf.mxu0  ;;  %v17997_v34 = vpop.eup %13630  ;;  %v1463_v1 = vsel %vm1461_vm5, %v13621_v14, %v636_v39  ;;  %v1466_v7 = vsel %vm1464_vm3, %v639_v47, %v13619_v32  ;;  %v833_v41 = vsel %vm748_vm15, %v832_v36, %v17710_v37  ;;  %21024 = vst [vmem:[#allocation185_spill] sm:$0xff] %v18002_v60  ;;  %v21025_v0 = vand.u32 2147483647, %v17453_v15 }
 0x513   : > { %v739_v33 = vxor.u32 2147483648, %v17975_v20  ;;  %v742_v5 = vxor.u32 2147483648, %v17968_v16  ;;  %v1562_v14 = vadd.s32 3, %v732_v58  ;;  %v935_v32 = vsub.s32 4, %v17723_v10  ;;  %v18015_v39 = vpop.eup %13632  ;;  %v18033_v57 = vpop.f32.mrf.mxu1 }
 0x514   : > { %vm18008_vm9 = vcmp.le.f32.partialorder %v21025_v0, 0.7853982  ;;  %vm529_vm15 = vweird.f32 %v20988_v27  ;;  %vm632_vm3 = vweird.f32 %v20989_v26  ;;  %vm738_vm5 = vcmp.eq.s32.totalorder %v736_v50, 0  ;;  %v18019_v37 = vpop.eup %13634 }
 0x515   : > { %vm741_vm10 = vcmp.eq.s32.totalorder %v736_v50, 2  ;;  %13638 = vcosq.f32 %v17963_v21  ;;  %v538_v0 = vsel %vm531_vm7, %v534_v52, %v537_v23  ;;  %v1363_v47 = vsel %vm1356_vm14, %v1359_v54, %v1362_v53  ;;  %v18028_v42 = vpop.eup %13636  ;;  %v18065_v27 = vpop.f32.mrf.mxu1 }
 0x516   : > { %v18004_v25 = vpop.f32.mrf.mxu0  ;;  %v835_v58 = vsel %vm17872_vm1, 0, %v833_v41  ;;  %v1242_v36 = vxor.u32 2147483648, %v1241_v12  ;;  %v641_v60 = vsel %vm634_vm0, %v637_v3, %v640_v45  ;;  %v1467_v28 = vsel %vm1460_vm8, %v1463_v1, %v1466_v7 }
 0x517   : > { %vm737_vm11 = vcmp.lt.s32.totalorder %v736_v50, 2  ;;  %v740_v31 = vsel %vm738_vm5, %v17968_v16, %v739_v33  ;;  %v743_v18 = vsel %vm741_vm10, %v742_v5, %v17975_v20  ;;  %v1563_v52 = vand.u32 3, %v1562_v14 }
 0x518   : > { %v18035_v59 = vpop.f32.mrf.mxu0  ;;  %vm21028_vm1 = vcmp.lt.s32.totalorder %v17193_v62, 0  ;;  %13640 = vsinq.f32 %v17963_v21  ;;  %vm1160_vm0 = vcmp.lt.s32.totalorder %v17453_v15, 0  ;;  %v839_v3 = vand.u32 3, %v835_v58 }
 0x519   : > { %v936_v30 = vsel %vm21028_vm1, %v935_v32, %v17723_v10  ;;  %v1666_v1 = vadd.s32 3, %v835_v58  ;;  %v18046_v45 = vsel %vm529_vm15, nan, %v538_v0  ;;  %v18050_v22 = vsel %vm529_vm15, nan, %v1363_v47  ;;  %v18083_v0 = vpop.f32.mrf.mxu1 }
 0x51a   : > { %v18054_v2 = vsel %vm632_vm3, nan, %v641_v60  ;;  %vm735_vm7 = vweird.f32 %v20996_v4  ;;  %v18059_v10 = vsel %vm632_vm3, nan, %v1467_v28  ;;  %v744_v21 = vsel %vm737_vm11, %v740_v31, %v743_v18 }
 0x51b   : > { %v842_v23 = vxor.u32 2147483648, %v17990_v29  ;;  %v938_v54 = vsel %vm17888_vm2, 0, %v936_v30  ;;  %v1243_v7 = vsel %vm1160_vm0, %v1242_v36, %v1241_v12  ;;  %vm1565_vm12 = vcmp.eq.s32.totalorder %v1563_v52, 0 }
 0x51c   : > { %v18067_v53 = vpop.f32.mrf.mxu0  ;;  %vm1568_vm13 = vcmp.eq.s32.totalorder %v1563_v52, 2  ;;  %v845_v26 = vxor.u32 2147483648, %v17983_v8  ;;  %vm841_vm14 = vcmp.eq.s32.totalorder %v839_v3, 0  ;;  %vm844_vm8 = vcmp.eq.s32.totalorder %v839_v3, 2 }
 0x51d   : > { %v1667_v28 = vand.u32 3, %v1666_v1  ;;  %v1038_v50 = vsub.s32 4, %v17737_v44  ;;  %v18075_v6 = vsel %vm735_vm7, nan, %v744_v21  ;;  %vm838_vm2 = vweird.f32 %v16875_v38  ;;  %v18099_v1 = vpop.f32.mrf.mxu1 }
 0x51e   : > { %v942_v41 = vand.u32 3, %v938_v54  ;;  %v1770_v60 = vadd.s32 3, %v938_v54  ;;  %v1246_v12 = vsel %vm18008_vm9, %v17453_v15, %v1243_v7  ;;  %vm1564_vm15 = vcmp.lt.s32.totalorder %v1563_v52, 2  ;;  %v18085_v47 = vpop.f32.mrf.mxu0 }
 0x51f   : > { %v1567_v14 = vsel %vm1565_vm12, %v17968_v16, %v739_v33  ;;  %v1570_v32 = vsel %vm1568_vm13, %v742_v5, %v17975_v20  ;;  %vm840_vm3 = vcmp.lt.s32.totalorder %v839_v3, 2  ;;  %v843_v58 = vsel %vm841_vm14, %v17983_v8, %v842_v23 }
 0x520   : > { %v846_v36 = vsel %vm844_vm8, %v845_v26, %v17990_v29  ;;  %v945_v31 = vxor.u32 2147483648, %v18015_v39  ;;  %vm1669_vm5 = vcmp.eq.s32.totalorder %v1667_v28, 0  ;;  %vm1672_vm10 = vcmp.eq.s32.totalorder %v1667_v28, 2 }
 0x521   : > { %v948_v18 = vxor.u32 2147483648, %v17997_v34  ;;  %vm21029_vm11 = vcmp.lt.s32.totalorder %v21009_v19, 0  ;;  %vm944_vm1 = vcmp.eq.s32.totalorder %v942_v41, 0  ;;  %vm947_vm12 = vcmp.eq.s32.totalorder %v942_v41, 2  ;;  %v18101_v21 = vpop.f32.mrf.mxu0 }
 0x522   : > { %v1039_v33 = vsel %vm21029_vm11, %v1038_v50, %v17737_v44  ;;  %v1771_v16 = vand.u32 3, %v1770_v60  ;;  %v6889_v20 = vadd.f32 %v17808_v24, %v17816_v43  ;;  %v18096_v5 = vpop.eup %13638  ;;  %13642 = vcosq.f32 %v1246_v12 }
 0x523   : > { %v1571_v30 = vsel %vm1564_vm15, %v1567_v14, %v1570_v32  ;;  %v847_v3 = vsel %vm840_vm3, %v843_v58, %v846_v36  ;;  %vm1668_vm13 = vcmp.lt.s32.totalorder %v1667_v28, 2  ;;  %v1671_v54 = vsel %vm1669_vm5, %v17983_v8, %v842_v23  ;;  %v18127_v23 = vpop.f32.mrf.mxu0 }
 0x524   : > { %v1041_v44 = vsel %vm17903_vm4, 0, %v1039_v33  ;;  %v6883_v7 = vadd.f32 %v17814_v35, %v17824_v17  ;;  %v7036_v24 = vadd.f32 %v17958_v48, %v6889_v20  ;;  %v1674_v43 = vsel %vm1672_vm10, %v845_v26, %v17990_v29 }
 0x525   : > { %vm943_vm14 = vcmp.lt.s32.totalorder %v942_v41, 2  ;;  %v946_v52 = vsel %vm944_vm1, %v17997_v34, %v945_v31  ;;  %v949_v50 = vsel %vm947_vm12, %v948_v18, %v18015_v39  ;;  %v18115_v8 = vpop.eup %13640  ;;  %13644 = vsinq.f32 %v1246_v12 }
 0x526   : > { %vm1773_vm4 = vcmp.eq.s32.totalorder %v1771_v16, 0  ;;  %vm1776_vm8 = vcmp.eq.s32.totalorder %v1771_v16, 2  ;;  %v7029_v35 = vadd.f32 %v17981_v46, %v6883_v7  ;;  %v18120_v17 = vsel %vm735_vm7, nan, %v1571_v30  ;;  %v21031_v30 = vld [vmem:[#allocation129_spill] sm:$0xff] }
 0x527   : > { %v18124_v40 = vsel %vm838_vm2, nan, %v847_v3  ;;  %v1874_v48 = vadd.s32 3, %v1041_v44  ;;  %v1141_v29 = vsub.s32 4, %v17763_v49  ;;  %v1675_v26 = vsel %vm1668_vm13, %v1671_v54, %v1674_v43 }
 0x528   : > { %vm941_vm15 = vweird.f32 %v17193_v62  ;;  %v950_v12 = vsel %vm943_vm14, %v946_v52, %v949_v50  ;;  %v7175_v46 = vadd.f32 %v17935_v13, %v7036_v24  ;;  %vm1772_vm3 = vcmp.lt.s32.totalorder %v1771_v16, 2 }
 0x529   : > { %v1775_v4 = vsel %vm1773_vm4, %v17997_v34, %v945_v31  ;;  %v1778_v14 = vsel %vm1776_vm8, %v948_v18, %v18015_v39  ;;  %v18135_v32 = vand.u32 3, %v1041_v44  ;;  %v6901_v33 = vadd.f32 %v17822_v63, %v17844_v51 }
 0x52a   : > { %v6895_v28 = vadd.f32 %v17842_v61, %v17857_v9  ;;  %v7167_v41 = vadd.f32 %v17956_v56, %v7029_v35  ;;  %v18144_v13 = vsel %vm838_vm2, nan, %v1675_v26  ;;  %v1048_v34 = vxor.u32 2147483648, %v18028_v42  ;;  %v21035_v35 = vld [vmem:[#allocation152_spill] sm:$0xff] }
 0x52b   : > { %v1875_v39 = vand.u32 3, %v1874_v48  ;;  %vm21030_vm7 = vcmp.lt.s32.totalorder %v21017_v11, 0  ;;  %v18152_v63 = vsel %vm941_vm15, nan, %v950_v12  ;;  %v7050_v61 = vadd.f32 %v18004_v25, %v6901_v33  ;;  %v21034_v25 = vld [vmem:[#allocation140_spill] sm:$0xff]  ;;  %v21037_v12 = vld [vmem:[#allocation99_spill] sm:$0xff] }
 0x52c   : > { %v1142_v31 = vsel %vm21030_vm7, %v1141_v29, %v17763_v49  ;;  %v7043_v51 = vadd.f32 %v18035_v59, %v6895_v28  ;;  %v1779_v38 = vsel %vm1772_vm3, %v1775_v4, %v1778_v14  ;;  %vm1046_vm2 = vcmp.lt.s32.totalorder %v18135_v32, 2  ;;  %v21033_v59 = vld [vmem:[#allocation135_spill] sm:$0xff]  ;;  %v21036_v29 = vld [vmem:[#allocation185_spill] sm:$0xff] }
 0x52d   : > { %v1051_v56 = vxor.u32 2147483648, %v18019_v37  ;;  %v1244_v3 = vsub.s32 4, %v21031_v30  ;;  %vm1047_vm5 = vcmp.eq.s32.totalorder %v18135_v32, 0  ;;  %v1144_v44 = vsel %vm17939_vm6, 0, %v1142_v31  ;;  %v21038_v14 = vld [vmem:[#allocation183_spill] sm:$0xff] }
 0x52e   : > { %v12752_v60 = vpop.f32.mrf.mxu1  ;;  %vm1050_vm10 = vcmp.eq.s32.totalorder %v18135_v32, 2  ;;  %vm1877_vm11 = vcmp.eq.s32.totalorder %v1875_v39, 0  ;;  %vm1880_vm1 = vcmp.eq.s32.totalorder %v1875_v39, 2  ;;  %v6907_v16 = vadd.f32 %v21034_v25, %v21033_v59  ;;  %v21045_v32 = vld [vmem:[#allocation159_spill] sm:$0xff] }
 0x52f   : > { %v18166_v52 = vpop.eup %13642  ;;  %v7191_v48 = vadd.f32 %v21035_v35, %v7050_v61  ;;  %v7183_v26 = vadd.f32 %v21036_v29, %v7043_v51  ;;  %v1245_v4 = vsel %vm1160_vm0, %v1244_v3, %v21031_v30  ;;  %vm1044_vm6 = vweird.f32 %v21009_v19 }
 0x530   : > { %v7470_v58 = vpop.f32.mrf.mxu1  ;;  %v7057_v33 = vadd.f32 %v18085_v47, %v6907_v16  ;;  %v1052_v30 = vsel %vm1050_vm10, %v1051_v56, %v18028_v42  ;;  %vm1876_vm0 = vcmp.lt.s32.totalorder %v1875_v39, 2  ;;  %v1879_v47 = vsel %vm1877_vm11, %v18019_v37, %v1048_v34 }
 0x531   : > { %v1882_v3 = vsel %vm1880_vm1, %v1051_v56, %v18028_v42  ;;  %v18198_v16 = vsel %vm941_vm15, nan, %v1779_v38  ;;  %v21041_v42 = vld [vmem:[#allocation136_spill] sm:$0xff]  ;;  %v21042_v56 = vld [vmem:[#allocation170_spill] sm:$0xff]  ;;  %vm1147_vm10 = vweird.f32 %v21017_v11  ;;  %vm1250_vm1 = vweird.f32 %v17453_v15 }
 0x532   : > { %v18181_v51 = vpop.eup %13644  ;;  %v1883_v38 = vsel %vm1876_vm0, %v1879_v47, %v1882_v3 }
 0x533   : > { %v12755_v54 = vpop.f32.mrf.mxu1 }
 0x535   : > { %v7482_v28 = vpop.f32.mrf.mxu1 }
 0x538   : > { %v12708_v36 = vpop.f32.mrf.mxu0 }
 0x539   : > { %v7348_v20 = vadd.f32 %v12708_v36, %v7175_v46  ;;  %v1978_v46 = vadd.s32 3, %v1144_v44 }
 0x53a   : > { %v7341_v18 = vpop.f32.mrf.mxu0 }
 0x53b   : > { %v7342_v9 = vadd.f32 %v7341_v18, %v7167_v41  ;;  %v7477_v7 = vadd.f32 %v12752_v60, %v7348_v20  ;;  %v6566_v60 = vmul.f32 %v21037_v12, %v18046_v45  ;;  %v1148_v12 = vand.u32 3, %v1144_v44 }
 0x53d   : > { %v7471_v24 = vadd.f32 %v7470_v58, %v7342_v9  ;;  %v21039_v58 = vld [vmem:[#allocation109_spill] sm:$0xff]  ;;  %v7517_v41 = vmul.f32 %v7477_v7, %v18059_v10  ;;  %v1049_v9 = vsel %vm1047_vm5, %v18019_v37, %v1048_v34  ;;  %v21040_v7 = vld [vmem:[#allocation132_spill] sm:$0xff]  ;;  %v12758_v37 = vpop.f32.mrf.mxu1  ;;  %v7199_v34 = vadd.f32 %v18065_v27, %v7057_v33  ;;  %v21043_v27 = vld [vmem:[#allocation138_spill] sm:$0xff] }
 0x53e   : > { %v12711_v43 = vpop.f32.mrf.mxu0  ;;  %v6913_v36 = vadd.f32 %v21039_v58, %v21038_v14  ;;  %v1053_v62 = vsel %vm1046_vm2, %v1049_v9, %v1052_v30  ;;  %v21044_v58 = vld [vmem:[#allocation182_spill] sm:$0xff]  ;;  %vm1150_vm13 = vcmp.eq.s32.totalorder %v1148_v12, 0  ;;  %vm1153_vm14 = vcmp.eq.s32.totalorder %v1148_v12, 2 }
 0x53f   : > { %v7516_v50 = vmul.f32 %v7471_v24, %v18050_v22  ;;  %v7360_v31 = vadd.f32 %v12711_v43, %v7191_v48  ;;  %v6567_v24 = vmul.f32 %v21040_v7, %v18054_v2  ;;  %v1979_v43 = vand.u32 3, %v1978_v46  ;;  %v7494_v39 = vpop.f32.mrf.mxu1  ;;  %v21047_v9 = vld [vmem:[#allocation146_spill] sm:$0xff] }
 0x540   : > { %v7353_v20 = vpop.f32.mrf.mxu0  ;;  %v7064_v49 = vadd.f32 %v18067_v53, %v6913_v36  ;;  %v6919_v53 = vadd.f32 %v21042_v56, %v21041_v42  ;;  %v6925_v36 = vadd.f32 %v21045_v32, %v21044_v58  ;;  %v6569_v30 = vmul.f32 %v21047_v9, %v18124_v40 }
 0x541   : > { %v7354_v18 = vadd.f32 %v7353_v20, %v7183_v26  ;;  %v7524_v61 = vadd.f32 %v7516_v50, %v6566_v60  ;;  %v1247_v50 = vsel %vm18008_vm9, 0, %v1245_v4  ;;  %v7525_v35 = vadd.f32 %v7517_v41, %v6567_v24  ;;  %v12761_v24 = vpop.f32.mrf.mxu1 }
 0x542   : > { %v7489_v48 = vadd.f32 %v12755_v54, %v7360_v31  ;;  %v2082_v55 = vadd.s32 3, %v1247_v50  ;;  %v7071_v46 = vadd.f32 %v18127_v23, %v6919_v53  ;;  %v6568_v4 = vmul.f32 %v21043_v27, %v18075_v6  ;;  %v21048_v53 = vld [vmem:[#allocation143_spill] sm:$0xff] }
 0x543   : > { %v7483_v59 = vadd.f32 %v7482_v28, %v7354_v18  ;;  %v12714_v25 = vpop.f32.mrf.mxu0  ;;  %7532 = vxpose.xlu0.b32.start [1/8] (short) %v7524_v61, 128  ;;  %v7207_v14 = vadd.f32 %v18033_v57, %v7064_v49  ;;  %v1151_v54 = vxor.u32 2147483648, %v18115_v8  ;;  %vm1981_vm9 = vcmp.eq.s32.totalorder %v1979_v43, 0 }
 0x544   : > { %vm1984_vm12 = vcmp.eq.s32.totalorder %v1979_v43, 2  ;;  %v7519_v44 = vmul.f32 %v7489_v48, %v18144_v13  ;;  %v18219_v41 = vsel %vm1044_vm6, nan, %v1883_v38  ;;  %v1154_v57 = vxor.u32 2147483648, %v18096_v5 }
 0x545   : > { %v7518_v29 = vmul.f32 %v7483_v59, %v18120_v17  ;;  %v7365_v26 = vpop.f32.mrf.mxu0  ;;  %v7372_v20 = vadd.f32 %v12714_v25, %v7207_v14  ;;  %21046 = vst [vmem:[#allocation107_spill] sm:$0xff] %v18219_v41  ;;  %v2083_v18 = vand.u32 3, %v2082_v55  ;;  %v7078_v61 = vadd.f32 %v18101_v21, %v6925_v36  ;;  %v21053_v36 = vld [vmem:[#allocation145_spill] sm:$0xff] }
 0x546   : > { %v7366_v60 = vadd.f32 %v7365_v26, %v7199_v34  ;;  %v7215_v47 = vadd.f32 %v18099_v1, %v7071_v46  ;;  %vm1980_vm4 = vcmp.lt.s32.totalorder %v1979_v43, 2  ;;  %v1983_v3 = vsel %vm1981_vm9, %v18096_v5, %v1151_v54  ;;  %v21050_v46 = vld [vmem:[#allocation151_spill] sm:$0xff] }
 0x547   : > { %7533 = vxpose.xlu0.b32.cont [2/8] (short) %v7525_v35, 128  ;;  %v7526_v28 = vadd.f32 %v7518_v29, %v6568_v4  ;;  %v1986_v49 = vsel %vm1984_vm12, %v1154_v57, %v18115_v8  ;;  %v1251_v7 = vand.u32 3, %v1247_v50  ;;  %v7527_v59 = vadd.f32 %v7519_v44, %v6569_v30 }
 0x548   : > { %v12717_v33 = vpop.f32.mrf.mxu0  ;;  %v7495_v23 = vadd.f32 %v7494_v39, %v7366_v60  ;;  %v7501_v25 = vadd.f32 %v12758_v37, %v7372_v20  ;;  %vm1149_vm8 = vcmp.lt.s32.totalorder %v1148_v12, 2  ;;  %v1152_v42 = vsel %vm1150_vm13, %v18096_v5, %v1151_v54  ;;  %v7506_v5 = vpop.f32.mrf.mxu1 }
 0x549   : > { %v1155_v1 = vsel %vm1153_vm14, %v1154_v57, %v18115_v8  ;;  %v1254_v56 = vxor.u32 2147483648, %v18181_v51  ;;  %vm2085_vm15 = vcmp.eq.s32.totalorder %v2083_v18, 0  ;;  %vm2088_vm3 = vcmp.eq.s32.totalorder %v2083_v18, 2 }
 0x54a   : > { %v7377_v31 = vpop.f32.mrf.mxu0  ;;  %v7520_v34 = vmul.f32 %v7495_v23, %v18198_v16  ;;  %v6570_v50 = vmul.f32 %v21048_v53, %v18152_v63  ;;  %v7223_v35 = vadd.f32 %v18083_v0, %v7078_v61  ;;  %v1987_v37 = vsel %vm1980_vm4, %v1983_v3, %v1986_v49  ;;  %v21059_v53 = vld [vmem:[#allocation162_spill] sm:$0xff] }
 0x54b   : > { %7534 = vxpose.xlu0.b32.cont [3/8] (short) %v7526_v28, 128  ;;  %v7378_v21 = vadd.f32 %v7377_v31, %v7215_v47  ;;  %vm1253_vm7 = vcmp.eq.s32.totalorder %v1251_v7, 0  ;;  %vm1256_vm2 = vcmp.eq.s32.totalorder %v1251_v7, 2  ;;  %v1257_v48 = vxor.u32 2147483648, %v18166_v52  ;;  %v21056_v28 = vld [vmem:[#allocation153_spill] sm:$0xff] }
 0x54c   : > { %v7521_v29 = vmul.f32 %v7501_v25, %v18219_v41  ;;  %v7528_v8 = vadd.f32 %v7520_v34, %v6570_v50  ;;  %v7384_v26 = vadd.f32 %v12717_v33, %v7223_v35  ;;  %v18244_v60 = vsel %vm1044_vm6, nan, %v1053_v62 }
 0x54d   : > { %v7507_v38 = vadd.f32 %v7506_v5, %v7378_v21  ;;  %21049 = vst [vmem:[#allocation83_spill] sm:$0xff] %v18244_v60  ;;  %vm2084_vm5 = vcmp.lt.s32.totalorder %v2083_v18, 2  ;;  %v2087_v0 = vsel %vm2085_vm15, %v18166_v52, %v1254_v56  ;;  %v2090_v43 = vsel %vm2088_vm3, %v1257_v48, %v18181_v51  ;;  %v21058_v21 = vld [vmem:[#allocation157_spill] sm:$0xff] }
 0x54e   : > { %v1156_v55 = vsel %vm1149_vm8, %v1152_v42, %v1155_v1  ;;  %v6571_v27 = vmul.f32 %v21050_v46, %v18244_v60  ;;  %v18254_v4 = vsel %vm1147_vm10, nan, %v1987_v37  ;;  %vm1252_vm11 = vcmp.lt.s32.totalorder %v1251_v7, 2 }
 0x54f   : > { %7535 = vxpose.xlu0.b32.cont [4/8] (short) %v7527_v59, 128  ;;  %21051 = vst [vmem:[#allocation167_spill] sm:$0xff] %v18254_v4  ;;  %v1255_v19 = vsel %vm1253_vm7, %v18166_v52, %v1254_v56  ;;  %v1258_v62 = vsel %vm1256_vm2, %v1257_v48, %v18181_v51  ;;  %v2091_v14 = vsel %vm2084_vm5, %v2087_v0, %v2090_v43  ;;  %v18261_v12 = vsel %vm1147_vm10, nan, %v1156_v55  ;;  %v21057_v59 = vld [vmem:[#allocation169_spill] sm:$0xff] }
 0x550   : > { %v7529_v54 = vadd.f32 %v7521_v29, %v6571_v27  ;;  %v7513_v58 = vadd.f32 %v12761_v24, %v7384_v26  ;;  %v7522_v11 = vmul.f32 %v7507_v38, %v18254_v4  ;;  %21052 = vst [vmem:[#allocation181_spill] sm:$0xff] %v18261_v12  ;;  %v1259_v32 = vsel %vm1252_vm11, %v1255_v19, %v1258_v62  ;;  %v21060_v29 = vld [vmem:[#allocation172_spill] sm:$0xff]  ;;  %v21061_v26 = vld [vmem:[#allocation127_spill] sm:$0xff]  ;;  %v21062_v55 = vld [vmem:[#allocation173_spill] sm:$0xff] }
 0x551   : > { %v6572_v39 = vmul.f32 %v21053_v36, %v18261_v12  ;;  %v18266_v33 = vsel %vm1250_vm1, nan, %v2091_v14  ;;  %v18269_v51 = vsel %vm1250_vm1, nan, %v1259_v32  ;;  %vm7564_vm6 = vcmask 523264   ;;  %v21063_v19 = vld [vmem:[#allocation168_spill] sm:$0xff]  ;;  %v21064_v14 = vld [vmem:[#allocation137_spill] sm:$0xff] }
 0x552   : > { %21054 = vst [vmem:[#allocation178_spill] sm:$0xff] %v18266_v33  ;;  %v7523_v52 = vmul.f32 %v7513_v58, %v18266_v33  ;;  %21055 = vst [vmem:[#allocation101_spill] sm:$0xff] %v18269_v51  ;;  %v6573_v20 = vmul.f32 %v21056_v28, %v18269_v51  ;;  %v21066_v36 = vld [vmem:[#allocation149_spill] sm:$0xff] }
 0x553   : > { %7536 = vxpose.xlu0.b32.cont [5/8] (short) %v7528_v8, 128  ;;  %v7530_v44 = vadd.f32 %v7522_v11, %v6572_v39  ;;  %v21065_v11 = vld [vmem:[#allocation118_spill] sm:$0xff] }
 0x554   : > { %v7531_v23 = vadd.f32 %v7523_v52, %v6573_v20  ;;  %v21067_v20 = vld [vmem:[#allocation130_spill] sm:$0xff] }
 0x557   : > { %7537 = vxpose.xlu0.b32.cont [6/8] (short) %v7529_v54, 128 }
 0x55b   : > { %7538 = vxpose.xlu0.b32.cont [7/8] (short) %v7530_v44, 128 }
 0x55f   : > { %7539 = vxpose.xlu0.b32.end [8/8] (short) %v7531_v23, 128 }
 0x5bf   : > { %v7548_v15 = vpop.trf.xlu0 }
 0x5c0   : > { %v7566_v57 = vsel %vm7564_vm6, %v7548_v15, 0  ;;  %v21068_v15 = vld [vmem:[#allocation161_spill] sm:$0xff] }
 0x5c1   : > { %v18274_v31 = vand.u32 4294901760, %v7566_v57 }
 0x5c3   : > { %v18277_v18 = vsub.f32 %v7566_v57, %v18274_v31  ;;  %12818 = vmatprep.mubr.f32.mxu1 %v18274_v31  ;;  %v7549_v61 = vpop.trf.xlu0 }
 0x5c4   : > { %v7569_v9 = vsel %vm7564_vm6, %v7549_v61, 0 }
 0x5c5   : > { %v20293_v30 = vand.u32 4294901760, %v18277_v18  ;;  %v18282_v47 = vand.u32 4294901760, %v7569_v9 }
 0x5c7   : > { %v18285_v3 = vsub.f32 %v7569_v9, %v18282_v47  ;;  %v7550_v49 = vpop.trf.xlu0  ;;  %12819 = vmatmul.mubr.f32.vlgmr.msra.gmra.mxu1 %v18282_v47  ;;  %v7689_v7 = vsub.f32 %v18277_v18, %v20293_v30  ;;  %v21069_v9 = vld [vmem:[#allocation142_spill] sm:$0xff] }
 0x5c8   : > { %v7572_v24 = vsel %vm7564_vm6, %v7550_v49, 0  ;;  %12883 = vmatpush3.msra.mxu1 %v21057_v59 }
 0x5c9   : > { %v20291_v25 = vand.u32 4294901760, %v18285_v3  ;;  %v18294_v34 = vand.u32 4294901760, %v7572_v24  ;;  %12884 = vmatprep.subr.mxu1 %v21058_v21  ;;  %v7690_v42 = vand.u32 4294901760, %v7689_v7  ;;  %v21075_v33 = vand.u32 4294901760, %v18285_v3 }
 0x5ca   : > { %12885 = vmatpush3.msra.mxu1 %v21058_v21 }
 0x5cb   : > { %v7699_v1 = vsub.f32 %v18285_v3, %v20291_v25  ;;  %v18302_v56 = vsub.f32 %v7572_v24, %v18294_v34  ;;  %12886 = vmatprep.subr.mxu1 %v21059_v53  ;;  %12778 = vmatprep.mubr.f32.mxu0 %v7690_v42  ;;  %v7551_v50 = vpop.trf.xlu0 }
 0x5cc   : > { %v7575_v35 = vsel %vm7564_vm6, %v7551_v50, 0  ;;  %12821 = vmatprep.mubr.f32.mxu1 %v18294_v34  ;;  %12887 = vmatpush3.msra.mxu1 %v21059_v53 }
 0x5cd   : > { %v7700_v37 = vand.u32 4294901760, %v7699_v1  ;;  %v20289_v48 = vand.u32 4294901760, %v18302_v56  ;;  %v18309_v5 = vand.u32 4294901760, %v7575_v35  ;;  %12888 = vmatprep.subr.mxu1 %v21060_v29 }
 0x5ce   : > { %12889 = vmatpush3.msra.mxu1 %v21060_v29 }
 0x5cf   : > { %v18314_v8 = vsub.f32 %v7575_v35, %v18309_v5  ;;  %12890 = vmatprep.subr.mxu1 %v21061_v26  ;;  %v7552_v38 = vpop.trf.xlu0  ;;  %12779 = vmatmul.mubr.f32.vlgmr.msra.gmra.mxu0 %v7700_v37  ;;  %v7709_v0 = vsub.f32 %v18302_v56, %v20289_v48  ;;  %v21070_v35 = vld [vmem:[#allocation154_spill] sm:$0xff] }
 0x5d0   : > { %v7578_v43 = vsel %vm7564_vm6, %v7552_v38, 0  ;;  %12822 = vmatmul.mubr.f32.gmra.mxu1 %v18309_v5  ;;  %12843 = vmatpush3.msra.mxu0 %v21062_v55  ;;  %v21071_v55 = vld [vmem:[#allocation165_spill] sm:$0xff] }
 0x5d1   : > { %v20288_v46 = vand.u32 4294901760, %v18314_v8  ;;  %v18324_v27 = vand.u32 4294901760, %v7578_v43  ;;  %12891 = vmatpush3.msra.mxu1 %v21061_v26  ;;  %12844 = vmatprep.subr.mxu0 %v21063_v19  ;;  %v7710_v62 = vand.u32 4294901760, %v7709_v0 }
 0x5d2   : > { %12892 = vmatprep.subr.mxu1 %v21064_v14  ;;  %12845 = vmatpush3.msra.mxu0 %v21063_v19 }
 0x5d3   : > { %v7719_v54 = vsub.f32 %v18314_v8, %v20288_v46  ;;  %v18334_v58 = vsub.f32 %v7578_v43, %v18324_v27  ;;  %12893 = vmatpush3.msra.mxu1 %v21064_v14  ;;  %12846 = vmatprep.subr.mxu0 %v21065_v11  ;;  %v7553_v32 = vpop.trf.xlu0 }
 0x5d4   : > { %12894 = vmatprep.subr.mxu1 %v21066_v36  ;;  %v7581_v39 = vsel %vm7564_vm6, %v7553_v32, 0  ;;  %12781 = vmatprep.mubr.f32.mxu0 %v7710_v62 }
 0x5d5   : > { %v7720_v52 = vand.u32 4294901760, %v7719_v54  ;;  %v20287_v44 = vand.u32 4294901760, %v18334_v58  ;;  %v18341_v28 = vand.u32 4294901760, %v7581_v39  ;;  %12824 = vmatprep.mubr.f32.mxu1 %v18324_v27  ;;  %12847 = vmatpush3.msra.mxu0 %v21065_v11  ;;  %v21072_v54 = vld [vmem:[#allocation175_spill] sm:$0xff] }
 0x5d6   : > { %12895 = vmatpush3.msra.mxu1 %v21066_v36  ;;  %12848 = vmatprep.subr.mxu0 %v21067_v20 }
 0x5d7   : > { %v18348_v23 = vsub.f32 %v7581_v39, %v18341_v28  ;;  %12896 = vmatprep.subr.mxu1 %v21068_v15  ;;  %12849 = vmatpush3.msra.mxu0 %v21067_v20  ;;  %v7554_v57 = vpop.trf.xlu0  ;;  %v7729_v61 = vsub.f32 %v18334_v58, %v20287_v44  ;;  %v21073_v20 = vld [vmem:[#allocation177_spill] sm:$0xff] }
 0x5d8   : > { %12897 = vmatpush3.msra.mxu1 %v21068_v15  ;;  %12850 = vmatprep.subr.mxu0 %v21069_v9  ;;  %v7584_v49 = vsel %vm7564_vm6, %v7554_v57, 0 }
 0x5d9   : > { %v20285_v7 = vand.u32 4294901760, %v18348_v23  ;;  %12962 = vmatprep.subr.mxu1 %v21057_v59  ;;  %v18360_v24 = vand.u32 4294901760, %v7584_v49  ;;  %12782 = vmatmul.mubr.f32.gmra.mxu0 %v7720_v52  ;;  %v7730_v42 = vand.u32 4294901760, %v7729_v61 }
 0x5da   : > { %12825 = vmatmul.mubr.f32.gmra.mxu1 %v18341_v28  ;;  %12851 = vmatpush3.msra.mxu0 %v21069_v9 }
 0x5db   : > { %v7739_v1 = vsub.f32 %v18348_v23, %v20285_v7  ;;  %v18368_v50 = vsub.f32 %v7584_v49, %v18360_v24  ;;  %12852 = vmatprep.subr.mxu0 %v21070_v35  ;;  %v7555_v37 = vpop.trf.xlu0  ;;  %12784 = vmatprep.mubr.f32.mxu0 %v7730_v42 }
 0x5dc   : > { %12853 = vmatpush3.msra.mxu0 %v21070_v35  ;;  %v7587_v38 = vsel %vm7564_vm6, %v7555_v37, 0  ;;  %12827 = vmatprep.mubr.f32.mxu1 %v18360_v24 }
 0x5dd   : > { %v7740_v0 = vand.u32 4294901760, %v7739_v1  ;;  %v20283_v43 = vand.u32 4294901760, %v18368_v50  ;;  %12854 = vmatprep.subr.mxu0 %v21071_v55  ;;  %v18376_v19 = vand.u32 4294901760, %v7587_v38 }
 0x5de   : > { %12855 = vmatpush3.msra.mxu0 %v21071_v55 }
 0x5df   : > { %v18380_v62 = vsub.f32 %v7587_v38, %v18376_v19  ;;  %12856 = vmatprep.subr.mxu0 %v21072_v54  ;;  %v7556_v11 = vpop.trf.xlu0  ;;  %12785 = vmatmul.mubr.f32.gmra.mxu0 %v7740_v0  ;;  %v7749_v32 = vsub.f32 %v18368_v50, %v20283_v43 }
 0x5e0   : > { %12857 = vmatpush3.msra.mxu0 %v21072_v54  ;;  %v7590_v39 = vsel %vm7564_vm6, %v7556_v11, 0  ;;  %12828 = vmatmul.mubr.f32.gmra.mxu1 %v18376_v19 }
 0x5e1   : > { %v20282_v52 = vand.u32 4294901760, %v18380_v62  ;;  %12922 = vmatprep.subr.mxu0 %v21073_v20  ;;  %v18391_v57 = vand.u32 4294901760, %v7590_v39  ;;  %v7750_v61 = vand.u32 4294901760, %v7749_v32 }
 0x5e3   : > { %v7759_v9 = vsub.f32 %v18380_v62, %v20282_v52  ;;  %v18397_v49 = vsub.f32 %v7590_v39, %v18391_v57  ;;  %v7557_v42 = vpop.trf.xlu0  ;;  %12787 = vmatprep.mubr.f32.mxu0 %v7750_v61  ;;  %12830 = vmatprep.mubr.f32.mxu1 %v18391_v57 }
 0x5e4   : > { %v7593_v1 = vsel %vm7564_vm6, %v7557_v42, 0 }
 0x5e5   : > { %v7760_v35 = vand.u32 4294901760, %v7759_v9  ;;  %v20281_v37 = vand.u32 4294901760, %v18397_v49  ;;  %v18402_v38 = vand.u32 4294901760, %v7593_v1 }
 0x5e7   : > { %v18405_v0 = vsub.f32 %v7593_v1, %v18402_v38  ;;  %v7558_v55 = vpop.trf.xlu0  ;;  %12788 = vmatmul.mubr.f32.gmra.mxu0 %v7760_v35  ;;  %12831 = vmatmul.mubr.f32.gmra.mxu1 %v18402_v38  ;;  %v7769_v54 = vsub.f32 %v18397_v49, %v20281_v37 }
 0x5e8   : > { %v7596_v11 = vsel %vm7564_vm6, %v7558_v55, 0 }
 0x5e9   : > { %v20284_v32 = vand.u32 4294901760, %v18405_v0  ;;  %v18413_v39 = vand.u32 4294901760, %v7596_v11  ;;  %v7770_v61 = vand.u32 4294901760, %v7769_v54 }
 0x5eb   : > { %v7779_v9 = vsub.f32 %v18405_v0, %v20284_v32  ;;  %v18419_v42 = vsub.f32 %v7596_v11, %v18413_v39  ;;  %v7559_v1 = vpop.trf.xlu0  ;;  %12790 = vmatprep.mubr.f32.mxu0 %v7770_v61  ;;  %12833 = vmatprep.mubr.f32.mxu1 %v18413_v39 }
 0x5ec   : > { %v7599_v35 = vsel %vm7564_vm6, %v7559_v1, 0 }
 0x5ed   : > { %v7780_v37 = vand.u32 4294901760, %v7779_v9  ;;  %v20286_v55 = vand.u32 4294901760, %v18419_v42  ;;  %v18424_v52 = vand.u32 4294901760, %v7599_v35 }
 0x5ef   : > { %v18427_v54 = vsub.f32 %v7599_v35, %v18424_v52  ;;  %v7560_v43 = vpop.trf.xlu0  ;;  %12791 = vmatmul.mubr.f32.gmra.mxu0 %v7780_v37  ;;  %12834 = vmatmul.mubr.f32.gmra.mxu1 %v18424_v52  ;;  %v7789_v11 = vsub.f32 %v18419_v42, %v20286_v55 }
 0x5f0   : > { %v7602_v61 = vsel %vm7564_vm6, %v7560_v43, 0 }
 0x5f1   : > { %v20290_v1 = vand.u32 4294901760, %v18427_v54  ;;  %v18435_v9 = vand.u32 4294901760, %v7602_v61  ;;  %v7790_v32 = vand.u32 4294901760, %v7789_v11 }
 0x5f3   : > { %v7799_v35 = vsub.f32 %v18427_v54, %v20290_v1  ;;  %v18441_v7 = vsub.f32 %v7602_v61, %v18435_v9  ;;  %v7561_v37 = vpop.trf.xlu0  ;;  %12793 = vmatprep.mubr.f32.mxu0 %v7790_v32  ;;  %12836 = vmatprep.mubr.f32.mxu1 %v18435_v9 }
 0x5f4   : > { %v7605_v55 = vsel %vm7564_vm6, %v7561_v37, 0 }
 0x5f5   : > { %v7800_v44 = vand.u32 4294901760, %v7799_v35  ;;  %v20292_v43 = vand.u32 4294901760, %v18441_v7  ;;  %v18446_v46 = vand.u32 4294901760, %v7605_v55 }
 0x5f7   : > { %v18449_v11 = vsub.f32 %v7605_v55, %v18446_v46  ;;  %v7562_v48 = vpop.trf.xlu0  ;;  %12794 = vmatmul.mubr.f32.gmra.mxu0 %v7800_v44  ;;  %12837 = vmatmul.mubr.f32.gmra.mxu1 %v18446_v46  ;;  %v7809_v32 = vsub.f32 %v18441_v7, %v20292_v43 }
 0x5f8   : > { %v7608_v61 = vsel %vm7564_vm6, %v7562_v48, 0 }
 0x5f9   : > { %v20295_v37 = vand.u32 4294901760, %v18449_v11  ;;  %v18457_v35 = vand.u32 4294901760, %v7608_v61  ;;  %v7810_v1 = vand.u32 4294901760, %v7809_v32 }
 0x5fb   : > { %v7819_v55 = vsub.f32 %v18449_v11, %v20295_v37  ;;  %v18463_v25 = vsub.f32 %v7608_v61, %v18457_v35  ;;  %v7563_v44 = vpop.trf.xlu0  ;;  %12796 = vmatprep.mubr.f32.mxu0 %v7810_v1  ;;  %12839 = vmatprep.mubr.f32.mxu1 %v18457_v35  ;;  %v21074_v1 = vand.u32 4294901760, %v18277_v18 }
 0x5fc   : > { %v7611_v43 = vsel %vm7564_vm6, %v7563_v44, 0 }
 0x5fd   : > { %v7820_v30 = vand.u32 4294901760, %v7819_v55  ;;  %v7828_v48 = vand.u32 4294901760, %v18463_v25  ;;  %v18468_v51 = vand.u32 4294901760, %v7611_v43 }
 0x5ff   : > { %v18471_v32 = vsub.f32 %v7611_v43, %v18468_v51  ;;  %12797 = vmatmul.mubr.f32.gmra.mxu0 %v7820_v30  ;;  %12840 = vmatmul.mubr.f32.gmra.mxu1 %v18468_v51  ;;  %v7829_v61 = vsub.f32 %v18463_v25, %v7828_v48  ;;  %v21076_v30 = vand.u32 4294901760, %v18302_v56 }
 0x600   : > { %12898 = vmatprep.mubr.f32.mxu1 %v21074_v1  ;;  %v21097_v1 = vld [vmem:[#allocation25_spill] sm:$0xff] }
 0x601   : > { %v7838_v44 = vand.u32 4294901760, %v18471_v32  ;;  %v7830_v55 = vand.u32 4294901760, %v7829_v61  ;;  %v21077_v61 = vand.u32 4294901760, %v18314_v8 }
 0x603   : > { %v7839_v37 = vsub.f32 %v18471_v32, %v7838_v44  ;;  %12799 = vmatprep.mubr.f32.mxu0 %v7830_v55  ;;  %12899 = vmatmul.mubr.f32.vlgmr.msra.gmra.mxu1 %v21075_v33  ;;  %v21078_v33 = vand.u32 4294901760, %v18334_v58 }
 0x604   : > { %12963 = vmatpush3.msra.mxu1 %v21057_v59  ;;  %12901 = vmatprep.mubr.f32.mxu1 %v21076_v30  ;;  %v21079_v59 = vand.u32 4294901760, %v18348_v23 }
 0x605   : > { %v7840_v43 = vand.u32 4294901760, %v7839_v37  ;;  %12964 = vmatprep.subr.mxu1 %v21058_v21  ;;  %v21096_v37 = vld [vmem:[#allocation2_spill] sm:$0xff] }
 0x606   : > { %12965 = vmatpush3.msra.mxu1 %v21058_v21  ;;  %v21081_v21 = vld [vmem:[#allocation126_spill] sm:$0xff] }
 0x607   : > { %12966 = vmatprep.subr.mxu1 %v21059_v53  ;;  %12800 = vmatmul.mubr.f32.gmra.mxu0 %v7840_v43 }
 0x608   : > { %12902 = vmatmul.mubr.f32.gmra.mxu1 %v21077_v61  ;;  %12858 = vmatprep.mubr.f32.mxu0 %v18277_v18  ;;  %v21080_v18 = vand.u32 4294901760, %v18368_v50 }
 0x609   : > { %12967 = vmatpush3.msra.mxu1 %v21059_v53  ;;  %12904 = vmatprep.mubr.f32.mxu1 %v21078_v33  ;;  %v21083_v53 = vand.u32 4294901760, %v18380_v62 }
 0x60a   : > { %12968 = vmatprep.subr.mxu1 %v21060_v29 }
 0x60b   : > { %12969 = vmatpush3.msra.mxu1 %v21060_v29  ;;  %12859 = vmatmul.mubr.f32.vlgmr.msra.gmra.mxu0 %v18285_v3  ;;  %v21082_v3 = vld [vmem:[#allocation133_spill] sm:$0xff]  ;;  %v21085_v29 = vld [vmem:[#allocation148_spill] sm:$0xff] }
 0x60c   : > { %12970 = vmatprep.subr.mxu1 %v21061_v26  ;;  %12905 = vmatmul.mubr.f32.gmra.mxu1 %v21079_v59 }
 0x60d   : > { %12923 = vmatpush3.msra.mxu0 %v21073_v20  ;;  %12971 = vmatpush3.msra.mxu1 %v21061_v26  ;;  %v21087_v26 = vand.u32 4294901760, %v18405_v0  ;;  %v21094_v20 = vand.u32 4294901760, %v18449_v11 }
 0x60e   : > { %12861 = vmatprep.mubr.f32.mxu0 %v18302_v56  ;;  %12907 = vmatprep.mubr.f32.mxu1 %v21080_v18  ;;  %v21084_v56 = vand.u32 4294901760, %v18397_v49 }
 0x60f   : > { %12924 = vmatprep.subr.mxu0 %v21081_v21  ;;  %12972 = vmatprep.subr.mxu1 %v21064_v14 }
 0x610   : > { %12925 = vmatpush3.msra.mxu0 %v21081_v21  ;;  %12973 = vmatpush3.msra.mxu1 %v21064_v14  ;;  %v21088_v14 = vand.u32 4294901760, %v18419_v42 }
 0x611   : > { %12926 = vmatprep.subr.mxu0 %v21082_v3  ;;  %12974 = vmatprep.subr.mxu1 %v21066_v36 }
 0x612   : > { %12862 = vmatmul.mubr.f32.gmra.mxu0 %v18314_v8  ;;  %12908 = vmatmul.mubr.f32.gmra.mxu1 %v21083_v53  ;;  %v21086_v8 = vld [vmem:[#allocation160_spill] sm:$0xff] }
 0x613   : > { %12927 = vmatpush3.msra.mxu0 %v21082_v3  ;;  %12975 = vmatpush3.msra.mxu1 %v21066_v36  ;;  %v21090_v36 = vld [vmem:[#allocation180_spill] sm:$0xff] }
 0x614   : > { %12864 = vmatprep.mubr.f32.mxu0 %v18334_v58  ;;  %12910 = vmatprep.mubr.f32.mxu1 %v21084_v56  ;;  %v21089_v58 = vld [vmem:[#allocation171_spill] sm:$0xff] }
 0x615   : > { %12928 = vmatprep.subr.mxu0 %v21085_v29  ;;  %12976 = vmatprep.subr.mxu1 %v21068_v15 }
 0x616   : > { %12929 = vmatpush3.msra.mxu0 %v21085_v29  ;;  %12977 = vmatpush3.msra.mxu1 %v21068_v15  ;;  %v21092_v15 = vand.u32 4294901760, %v18441_v7 }
 0x617   : > { %12930 = vmatprep.subr.mxu0 %v21086_v8  ;;  %12865 = vmatmul.mubr.f32.gmra.mxu0 %v18348_v23  ;;  %v21091_v23 = vand.u32 4294901760, %v18427_v54 }
 0x618   : > { %12911 = vmatmul.mubr.f32.gmra.mxu1 %v21087_v26  ;;  %12931 = vmatpush3.msra.mxu0 %v21086_v8 }
 0x619   : > { %12867 = vmatprep.mubr.f32.mxu0 %v18368_v50  ;;  %12913 = vmatprep.mubr.f32.mxu1 %v21088_v14  ;;  %v21093_v50 = vld [vmem:[#allocation100_spill] sm:$0xff] }
 0x61a   : > { %12932 = vmatprep.subr.mxu0 %v21089_v58 }
 0x61b   : > { %12933 = vmatpush3.msra.mxu0 %v21089_v58 }
 0x61c   : > { %12934 = vmatprep.subr.mxu0 %v21090_v36  ;;  %12868 = vmatmul.mubr.f32.gmra.mxu0 %v18380_v62  ;;  %v21095_v62 = vld [vmem:[#allocation3_spill] sm:$0xff] }
 0x61d   : > { %12914 = vmatmul.mubr.f32.gmra.mxu1 %v21091_v23  ;;  %12935 = vmatpush3.msra.mxu0 %v21090_v36 }
 0x61e   : > { %12870 = vmatprep.mubr.f32.mxu0 %v18397_v49  ;;  %12916 = vmatprep.mubr.f32.mxu1 %v21092_v15  ;;  %v2405_v49 = vadd.f32 %v21096_v37, %v21095_v62 }
 0x61f   : > { %12936 = vmatprep.subr.mxu0 %v21093_v50 }
 0x620   : > { %12937 = vmatpush3.msra.mxu0 %v21093_v50  ;;  %v2543_v55 = vadd.f32 %v21097_v1, %v2405_v49 }
 0x621   : > { %12871 = vmatmul.mubr.f32.gmra.mxu0 %v18405_v0  ;;  %12917 = vmatmul.mubr.f32.gmra.mxu1 %v21094_v20  ;;  %v21098_v0 = vld [vmem:[#allocation24_spill] sm:$0xff] }
 0x622   : > { %12873 = vmatprep.mubr.f32.mxu0 %v18419_v42  ;;  %12919 = vmatprep.mubr.f32.mxu1 %v7828_v48  ;;  %v2681_v42 = vadd.f32 %v21098_v0, %v2543_v55  ;;  %v21099_v48 = vld [vmem:[#allocation51_spill] sm:$0xff] }
 0x624   : > { %v2840_v30 = vadd.f32 %v21099_v48, %v2681_v42 }
 0x625   : > { %12874 = vmatmul.mubr.f32.gmra.mxu0 %v18427_v54  ;;  %12920 = vmatmul.mubr.f32.gmra.mxu1 %v7838_v44 }
 0x626   : > { %12876 = vmatprep.mubr.f32.mxu0 %v18441_v7  ;;  %12978 = vmatprep.mubr.f32.mxu1 %v18274_v31  ;;  %v21100_v7 = vld [vmem:[#allocation50_spill] sm:$0xff] }
 0x627   : > { %v2969_v54 = vadd.f32 %v21100_v7, %v2840_v30 }
 0x629   : > { %12877 = vmatmul.mubr.f32.gmra.mxu0 %v18449_v11  ;;  %12979 = vmatmul.mubr.f32.vlgmr.msra.gmra.mxu1 %v18282_v47 }
 0x62a   : > { %12879 = vmatprep.mubr.f32.mxu0 %v18463_v25  ;;  %12981 = vmatprep.mubr.f32.mxu1 %v18294_v34  ;;  %v6550_v25 = vmul.f32 %v2969_v54, %v18050_v22 }
 0x62d   : > { %12880 = vmatmul.mubr.f32.gmra.mxu0 %v18471_v32  ;;  %12982 = vmatmul.mubr.f32.gmra.mxu1 %v18309_v5 }
 0x62e   : > { %12938 = vmatprep.mubr.f32.mxu0 %v18274_v31  ;;  %12984 = vmatprep.mubr.f32.mxu1 %v18324_v27  ;;  %v21101_v31 = vld [vmem:[#allocation91_spill] sm:$0xff] }
 0x62f   : > { %v6542_v11 = vmul.f32 %v21101_v31, %v18046_v45 }
 0x631   : > { %12939 = vmatmul.mubr.f32.vlgmr.msra.gmra.mxu0 %v18282_v47  ;;  %12985 = vmatmul.mubr.f32.gmra.mxu1 %v18341_v28  ;;  %v6558_v47 = vadd.f32 %v6550_v25, %v6542_v11 }
 0x632   : > { %12941 = vmatprep.mubr.f32.mxu0 %v18294_v34  ;;  %12987 = vmatprep.mubr.f32.mxu1 %v18360_v24 }
 0x633   : > { %v18582_v22 = vand.u32 4294901760, %v6558_v47 }
 0x635   : > { %12942 = vmatmul.mubr.f32.gmra.mxu0 %v18309_v5  ;;  %12988 = vmatmul.mubr.f32.gmra.mxu1 %v18376_v19  ;;  %21102 = vst [vmem:[#allocation85_spill] sm:$0xff] %v18582_v22  ;;  %v18589_v45 = vsub.f32 %v6558_v47, %v18582_v22 }
 0x636   : > { %12944 = vmatprep.mubr.f32.mxu0 %v18324_v27  ;;  %12990 = vmatprep.mubr.f32.mxu1 %v18391_v57 }
 0x637   : > { %21103 = vst [vmem:[#allocation166_spill] sm:$0xff] %v18589_v45  ;;  %v20297_v34 = vand.u32 4294901760, %v18589_v45 }
 0x639   : > { %12945 = vmatmul.mubr.f32.gmra.mxu0 %v18341_v28  ;;  %12991 = vmatmul.mubr.f32.gmra.mxu1 %v18402_v38  ;;  %v8895_v5 = vsub.f32 %v18589_v45, %v20297_v34  ;;  %v21125_v45 = vld [vmem:[#allocation29_spill] sm:$0xff] }
 0x63a   : > { %12947 = vmatprep.mubr.f32.mxu0 %v18360_v24  ;;  %12993 = vmatprep.mubr.f32.mxu1 %v18413_v39 }
 0x63b   : > { %v8896_v27 = vand.u32 4294901760, %v8895_v5 }
 0x63d   : > { %12948 = vmatmul.mubr.f32.gmra.mxu0 %v18376_v19  ;;  %12994 = vmatmul.mubr.f32.gmra.mxu1 %v18424_v52 }
 0x63e   : > { %12950 = vmatprep.mubr.f32.mxu0 %v18391_v57  ;;  %12996 = vmatprep.mubr.f32.mxu1 %v18435_v9 }
 0x641   : > { %12951 = vmatmul.mubr.f32.gmra.mxu0 %v18402_v38  ;;  %12997 = vmatmul.mubr.f32.gmra.mxu1 %v18446_v46 }
 0x642   : > { %12953 = vmatprep.mubr.f32.mxu0 %v18413_v39  ;;  %12999 = vmatprep.mubr.f32.mxu1 %v18457_v35 }
 0x645   : > { %12954 = vmatmul.mubr.f32.gmra.mxu0 %v18424_v52  ;;  %13000 = vmatmul.mubr.f32.gmra.mxu1 %v18468_v51 }
 0x646   : > { %12956 = vmatprep.mubr.f32.mxu0 %v18435_v9  ;;  %13078 = vmatprep.mubr.f32.mxu1 %v18582_v22  ;;  %v21124_v22 = vld [vmem:[#allocation53_spill] sm:$0xff] }
 0x647   : > { %v2557_v12 = vadd.f32 %v21125_v45, %v21124_v22  ;;  %v21135_v22 = vld [vmem:[#allocation9_spill] sm:$0xff]  ;;  %v21136_v45 = vld [vmem:[#allocation8_spill] sm:$0xff] }
 0x649   : > { %12957 = vmatmul.mubr.f32.gmra.mxu0 %v18446_v46 }
 0x64a   : > { %12959 = vmatprep.mubr.f32.mxu0 %v18457_v35 }
 0x64d   : > { %12960 = vmatmul.mubr.f32.gmra.mxu0 %v18468_v51 }
 0x64e   : > { %13034 = vmatprep.mubr.f32.mxu0 %v8896_v27 }
 0x687   : > { %v12820_v28 = vpop.f32.mrf.mxu1 }
 0x689   : > { %v7953_v52 = vpop.f32.mrf.mxu1 }
 0x68f   : > { %v12780_v24 = vpop.f32.mrf.mxu0 }
 0x690   : > { %v7960_v19 = vadd.f32 %v12820_v28, %v12780_v24  ;;  %v12823_v39 = vpop.f32.mrf.mxu1 }
 0x691   : > { %v7692_v57 = vpop.f32.mrf.mxu0 }
 0x692   : > { %v7954_v38 = vadd.f32 %v7953_v52, %v7692_v57  ;;  %v7965_v44 = vpop.f32.mrf.mxu1 }
 0x699   : > { %v12783_v9 = vpop.f32.mrf.mxu0 }
 0x69a   : > { %v7972_v32 = vadd.f32 %v12823_v39, %v12783_v9  ;;  %v12826_v33 = vpop.f32.mrf.mxu1 }
 0x69b   : > { %v7712_v43 = vpop.f32.mrf.mxu0 }
 0x69c   : > { %v7966_v61 = vadd.f32 %v7965_v44, %v7712_v43  ;;  %v7977_v35 = vpop.f32.mrf.mxu1 }
 0x69f   : > { %v12786_v46 = vpop.f32.mrf.mxu0 }
 0x6a0   : > { %v7984_v59 = vadd.f32 %v12826_v33, %v12786_v46  ;;  %v12829_v51 = vpop.f32.mrf.mxu1 }
 0x6a1   : > { %v7732_v18 = vpop.f32.mrf.mxu0 }
 0x6a2   : > { %v7978_v21 = vadd.f32 %v7977_v35, %v7732_v18  ;;  %v7989_v56 = vpop.f32.mrf.mxu1 }
 0x6a7   : > { %v12789_v3 = vpop.f32.mrf.mxu0  ;;  %v12832_v26 = vpop.f32.mrf.mxu1 }
 0x6a8   : > { %v18606_v53 = vadd.f32 %v12829_v51, %v12789_v3 }
 0x6a9   : > { %v7752_v29 = vpop.f32.mrf.mxu0  ;;  %v8001_v36 = vpop.f32.mrf.mxu1 }
 0x6aa   : > { %v18608_v8 = vadd.f32 %v7989_v56, %v7752_v29 }
 0x6af   : > { %v12792_v14 = vpop.f32.mrf.mxu0  ;;  %v12835_v50 = vpop.f32.mrf.mxu1 }
 0x6b0   : > { %v18610_v58 = vadd.f32 %v12832_v26, %v12792_v14 }
 0x6b1   : > { %v7772_v23 = vpop.f32.mrf.mxu0  ;;  %v8013_v20 = vpop.f32.mrf.mxu1 }
 0x6b2   : > { %v18612_v15 = vadd.f32 %v8001_v36, %v7772_v23 }
 0x6b7   : > { %v12795_v62 = vpop.f32.mrf.mxu0  ;;  %v12838_v49 = vpop.f32.mrf.mxu1 }
 0x6b8   : > { %v18614_v37 = vadd.f32 %v12835_v50, %v12795_v62 }
 0x6b9   : > { %v7792_v1 = vpop.f32.mrf.mxu0  ;;  %v8025_v0 = vpop.f32.mrf.mxu1 }
 0x6ba   : > { %v18616_v55 = vadd.f32 %v8013_v20, %v7792_v1 }
 0x6bf   : > { %v12798_v42 = vpop.f32.mrf.mxu0  ;;  %v18618_v48 = vpop.f32.mrf.mxu1 }
 0x6c0   : > { %v18620_v30 = vadd.f32 %v12838_v49, %v12798_v42 }
 0x6c1   : > { %v7812_v7 = vpop.f32.mrf.mxu0  ;;  %v18622_v54 = vpop.f32.mrf.mxu1 }
 0x6c2   : > { %v18624_v25 = vadd.f32 %v8025_v0, %v7812_v7 }
 0x6c3   : > { %v12900_v31 = vpop.f32.mrf.mxu1 }
 0x6c5   : > { %v8317_v11 = vpop.f32.mrf.mxu1 }
 0x6c7   : > { %v18626_v47 = vpop.f32.mrf.mxu0 }
 0x6c8   : > { %v12903_v5 = vpop.f32.mrf.mxu1 }
 0x6c9   : > { %v18628_v27 = vpop.f32.mrf.mxu0 }
 0x6ca   : > { %v8333_v28 = vpop.f32.mrf.mxu1 }
 0x6cb   : > { %v12860_v24 = vpop.f32.mrf.mxu0 }
 0x6cc   : > { %v8139_v52 = vadd.f32 %v12860_v24, %v7960_v19  ;;  %v12906_v57 = vpop.f32.mrf.mxu1  ;;  %v21115_v24 = vld [vmem:[#allocation4_spill] sm:$0xff] }
 0x6cd   : > { %v8131_v39 = vpop.f32.mrf.mxu0 }
 0x6ce   : > { %v8132_v9 = vadd.f32 %v8131_v39, %v7954_v38  ;;  %v8349_v44 = vpop.f32.mrf.mxu1  ;;  %v18630_v43 = vadd.f32 %v12900_v31, %v8139_v52 }
 0x6d0   : > { %21104 = vst [vmem:[#allocation186_spill] sm:$0xff] %v18630_v43  ;;  %v18632_v33 = vadd.f32 %v8317_v11, %v8132_v9  ;;  %v21117_v9 = vld [vmem:[#allocation7_spill] sm:$0xff] }
 0x6d2   : > { %21105 = vst [vmem:[#allocation98_spill] sm:$0xff] %v18632_v33  ;;  %v12863_v46 = vpop.f32.mrf.mxu0  ;;  %v18634_v35 = vpop.f32.mrf.mxu1  ;;  %v21132_v33 = vld [vmem:[#allocation60_spill] sm:$0xff] }
 0x6d3   : > { %21106 = vst [vmem:[#allocation128_spill] sm:$0xff] %v18634_v35  ;;  %v8153_v18 = vadd.f32 %v12863_v46, %v7972_v32 }
 0x6d4   : > { %v8145_v51 = vpop.f32.mrf.mxu0  ;;  %v18636_v3 = vpop.f32.mrf.mxu1 }
 0x6d5   : > { %21107 = vst [vmem:[#allocation156_spill] sm:$0xff] %v18636_v3  ;;  %v8146_v56 = vadd.f32 %v8145_v51, %v7966_v61  ;;  %v18638_v29 = vadd.f32 %v12903_v5, %v8153_v18  ;;  %v21119_v18 = vld [vmem:[#allocation27_spill] sm:$0xff] }
 0x6d7   : > { %21108 = vst [vmem:[#allocation116_spill] sm:$0xff] %v18638_v29  ;;  %v12866_v26 = vpop.f32.mrf.mxu0  ;;  %v18640_v19 = vadd.f32 %v8333_v28, %v8146_v56  ;;  %v21114_v28 = vld [vmem:[#allocation5_spill] sm:$0xff] }
 0x6d8   : > { %v8167_v14 = vadd.f32 %v12866_v26, %v7984_v59  ;;  %v18642_v38 = vpop.f32.mrf.mxu1  ;;  %v2412_v52 = vadd.f32 %v21115_v24, %v21114_v28  ;;  %v21123_v28 = vld [vmem:[#allocation26_spill] sm:$0xff] }
 0x6d9   : > { %21109 = vst [vmem:[#allocation111_spill] sm:$0xff] %v18640_v19  ;;  %v8159_v36 = vpop.f32.mrf.mxu0  ;;  %v2426_v19 = vadd.f32 %v21136_v45, %v21135_v22  ;;  %v21147_v22 = vld [vmem:[#allocation55_spill] sm:$0xff]  ;;  %v21148_v45 = vld [vmem:[#allocation33_spill] sm:$0xff] }
 0x6da   : > { %v8160_v23 = vadd.f32 %v8159_v36, %v7978_v21  ;;  %v18644_v50 = vpop.f32.mrf.mxu1  ;;  %v18646_v20 = vadd.f32 %v12906_v57, %v8167_v14  ;;  %v2551_v51 = vadd.f32 %v21119_v18, %v2412_v52  ;;  %v21121_v14 = vld [vmem:[#allocation31_spill] sm:$0xff]  ;;  %v21127_v52 = vld [vmem:[#allocation30_spill] sm:$0xff]  ;;  %v21128_v18 = vld [vmem:[#allocation56_spill] sm:$0xff] }
 0x6dc   : > { %21110 = vst [vmem:[#allocation117_spill] sm:$0xff] %v18646_v20  ;;  %v18648_v62 = vpop.f32.mrf.mxu0  ;;  %v18650_v32 = vadd.f32 %v8349_v44, %v8160_v23  ;;  %v21118_v44 = vld [vmem:[#allocation6_spill] sm:$0xff]  ;;  %v2690_v24 = vadd.f32 %v21123_v28, %v2551_v51 }
 0x6dd   : > { %v18652_v49 = vpop.f32.mrf.mxu1  ;;  %v2419_v46 = vadd.f32 %v21118_v44, %v21117_v9 }
 0x6de   : > { %21111 = vst [vmem:[#allocation86_spill] sm:$0xff] %v18650_v32  ;;  %v18654_v61 = vpop.f32.mrf.mxu0 }
 0x6df   : > { %v18656_v1 = vpop.f32.mrf.mxu1  ;;  %v2559_v36 = vadd.f32 %v21121_v14, %v2419_v46  ;;  %v21131_v14 = vld [vmem:[#allocation28_spill] sm:$0xff] }
 0x6e0   : > { %v2697_v41 = vadd.f32 %v21131_v14, %v2557_v12  ;;  %v21142_v12 = vld [vmem:[#allocation93_spill] sm:$0xff]  ;;  %v21143_v14 = vld [vmem:[#allocation52_spill] sm:$0xff] }
 0x6e1   : > { %v18658_v0 = vpop.f32.mrf.mxu0  ;;  %v18660_v59 = vpop.f32.mrf.mxu1  ;;  %v2699_v44 = vadd.f32 %v21127_v52, %v2559_v36  ;;  %v21138_v36 = vld [vmem:[#allocation58_spill] sm:$0xff] }
 0x6e2   : > { %v2852_v52 = vadd.f32 %v21138_v36, %v2697_v41  ;;  %v21150_v41 = vld [vmem:[#allocation10_spill] sm:$0xff] }
 0x6e3   : > { %v18662_v42 = vpop.f32.mrf.mxu0  ;;  %v18664_v21 = vpop.f32.mrf.mxu1  ;;  %v2854_v43 = vadd.f32 %v21132_v33, %v2699_v44  ;;  %v2974_v33 = vadd.f32 %v21143_v14, %v21142_v12  ;;  %v21144_v44 = vld [vmem:[#allocation59_spill] sm:$0xff]  ;;  %v21154_v12 = vld [vmem:[#allocation13_spill] sm:$0xff] }
 0x6e5   : > { %v18666_v7 = vpop.f32.mrf.mxu0  ;;  %v18668_v31 = vpop.f32.mrf.mxu1 }
 0x6e6   : > { %21112 = vst [vmem:[#allocation139_spill] sm:$0xff] %v18668_v31  ;;  %v21181_v31 = vld [vmem:[#allocation63_spill] sm:$0xff] }
 0x6e7   : > { %v18670_v11 = vpop.f32.mrf.mxu0  ;;  %v18672_v5 = vpop.f32.mrf.mxu1 }
 0x6e8   : > { %21113 = vst [vmem:[#allocation120_spill] sm:$0xff] %v18672_v5  ;;  %v21178_v5 = vld [vmem:[#allocation38_spill] sm:$0xff] }
 0x6e9   : > { %v18676_v57 = vpop.f32.mrf.mxu0  ;;  %v18678_v39 = vpop.f32.mrf.mxu1 }
 0x6ea   : > { %21116 = vst [vmem:[#allocation121_spill] sm:$0xff] %v18678_v39  ;;  %v2847_v39 = vadd.f32 %v21128_v18, %v2690_v24 }
 0x6eb   : > { %v18683_v56 = vpop.f32.mrf.mxu0  ;;  %v18685_v26 = vpop.f32.mrf.mxu1 }
 0x6ec   : > { %21120 = vst [vmem:[#allocation131_spill] sm:$0xff] %v18685_v26 }
 0x6ed   : > { %v18688_v23 = vpop.f32.mrf.mxu0  ;;  %v18690_v34 = vpop.f32.mrf.mxu1 }
 0x6ee   : > { %21122 = vst [vmem:[#allocation97_spill] sm:$0xff] %v18690_v34 }
 0x6ef   : > { %v18695_v4 = vpop.f32.mrf.mxu0  ;;  %v18697_v9 = vpop.f32.mrf.mxu1 }
 0x6f0   : > { %21126 = vst [vmem:[#allocation141_spill] sm:$0xff] %v18697_v9  ;;  %v21137_v9 = vld [vmem:[#allocation54_spill] sm:$0xff] }
 0x6f1   : > { %v18701_v26 = vpop.f32.mrf.mxu0  ;;  %v18703_v46 = vpop.f32.mrf.mxu1  ;;  %v2976_v34 = vadd.f32 %v21137_v9, %v2847_v39  ;;  %v2565_v39 = vadd.f32 %v21148_v45, %v21147_v22  ;;  %v21149_v9 = vld [vmem:[#allocation11_spill] sm:$0xff]  ;;  %v6543_v22 = vmul.f32 %v2974_v33, %v18054_v2 }
 0x6f2   : > { %21129 = vst [vmem:[#allocation119_spill] sm:$0xff] %v18701_v26  ;;  %21130 = vst [vmem:[#allocation124_spill] sm:$0xff] %v18703_v46  ;;  %v21141_v26 = vld [vmem:[#allocation35_spill] sm:$0xff]  ;;  %v2431_v36 = vadd.f32 %v21150_v41, %v21149_v9 }
 0x6f3   : > { %v18707_v51 = vpop.f32.mrf.mxu0  ;;  %v18709_v28 = vpop.f32.mrf.mxu1  ;;  %v2567_v46 = vadd.f32 %v21141_v26, %v2426_v19  ;;  %v6551_v32 = vmul.f32 %v2976_v34, %v18059_v10  ;;  %v21160_v34 = vld [vmem:[#allocation32_spill] sm:$0xff] }
 0x6f4   : > { %21133 = vst [vmem:[#allocation110_spill] sm:$0xff] %v18707_v51  ;;  %21134 = vst [vmem:[#allocation123_spill] sm:$0xff] %v18709_v28  ;;  %v2983_v51 = vadd.f32 %v21144_v44, %v2854_v43  ;;  %v21155_v43 = vld [vmem:[#allocation12_spill] sm:$0xff]  ;;  %v21156_v44 = vld [vmem:[#allocation34_spill] sm:$0xff] }
 0x6f5   : > { %v18715_v24 = vpop.f32.mrf.mxu0  ;;  %v18717_v18 = vpop.f32.mrf.mxu1  ;;  %v2433_v14 = vadd.f32 %v21155_v43, %v21154_v12  ;;  %v21164_v12 = vld [vmem:[#allocation14_spill] sm:$0xff] }
 0x6f6   : > { %21139 = vst [vmem:[#allocation84_spill] sm:$0xff] %v18715_v24  ;;  %21140 = vst [vmem:[#allocation96_spill] sm:$0xff] %v18717_v18  ;;  %v21151_v24 = vld [vmem:[#allocation57_spill] sm:$0xff]  ;;  %v6552_v45 = vmul.f32 %v2983_v51, %v18120_v17  ;;  %v21168_v51 = vld [vmem:[#allocation16_spill] sm:$0xff] }
 0x6f7   : > { %v18723_v60 = vpop.f32.mrf.mxu0  ;;  %v18725_v28 = vpop.f32.mrf.mxu1  ;;  %v2981_v29 = vadd.f32 %v21151_v24, %v2852_v52  ;;  %v2706_v52 = vadd.f32 %v21160_v34, %v2565_v39  ;;  %v21161_v24 = vld [vmem:[#allocation39_spill] sm:$0xff]  ;;  %v21167_v17 = vld [vmem:[#allocation17_spill] sm:$0xff] }
 0x6f8   : > { %21145 = vst [vmem:[#allocation106_spill] sm:$0xff] %v18723_v60  ;;  %21146 = vst [vmem:[#allocation134_spill] sm:$0xff] %v18725_v28  ;;  %v2708_v60 = vadd.f32 %v21156_v44, %v2567_v46  ;;  %v21157_v28 = vld [vmem:[#allocation37_spill] sm:$0xff]  ;;  %v2575_v41 = vadd.f32 %v21161_v24, %v2433_v14  ;;  %v6559_v46 = vadd.f32 %v6551_v32, %v6543_v22  ;;  %v21169_v44 = vld [vmem:[#allocation19_spill] sm:$0xff] }
 0x6f9   : > { %v18733_v19 = vpop.f32.mrf.mxu0  ;;  %v18735_v26 = vpop.f32.mrf.mxu1  ;;  %v2573_v18 = vadd.f32 %v21157_v28, %v2431_v36  ;;  %v6544_v28 = vmul.f32 %v2981_v29, %v18075_v6  ;;  %v2440_v33 = vadd.f32 %v21168_v51, %v21167_v17  ;;  %v21171_v34 = vld [vmem:[#allocation21_spill] sm:$0xff]  ;;  %v21172_v14 = vld [vmem:[#allocation20_spill] sm:$0xff]  ;;  %v21179_v51 = vld [vmem:[#allocation43_spill] sm:$0xff] }
 0x6fa   : > { %21152 = vst [vmem:[#allocation108_spill] sm:$0xff] %v18733_v19  ;;  %21153 = vst [vmem:[#allocation179_spill] sm:$0xff] %v18735_v26  ;;  %v21162_v19 = vld [vmem:[#allocation64_spill] sm:$0xff]  ;;  %v21163_v26 = vld [vmem:[#allocation15_spill] sm:$0xff]  ;;  %v2447_v24 = vadd.f32 %v21172_v14, %v21171_v34  ;;  %v2717_v17 = vadd.f32 %v21178_v5, %v2575_v41 }
 0x6fb   : > { %v18743_v9 = vpop.f32.mrf.mxu0  ;;  %v18745_v10 = vpop.f32.mrf.mxu1  ;;  %v2861_v20 = vadd.f32 %v21162_v19, %v2708_v60  ;;  %v2438_v43 = vadd.f32 %v21164_v12, %v21163_v26  ;;  %v21173_v60 = vld [vmem:[#allocation62_spill] sm:$0xff]  ;;  %v21176_v22 = vld [vmem:[#allocation36_spill] sm:$0xff]  ;;  %v21177_v29 = vld [vmem:[#allocation41_spill] sm:$0xff]  ;;  %v6560_v3 = vadd.f32 %v6552_v45, %v6544_v28  ;;  %v2583_v35 = vadd.f32 %v21179_v51, %v2440_v33 }
 0x6fc   : > { %21158 = vst [vmem:[#allocation104_spill] sm:$0xff] %v18743_v9  ;;  %21159 = vst [vmem:[#allocation82_spill] sm:$0xff] %v18745_v10  ;;  %v21170_v9 = vld [vmem:[#allocation18_spill] sm:$0xff]  ;;  %v2859_v19 = vadd.f32 %v21173_v60, %v2706_v52  ;;  %v21174_v10 = vld [vmem:[#allocation23_spill] sm:$0xff]  ;;  %v2715_v6 = vadd.f32 %v21176_v22, %v2573_v18 }
 0x6fd   : > { %v18753_v36 = vpop.f32.mrf.mxu0  ;;  %v18755_v2 = vpop.f32.mrf.mxu1  ;;  %v2445_v39 = vadd.f32 %v21170_v9, %v21169_v44  ;;  %v21175_v26 = vld [vmem:[#allocation22_spill] sm:$0xff]  ;;  %v2581_v12 = vadd.f32 %v21177_v29, %v2438_v43  ;;  %v21180_v9 = vld [vmem:[#allocation45_spill] sm:$0xff]  ;;  %v2990_v34 = vadd.f32 %v21181_v31, %v2861_v20  ;;  %v21182_v14 = vld [vmem:[#allocation47_spill] sm:$0xff]  ;;  %v8209_v20 = vadd.f32 %v18666_v7, %v18614_v37 }
 0x6fe   : > { %21165 = vst [vmem:[#allocation90_spill] sm:$0xff] %v18753_v36  ;;  %21166 = vst [vmem:[#allocation144_spill] sm:$0xff] %v18755_v2  ;;  %v2454_v32 = vadd.f32 %v21175_v26, %v21174_v10  ;;  %v2591_v52 = vadd.f32 %v21182_v14, %v2447_v24  ;;  %v21183_v60 = vld [vmem:[#allocation49_spill] sm:$0xff]  ;;  %v18776_v10 = vand.u32 4294901760, %v6559_v46  ;;  %v21185_v26 = vld [vmem:[#allocation66_spill] sm:$0xff]  ;;  %v8202_v37 = vadd.f32 %v18670_v11, %v18616_v55 }
 0x6ff   : > { %v18768_v36 = vpop.f32.mrf.mxu0  ;;  %v2589_v44 = vadd.f32 %v21180_v9, %v2445_v39  ;;  %v18778_v18 = vpop.f32.mrf.mxu1  ;;  %v21184_v45 = vld [vmem:[#allocation61_spill] sm:$0xff]  ;;  %v2866_v22 = vadd.f32 %v21185_v26, %v2715_v6  ;;  %v21186_v5 = vld [vmem:[#allocation68_spill] sm:$0xff]  ;;  %v18784_v39 = vand.u32 4294901760, %v6560_v3  ;;  %v21188_v24 = vld [vmem:[#allocation42_spill] sm:$0xff]  ;;  %v6553_v14 = vmul.f32 %v2990_v34, %v18144_v13 }
 0x700   : > { %v2599_v2 = vadd.f32 %v21183_v60, %v2454_v32  ;;  %v2988_v28 = vadd.f32 %v21184_v45, %v2859_v19  ;;  %v2868_v41 = vadd.f32 %v21186_v5, %v2717_v17  ;;  %v21187_v33 = vld [vmem:[#allocation40_spill] sm:$0xff]  ;;  %v2726_v32 = vadd.f32 %v21188_v24, %v2583_v35  ;;  %v21190_v6 = vld [vmem:[#allocation46_spill] sm:$0xff]  ;;  %v21192_v13 = vld [vmem:[#allocation65_spill] sm:$0xff] }
 0x701   : > { %v12952_v43 = vpop.f32.mrf.mxu0  ;;  %v2724_v29 = vadd.f32 %v21187_v33, %v2581_v12  ;;  %v21189_v51 = vld [vmem:[#allocation44_spill] sm:$0xff]  ;;  %v8223_v19 = vadd.f32 %v18676_v57, %v18620_v30  ;;  %v18796_v17 = vadd.f32 %v21190_v6, %v2591_v52  ;;  %v18802_v45 = vsub.f32 %v6559_v46, %v18776_v10  ;;  %v12998_v35 = vpop.f32.mrf.mxu1  ;;  %v21193_v26 = vld [vmem:[#allocation67_spill] sm:$0xff] }
 0x702   : > { %v18790_v9 = vadd.f32 %v21189_v51, %v2589_v44  ;;  %v21191_v12 = vld [vmem:[#allocation48_spill] sm:$0xff]  ;;  %v6545_v44 = vmul.f32 %v2988_v28, %v18124_v40  ;;  %v2995_v34 = vadd.f32 %v21192_v13, %v2866_v22  ;;  %v2997_v30 = vadd.f32 %v21193_v26, %v2868_v41  ;;  %v21194_v28 = vld [vmem:[#allocation70_spill] sm:$0xff] }
 0x703   : > { %v8580_v31 = vpop.f32.mrf.mxu0  ;;  %v18799_v60 = vadd.f32 %v21191_v12, %v2599_v2  ;;  %v8216_v57 = vadd.f32 %v18683_v56, %v18624_v25  ;;  %v18812_v2 = vsub.f32 %v6560_v3, %v18784_v39  ;;  %v8044_v46 = vadd.f32 %v18618_v48, %v18626_v47  ;;  %v8773_v47 = vpop.f32.mrf.mxu1  ;;  %v21198_v12 = vld [vmem:[#allocation128_spill] sm:$0xff] }
 0x704   : > { %v8195_v55 = vadd.f32 %v18658_v0, %v18610_v58  ;;  %v8406_v11 = vadd.f32 %v18652_v49, %v8209_v20  ;;  %v18819_v40 = vadd.f32 %v6553_v14, %v6545_v44  ;;  %v2873_v22 = vadd.f32 %v21194_v28, %v2724_v29  ;;  %v21197_v14 = vld [vmem:[#allocation139_spill] sm:$0xff]  ;;  %v346_v28 = vld [vmem:[%s19883_s5 + $0x78] sm:$0xff] }
 0x705   : > { %v12955_v7 = vpop.f32.mrf.mxu0  ;;  %v8038_v5 = vadd.f32 %v18622_v54, %v18628_v27  ;;  %v8422_v25 = vadd.f32 %v18660_v59, %v8223_v19  ;;  %v8188_v3 = vadd.f32 %v18662_v42, %v18612_v15  ;;  %v8237_v48 = vadd.f32 %v18688_v23, %v8044_v46  ;;  %v21195_v59 = vld [vmem:[#allocation72_spill] sm:$0xff]  ;;  %v13001_v51 = vpop.f32.mrf.mxu1 }
 0x706   : > { %v8599_v56 = vadd.f32 %v12955_v7, %v8406_v11  ;;  %v8398_v58 = vadd.f32 %v18656_v1, %v8202_v37  ;;  %v8181_v0 = vadd.f32 %v18648_v62, %v18606_v53  ;;  %v8414_v54 = vadd.f32 %v18664_v21, %v8216_v57  ;;  %v344_v1 = vld [vmem:[%s19883_s5 + $0x68] sm:$0xff]  ;;  %v21196_v24 = vld [vmem:[#allocation144_spill] sm:$0xff] }
 0x707   : > { %v8592_v52 = vpop.f32.mrf.mxu0  ;;  %v8230_v41 = vadd.f32 %v18695_v4, %v8038_v5  ;;  %v6546_v27 = vmul.f32 %v2995_v34, %v18152_v63  ;;  %v2875_v29 = vadd.f32 %v21195_v59, %v2726_v32  ;;  %v8390_v15 = vadd.f32 %v18642_v38, %v8195_v55  ;;  %v343_v38 = vld [vmem:[%s19883_s5 + $0x60] sm:$0xff]  ;;  %v21199_v37 = vld [vmem:[#allocation120_spill] sm:$0xff] }
 0x708   : > { %v8593_v42 = vadd.f32 %v8592_v52, %v8398_v58  ;;  %v6554_v20 = vmul.f32 %v2997_v30, %v18198_v16  ;;  %v8174_v4 = vadd.f32 %v18654_v61, %v18608_v8  ;;  %v8382_v63 = vadd.f32 %v18644_v50, %v8188_v3  ;;  %v342_v8 = vld [vmem:[%s19883_s5 + $0x58] sm:$0xff]  ;;  %v21201_v30 = vld [vmem:[#allocation90_spill] sm:$0xff]  ;;  %v21202_v46 = vld [vmem:[#allocation156_spill] sm:$0xff] }
 0x709   : > { %v12958_v49 = vpop.f32.mrf.mxu0  ;;  %v8587_v21 = vadd.f32 %v12952_v43, %v8390_v15  ;;  %v8768_v32 = vadd.f32 %v21196_v24, %v8599_v56  ;;  %v8438_v19 = vadd.f32 %v21197_v14, %v8237_v48  ;;  %v8374_v16 = vadd.f32 %v21198_v12, %v8181_v0  ;;  %v341_v11 = vld [vmem:[%s19883_s5 + $0x50] sm:$0xff]  ;;  %v21204_v58 = vld [vmem:[#allocation71_spill] sm:$0xff] }
 0x70a   : > { %v8611_v33 = vadd.f32 %v12958_v49, %v8422_v25  ;;  %v8430_v50 = vadd.f32 %v21199_v37, %v8230_v41  ;;  %v8581_v44 = vadd.f32 %v8580_v31, %v8382_v63  ;;  %v8762_v13 = vadd.f32 %v18778_v18, %v8593_v42  ;;  %v8785_v18 = vpop.f32.mrf.mxu1  ;;  %v340_v41 = vld [vmem:[%s19883_s5 + $0x48] sm:$0xff]  ;;  %v338_v63 = vld [vmem:[%s19883_s5 + $0x38] sm:$0xff]  ;;  %v21211_v14 = vld [vmem:[#allocation84_spill] sm:$0xff] }
 0x70b   : > { %v8604_v23 = vpop.f32.mrf.mxu0  ;;  %v8575_v57 = vadd.f32 %v21201_v30, %v8374_v16  ;;  %v8366_v55 = vadd.f32 %v21202_v46, %v8174_v4  ;;  %v8806_v25 = vmul.f32 %v8768_v32, %v342_v8  ;;  %v18869_v56 = vadd.f32 %v6554_v20, %v6546_v27  ;;  %v21207_v20 = vld [vmem:[#allocation117_spill] sm:$0xff]  ;;  %v21213_v12 = vld [vmem:[#allocation104_spill] sm:$0xff]  ;;  %v21214_v8 = vld [vmem:[#allocation134_spill] sm:$0xff] }
 0x70c   : > { %v8780_v53 = vadd.f32 %v12998_v35, %v8611_v33  ;;  %v8605_v62 = vadd.f32 %v8604_v23, %v8414_v54  ;;  %v21200_v35 = vld [vmem:[#allocation69_spill] sm:$0xff]  ;;  %v18872_v49 = vadd.f32 %v21204_v58, %v2875_v29  ;;  %v21205_v54 = vld [vmem:[#allocation82_spill] sm:$0xff]  ;;  %v8805_v15 = vmul.f32 %v8762_v13, %v341_v11  ;;  %v21208_v29 = vld [vmem:[#allocation108_spill] sm:$0xff] }
 0x70d   : > { %v12961_v6 = vpop.f32.mrf.mxu0  ;;  %v3002_v7 = vadd.f32 %v21200_v35, %v2873_v22  ;;  %v21203_v22 = vld [vmem:[#allocation179_spill] sm:$0xff]  ;;  %v8569_v0 = vadd.f32 %v18768_v36, %v8366_v55  ;;  %v8750_v59 = vadd.f32 %v21205_v54, %v8581_v44  ;;  %v21206_v23 = vld [vmem:[#allocation74_spill] sm:$0xff]  ;;  %v8563_v4 = vadd.f32 %v21208_v29, %v21207_v20  ;;  %v21216_v30 = vld [vmem:[#allocation124_spill] sm:$0xff] }
 0x70e   : > { %v8808_v61 = vmul.f32 %v8780_v53, %v344_v1  ;;  %v8774_v43 = vadd.f32 %v8773_v47, %v8605_v62  ;;  %v8623_v34 = vadd.f32 %v12961_v6, %v8438_v19  ;;  %v8756_v31 = vadd.f32 %v21203_v22, %v8587_v21  ;;  %v345_v47 = vld [vmem:[%s19883_s5 + $0x70] sm:$0xff]  ;;  %v339_v62 = vld [vmem:[%s19883_s5 + $0x40] sm:$0xff]  ;;  %v336_v11 = vld [vmem:[%s19883_s5 + $0x28] sm:$0xff] }
 0x70f   : > { %v8616_v26 = vpop.f32.mrf.mxu0  ;;  %v18883_v27 = vadd.f32 %v21206_v23, %v18790_v9  ;;  %v21209_v53 = vld [vmem:[#allocation96_spill] sm:$0xff]  ;;  %v18894_v32 = vand.u32 4294901760, %v8806_v25  ;;  %v21212_v6 = vld [vmem:[#allocation86_spill] sm:$0xff]  ;;  %v8803_v35 = vmul.f32 %v8750_v59, %v339_v62  ;;  %v18911_v44 = vand.u32 4294901760, %v8805_v15  ;;  %v21217_v22 = vld [vmem:[#allocation97_spill] sm:$0xff] }
 0x710   : > { %v8807_v52 = vmul.f32 %v8774_v43, %v343_v38  ;;  %v8617_v5 = vadd.f32 %v8616_v26, %v8430_v50  ;;  %v18864_v3 = vand.u32 4294901760, %v8808_v61  ;;  %v8792_v48 = vadd.f32 %v13001_v51, %v8623_v34  ;;  %v21210_v38 = vld [vmem:[#allocation116_spill] sm:$0xff]  ;;  %v21215_v34 = vld [vmem:[#allocation83_spill] sm:$0xff] }
 0x711   : > { %v8744_v36 = vadd.f32 %v21209_v53, %v8575_v57  ;;  %v8804_v24 = vmul.f32 %v8756_v31, %v340_v41  ;;  %v8551_v19 = vadd.f32 %v21211_v14, %v21210_v38  ;;  %v8557_v16 = vadd.f32 %v21213_v12, %v21212_v6  ;;  %v337_v50 = vld [vmem:[%s19883_s5 + $0x30] sm:$0xff]  ;;  %v21219_v59 = vld [vmem:[#allocation111_spill] sm:$0xff]  ;;  %v21223_v14 = vld [vmem:[#allocation186_spill] sm:$0xff] }
 0x712   : > { %v8786_v33 = vadd.f32 %v8785_v18, %v8617_v5  ;;  %v18879_v42 = vand.u32 4294901760, %v8807_v52  ;;  %v8810_v1 = vmul.f32 %v8792_v48, %v346_v28  ;;  %v18897_v9 = vsub.f32 %v8808_v61, %v18864_v3  ;;  %v21218_v18 = vld [vmem:[#allocation123_spill] sm:$0xff] }
 0x713   : > { %v8738_v43 = vadd.f32 %v21214_v8, %v8569_v0  ;;  %v18921_v26 = vmul.f32 %v3002_v7, %v21215_v34  ;;  %v8732_v57 = vadd.f32 %v21216_v30, %v8563_v4  ;;  %v8802_v46 = vmul.f32 %v8744_v36, %v338_v63  ;;  %v334_v4 = vld [vmem:[%s19883_s5 + $0x18] sm:$0xff]  ;;  %v21222_v63 = vld [vmem:[#allocation76_spill] sm:$0xff]  ;;  %v21227_v34 = vld [vmem:[#allocation110_spill] sm:$0xff] }
 0x714   : > { %v8809_v21 = vmul.f32 %v8786_v33, %v345_v47  ;;  %v18899_v51 = vand.u32 4294901760, %v8810_v1  ;;  %v18914_v61 = vsub.f32 %v8807_v52, %v18879_v42  ;;  %v18931_v52 = vand.u32 4294901760, %v8804_v24 }
 0x715   : > { %v18934_v28 = vsub.f32 %v8806_v25, %v18894_v32  ;;  %v18941_v5 = vand.u32 4294901760, %v18897_v9  ;;  %v8720_v31 = vadd.f32 %v21217_v22, %v8551_v19  ;;  %v8726_v48 = vadd.f32 %v21218_v18, %v8557_v16  ;;  %v335_v25 = vld [vmem:[%s19883_s5 + $0x20] sm:$0xff]  ;;  %v21224_v19 = vld [vmem:[#allocation119_spill] sm:$0xff] }
 0x716   : > { %v18906_v37 = vand.u32 4294901760, %v8809_v21  ;;  %v18917_v13 = vsub.f32 %v8810_v1, %v18899_v51  ;;  %13002 = vmatprep.subr.mxu0 %v18899_v51  ;;  %v8801_v47 = vmul.f32 %v8738_v43, %v337_v50  ;;  %v18952_v0 = vand.u32 4294901760, %v8803_v35  ;;  %v21220_v1 = vld [vmem:[#allocation106_spill] sm:$0xff] }
 0x717   : > { %13003 = vmatpush3.msra.mxu0 %v18899_v51  ;;  %v18955_v41 = vsub.f32 %v8805_v15, %v18911_v44  ;;  %v18961_v54 = vand.u32 4294901760, %v18914_v61  ;;  %v8545_v23 = vadd.f32 %v21220_v1, %v21219_v59  ;;  %v8800_v20 = vmul.f32 %v8732_v57, %v336_v11  ;;  %v21226_v50 = vld [vmem:[#allocation98_spill] sm:$0xff]  ;;  %v21228_v11 = vld [vmem:[#allocation141_spill] sm:$0xff]  ;;  %v21230_v59 = vld [vmem:[#allocation107_spill] sm:$0xff] }
 0x718   : > { %v18925_v55 = vsub.f32 %v8809_v21, %v18906_v37  ;;  %13004 = vmatprep.subr.mxu0 %v18906_v37  ;;  %v18938_v7 = vand.u32 4294901760, %v18917_v13  ;;  %v18965_v29 = vand.u32 4294901760, %v8802_v46  ;;  %v18974_v53 = vsub.f32 %v8804_v24, %v18931_v52 }
 0x719   : > { %13005 = vmatpush3.msra.mxu0 %v18906_v37  ;;  %v8990_v62 = vsub.f32 %v18897_v9, %v18941_v5  ;;  %v18980_v21 = vand.u32 4294901760, %v18934_v28  ;;  %v2882_v38 = vadd.f32 %v21222_v63, %v18796_v17  ;;  %v8539_v6 = vadd.f32 %v21224_v19, %v21223_v14  ;;  %v21234_v19 = vld [vmem:[#allocation80_spill] sm:$0xff] }
 0x71a   : > { %v18947_v58 = vand.u32 4294901760, %v18925_v55  ;;  %13006 = vmatprep.subr.mxu0 %v18864_v3  ;;  %v8976_v33 = vsub.f32 %v18917_v13, %v18938_v7  ;;  %v8799_v12 = vmul.f32 %v8726_v48, %v335_v25  ;;  %v18987_v16 = vand.u32 4294901760, %v8801_v47 }
 0x71b   : > { %13007 = vmatpush3.msra.mxu0 %v18864_v3  ;;  %21221 = vst [vmem:[#allocation92_spill] sm:$0xff] %v18980_v21  ;;  %v18990_v8 = vsub.f32 %v8803_v35, %v18952_v0  ;;  %v8997_v43 = vsub.f32 %v18914_v61, %v18961_v54  ;;  %v18996_v17 = vand.u32 4294901760, %v18955_v41  ;;  %v8533_v30 = vadd.f32 %v21227_v34, %v21226_v50  ;;  %v333_v35 = vld [vmem:[%s19883_s5 + $0x10] sm:$0xff] }
 0x71c   : > { %v8983_v15 = vsub.f32 %v18925_v55, %v18947_v58  ;;  %13008 = vmatprep.subr.mxu0 %v18879_v42  ;;  %v8977_v36 = vand.u32 4294901760, %v8976_v33  ;;  %v8798_v57 = vmul.f32 %v8720_v31, %v334_v4  ;;  %v8714_v22 = vadd.f32 %v21228_v11, %v8545_v23  ;;  %v21231_v23 = vld [vmem:[#allocation75_spill] sm:$0xff]  ;;  %v21232_v4 = vld [vmem:[#allocation121_spill] sm:$0xff] }
 0x71d   : > { %13009 = vmatpush3.msra.mxu0 %v18879_v42  ;;  %21225 = vst [vmem:[#allocation147_spill] sm:$0xff] %v18996_v17  ;;  %v19001_v18 = vand.u32 4294901760, %v8800_v20  ;;  %v19008_v48 = vsub.f32 %v8802_v46, %v18965_v29  ;;  %v8991_v25 = vand.u32 4294901760, %v8990_v62  ;;  %v9004_v31 = vsub.f32 %v18934_v28, %v18980_v21  ;;  %v332_v46 = vld [vmem:[%s19883_s5 + $0x8] sm:$0xff] }
 0x71e   : > { %v8984_v24 = vand.u32 4294901760, %v8983_v15  ;;  %13010 = vmatprep.subr.mxu0 %v18894_v32  ;;  %13046 = vmatprep.subr.mxu1 %v8977_v36  ;;  %v19014_v33 = vand.u32 4294901760, %v18974_v53  ;;  %v6555_v1 = vmul.f32 %v18872_v49, %v21230_v59  ;;  %v3011_v15 = vadd.f32 %v21231_v23, %v2882_v38  ;;  %v21238_v23 = vld [vmem:[#allocation89_spill] sm:$0xff] }
 0x71f   : > { %13011 = vmatpush3.msra.mxu0 %v18894_v32  ;;  %13047 = vmatpush3.msra.mxu1 %v8977_v36  ;;  %v8708_v36 = vadd.f32 %v21232_v4, %v8539_v6  ;;  %v19020_v63 = vand.u32 4294901760, %v8799_v12  ;;  %v19027_v62 = vsub.f32 %v8801_v47, %v18987_v16  ;;  %v8998_v49 = vand.u32 4294901760, %v8997_v43  ;;  %v331_v47 = vld [vmem:[%s19883_s5] sm:$0xff] }
 0x720   : > { %13012 = vmatprep.subr.mxu0 %v18911_v44  ;;  %13048 = vmatprep.subr.mxu1 %v8984_v24  ;;  %21229 = vst [vmem:[#allocation105_spill] sm:$0xff] %v19014_v33  ;;  %v9011_v38 = vsub.f32 %v18955_v41, %v18996_v17  ;;  %v19033_v14 = vand.u32 4294901760, %v18990_v8  ;;  %v2889_v6 = vadd.f32 %v21234_v19, %v18799_v60  ;;  %v19038_v34 = vand.u32 4294901760, %v8798_v57  ;;  %v21239_v4 = vld [vmem:[#allocation78_spill] sm:$0xff] }
 0x721   : > { %13013 = vmatpush3.msra.mxu0 %v18911_v44  ;;  %13049 = vmatpush3.msra.mxu1 %v8984_v24  ;;  %v21235_v24 = vld [vmem:[#allocation131_spill] sm:$0xff]  ;;  %v8797_v11 = vmul.f32 %v8714_v22, %v333_v35  ;;  %v19045_v43 = vsub.f32 %v8800_v20, %v19001_v18  ;;  %v9005_v59 = vand.u32 4294901760, %v9004_v31  ;;  %v9018_v60 = vsub.f32 %v18974_v53, %v19014_v33  ;;  %v21237_v35 = vld [vmem:[#allocation73_spill] sm:$0xff] }
 0x722   : > { %13014 = vmatprep.subr.mxu0 %v18931_v52  ;;  %13050 = vmatprep.subr.mxu1 %v8991_v25  ;;  %21233 = vst [vmem:[#allocation163_spill] sm:$0xff] %v19033_v14  ;;  %v8702_v50 = vadd.f32 %v21235_v24, %v8533_v30  ;;  %v19051_v30 = vand.u32 4294901760, %v19008_v48  ;;  %v19054_v22 = vand.u32 4294901760, %v18819_v40  ;;  %v2887_v20 = vadd.f32 %v21239_v4, %v21238_v23  ;;  %v21242_v23 = vld [vmem:[#allocation79_spill] sm:$0xff] }
 0x723   : > { %13015 = vmatpush3.msra.mxu0 %v18931_v52  ;;  %13051 = vmatpush3.msra.mxu1 %v8991_v25  ;;  %v3009_v25 = vadd.f32 %v21237_v35, %v18883_v27  ;;  %v8796_v19 = vmul.f32 %v8708_v36, %v332_v46  ;;  %v19062_v31 = vsub.f32 %v8799_v12, %v19020_v63  ;;  %v9012_v24 = vand.u32 4294901760, %v9011_v38  ;;  %v21241_v27 = vld [vmem:[#allocation167_spill] sm:$0xff] }
 0x724   : > { %13016 = vmatprep.subr.mxu0 %v18952_v0  ;;  %13052 = vmatprep.subr.mxu1 %v8998_v49  ;;  %21236 = vst [vmem:[#allocation103_spill] sm:$0xff] %v19051_v30  ;;  %v9025_v33 = vsub.f32 %v18990_v8, %v19033_v14  ;;  %v19068_v17 = vand.u32 4294901760, %v19027_v62  ;;  %v6556_v35 = vmul.f32 %v3011_v15, %v21241_v27  ;;  %v19072_v4 = vand.u32 4294901760, %v8797_v11 }
 0x725   : > { %13017 = vmatpush3.msra.mxu0 %v18952_v0  ;;  %13053 = vmatpush3.msra.mxu1 %v8998_v49  ;;  %v3018_v36 = vadd.f32 %v21242_v23, %v2889_v6  ;;  %v8795_v46 = vmul.f32 %v8702_v50, %v331_v47  ;;  %v19076_v12 = vsub.f32 %v8798_v57, %v19038_v34  ;;  %v9019_v49 = vand.u32 4294901760, %v9018_v60  ;;  %v21244_v47 = vld [vmem:[#allocation181_spill] sm:$0xff] }
 0x726   : > { %13018 = vmatprep.subr.mxu0 %v18965_v29  ;;  %13054 = vmatprep.subr.mxu1 %v9005_v59  ;;  %21240 = vst [vmem:[#allocation174_spill] sm:$0xff] %v19068_v17  ;;  %v9032_v38 = vsub.f32 %v19008_v48, %v19051_v30  ;;  %v19082_v15 = vand.u32 4294901760, %v19045_v43  ;;  %v19085_v6 = vand.u32 4294901760, %v18869_v56  ;;  %v6563_v50 = vadd.f32 %v6555_v1, %v18921_v26  ;;  %v21245_v57 = vld [vmem:[#allocation77_spill] sm:$0xff] }
 0x727   : > { %13019 = vmatpush3.msra.mxu0 %v18965_v29  ;;  %13055 = vmatpush3.msra.mxu1 %v9005_v59  ;;  %v6548_v59 = vmul.f32 %v3009_v25, %v21244_v47  ;;  %v19089_v27 = vand.u32 4294901760, %v8796_v19  ;;  %v3016_v60 = vadd.f32 %v21245_v57, %v2887_v20  ;;  %v9026_v23 = vand.u32 4294901760, %v9025_v33  ;;  %v21247_v25 = vld [vmem:[#allocation178_spill] sm:$0xff] }
 0x728   : > { %13020 = vmatprep.subr.mxu0 %v18987_v16  ;;  %13056 = vmatprep.subr.mxu1 %v9012_v24  ;;  %21243 = vst [vmem:[#allocation184_spill] sm:$0xff] %v19082_v15  ;;  %v9039_v30 = vsub.f32 %v19027_v62, %v19068_v17  ;;  %v19097_v14 = vand.u32 4294901760, %v19062_v31  ;;  %v20318_v26 = vand.u32 4294901760, %v18802_v45  ;;  %v6557_v47 = vmul.f32 %v3018_v36, %v21247_v25 }
 0x729   : > { %13021 = vmatpush3.msra.mxu0 %v18987_v16  ;;  %13057 = vmatpush3.msra.mxu1 %v9012_v24  ;;  %v6564_v1 = vadd.f32 %v6556_v35, %v6548_v59  ;;  %v19102_v21 = vsub.f32 %v8797_v11, %v19072_v4  ;;  %v19105_v20 = vand.u32 4294901760, %v8795_v46  ;;  %v9033_v33 = vand.u32 4294901760, %v9032_v38  ;;  %v21249_v59 = vld [vmem:[#allocation101_spill] sm:$0xff] }
 0x72a   : > { %13022 = vmatprep.subr.mxu0 %v19001_v18  ;;  %13058 = vmatprep.subr.mxu1 %v9019_v49  ;;  %21246 = vst [vmem:[#allocation125_spill] sm:$0xff] %v19097_v14  ;;  %v9046_v24 = vsub.f32 %v19045_v43, %v19082_v15  ;;  %v19111_v57 = vand.u32 4294901760, %v19076_v12  ;;  %v19115_v35 = vsub.f32 %v18819_v40, %v19054_v22  ;;  %v19126_v38 = vand.u32 4294901760, %v6563_v50 }
 0x72b   : > { %13023 = vmatpush3.msra.mxu0 %v19001_v18  ;;  %13059 = vmatpush3.msra.mxu1 %v9019_v49  ;;  %v19119_v11 = vsub.f32 %v18869_v56, %v19085_v6  ;;  %v19122_v36 = vsub.f32 %v8796_v19, %v19089_v27  ;;  %v6549_v25 = vmul.f32 %v3016_v60, %v21249_v59  ;;  %v9040_v40 = vand.u32 4294901760, %v9039_v30 }
 0x72c   : > { %13024 = vmatprep.subr.mxu0 %v19020_v63  ;;  %13060 = vmatprep.subr.mxu1 %v9026_v23  ;;  %21248 = vst [vmem:[#allocation112_spill] sm:$0xff] %v19111_v57  ;;  %v9053_v56 = vsub.f32 %v19062_v31, %v19097_v14  ;;  %v8905_v19 = vsub.f32 %v18802_v45, %v20318_v26  ;;  %v19135_v15 = vand.u32 4294901760, %v6564_v1  ;;  %v9047_v30 = vand.u32 4294901760, %v9046_v24 }
 0x72d   : > { %13025 = vmatpush3.msra.mxu0 %v19020_v63  ;;  %13061 = vmatpush3.msra.mxu1 %v9026_v23  ;;  %v19139_v23 = vand.u32 4294901760, %v19102_v21  ;;  %v6565_v60 = vadd.f32 %v6557_v47, %v6549_v25  ;;  %v19142_v59 = vsub.f32 %v8795_v46, %v19105_v20  ;;  %v9060_v49 = vsub.f32 %v19076_v12, %v19111_v57 }
 0x72e   : > { %13026 = vmatprep.subr.mxu0 %v19038_v34  ;;  %13062 = vmatprep.subr.mxu1 %v9033_v33  ;;  %v21251_v26 = vand.u32 4294901760, %v18812_v2  ;;  %v19153_v47 = vand.u32 4294901760, %v19122_v36  ;;  %v19156_v46 = vsub.f32 %v6563_v50, %v19126_v38  ;;  %v9054_v24 = vand.u32 4294901760, %v9053_v56 }
 0x72f   : > { %13027 = vmatpush3.msra.mxu0 %v19038_v34  ;;  %13063 = vmatpush3.msra.mxu1 %v9033_v33  ;;  %21250 = vst [vmem:[#allocation87_spill] sm:$0xff] %v19139_v23  ;;  %v8906_v57 = vand.u32 4294901760, %v8905_v19  ;;  %v19166_v14 = vand.u32 4294901760, %v6565_v60  ;;  %v9061_v50 = vand.u32 4294901760, %v9060_v49  ;;  %v19170_v56 = vand.u32 4294901760, %v19142_v59 }
 0x730   : > { %13028 = vmatprep.subr.mxu0 %v19072_v4  ;;  %13064 = vmatprep.subr.mxu1 %v9040_v40  ;;  %v8915_v33 = vsub.f32 %v18812_v2, %v21251_v26  ;;  %v9067_v26 = vsub.f32 %v19102_v21, %v19139_v23  ;;  %v21253_v23 = vand.u32 4294901760, %v19119_v11 }
 0x731   : > { %13029 = vmatpush3.msra.mxu0 %v19072_v4  ;;  %13065 = vmatpush3.msra.mxu1 %v9040_v40  ;;  %v19164_v40 = vsub.f32 %v6564_v1, %v19135_v15  ;;  %v9074_v1 = vsub.f32 %v19122_v36, %v19153_v47 }
 0x732   : > { %13030 = vmatprep.subr.mxu0 %v19089_v27  ;;  %13066 = vmatprep.subr.mxu1 %v9047_v30  ;;  %v8916_v19 = vand.u32 4294901760, %v8915_v33  ;;  %v8935_v49 = vsub.f32 %v19119_v11, %v21253_v23  ;;  %v19184_v33 = vsub.f32 %v6565_v60, %v19166_v14  ;;  %v21254_v60 = vand.u32 4294901760, %v19156_v46 }
 0x733   : > { %13031 = vmatpush3.msra.mxu0 %v19089_v27  ;;  %13067 = vmatpush3.msra.mxu1 %v9047_v30  ;;  %v21252_v30 = vand.u32 4294901760, %v19115_v35  ;;  %v9075_v17 = vand.u32 4294901760, %v9074_v1 }
 0x734   : > { %13032 = vmatprep.subr.mxu0 %v19105_v20  ;;  %13068 = vmatprep.subr.mxu1 %v9054_v24 }
 0x735   : > { %13033 = vmatpush3.msra.mxu0 %v19105_v20  ;;  %13069 = vmatpush3.msra.mxu1 %v9054_v24  ;;  %v8925_v25 = vsub.f32 %v19115_v35, %v21252_v30  ;;  %v9068_v24 = vand.u32 4294901760, %v9067_v26  ;;  %v8954_v30 = vand.u32 4294901760, %v19164_v40  ;;  %v8936_v26 = vand.u32 4294901760, %v8935_v49 }
 0x736   : > { %13035 = vmatmul.mubr.f32.vlgmr.msra.gmra.mxu0 %v8906_v57  ;;  %13070 = vmatprep.subr.mxu1 %v9061_v50  ;;  %v9081_v57 = vsub.f32 %v19142_v59, %v19170_v56 }
 0x737   : > { %13090 = vmatprep.subr.mxu0 %v18917_v13  ;;  %13037 = vmatprep.mubr.f32.mxu0 %v8916_v19  ;;  %v8926_v23 = vand.u32 4294901760, %v8925_v25  ;;  %v8955_v19 = vsub.f32 %v19164_v40, %v8954_v30  ;;  %v8964_v25 = vand.u32 4294901760, %v19184_v33 }
 0x738   : > { %13071 = vmatpush3.msra.mxu1 %v9061_v50  ;;  %13091 = vmatpush3.msra.mxu0 %v18917_v13  ;;  %v8945_v50 = vsub.f32 %v19156_v46, %v21254_v60  ;;  %v9082_v13 = vand.u32 4294901760, %v9081_v57 }
 0x739   : > { %13072 = vmatprep.subr.mxu1 %v9068_v24  ;;  %13092 = vmatprep.subr.mxu0 %v18925_v55  ;;  %v8956_v1 = vand.u32 4294901760, %v8955_v19  ;;  %v8965_v49 = vsub.f32 %v19184_v33, %v8964_v25 }
 0x73a   : > { %13073 = vmatpush3.msra.mxu1 %v9068_v24  ;;  %13093 = vmatpush3.msra.mxu0 %v18925_v55  ;;  %v8946_v55 = vand.u32 4294901760, %v8945_v50 }
 0x73b   : > { %13038 = vmatmul.mubr.f32.gmra.mxu0 %v8926_v23  ;;  %13074 = vmatprep.subr.mxu1 %v9075_v17 }
 0x73c   : > { %13094 = vmatprep.subr.mxu0 %v18897_v9  ;;  %13040 = vmatprep.mubr.f32.mxu0 %v8936_v26 }
 0x73d   : > { %13075 = vmatpush3.msra.mxu1 %v9075_v17  ;;  %13095 = vmatpush3.msra.mxu0 %v18897_v9  ;;  %v8966_v9 = vand.u32 4294901760, %v8965_v49  ;;  %v9766_v17 = vld [vmem:[%s19880_s2 + $0x68] sm:$0xff] }
 0x73e   : > { %13076 = vmatprep.subr.mxu1 %v9082_v13  ;;  %13096 = vmatprep.subr.mxu0 %v18914_v61 }
 0x73f   : > { %13077 = vmatpush3.msra.mxu1 %v9082_v13  ;;  %13097 = vmatpush3.msra.mxu0 %v18914_v61  ;;  %v21255_v61 = vld [vmem:[#allocation166_spill] sm:$0xff] }
 0x740   : > { %13041 = vmatmul.mubr.f32.gmra.mxu0 %v8946_v55  ;;  %13079 = vmatmul.mubr.f32.vlgmr.msra.gmra.mxu1 %v18776_v10 }
 0x741   : > { %13098 = vmatprep.subr.mxu0 %v18934_v28  ;;  %13134 = vmatprep.subr.mxu1 %v18899_v51 }
 0x742   : > { %13043 = vmatprep.mubr.f32.mxu0 %v8956_v1  ;;  %13081 = vmatprep.mubr.f32.mxu1 %v18784_v39 }
 0x743   : > { %13099 = vmatpush3.msra.mxu0 %v18934_v28  ;;  %13135 = vmatpush3.msra.mxu1 %v18899_v51  ;;  %v21256_v28 = vand.u32 4294901760, %v21255_v61 }
 0x744   : > { %13100 = vmatprep.subr.mxu0 %v18955_v41  ;;  %13136 = vmatprep.subr.mxu1 %v18906_v37 }
 0x745   : > { %13101 = vmatpush3.msra.mxu0 %v18955_v41  ;;  %13137 = vmatpush3.msra.mxu1 %v18906_v37  ;;  %v21260_v41 = vld [vmem:[#allocation147_spill] sm:$0xff] }
 0x746   : > { %13044 = vmatmul.mubr.f32.gmra.mxu0 %v8966_v9  ;;  %13082 = vmatmul.mubr.f32.gmra.mxu1 %v19054_v22 }
 0x747   : > { %13102 = vmatprep.subr.mxu0 %v18974_v53  ;;  %13138 = vmatprep.subr.mxu1 %v18864_v3 }
 0x748   : > { %13084 = vmatprep.mubr.f32.mxu1 %v19085_v6  ;;  %13103 = vmatpush3.msra.mxu0 %v18974_v53  ;;  %v21265_v53 = vld [vmem:[#allocation163_spill] sm:$0xff] }
 0x749   : > { %13122 = vmatprep.mubr.f32.mxu0 %v21255_v61  ;;  %13139 = vmatpush3.msra.mxu1 %v18864_v3 }
 0x74a   : > { %13104 = vmatprep.subr.mxu0 %v18990_v8  ;;  %13140 = vmatprep.subr.mxu1 %v18879_v42 }
 0x74b   : > { %13105 = vmatpush3.msra.mxu0 %v18990_v8  ;;  %13141 = vmatpush3.msra.mxu1 %v18879_v42  ;;  %v21272_v8 = vld [vmem:[#allocation87_spill] sm:$0xff] }
 0x74c   : > { %13085 = vmatmul.mubr.f32.gmra.mxu1 %v19126_v38  ;;  %13106 = vmatprep.subr.mxu0 %v19008_v48 }
 0x74d   : > { %13142 = vmatprep.subr.mxu1 %v18894_v32  ;;  %13087 = vmatprep.mubr.f32.mxu1 %v19135_v15 }
 0x74e   : > { %13107 = vmatpush3.msra.mxu0 %v19008_v48  ;;  %13143 = vmatpush3.msra.mxu1 %v18894_v32 }
 0x74f   : > { %13108 = vmatprep.subr.mxu0 %v19027_v62  ;;  %13144 = vmatprep.subr.mxu1 %v18911_v44 }
 0x750   : > { %13109 = vmatpush3.msra.mxu0 %v19027_v62  ;;  %13145 = vmatpush3.msra.mxu1 %v18911_v44 }
 0x751   : > { %13088 = vmatmul.mubr.f32.gmra.mxu1 %v19166_v14  ;;  %13110 = vmatprep.subr.mxu0 %v19045_v43 }
 0x752   : > { %13146 = vmatprep.subr.mxu1 %v18931_v52  ;;  %13111 = vmatpush3.msra.mxu0 %v19045_v43  ;;  %v9765_v43 = vld [vmem:[%s19880_s2 + $0x60] sm:$0xff] }
 0x753   : > { %13147 = vmatpush3.msra.mxu1 %v18931_v52  ;;  %13166 = vmatprep.mubr.f32.mxu1 %v21256_v28 }
 0x754   : > { %13112 = vmatprep.subr.mxu0 %v19062_v31  ;;  %13148 = vmatprep.subr.mxu1 %v18952_v0 }
 0x755   : > { %13113 = vmatpush3.msra.mxu0 %v19062_v31  ;;  %13149 = vmatpush3.msra.mxu1 %v18952_v0 }
 0x756   : > { %13114 = vmatprep.subr.mxu0 %v19076_v12  ;;  %13150 = vmatprep.subr.mxu1 %v18965_v29 }
 0x757   : > { %13115 = vmatpush3.msra.mxu0 %v19076_v12  ;;  %13151 = vmatpush3.msra.mxu1 %v18965_v29  ;;  %v9764_v12 = vld [vmem:[%s19880_s2 + $0x58] sm:$0xff] }
 0x758   : > { %13116 = vmatprep.subr.mxu0 %v19102_v21  ;;  %13152 = vmatprep.subr.mxu1 %v18987_v16 }
 0x759   : > { %13117 = vmatpush3.msra.mxu0 %v19102_v21  ;;  %13153 = vmatpush3.msra.mxu1 %v18987_v16  ;;  %v21267_v21 = vld [vmem:[#allocation103_spill] sm:$0xff] }
 0x75a   : > { %13118 = vmatprep.subr.mxu0 %v19122_v36  ;;  %13154 = vmatprep.subr.mxu1 %v19001_v18 }
 0x75b   : > { %13119 = vmatpush3.msra.mxu0 %v19122_v36  ;;  %13155 = vmatpush3.msra.mxu1 %v19001_v18  ;;  %v9761_v36 = vld [vmem:[%s19880_s2 + $0x40] sm:$0xff] }
 0x75c   : > { %13120 = vmatprep.subr.mxu0 %v19142_v59  ;;  %13156 = vmatprep.subr.mxu1 %v19020_v63 }
 0x75d   : > { %13121 = vmatpush3.msra.mxu0 %v19142_v59  ;;  %13157 = vmatpush3.msra.mxu1 %v19020_v63 }
 0x75e   : > { %13123 = vmatmul.mubr.f32.vlgmr.msra.gmra.mxu0 %v18802_v45  ;;  %13158 = vmatprep.subr.mxu1 %v19038_v34 }
 0x75f   : > { %13178 = vmatprep.subr.mxu0 %v18938_v7  ;;  %13125 = vmatprep.mubr.f32.mxu0 %v18812_v2 }
 0x760   : > { %13159 = vmatpush3.msra.mxu1 %v19038_v34  ;;  %13179 = vmatpush3.msra.mxu0 %v18938_v7  ;;  %v21257_v7 = vand.u32 4294901760, %v18802_v45  ;;  %v21261_v45 = vand.u32 4294901760, %v19115_v35 }
 0x761   : > { %13160 = vmatprep.subr.mxu1 %v19072_v4  ;;  %13180 = vmatprep.subr.mxu0 %v18947_v58 }
 0x762   : > { %13161 = vmatpush3.msra.mxu1 %v19072_v4  ;;  %13181 = vmatpush3.msra.mxu0 %v18947_v58  ;;  %v21258_v58 = vld [vmem:[#allocation92_spill] sm:$0xff] }
 0x763   : > { %13126 = vmatmul.mubr.f32.gmra.mxu0 %v19115_v35  ;;  %13162 = vmatprep.subr.mxu1 %v19089_v27 }
 0x764   : > { %13182 = vmatprep.subr.mxu0 %v18941_v5  ;;  %13128 = vmatprep.mubr.f32.mxu0 %v19119_v11 }
 0x765   : > { %13163 = vmatpush3.msra.mxu1 %v19089_v27  ;;  %13183 = vmatpush3.msra.mxu0 %v18941_v5  ;;  %v21259_v5 = vand.u32 4294901760, %v18812_v2  ;;  %v21263_v2 = vand.u32 4294901760, %v19119_v11 }
 0x766   : > { %13164 = vmatprep.subr.mxu1 %v19105_v20  ;;  %13184 = vmatprep.subr.mxu0 %v18961_v54 }
 0x767   : > { %13165 = vmatpush3.msra.mxu1 %v19105_v20  ;;  %13185 = vmatpush3.msra.mxu0 %v18961_v54  ;;  %v21262_v54 = vld [vmem:[#allocation105_spill] sm:$0xff] }
 0x768   : > { %13129 = vmatmul.mubr.f32.gmra.mxu0 %v19156_v46  ;;  %13167 = vmatmul.mubr.f32.vlgmr.msra.gmra.mxu1 %v21257_v7  ;;  %v19448_v46 = vand.u32 4294901760, %v9761_v36 }
 0x769   : > { %13186 = vmatprep.subr.mxu0 %v21258_v58  ;;  %13222 = vmatprep.subr.mxu1 %v18899_v51 }
 0x76a   : > { %13131 = vmatprep.mubr.f32.mxu0 %v19164_v40  ;;  %13169 = vmatprep.mubr.f32.mxu1 %v21259_v5  ;;  %v19467_v23 = vsub.f32 %v9761_v36, %v19448_v46 }
 0x76b   : > { %13187 = vmatpush3.msra.mxu0 %v21258_v58  ;;  %13223 = vmatpush3.msra.mxu1 %v18899_v51  ;;  %v21264_v51 = vld [vmem:[#allocation85_spill] sm:$0xff] }
 0x76c   : > { %13188 = vmatprep.subr.mxu0 %v21260_v41  ;;  %13224 = vmatprep.subr.mxu1 %v18906_v37  ;;  %21281 = vst [vmem:[#allocation150_spill] sm:$0xff] %v19467_v23 }
 0x76d   : > { %13189 = vmatpush3.msra.mxu0 %v21260_v41  ;;  %13225 = vmatpush3.msra.mxu1 %v18906_v37  ;;  %v21266_v37 = vmov %v21254_v60 }
 0x76e   : > { %13132 = vmatmul.mubr.f32.gmra.mxu0 %v19184_v33  ;;  %13170 = vmatmul.mubr.f32.gmra.mxu1 %v21261_v45  ;;  %v9759_v45 = vld [vmem:[%s19880_s2 + $0x30] sm:$0xff] }
 0x76f   : > { %13190 = vmatprep.subr.mxu0 %v21262_v54  ;;  %13226 = vmatprep.subr.mxu1 %v18864_v3 }
 0x770   : > { %13172 = vmatprep.mubr.f32.mxu1 %v21263_v2  ;;  %13191 = vmatpush3.msra.mxu0 %v21262_v54  ;;  %v19510_v54 = vand.u32 4294901760, %v9759_v45 }
 0x771   : > { %13210 = vmatprep.mubr.f32.mxu0 %v21264_v51  ;;  %13227 = vmatpush3.msra.mxu1 %v18864_v3  ;;  %v21268_v3 = vld [vmem:[#allocation174_spill] sm:$0xff] }
 0x772   : > { %13192 = vmatprep.subr.mxu0 %v21265_v53  ;;  %13228 = vmatprep.subr.mxu1 %v18879_v42  ;;  %21288 = vst [vmem:[#allocation135_spill] sm:$0xff] %v19510_v54 }
 0x773   : > { %13193 = vmatpush3.msra.mxu0 %v21265_v53  ;;  %13229 = vmatpush3.msra.mxu1 %v18879_v42  ;;  %v21269_v42 = vld [vmem:[#allocation184_spill] sm:$0xff]  ;;  %v19517_v53 = vsub.f32 %v9759_v45, %v19510_v54 }
 0x774   : > { %13173 = vmatmul.mubr.f32.gmra.mxu1 %v21266_v37  ;;  %13194 = vmatprep.subr.mxu0 %v21267_v21 }
 0x775   : > { %13230 = vmatprep.subr.mxu1 %v18894_v32  ;;  %13175 = vmatprep.mubr.f32.mxu1 %v8954_v30  ;;  %21289 = vst [vmem:[#allocation140_spill] sm:$0xff] %v19517_v53 }
 0x776   : > { %13195 = vmatpush3.msra.mxu0 %v21267_v21  ;;  %13231 = vmatpush3.msra.mxu1 %v18894_v32  ;;  %v21270_v32 = vld [vmem:[#allocation125_spill] sm:$0xff] }
 0x777   : > { %13196 = vmatprep.subr.mxu0 %v21268_v3  ;;  %13232 = vmatprep.subr.mxu1 %v18911_v44 }
 0x778   : > { %13197 = vmatpush3.msra.mxu0 %v21268_v3  ;;  %13233 = vmatpush3.msra.mxu1 %v18911_v44  ;;  %v21271_v44 = vld [vmem:[#allocation112_spill] sm:$0xff]  ;;  %v9757_v3 = vld [vmem:[%s19880_s2 + $0x20] sm:$0xff] }
 0x779   : > { %13176 = vmatmul.mubr.f32.gmra.mxu1 %v8964_v25  ;;  %13198 = vmatprep.subr.mxu0 %v21269_v42  ;;  %v19486_v25 = vand.u32 4294901760, %v19467_v23 }
 0x77a   : > { %13234 = vmatprep.subr.mxu1 %v18931_v52  ;;  %13199 = vmatpush3.msra.mxu0 %v21269_v42  ;;  %v19527_v42 = vand.u32 4294901760, %v19517_v53 }
 0x77b   : > { %13235 = vmatpush3.msra.mxu1 %v18931_v52  ;;  %13254 = vmatprep.mubr.f32.mxu1 %v21264_v51  ;;  %21286 = vst [vmem:[#allocation129_spill] sm:$0xff] %v19486_v25  ;;  %v9983_v58 = vsub.f32 %v19467_v23, %v19486_v25  ;;  %v9758_v51 = vld [vmem:[%s19880_s2 + $0x28] sm:$0xff] }
 0x77c   : > { %13200 = vmatprep.subr.mxu0 %v21270_v32  ;;  %13236 = vmatprep.subr.mxu1 %v18952_v0  ;;  %v19519_v37 = vand.u32 4294901760, %v9758_v51  ;;  %21291 = vst [vmem:[#allocation185_spill] sm:$0xff] %v19527_v42 }
 0x77d   : > { %13201 = vmatpush3.msra.mxu0 %v21270_v32  ;;  %13237 = vmatpush3.msra.mxu1 %v18952_v0  ;;  %v9767_v0 = vld [vmem:[%s19880_s2 + $0x70] sm:$0xff]  ;;  %v9984_v2 = vand.u32 4294901760, %v9983_v58 }
 0x77e   : > { %13202 = vmatprep.subr.mxu0 %v21271_v44  ;;  %13238 = vmatprep.subr.mxu1 %v18965_v29  ;;  %21290 = vst [vmem:[#allocation152_spill] sm:$0xff] %v19519_v37  ;;  %v19530_v32 = vsub.f32 %v9758_v51, %v19519_v37 }
 0x77f   : > { %13203 = vmatpush3.msra.mxu0 %v21271_v44  ;;  %13239 = vmatpush3.msra.mxu1 %v18965_v29  ;;  %v19532_v44 = vand.u32 4294901760, %v9757_v3 }
 0x780   : > { %13204 = vmatprep.subr.mxu0 %v21272_v8  ;;  %13240 = vmatprep.subr.mxu1 %v18987_v16  ;;  %21292 = vst [vmem:[#allocation99_spill] sm:$0xff] %v19530_v32 }
 0x781   : > { %13205 = vmatpush3.msra.mxu0 %v21272_v8  ;;  %13241 = vmatpush3.msra.mxu1 %v18987_v16  ;;  %v19389_v16 = vand.u32 4294901760, %v9767_v0  ;;  %21293 = vst [vmem:[#allocation183_spill] sm:$0xff] %v19532_v44  ;;  %v9756_v8 = vld [vmem:[%s19880_s2 + $0x18] sm:$0xff] }
 0x782   : > { %13206 = vmatprep.subr.mxu0 %v19153_v47  ;;  %13242 = vmatprep.subr.mxu1 %v19001_v18 }
 0x783   : > { %13207 = vmatpush3.msra.mxu0 %v19153_v47  ;;  %13243 = vmatpush3.msra.mxu1 %v19001_v18  ;;  %v19397_v48 = vsub.f32 %v9767_v0, %v19389_v16  ;;  %v19542_v0 = vand.u32 4294901760, %v19530_v32 }
 0x784   : > { %13208 = vmatprep.subr.mxu0 %v19170_v56  ;;  %13244 = vmatprep.subr.mxu1 %v19020_v63 }
 0x785   : > { %13209 = vmatpush3.msra.mxu0 %v19170_v56  ;;  %13245 = vmatpush3.msra.mxu1 %v19020_v63  ;;  %v19399_v63 = vand.u32 4294901760, %v9766_v17  ;;  %21294 = vst [vmem:[#allocation109_spill] sm:$0xff] %v19542_v0 }
 0x786   : > { %13211 = vmatmul.mubr.f32.vlgmr.msra.gmra.mxu0 %v18776_v10  ;;  %13246 = vmatprep.subr.mxu1 %v19038_v34 }
 0x787   : > { %13213 = vmatprep.mubr.f32.mxu0 %v18784_v39  ;;  %13247 = vmatpush3.msra.mxu1 %v19038_v34  ;;  %v19407_v34 = vsub.f32 %v9766_v17, %v19399_v63  ;;  %v19545_v17 = vsub.f32 %v9757_v3, %v19532_v44 }
 0x788   : > { %13248 = vmatprep.subr.mxu1 %v19072_v4 }
 0x789   : > { %13249 = vmatpush3.msra.mxu1 %v19072_v4  ;;  %v19419_v4 = vand.u32 4294901760, %v19407_v34  ;;  %21295 = vst [vmem:[#allocation132_spill] sm:$0xff] %v19545_v17 }
 0x78a   : > { %13214 = vmatmul.mubr.f32.gmra.mxu0 %v19054_v22  ;;  %13250 = vmatprep.subr.mxu1 %v19089_v27 }
 0x78b   : > { %13216 = vmatprep.mubr.f32.mxu0 %v19085_v6  ;;  %13251 = vmatpush3.msra.mxu1 %v19089_v27  ;;  %21275 = vst [vmem:[#allocation102_spill] sm:$0xff] %v19419_v4  ;;  %v9948_v47 = vsub.f32 %v19407_v34, %v19419_v4 }
 0x78c   : > { %13252 = vmatprep.subr.mxu1 %v19105_v20 }
 0x78d   : > { %13253 = vmatpush3.msra.mxu1 %v19105_v20  ;;  %v19433_v20 = vand.u32 4294901760, %v9764_v12  ;;  %v9949_v30 = vand.u32 4294901760, %v9948_v47 }
 0x78e   : > { %13217 = vmatmul.mubr.f32.gmra.mxu0 %v19126_v38  ;;  %13255 = vmatmul.mubr.f32.vlgmr.msra.gmra.mxu1 %v18776_v10  ;;  %v9768_v10 = vld [vmem:[%s19880_s2 + $0x78] sm:$0xff] }
 0x78f   : > { %13219 = vmatprep.mubr.f32.mxu0 %v19135_v15  ;;  %13257 = vmatprep.mubr.f32.mxu1 %v18784_v39  ;;  %v19376_v52 = vand.u32 4294901760, %v9768_v10  ;;  %v19457_v24 = vsub.f32 %v9764_v12, %v19433_v20 }
 0x791   : > { %v19379_v39 = vsub.f32 %v9768_v10, %v19376_v52  ;;  %13266 = vmatprep.subr.mxu0 %v19376_v52  ;;  %21278 = vst [vmem:[#allocation94_spill] sm:$0xff] %v19457_v24  ;;  %v19476_v50 = vand.u32 4294901760, %v19457_v24  ;;  %v9997_v10 = vsub.f32 %v19517_v53, %v19527_v42 }
 0x792   : > { %13220 = vmatmul.mubr.f32.gmra.mxu0 %v19166_v14  ;;  %13258 = vmatmul.mubr.f32.gmra.mxu1 %v19054_v22  ;;  %v19413_v22 = vand.u32 4294901760, %v9765_v43 }
 0x793   : > { %13260 = vmatprep.mubr.f32.mxu1 %v19085_v6  ;;  %13267 = vmatpush3.msra.mxu0 %v19376_v52  ;;  %v19387_v29 = vand.u32 4294901760, %v19379_v39  ;;  %v9762_v6 = vld [vmem:[%s19880_s2 + $0x48] sm:$0xff]  ;;  %21283 = vst [vmem:[#allocation155_spill] sm:$0xff] %v19476_v50  ;;  %v9962_v49 = vsub.f32 %v19457_v24, %v19476_v50 }
 0x794   : > { %13268 = vmatprep.subr.mxu0 %v19389_v16  ;;  %v19431_v27 = vsub.f32 %v9765_v43, %v19413_v22  ;;  %v19437_v11 = vand.u32 4294901760, %v9762_v6  ;;  %v10004_v43 = vsub.f32 %v19530_v32, %v19542_v0 }
 0x795   : > { %21273 = vst [vmem:[#allocation176_spill] sm:$0xff] %v19387_v29  ;;  %v9934_v18 = vsub.f32 %v19379_v39, %v19387_v29  ;;  %13269 = vmatpush3.msra.mxu0 %v19389_v16  ;;  %v9963_v28 = vand.u32 4294901760, %v9962_v49 }
 0x796   : > { %13261 = vmatmul.mubr.f32.gmra.mxu1 %v19126_v38  ;;  %13270 = vmatprep.subr.mxu0 %v19399_v63  ;;  %v9760_v38 = vld [vmem:[%s19880_s2 + $0x38] sm:$0xff]  ;;  %v19454_v56 = vand.u32 4294901760, %v19431_v27  ;;  %v19463_v57 = vsub.f32 %v9762_v6, %v19437_v11 }
 0x797   : > { %13263 = vmatprep.mubr.f32.mxu1 %v19135_v15  ;;  %v9935_v62 = vand.u32 4294901760, %v9934_v18  ;;  %13271 = vmatpush3.msra.mxu0 %v19399_v63  ;;  %v9763_v15 = vld [vmem:[%s19880_s2 + $0x50] sm:$0xff]  ;;  %v19451_v40 = vand.u32 4294901760, %v9760_v38  ;;  %v19547_v18 = vand.u32 4294901760, %v9756_v8 }
 0x798   : > { %v19435_v35 = vand.u32 4294901760, %v9763_v15  ;;  %13272 = vmatprep.subr.mxu0 %v19413_v22  ;;  %21277 = vst [vmem:[#allocation81_spill] sm:$0xff] %v19454_v56  ;;  %21280 = vst [vmem:[#allocation158_spill] sm:$0xff] %v19463_v57  ;;  %v9955_v60 = vsub.f32 %v19431_v27, %v19454_v56  ;;  %v19482_v19 = vand.u32 4294901760, %v19463_v57 }
 0x799   : > { %13310 = vmatprep.subr.mxu1 %v9935_v62  ;;  %13273 = vmatpush3.msra.mxu0 %v19413_v22  ;;  %21276 = vst [vmem:[#allocation114_spill] sm:$0xff] %v19451_v40  ;;  %v19470_v26 = vsub.f32 %v9760_v38, %v19451_v40  ;;  %21296 = vst [vmem:[#allocation136_spill] sm:$0xff] %v19547_v18  ;;  %v19557_v12 = vsub.f32 %v9756_v8, %v19547_v18 }
 0x79a   : > { %13264 = vmatmul.mubr.f32.gmra.mxu1 %v19166_v14  ;;  %v19404_v14 = vand.u32 4294901760, %v19397_v48  ;;  %v19460_v33 = vsub.f32 %v9763_v15, %v19435_v35  ;;  %13274 = vmatprep.subr.mxu0 %v19433_v20  ;;  %21285 = vst [vmem:[#allocation88_spill] sm:$0xff] %v19482_v19  ;;  %v9956_v1 = vand.u32 4294901760, %v9955_v60  ;;  %v9976_v61 = vsub.f32 %v19463_v57, %v19482_v19  ;;  %v9754_v60 = vld [vmem:[%s19880_s2 + $0x8] sm:$0xff] }
 0x79b   : > { %13311 = vmatpush3.msra.mxu1 %v9935_v62  ;;  %21282 = vst [vmem:[#allocation164_spill] sm:$0xff] %v19470_v26  ;;  %13275 = vmatpush3.msra.mxu0 %v19433_v20  ;;  %v19489_v55 = vand.u32 4294901760, %v19470_v26  ;;  %v9998_v62 = vand.u32 4294901760, %v9997_v10  ;;  %21298 = vst [vmem:[#allocation138_spill] sm:$0xff] %v19557_v12  ;;  %v10005_v15 = vand.u32 4294901760, %v10004_v43  ;;  %v19564_v36 = vand.u32 4294901760, %v19557_v12 }
 0x79c   : > { %21274 = vst [vmem:[#allocation95_spill] sm:$0xff] %v19404_v14  ;;  %v9941_v31 = vsub.f32 %v19397_v48, %v19404_v14  ;;  %21279 = vst [vmem:[#allocation115_spill] sm:$0xff] %v19460_v33  ;;  %v19479_v13 = vand.u32 4294901760, %v19460_v33  ;;  %13276 = vmatprep.subr.mxu0 %v19435_v35  ;;  %v9977_v5 = vand.u32 4294901760, %v9976_v61  ;;  %v19576_v49 = vand.u32 4294901760, %v9754_v60 }
 0x79d   : > { %21287 = vst [vmem:[#allocation122_spill] sm:$0xff] %v19489_v55  ;;  %13277 = vmatpush3.msra.mxu0 %v19435_v35  ;;  %v9990_v41 = vsub.f32 %v19470_v26, %v19489_v55  ;;  %21299 = vst [vmem:[#allocation182_spill] sm:$0xff] %v19564_v36 }
 0x79e   : > { %v9942_v59 = vand.u32 4294901760, %v9941_v31  ;;  %21284 = vst [vmem:[#allocation113_spill] sm:$0xff] %v19479_v13  ;;  %v9969_v9 = vsub.f32 %v19460_v33, %v19479_v13  ;;  %13278 = vmatprep.subr.mxu0 %v19437_v11  ;;  %v19554_v31 = vand.u32 4294901760, %v19545_v17  ;;  %21301 = vst [vmem:[#allocation146_spill] sm:$0xff] %v19576_v49 }
 0x79f   : > { %13279 = vmatpush3.msra.mxu0 %v19437_v11  ;;  %v9991_v21 = vand.u32 4294901760, %v9990_v41 }
 0x7a0   : > { %13312 = vmatprep.subr.mxu1 %v9942_v59  ;;  %v9970_v7 = vand.u32 4294901760, %v9969_v9  ;;  %13280 = vmatprep.subr.mxu0 %v19448_v46  ;;  %21297 = vst [vmem:[#allocation170_spill] sm:$0xff] %v19554_v31  ;;  %v10011_v6 = vsub.f32 %v19545_v17, %v19554_v31  ;;  %v9753_v9 = vld [vmem:[%s19880_s2] sm:$0xff] }
 0x7a1   : > { %13313 = vmatpush3.msra.mxu1 %v9942_v59  ;;  %13281 = vmatpush3.msra.mxu0 %v19448_v46  ;;  %v10018_v59 = vsub.f32 %v19557_v12, %v19564_v36 }
 0x7a2   : > { %13314 = vmatprep.subr.mxu1 %v9949_v30  ;;  %13282 = vmatprep.subr.mxu0 %v19451_v40  ;;  %v10012_v38 = vand.u32 4294901760, %v10011_v6 }
 0x7a3   : > { %13315 = vmatpush3.msra.mxu1 %v9949_v30  ;;  %13283 = vmatpush3.msra.mxu0 %v19451_v40  ;;  %v10019_v47 = vand.u32 4294901760, %v10018_v59  ;;  %v9755_v30 = vld [vmem:[%s19880_s2 + $0x10] sm:$0xff] }
 0x7a4   : > { %13316 = vmatprep.subr.mxu1 %v9956_v1  ;;  %13284 = vmatprep.subr.mxu0 %v19510_v54 }
 0x7a5   : > { %13317 = vmatpush3.msra.mxu1 %v9956_v1  ;;  %13285 = vmatpush3.msra.mxu0 %v19510_v54  ;;  %v19574_v1 = vand.u32 4294901760, %v9755_v30 }
 0x7a6   : > { %13318 = vmatprep.subr.mxu1 %v9963_v28  ;;  %13286 = vmatprep.subr.mxu0 %v19519_v37 }
 0x7a7   : > { %13319 = vmatpush3.msra.mxu1 %v9963_v28  ;;  %13287 = vmatpush3.msra.mxu0 %v19519_v37  ;;  %21300 = vst [vmem:[#allocation159_spill] sm:$0xff] %v19574_v1  ;;  %v19582_v61 = vsub.f32 %v9755_v30, %v19574_v1  ;;  %v19585_v28 = vsub.f32 %v9754_v60, %v19576_v49 }
 0x7a8   : > { %13320 = vmatprep.subr.mxu1 %v9970_v7  ;;  %13288 = vmatprep.subr.mxu0 %v19532_v44 }
 0x7a9   : > { %13321 = vmatpush3.msra.mxu1 %v9970_v7  ;;  %13289 = vmatpush3.msra.mxu0 %v19532_v44  ;;  %21302 = vst [vmem:[#allocation143_spill] sm:$0xff] %v19582_v61  ;;  %21303 = vst [vmem:[#allocation151_spill] sm:$0xff] %v19585_v28  ;;  %v19587_v7 = vand.u32 4294901760, %v9753_v9  ;;  %v19592_v58 = vand.u32 4294901760, %v19582_v61 }
 0x7aa   : > { %13322 = vmatprep.subr.mxu1 %v9977_v5  ;;  %13290 = vmatprep.subr.mxu0 %v19547_v18 }
 0x7ab   : > { %13323 = vmatpush3.msra.mxu1 %v9977_v5  ;;  %13291 = vmatpush3.msra.mxu0 %v19547_v18  ;;  %21304 = vst [vmem:[#allocation145_spill] sm:$0xff] %v19587_v7  ;;  %21305 = vst [vmem:[#allocation153_spill] sm:$0xff] %v19592_v58  ;;  %v19595_v5 = vand.u32 4294901760, %v19585_v28  ;;  %v19598_v41 = vsub.f32 %v9753_v9, %v19587_v7  ;;  %v10025_v45 = vsub.f32 %v19582_v61, %v19592_v58 }
 0x7ac   : > { %13324 = vmatprep.subr.mxu1 %v9984_v2  ;;  %13292 = vmatprep.subr.mxu0 %v19574_v1 }
 0x7ad   : > { %13325 = vmatpush3.msra.mxu1 %v9984_v2  ;;  %13293 = vmatpush3.msra.mxu0 %v19574_v1  ;;  %21306 = vst [vmem:[#allocation169_spill] sm:$0xff] %v19595_v5  ;;  %21307 = vst [vmem:[#allocation157_spill] sm:$0xff] %v19598_v41  ;;  %v10032_v2 = vsub.f32 %v19585_v28, %v19595_v5  ;;  %v19607_v51 = vand.u32 4294901760, %v19598_v41 }
 0x7ae   : > { %13326 = vmatprep.subr.mxu1 %v9991_v21  ;;  %13294 = vmatprep.subr.mxu0 %v19576_v49 }
 0x7af   : > { %13327 = vmatpush3.msra.mxu1 %v9991_v21  ;;  %13295 = vmatpush3.msra.mxu0 %v19576_v49  ;;  %21308 = vst [vmem:[#allocation162_spill] sm:$0xff] %v19607_v51  ;;  %v10026_v21 = vand.u32 4294901760, %v10025_v45  ;;  %v10033_v3 = vand.u32 4294901760, %v10032_v2  ;;  %v10039_v8 = vsub.f32 %v19598_v41, %v19607_v51 }
 0x7b0   : > { %13328 = vmatprep.subr.mxu1 %v9998_v62  ;;  %13296 = vmatprep.subr.mxu0 %v19587_v7 }
 0x7b1   : > { %13329 = vmatpush3.msra.mxu1 %v9998_v62  ;;  %13297 = vmatpush3.msra.mxu0 %v19587_v7  ;;  %v10040_v10 = vand.u32 4294901760, %v10039_v8 }
 0x7b2   : > { %13330 = vmatprep.subr.mxu1 %v10005_v15  ;;  %13354 = vmatprep.subr.mxu0 %v19379_v39 }
 0x7b3   : > { %13331 = vmatpush3.msra.mxu1 %v10005_v15 }
 0x7b4   : > { %13332 = vmatprep.subr.mxu1 %v10012_v38 }
 0x7b5   : > { %13333 = vmatpush3.msra.mxu1 %v10012_v38 }
 0x7b6   : > { %13334 = vmatprep.subr.mxu1 %v10019_v47 }
 0x7b7   : > { %13335 = vmatpush3.msra.mxu1 %v10019_v47 }
 0x7b8   : > { %13336 = vmatprep.subr.mxu1 %v10026_v21 }
 0x7b9   : > { %13337 = vmatpush3.msra.mxu1 %v10026_v21 }
 0x7ba   : > { %13338 = vmatprep.subr.mxu1 %v10033_v3 }
 0x7bb   : > { %13339 = vmatpush3.msra.mxu1 %v10033_v3 }
 0x7bc   : > { %13340 = vmatprep.subr.mxu1 %v10040_v10 }
 0x7bd   : > { %13341 = vmatpush3.msra.mxu1 %v10040_v10 }
 0x7be   : > { %13398 = vmatprep.subr.mxu1 %v19376_v52 }
 0x7f6   : > { %v13036_v62 = vpop.f32.mrf.mxu0 }
 0x7f8   : > { %v8898_v43 = vpop.f32.mrf.mxu0 }
 0x7fb   : > { %v13039_v15 = vpop.f32.mrf.mxu0 }
 0x7fd   : > { %v8918_v38 = vpop.f32.mrf.mxu0 }
 0x800   : > { %v13080_v6 = vpop.f32.mrf.mxu1  ;;  %v13042_v47 = vpop.f32.mrf.mxu0 }
 0x801   : > { %v9126_v29 = vadd.f32 %v13080_v6, %v13036_v62 }
 0x802   : > { %v9119_v59 = vpop.f32.mrf.mxu1  ;;  %v8938_v60 = vpop.f32.mrf.mxu0 }
 0x803   : > { %v9120_v61 = vadd.f32 %v9119_v59, %v8898_v43 }
 0x806   : > { %v13083_v30 = vpop.f32.mrf.mxu1  ;;  %v13045_v45 = vpop.f32.mrf.mxu0 }
 0x807   : > { %v9138_v17 = vadd.f32 %v13083_v30, %v13039_v15 }
 0x808   : > { %v9131_v9 = vpop.f32.mrf.mxu1  ;;  %v8958_v8 = vpop.f32.mrf.mxu0 }
 0x809   : > { %v9132_v23 = vadd.f32 %v9131_v9, %v8918_v38 }
 0x80c   : > { %v13086_v2 = vpop.f32.mrf.mxu1 }
 0x80d   : > { %v9150_v54 = vadd.f32 %v13086_v2, %v13042_v47 }
 0x80e   : > { %v9143_v21 = vpop.f32.mrf.mxu1 }
 0x80f   : > { %v9144_v6 = vadd.f32 %v9143_v21, %v8938_v60 }
 0x811   : > { %v13089_v3 = vpop.f32.mrf.mxu1 }
 0x813   : > { %v9155_v10 = vpop.f32.mrf.mxu1 }
 0x81e   : > { %v13124_v51 = vpop.f32.mrf.mxu0 }
 0x81f   : > { %v9273_v12 = vadd.f32 %v13124_v51, %v9126_v29 }
 0x820   : > { %v9265_v5 = vpop.f32.mrf.mxu0 }
 0x821   : > { %v9266_v49 = vadd.f32 %v9265_v5, %v9120_v61 }
 0x823   : > { %v13127_v58 = vpop.f32.mrf.mxu0 }
 0x824   : > { %v9287_v18 = vadd.f32 %v13127_v58, %v9138_v17 }
 0x825   : > { %v9279_v31 = vpop.f32.mrf.mxu0 }
 0x826   : > { %v9280_v24 = vadd.f32 %v9279_v31, %v9132_v23 }
 0x828   : > { %v13168_v36 = vpop.f32.mrf.mxu1  ;;  %v13130_v42 = vpop.f32.mrf.mxu0 }
 0x829   : > { %v9412_v32 = vadd.f32 %v13168_v36, %v9273_v12  ;;  %v9301_v51 = vadd.f32 %v13130_v42, %v9150_v54  ;;  %v9162_v36 = vadd.f32 %v13089_v3, %v13045_v45 }
 0x82a   : > { %v9403_v0 = vpop.f32.mrf.mxu1  ;;  %v9293_v25 = vpop.f32.mrf.mxu0 }
 0x82b   : > { %v9404_v26 = vadd.f32 %v9403_v0, %v9266_v49  ;;  %v9294_v17 = vadd.f32 %v9293_v25, %v9144_v6 }
 0x82e   : > { %v13171_v55 = vpop.f32.mrf.mxu1  ;;  %v13133_v13 = vpop.f32.mrf.mxu0 }
 0x82f   : > { %v9428_v33 = vadd.f32 %v13171_v55, %v9287_v18  ;;  %v9315_v23 = vadd.f32 %v13133_v13, %v9162_v36 }
 0x830   : > { %v9419_v19 = vpop.f32.mrf.mxu1  ;;  %v9307_v56 = vpop.f32.mrf.mxu0 }
 0x831   : > { %v9420_v0 = vadd.f32 %v9419_v19, %v9280_v24 }
 0x834   : > { %v13174_v50 = vpop.f32.mrf.mxu1 }
 0x836   : > { %v9435_v4 = vpop.f32.mrf.mxu1 }
 0x839   : > { %v13177_v41 = vpop.f32.mrf.mxu1 }
 0x83a   : > { %v9460_v19 = vadd.f32 %v13177_v41, %v9315_v23 }
 0x83b   : > { %v9451_v1 = vpop.f32.mrf.mxu1 }
 0x846   : > { %v13212_v14 = vpop.f32.mrf.mxu0 }
 0x847   : > { %v9585_v44 = vadd.f32 %v13212_v14, %v9412_v32  ;;  %v9444_v32 = vadd.f32 %v13174_v50, %v9301_v51 }
 0x848   : > { %v9578_v28 = vpop.f32.mrf.mxu0 }
 0x849   : > { %v9579_v40 = vadd.f32 %v9578_v28, %v9404_v26  ;;  %v9156_v26 = vadd.f32 %v9155_v10, %v8958_v8 }
 0x84a   : > { %v13215_v7 = vpop.f32.mrf.mxu0 }
 0x84b   : > { %v9597_v15 = vadd.f32 %v13215_v7, %v9428_v33  ;;  %v9308_v50 = vadd.f32 %v9307_v56, %v9156_v26 }
 0x84c   : > { %v9590_v53 = vpop.f32.mrf.mxu0 }
 0x84d   : > { %v9591_v18 = vadd.f32 %v9590_v53, %v9420_v0  ;;  %v9452_v7 = vadd.f32 %v9451_v1, %v9308_v50  ;;  %v21310_v50 = vld [vmem:[#allocation114_spill] sm:$0xff] }
 0x84e   : > { %v13218_v37 = vpop.f32.mrf.mxu0  ;;  %v13256_v57 = vpop.f32.mrf.mxu1 }
 0x84f   : > { %v9714_v62 = vadd.f32 %v13256_v57, %v9585_v44  ;;  %v9436_v44 = vadd.f32 %v9435_v4, %v9294_v17  ;;  %v9609_v42 = vadd.f32 %v13218_v37, %v9444_v32 }
 0x850   : > { %v9602_v43 = vpop.f32.mrf.mxu0  ;;  %v9707_v29 = vpop.f32.mrf.mxu1 }
 0x851   : > { %v19615_v61 = vand.u32 4294901760, %v9714_v62  ;;  %v9708_v12 = vadd.f32 %v9707_v29, %v9579_v40  ;;  %v9603_v4 = vadd.f32 %v9602_v43, %v9436_v44 }
 0x852   : > { %v13259_v14 = vpop.f32.mrf.mxu1  ;;  %v13221_v54 = vpop.f32.mrf.mxu0 }
 0x853   : > { %v19618_v49 = vsub.f32 %v9714_v62, %v19615_v61  ;;  %v19620_v55 = vand.u32 4294901760, %v9708_v12  ;;  %v9726_v57 = vadd.f32 %v13259_v14, %v9597_v15  ;;  %v9621_v38 = vadd.f32 %v13221_v54, %v9460_v19 }
 0x854   : > { %v9719_v33 = vpop.f32.mrf.mxu1  ;;  %v9614_v58 = vpop.f32.mrf.mxu0 }
 0x855   : > { %v9862_v40 = vand.u32 4294901760, %v19618_v49  ;;  %v19624_v25 = vsub.f32 %v9708_v12, %v19620_v55  ;;  %v19626_v24 = vand.u32 4294901760, %v9726_v57  ;;  %13342 = vmatprep.mubr.f32.mxu1 %v19620_v55  ;;  %v9720_v31 = vadd.f32 %v9719_v33, %v9591_v18 }
 0x856   : > { %v13262_v28 = vpop.f32.mrf.mxu1  ;;  %13343 = vmatmul.mubr.f32.vlgmr.msra.gmra.mxu1 %v19615_v61  ;;  %v9615_v45 = vadd.f32 %v9614_v58, %v9452_v7  ;;  %v21316_v7 = vld [vmem:[#allocation183_spill] sm:$0xff]  ;;  %v21317_v58 = vld [vmem:[#allocation164_spill] sm:$0xff] }
 0x857   : > { %v19631_v13 = vsub.f32 %v9726_v57, %v19626_v24  ;;  %v9738_v53 = vadd.f32 %v13262_v28, %v9609_v42  ;;  %13399 = vmatpush3.msra.mxu1 %v19376_v52  ;;  %v9852_v37 = vand.u32 4294901760, %v19624_v25  ;;  %v19635_v5 = vand.u32 4294901760, %v9720_v31  ;;  %v21309_v42 = vld [vmem:[#allocation94_spill] sm:$0xff] }
 0x858   : > { %13400 = vmatprep.subr.mxu1 %v19389_v16  ;;  %v9731_v56 = vpop.f32.mrf.mxu1  ;;  %v9863_v41 = vsub.f32 %v19618_v49, %v9862_v40 }
 0x859   : > { %v19641_v59 = vand.u32 4294901760, %v9738_v53  ;;  %v9732_v47 = vadd.f32 %v9731_v56, %v9603_v4  ;;  %13401 = vmatpush3.msra.mxu1 %v19389_v16  ;;  %v19645_v30 = vsub.f32 %v9720_v31, %v19635_v5  ;;  %13345 = vmatprep.mubr.f32.mxu1 %v19635_v5  ;;  %v9853_v60 = vsub.f32 %v19624_v25, %v9852_v37  ;;  %v21311_v31 = vld [vmem:[#allocation115_spill] sm:$0xff]  ;;  %v21313_v4 = vld [vmem:[#allocation158_spill] sm:$0xff]  ;;  %v21318_v56 = vld [vmem:[#allocation136_spill] sm:$0xff] }
 0x85a   : > { %13402 = vmatprep.subr.mxu1 %v19399_v63  ;;  %v13265_v1 = vpop.f32.mrf.mxu1  ;;  %v9882_v9 = vand.u32 4294901760, %v19631_v13  ;;  %13346 = vmatmul.mubr.f32.gmra.mxu1 %v19626_v24  ;;  %v9864_v62 = vand.u32 4294901760, %v9863_v41  ;;  %v21319_v41 = vld [vmem:[#allocation140_spill] sm:$0xff] }
 0x85b   : > { %v19653_v2 = vand.u32 4294901760, %v9732_v47  ;;  %v9750_v8 = vadd.f32 %v13265_v1, %v9621_v38  ;;  %13403 = vmatpush3.msra.mxu1 %v19399_v63  ;;  %v9854_v3 = vand.u32 4294901760, %v9853_v60  ;;  %v9872_v10 = vand.u32 4294901760, %v19645_v30  ;;  %v21320_v38 = vld [vmem:[#allocation159_spill] sm:$0xff]  ;;  %v21323_v1 = vld [vmem:[#allocation132_spill] sm:$0xff]  ;;  %v21324_v60 = vld [vmem:[#allocation145_spill] sm:$0xff] }
 0x85c   : > { %v9743_v21 = vpop.f32.mrf.mxu1  ;;  %v19659_v6 = vsub.f32 %v9738_v53, %v19641_v59  ;;  %13404 = vmatprep.subr.mxu1 %v19413_v22  ;;  %v9883_v12 = vsub.f32 %v19631_v13, %v9882_v9  ;;  %v21314_v53 = vld [vmem:[#allocation152_spill] sm:$0xff] }
 0x85d   : > { %v19662_v43 = vsub.f32 %v9732_v47, %v19653_v2  ;;  %v9744_v29 = vadd.f32 %v9743_v21, %v9615_v45  ;;  %13348 = vmatprep.mubr.f32.mxu1 %v19653_v2  ;;  %v19666_v51 = vand.u32 4294901760, %v9750_v8  ;;  %13405 = vmatpush3.msra.mxu1 %v19413_v22  ;;  %v9873_v15 = vsub.f32 %v19645_v30, %v9872_v10  ;;  %v21322_v47 = vld [vmem:[#allocation146_spill] sm:$0xff]  ;;  %v21327_v21 = vld [vmem:[#allocation151_spill] sm:$0xff] }
 0x85e   : > { %13298 = vmatprep.mubr.f32.mxu0 %v9854_v3  ;;  %13406 = vmatprep.subr.mxu1 %v19433_v20  ;;  %v9902_v14 = vand.u32 4294901760, %v19659_v6  ;;  %v9884_v26 = vand.u32 4294901760, %v9883_v12  ;;  %v21325_v45 = vld [vmem:[#allocation138_spill] sm:$0xff]  ;;  %v21342_v3 = vld [vmem:[#allocation153_spill] sm:$0xff] }
 0x85f   : > { %v19675_v36 = vand.u32 4294901760, %v9744_v29  ;;  %13299 = vmatmul.mubr.f32.vlgmr.msra.gmra.mxu0 %v9864_v62  ;;  %v9892_v17 = vand.u32 4294901760, %v19662_v43  ;;  %13349 = vmatmul.mubr.f32.gmra.mxu1 %v19641_v59  ;;  %v9874_v0 = vand.u32 4294901760, %v9873_v15  ;;  %v19688_v57 = vsub.f32 %v9750_v8, %v19666_v51  ;;  %v21326_v8 = vld [vmem:[#allocation143_spill] sm:$0xff]  ;;  %v21344_v62 = vld [vmem:[#allocation162_spill] sm:$0xff] }
 0x860   : > { %13355 = vmatpush3.msra.mxu0 %v19379_v39  ;;  %13407 = vmatpush3.msra.mxu1 %v19433_v20  ;;  %v9903_v44 = vsub.f32 %v19659_v6, %v9902_v14 }
 0x861   : > { %v19683_v32 = vsub.f32 %v9744_v29, %v19675_v36  ;;  %13356 = vmatprep.subr.mxu0 %v19397_v48  ;;  %13408 = vmatprep.subr.mxu1 %v19435_v35  ;;  %v9893_v39 = vsub.f32 %v19662_v43, %v9892_v17 }
 0x862   : > { %13357 = vmatpush3.msra.mxu0 %v19397_v48  ;;  %13409 = vmatpush3.msra.mxu1 %v19435_v35  ;;  %v9922_v48 = vand.u32 4294901760, %v19688_v57  ;;  %v9904_v33 = vand.u32 4294901760, %v9903_v44 }
 0x863   : > { %13301 = vmatprep.mubr.f32.mxu0 %v9874_v0  ;;  %v9912_v23 = vand.u32 4294901760, %v19683_v32  ;;  %13351 = vmatprep.mubr.f32.mxu1 %v19675_v36  ;;  %v9894_v18 = vand.u32 4294901760, %v9893_v39 }
 0x864   : > { %13358 = vmatprep.subr.mxu0 %v19407_v34  ;;  %13410 = vmatprep.subr.mxu1 %v19437_v11 }
 0x865   : > { %13302 = vmatmul.mubr.f32.gmra.mxu0 %v9884_v26  ;;  %13352 = vmatmul.mubr.f32.gmra.mxu1 %v19666_v51  ;;  %v9913_v54 = vsub.f32 %v19683_v32, %v9912_v23 }
 0x866   : > { %13359 = vmatpush3.msra.mxu0 %v19407_v34  ;;  %13411 = vmatpush3.msra.mxu1 %v19437_v11  ;;  %v9923_v34 = vsub.f32 %v19688_v57, %v9922_v48 }
 0x867   : > { %13360 = vmatprep.subr.mxu0 %v19431_v27  ;;  %13412 = vmatprep.subr.mxu1 %v19448_v46  ;;  %v9914_v19 = vand.u32 4294901760, %v9913_v54 }
 0x868   : > { %13430 = vmatprep.mubr.f32.mxu1 %v9852_v37  ;;  %13361 = vmatpush3.msra.mxu0 %v19431_v27  ;;  %v21312_v27 = vld [vmem:[#allocation135_spill] sm:$0xff]  ;;  %v9924_v28 = vand.u32 4294901760, %v9923_v34  ;;  %v21315_v37 = vld [vmem:[#allocation150_spill] sm:$0xff] }
 0x869   : > { %13413 = vmatpush3.msra.mxu1 %v19448_v46  ;;  %13304 = vmatprep.mubr.f32.mxu0 %v9894_v18 }
 0x86a   : > { %13362 = vmatprep.subr.mxu0 %v21309_v42  ;;  %13414 = vmatprep.subr.mxu1 %v21310_v50 }
 0x86b   : > { %13305 = vmatmul.mubr.f32.gmra.mxu0 %v9904_v33  ;;  %13415 = vmatpush3.msra.mxu1 %v21310_v50 }
 0x86c   : > { %13363 = vmatpush3.msra.mxu0 %v21309_v42  ;;  %13416 = vmatprep.subr.mxu1 %v21312_v27 }
 0x86d   : > { %13364 = vmatprep.subr.mxu0 %v21311_v31  ;;  %13417 = vmatpush3.msra.mxu1 %v21312_v27 }
 0x86e   : > { %13365 = vmatpush3.msra.mxu0 %v21311_v31  ;;  %13307 = vmatprep.mubr.f32.mxu0 %v9914_v19 }
 0x86f   : > { %13366 = vmatprep.subr.mxu0 %v21313_v4  ;;  %13418 = vmatprep.subr.mxu1 %v21314_v53 }
 0x870   : > { %13308 = vmatmul.mubr.f32.gmra.mxu0 %v9924_v28  ;;  %13419 = vmatpush3.msra.mxu1 %v21314_v53 }
 0x871   : > { %13367 = vmatpush3.msra.mxu0 %v21313_v4  ;;  %13386 = vmatprep.mubr.f32.mxu0 %v19624_v25  ;;  %v21321_v25 = vld [vmem:[#allocation99_spill] sm:$0xff] }
 0x872   : > { %13368 = vmatprep.subr.mxu0 %v21315_v37  ;;  %13420 = vmatprep.subr.mxu1 %v21316_v7 }
 0x873   : > { %13369 = vmatpush3.msra.mxu0 %v21315_v37  ;;  %13421 = vmatpush3.msra.mxu1 %v21316_v7 }
 0x874   : > { %13370 = vmatprep.subr.mxu0 %v21317_v58  ;;  %13422 = vmatprep.subr.mxu1 %v21318_v56 }
 0x875   : > { %13371 = vmatpush3.msra.mxu0 %v21317_v58  ;;  %13423 = vmatpush3.msra.mxu1 %v21318_v56 }
 0x876   : > { %13372 = vmatprep.subr.mxu0 %v21319_v41  ;;  %13424 = vmatprep.subr.mxu1 %v21320_v38 }
 0x877   : > { %13373 = vmatpush3.msra.mxu0 %v21319_v41  ;;  %13425 = vmatpush3.msra.mxu1 %v21320_v38 }
 0x878   : > { %13374 = vmatprep.subr.mxu0 %v21321_v25  ;;  %13426 = vmatprep.subr.mxu1 %v21322_v47 }
 0x879   : > { %13375 = vmatpush3.msra.mxu0 %v21321_v25  ;;  %13427 = vmatpush3.msra.mxu1 %v21322_v47 }
 0x87a   : > { %13376 = vmatprep.subr.mxu0 %v21323_v1  ;;  %13428 = vmatprep.subr.mxu1 %v21324_v60 }
 0x87b   : > { %13377 = vmatpush3.msra.mxu0 %v21323_v1  ;;  %13429 = vmatpush3.msra.mxu1 %v21324_v60 }
 0x87c   : > { %13378 = vmatprep.subr.mxu0 %v21325_v45  ;;  %13431 = vmatmul.mubr.f32.vlgmr.msra.gmra.mxu1 %v9862_v40  ;;  %v21337_v40 = vld [vmem:[#allocation122_spill] sm:$0xff] }
 0x87d   : > { %13486 = vmatprep.subr.mxu1 %v19376_v52  ;;  %13379 = vmatpush3.msra.mxu0 %v21325_v45 }
 0x87e   : > { %13433 = vmatprep.mubr.f32.mxu1 %v9872_v10  ;;  %13487 = vmatpush3.msra.mxu1 %v19376_v52  ;;  %v21328_v52 = vld [vmem:[#allocation157_spill] sm:$0xff] }
 0x87f   : > { %13380 = vmatprep.subr.mxu0 %v21326_v8  ;;  %13488 = vmatprep.subr.mxu1 %v19389_v16  ;;  %v21343_v10 = vld [vmem:[#allocation169_spill] sm:$0xff] }
 0x880   : > { %13381 = vmatpush3.msra.mxu0 %v21326_v8  ;;  %13489 = vmatpush3.msra.mxu1 %v19389_v16  ;;  %v21329_v16 = vld [vmem:[#allocation176_spill] sm:$0xff] }
 0x881   : > { %13382 = vmatprep.subr.mxu0 %v21327_v21  ;;  %13434 = vmatmul.mubr.f32.gmra.mxu1 %v9882_v9  ;;  %v21341_v9 = vld [vmem:[#allocation182_spill] sm:$0xff] }
 0x882   : > { %13490 = vmatprep.subr.mxu1 %v19399_v63  ;;  %13383 = vmatpush3.msra.mxu0 %v21327_v21 }
 0x883   : > { %13436 = vmatprep.mubr.f32.mxu1 %v9892_v17  ;;  %13491 = vmatpush3.msra.mxu1 %v19399_v63  ;;  %v21330_v63 = vld [vmem:[#allocation95_spill] sm:$0xff] }
 0x884   : > { %13384 = vmatprep.subr.mxu0 %v21328_v52  ;;  %13492 = vmatprep.subr.mxu1 %v19413_v22 }
 0x885   : > { %13385 = vmatpush3.msra.mxu0 %v21328_v52  ;;  %13493 = vmatpush3.msra.mxu1 %v19413_v22  ;;  %v21331_v22 = vld [vmem:[#allocation102_spill] sm:$0xff] }
 0x886   : > { %13387 = vmatmul.mubr.f32.vlgmr.msra.gmra.mxu0 %v19618_v49  ;;  %13437 = vmatmul.mubr.f32.gmra.mxu1 %v9902_v14  ;;  %v21336_v49 = vld [vmem:[#allocation129_spill] sm:$0xff] }
 0x887   : > { %13442 = vmatprep.subr.mxu0 %v21329_v16  ;;  %13494 = vmatprep.subr.mxu1 %v19433_v20 }
 0x888   : > { %13389 = vmatprep.mubr.f32.mxu0 %v19645_v30  ;;  %13439 = vmatprep.mubr.f32.mxu1 %v9912_v23  ;;  %v21340_v30 = vld [vmem:[#allocation170_spill] sm:$0xff] }
 0x889   : > { %13443 = vmatpush3.msra.mxu0 %v21329_v16  ;;  %13495 = vmatpush3.msra.mxu1 %v19433_v20  ;;  %v21332_v20 = vld [vmem:[#allocation81_spill] sm:$0xff] }
 0x88a   : > { %13444 = vmatprep.subr.mxu0 %v21330_v63  ;;  %13496 = vmatprep.subr.mxu1 %v19435_v35 }
 0x88b   : > { %13445 = vmatpush3.msra.mxu0 %v21330_v63  ;;  %13497 = vmatpush3.msra.mxu1 %v19435_v35  ;;  %v21333_v35 = vld [vmem:[#allocation155_spill] sm:$0xff] }
 0x88c   : > { %13390 = vmatmul.mubr.f32.gmra.mxu0 %v19631_v13  ;;  %13440 = vmatmul.mubr.f32.gmra.mxu1 %v9922_v48  ;;  %v21338_v13 = vld [vmem:[#allocation185_spill] sm:$0xff] }
 0x88d   : > { %13446 = vmatprep.subr.mxu0 %v21331_v22  ;;  %13498 = vmatprep.subr.mxu1 %v19437_v11 }
 0x88e   : > { %13392 = vmatprep.mubr.f32.mxu0 %v19662_v43  ;;  %13447 = vmatpush3.msra.mxu0 %v21331_v22 }
 0x88f   : > { %13499 = vmatpush3.msra.mxu1 %v19437_v11  ;;  %13518 = vmatprep.mubr.f32.mxu1 %v19620_v55  ;;  %v21334_v11 = vld [vmem:[#allocation113_spill] sm:$0xff] }
 0x890   : > { %13448 = vmatprep.subr.mxu0 %v21332_v20  ;;  %13500 = vmatprep.subr.mxu1 %v19448_v46 }
 0x891   : > { %13449 = vmatpush3.msra.mxu0 %v21332_v20  ;;  %13501 = vmatpush3.msra.mxu1 %v19448_v46  ;;  %v21335_v46 = vld [vmem:[#allocation88_spill] sm:$0xff] }
 0x892   : > { %13393 = vmatmul.mubr.f32.gmra.mxu0 %v19659_v6  ;;  %13450 = vmatprep.subr.mxu0 %v21333_v35 }
 0x893   : > { %13502 = vmatprep.subr.mxu1 %v21310_v50  ;;  %13395 = vmatprep.mubr.f32.mxu0 %v19683_v32 }
 0x894   : > { %13451 = vmatpush3.msra.mxu0 %v21333_v35  ;;  %13503 = vmatpush3.msra.mxu1 %v21310_v50 }
 0x895   : > { %13452 = vmatprep.subr.mxu0 %v21334_v11  ;;  %13504 = vmatprep.subr.mxu1 %v21312_v27 }
 0x896   : > { %13453 = vmatpush3.msra.mxu0 %v21334_v11  ;;  %13505 = vmatpush3.msra.mxu1 %v21312_v27 }
 0x897   : > { %13396 = vmatmul.mubr.f32.gmra.mxu0 %v19688_v57  ;;  %13454 = vmatprep.subr.mxu0 %v21335_v46 }
 0x898   : > { %13506 = vmatprep.subr.mxu1 %v21314_v53  ;;  %13455 = vmatpush3.msra.mxu0 %v21335_v46 }
 0x899   : > { %13474 = vmatprep.mubr.f32.mxu0 %v19620_v55  ;;  %13507 = vmatpush3.msra.mxu1 %v21314_v53  ;;  %v21339_v55 = vld [vmem:[#allocation109_spill] sm:$0xff] }
 0x89a   : > { %13456 = vmatprep.subr.mxu0 %v21336_v49  ;;  %13508 = vmatprep.subr.mxu1 %v21316_v7 }
 0x89b   : > { %13457 = vmatpush3.msra.mxu0 %v21336_v49  ;;  %13509 = vmatpush3.msra.mxu1 %v21316_v7 }
 0x89c   : > { %13458 = vmatprep.subr.mxu0 %v21337_v40  ;;  %13510 = vmatprep.subr.mxu1 %v21318_v56 }
 0x89d   : > { %13459 = vmatpush3.msra.mxu0 %v21337_v40  ;;  %13511 = vmatpush3.msra.mxu1 %v21318_v56 }
 0x89e   : > { %13460 = vmatprep.subr.mxu0 %v21338_v13  ;;  %13512 = vmatprep.subr.mxu1 %v21320_v38 }
 0x89f   : > { %13461 = vmatpush3.msra.mxu0 %v21338_v13  ;;  %13513 = vmatpush3.msra.mxu1 %v21320_v38 }
 0x8a0   : > { %13462 = vmatprep.subr.mxu0 %v21339_v55  ;;  %13514 = vmatprep.subr.mxu1 %v21322_v47 }
 0x8a1   : > { %13463 = vmatpush3.msra.mxu0 %v21339_v55  ;;  %13515 = vmatpush3.msra.mxu1 %v21322_v47 }
 0x8a2   : > { %13464 = vmatprep.subr.mxu0 %v21340_v30  ;;  %13516 = vmatprep.subr.mxu1 %v21324_v60 }
 0x8a3   : > { %13465 = vmatpush3.msra.mxu0 %v21340_v30  ;;  %13517 = vmatpush3.msra.mxu1 %v21324_v60 }
 0x8a4   : > { %13466 = vmatprep.subr.mxu0 %v21341_v9  ;;  %13519 = vmatmul.mubr.f32.vlgmr.msra.gmra.mxu1 %v19615_v61 }
 0x8a5   : > { %13467 = vmatpush3.msra.mxu0 %v21341_v9  ;;  %13521 = vmatprep.mubr.f32.mxu1 %v19635_v5 }
 0x8a6   : > { %13468 = vmatprep.subr.mxu0 %v21342_v3 }
 0x8a7   : > { %13469 = vmatpush3.msra.mxu0 %v21342_v3 }
 0x8a8   : > { %13470 = vmatprep.subr.mxu0 %v21343_v10  ;;  %13522 = vmatmul.mubr.f32.gmra.mxu1 %v19626_v24 }
 0x8a9   : > { %13471 = vmatpush3.msra.mxu0 %v21343_v10  ;;  %13524 = vmatprep.mubr.f32.mxu1 %v19653_v2 }
 0x8aa   : > { %13472 = vmatprep.subr.mxu0 %v21344_v62 }
 0x8ab   : > { %13473 = vmatpush3.msra.mxu0 %v21344_v62 }
 0x8ac   : > { %13475 = vmatmul.mubr.f32.vlgmr.msra.gmra.mxu0 %v19615_v61  ;;  %13525 = vmatmul.mubr.f32.gmra.mxu1 %v19641_v59 }
 0x8ad   : > { %13477 = vmatprep.mubr.f32.mxu0 %v19635_v5  ;;  %13527 = vmatprep.mubr.f32.mxu1 %v19675_v36 }
 0x8b0   : > { %13478 = vmatmul.mubr.f32.gmra.mxu0 %v19626_v24  ;;  %13528 = vmatmul.mubr.f32.gmra.mxu1 %v19666_v51 }
 0x8b1   : > { %13480 = vmatprep.mubr.f32.mxu0 %v19653_v2 }
 0x8b4   : > { %13481 = vmatmul.mubr.f32.gmra.mxu0 %v19641_v59 }
 0x8b5   : > { %13483 = vmatprep.mubr.f32.mxu0 %v19675_v36 }
 0x8b8   : > { %13484 = vmatmul.mubr.f32.gmra.mxu0 %v19666_v51 }
 0x916   : > { %v13344_v6 = vpop.f32.mrf.mxu1 }
 0x918   : > { %v10077_v61 = vpop.f32.mrf.mxu1 }
 0x91a   : > { %v13347_v29 = vpop.f32.mrf.mxu1 }
 0x91c   : > { %v10089_v5 = vpop.f32.mrf.mxu1 }
 0x91f   : > { %v13300_v43 = vpop.f32.mrf.mxu0  ;;  %v13350_v17 = vpop.f32.mrf.mxu1 }
 0x920   : > { %v10084_v27 = vadd.f32 %v13344_v6, %v13300_v43 }
 0x921   : > { %v9856_v15 = vpop.f32.mrf.mxu0  ;;  %v10101_v24 = vpop.f32.mrf.mxu1 }
 0x922   : > { %v10078_v53 = vadd.f32 %v10077_v61, %v9856_v15 }
 0x925   : > { %v13303_v12 = vpop.f32.mrf.mxu0  ;;  %v13353_v32 = vpop.f32.mrf.mxu1 }
 0x926   : > { %v10096_v58 = vadd.f32 %v13347_v29, %v13303_v12 }
 0x927   : > { %v9876_v0 = vpop.f32.mrf.mxu0  ;;  %v10113_v2 = vpop.f32.mrf.mxu1 }
 0x928   : > { %v10090_v25 = vadd.f32 %v10089_v5, %v9876_v0 }
 0x92b   : > { %v13306_v14 = vpop.f32.mrf.mxu0 }
 0x92c   : > { %v10108_v8 = vadd.f32 %v13350_v17, %v13306_v14 }
 0x92d   : > { %v9896_v57 = vpop.f32.mrf.mxu0 }
 0x92e   : > { %v10102_v63 = vadd.f32 %v10101_v24, %v9896_v57 }
 0x930   : > { %v13309_v59 = vpop.f32.mrf.mxu0 }
 0x931   : > { %v10120_v49 = vadd.f32 %v13353_v32, %v13309_v59 }
 0x932   : > { %v9916_v36 = vpop.f32.mrf.mxu0 }
 0x933   : > { %v10114_v10 = vadd.f32 %v10113_v2, %v9916_v36 }
 0x93c   : > { %v13432_v39 = vpop.f32.mrf.mxu1 }
 0x93e   : > { %v10361_v26 = vpop.f32.mrf.mxu1 }
 0x941   : > { %v13435_v51 = vpop.f32.mrf.mxu1 }
 0x943   : > { %v10377_v48 = vpop.f32.mrf.mxu1 }
 0x946   : > { %v13388_v23 = vpop.f32.mrf.mxu0  ;;  %v13438_v54 = vpop.f32.mrf.mxu1 }
 0x947   : > { %v10231_v37 = vadd.f32 %v13388_v23, %v10084_v27 }
 0x948   : > { %v10223_v44 = vpop.f32.mrf.mxu0  ;;  %v10393_v34 = vpop.f32.mrf.mxu1 }
 0x949   : > { %v10224_v56 = vadd.f32 %v10223_v44, %v10078_v53  ;;  %v10370_v1 = vadd.f32 %v13432_v39, %v10231_v37 }
 0x94b   : > { %v10362_v16 = vadd.f32 %v10361_v26, %v10224_v56 }
 0x94c   : > { %v13391_v18 = vpop.f32.mrf.mxu0  ;;  %v13441_v50 = vpop.f32.mrf.mxu1 }
 0x94d   : > { %v10245_v47 = vadd.f32 %v13391_v18, %v10096_v58 }
 0x94e   : > { %v10237_v33 = vpop.f32.mrf.mxu0  ;;  %v10409_v31 = vpop.f32.mrf.mxu1 }
 0x94f   : > { %v10238_v21 = vadd.f32 %v10237_v33, %v10090_v25  ;;  %v10386_v46 = vadd.f32 %v13435_v51, %v10245_v47 }
 0x951   : > { %v10378_v3 = vadd.f32 %v10377_v48, %v10238_v21 }
 0x952   : > { %v13394_v42 = vpop.f32.mrf.mxu0 }
 0x953   : > { %v10259_v20 = vadd.f32 %v13394_v42, %v10108_v8 }
 0x954   : > { %v10251_v19 = vpop.f32.mrf.mxu0 }
 0x955   : > { %v10252_v55 = vadd.f32 %v10251_v19, %v10102_v63  ;;  %v10402_v29 = vadd.f32 %v13438_v54, %v10259_v20 }
 0x957   : > { %v13397_v4 = vpop.f32.mrf.mxu0  ;;  %v10394_v24 = vadd.f32 %v10393_v34, %v10252_v55 }
 0x958   : > { %v10273_v6 = vadd.f32 %v13397_v4, %v10120_v49 }
 0x959   : > { %v10265_v38 = vpop.f32.mrf.mxu0 }
 0x95a   : > { %v10266_v12 = vadd.f32 %v10265_v38, %v10114_v10  ;;  %v10418_v2 = vadd.f32 %v13441_v50, %v10273_v6 }
 0x95c   : > { %v10410_v23 = vadd.f32 %v10409_v31, %v10266_v12 }
 0x964   : > { %v13520_v28 = vpop.f32.mrf.mxu1 }
 0x966   : > { %v10665_v7 = vpop.f32.mrf.mxu1 }
 0x968   : > { %v13523_v41 = vpop.f32.mrf.mxu1 }
 0x96a   : > { %v10677_v60 = vpop.f32.mrf.mxu1 }
 0x96c   : > { %v13476_v45 = vpop.f32.mrf.mxu0  ;;  %v13526_v40 = vpop.f32.mrf.mxu1 }
 0x96d   : > { %v10543_v52 = vadd.f32 %v13476_v45, %v10370_v1 }
 0x96e   : > { %v10536_v22 = vpop.f32.mrf.mxu0  ;;  %v10689_v15 = vpop.f32.mrf.mxu1 }
 0x96f   : > { %v10672_v35 = vadd.f32 %v13520_v28, %v10543_v52  ;;  %v10537_v11 = vadd.f32 %v10536_v22, %v10362_v16 }
 0x970   : > { %v13479_v13 = vpop.f32.mrf.mxu0  ;;  %v13529_v39 = vpop.f32.mrf.mxu1 }
 0x971   : > { %10712 = vst [vmem:[%s19865_s27 + $0x8] sm:$0xff] %v10672_v35  ;;  %v10666_v30 = vadd.f32 %v10665_v7, %v10537_v11  ;;  %v10555_v9 = vadd.f32 %v13479_v13, %v10386_v46 }
 0x972   : > { %v10548_v62 = vpop.f32.mrf.mxu0  ;;  %v10701_v18 = vpop.f32.mrf.mxu1 }
 0x973   : > { %10711 = vst [vmem:[%s19865_s27] sm:$0xff] %v10666_v30  ;;  %v10684_v61 = vadd.f32 %v13523_v41, %v10555_v9  ;;  %v10549_v43 = vadd.f32 %v10548_v62, %v10378_v3 }
 0x974   : > { %v13482_v5 = vpop.f32.mrf.mxu0 }
 0x975   : > { %10714 = vst [vmem:[%s19865_s27 + $0x18] sm:$0xff] %v10684_v61  ;;  %v10678_v17 = vadd.f32 %v10677_v60, %v10549_v43  ;;  %v10567_v0 = vadd.f32 %v13482_v5, %v10402_v29 }
 0x976   : > { %v10560_v14 = vpop.f32.mrf.mxu0 }
 0x977   : > { %10713 = vst [vmem:[%s19865_s27 + $0x10] sm:$0xff] %v10678_v17  ;;  %v10696_v32 = vadd.f32 %v13526_v40, %v10567_v0  ;;  %v10561_v57 = vadd.f32 %v10560_v14, %v10394_v24 }
 0x978   : > { %v13485_v59 = vpop.f32.mrf.mxu0 }
 0x979   : > { %10716 = vst [vmem:[%s19865_s27 + $0x28] sm:$0xff] %v10696_v32  ;;  %v10690_v26 = vadd.f32 %v10689_v15, %v10561_v57  ;;  %v10579_v36 = vadd.f32 %v13485_v59, %v10418_v2 }
 0x97a   : > { %v10572_v51 = vpop.f32.mrf.mxu0 }
 0x97b   : > { %10715 = vst [vmem:[%s19865_s27 + $0x20] sm:$0xff] %v10690_v26  ;;  %v10708_v44 = vadd.f32 %v13529_v39, %v10579_v36  ;;  %v10573_v48 = vadd.f32 %v10572_v51, %v10410_v23 }
 0x97d   : > { %10718 = vst [vmem:[%s19865_s27 + $0x38] sm:$0xff] %v10708_v44  ;;  %v10702_v54 = vadd.f32 %v10701_v18, %v10573_v48 }
 0x97f   : > { %10717 = vst [vmem:[%s19865_s27 + $0x30] sm:$0xff] %v10702_v54 }
 0x980 PF: > { %s17_s24 = sadd.s32 1, %s13652_s24  }
 0x981   : > { %p14_p4 = scmp.ge.s32.totalorder %s17_s24, 4  }
 0x983   :  { %16 = sbr.rel (!%p14_p4) target bundleno = 1 (0x1), region = 81 }

</bundles_post_ra>
